<compile_context>
chip_gen: v5e
topology: v5e:2x2
jax: 0.10.0
libtpu: 0.0.40
codegen_flags: <defaults>
</compile_context>

<pallas_src>
import functools

import jax
import jax.numpy as jnp
from jax.experimental import pallas as pl
from jax.experimental.pallas import tpu as pltpu


def _gelu_tanh(v):
    c = 0.7978845608028654  # sqrt(2/pi)
    return 0.5 * v * (1.0 + jnp.tanh(c * (v + 0.044715 * v * v * v)))


def _build_boundary_masks(H, W):
    """(9, H*W) f32 masks zeroing taps whose neighbour falls outside the image."""
    pos = jnp.arange(H * W)
    row = pos // W
    col = pos % W
    masks = []
    for dy in (-1, 0, 1):
        mh = (row + dy >= 0) & (row + dy <= H - 1)
        for dx in (-1, 0, 1):
            mw = (col + dx >= 0) & (col + dx <= W - 1)
            masks.append((mh & mw).astype(jnp.float32))
    return jnp.stack(masks, axis=0)  # (9, H*W)


def _pick_group(B, HW):
    """Largest divisor g of B with g*HW lanes <= 2048 (keeps slabs in VMEM)."""
    g = 1
    for cand in range(1, B + 1):
        if B % cand == 0 and cand * HW <= 2048:
            g = cand
    return g


def mlp_kernel(x_ref, w1_ref, b1_ref, wdw_ref, bdw_ref, w2_ref, b2_ref,
               mask_ref, o_ref, *, img_w):
    x = x_ref[0]  # (C_in, L)  lane-dense slab, L = g * H * W

    # ---- fc1: 1x1 conv == channel matmul on the MXU --------------------------
    h = jnp.dot(w1_ref[...], x,
                preferred_element_type=jnp.float32,
                precision=jax.lax.Precision.HIGHEST) + b1_ref[...]   # (C_hid, L)

    # ---- 3x3 depthwise conv (padding=1, bias) ---------------------------------
    wdw = wdw_ref[...]      # (C_hid, 9)  per-channel taps, row-major (dy, dx)
    masks = mask_ref[...]   # (9, L)      zero-padding boundary masks (per image)

    accs = []
    for iy, dy in enumerate((-1, 0, 1)):
        acc = None
        for ix, dx in enumerate((-1, 0, 1)):
            t = iy * 3 + ix
            off = dy * img_w + dx
            if off == 0:
                contrib = wdw[:, t:t + 1] * h
            else:
                # shifted[p] = h[p + off]; static roll -> lane relayout.
                # Cross-image / out-of-image pixels are zeroed by masks[t].
                sh = jnp.roll(h, -off, axis=1)
                contrib = wdw[:, t:t + 1] * (sh * masks[t:t + 1, :])
            acc = contrib if acc is None else acc + contrib
        accs.append(acc)
    h = accs[0] + accs[1] + accs[2] + bdw_ref[...]                    # (C_hid, L)

    # ---- GELU (tanh approx); Dropout(p=0) is identity -------------------------
    h = _gelu_tanh(h)

    # ---- fc2: 1x1 conv == channel matmul --------------------------------------
    out = jnp.dot(w2_ref[...], h,
                  preferred_element_type=jnp.float32,
                  precision=jax.lax.Precision.HIGHEST) + b2_ref[...]  # (C_out, L)
    o_ref[0] = out.astype(o_ref.dtype)


@jax.jit
def mlp_pallas(x, w1, b1, wdw, bdw, w2, b2):
    B, C_in, H, W = x.shape
    C_hid = w1.shape[0]
    C_out = w2.shape[0]
    HW = H * W

    g = _pick_group(B, HW)       # images per grid step (lane-packed)
    G = B // g                   # grid steps
    L = g * HW                   # lanes per step

    # Lane-dense layout: group of g images side by side along the lane dim.
    x_lanes = (x.reshape(G, g, C_in, HW)
                .transpose(0, 2, 1, 3)
                .reshape(G, C_in, L))
    masks = jnp.tile(_build_boundary_masks(H, W), (1, g))   # (9, L)
    wdw_flat = wdw.reshape(C_hid, 9)

    grid_spec = pltpu.PrefetchScalarGridSpec(
        num_scalar_prefetch=0,
        grid=(G,),
        in_specs=[
            pl.BlockSpec((1, C_in, L), lambda i: (i, 0, 0)),    # x (per group)
            pl.BlockSpec((C_hid, C_in), lambda i: (0, 0)),      # fc1 weight
            pl.BlockSpec((C_hid, 1), lambda i: (0, 0)),         # fc1 bias
            pl.BlockSpec((C_hid, 9), lambda i: (0, 0)),         # dwconv weight
            pl.BlockSpec((C_hid, 1), lambda i: (0, 0)),         # dwconv bias
            pl.BlockSpec((C_out, C_hid), lambda i: (0, 0)),     # fc2 weight
            pl.BlockSpec((C_out, 1), lambda i: (0, 0)),         # fc2 bias
            pl.BlockSpec((9, L), lambda i: (0, 0)),             # boundary masks
        ],
        out_specs=pl.BlockSpec((1, C_out, L), lambda i: (i, 0, 0)),
    )

    out_lanes = pl.pallas_call(
        functools.partial(mlp_kernel, img_w=W),
        out_shape=jax.ShapeDtypeStruct((G, C_out, L), x.dtype),
        grid_spec=grid_spec,
        compiler_params=pltpu.CompilerParams(
            dimension_semantics=("parallel",)),   # groups are independent
    )(x_lanes, w1, b1.reshape(C_hid, 1), wdw_flat, bdw.reshape(C_hid, 1),
      w2, b2.reshape(C_out, 1), masks)

    return (out_lanes.reshape(G, C_out, g, HW)
                     .transpose(0, 2, 1, 3)
                     .reshape(B, C_out, H, W))


def mlp_reference(x, w1, b1, wdw, bdw, w2, b2):
    """Pure-JAX reference matching the PyTorch Mlp forward (tanh-GELU, drop=0)."""
    C_hid = w1.shape[0]
    hi = jax.lax.Precision.HIGHEST
    y = jnp.einsum("oi,bihw->bohw", w1, x, precision=hi) + b1.reshape(1, -1, 1, 1)
    y = jax.lax.conv_general_dilated(
        y, wdw.reshape(C_hid, 1, 3, 3),
        window_strides=(1, 1), padding=((1, 1), (1, 1)),
        dimension_numbers=("NCHW", "OIHW", "NCHW"),
        feature_group_count=C_hid, precision=hi) + bdw.reshape(1, -1, 1, 1)
    y = _gelu_tanh(y)
    y = jnp.einsum("oi,bihw->bohw", w2, y, precision=hi) + b2.reshape(1, -1, 1, 1)
    return y


if __name__ == "__main__":
    B, C_in, C_hid, C_out = 2, 32, 64, 32
    H = W = 16   # H*W = 256; whole batch packs to 512 lanes -> one grid step

    key = jax.random.PRNGKey(0)
    ks = jax.random.split(key, 7)

    x = jax.random.normal(ks[0], (B, C_in, H, W), dtype=jnp.float32)

    # Deterministic synthetic parameters (roughly PyTorch fan-in scaling).
    w1 = jax.random.normal(ks[1], (C_hid, C_in), jnp.float32) / jnp.sqrt(C_in * 1.0)
    b1 = jax.random.normal(ks[2], (C_hid,), jnp.float32) * 0.02
    wdw = jax.random.normal(ks[3], (C_hid, 3, 3), jnp.float32) / 3.0
    bdw = jax.random.normal(ks[4], (C_hid,), jnp.float32) * 0.02
    w2 = jax.random.normal(ks[5], (C_out, C_hid), jnp.float32) / jnp.sqrt(C_hid * 1.0)
    b2 = jax.random.normal(ks[6], (C_out,), jnp.float32) * 0.02

    out = mlp_pallas(x, w1, b1, wdw, bdw, w2, b2)
    out = jax.block_until_ready(out)

    ref = mlp_reference(x, w1, b1, wdw, bdw, w2, b2)
    assert out.shape == (B, C_out, H, W)
    max_diff = jnp.max(jnp.abs(out - ref))
    assert jnp.allclose(out, ref, atol=5e-3, rtol=5e-3), f"max abs diff = {max_diff}"

    print("KERNEL_OK")
</pallas_src>

<mosaic_0001>
module attributes {stable_mosaic.version = 11 : i64} {
  func.func @mlp_kernel(%arg0: i32, %arg1: memref<1x32x512xf32, #tpu.memory_space<vmem>>, %arg2: memref<64x32xf32, #tpu.memory_space<vmem>>, %arg3: memref<64x1xf32, #tpu.memory_space<vmem>>, %arg4: memref<64x9xf32, #tpu.memory_space<vmem>>, %arg5: memref<64x1xf32, #tpu.memory_space<vmem>>, %arg6: memref<32x64xf32, #tpu.memory_space<vmem>>, %arg7: memref<32x1xf32, #tpu.memory_space<vmem>>, %arg8: memref<9x512xf32, #tpu.memory_space<vmem>>, %arg9: memref<1x32x512xf32, #tpu.memory_space<vmem>>) attributes {dimension_semantics = [#tpu.dimension_semantics<parallel>], iteration_bounds = array<i64: 1>, scalar_prefetch = 0 : i64, scratch_operands = 0 : i64, tpu.core_type = #tpu.core_type<tc>, window_params = [{transform_indices = @transform_0, window_bounds = array<i64: 1, 32, 512>}, {pipeline_mode = #tpu.pipeline_mode<synchronous>, transform_indices = @transform_1, window_bounds = array<i64: 64, 32>}, {pipeline_mode = #tpu.pipeline_mode<synchronous>, transform_indices = @transform_2, window_bounds = array<i64: 64, 1>}, {pipeline_mode = #tpu.pipeline_mode<synchronous>, transform_indices = @transform_3, window_bounds = array<i64: 64, 9>}, {pipeline_mode = #tpu.pipeline_mode<synchronous>, transform_indices = @transform_4, window_bounds = array<i64: 64, 1>}, {pipeline_mode = #tpu.pipeline_mode<synchronous>, transform_indices = @transform_5, window_bounds = array<i64: 32, 64>}, {pipeline_mode = #tpu.pipeline_mode<synchronous>, transform_indices = @transform_6, window_bounds = array<i64: 32, 1>}, {pipeline_mode = #tpu.pipeline_mode<synchronous>, transform_indices = @transform_7, window_bounds = array<i64: 9, 512>}, {transform_indices = @transform_8, window_bounds = array<i64: 1, 32, 512>}]} {
    %c0 = arith.constant 0 : index
    %c0_0 = arith.constant 0 : index
    %c0_1 = arith.constant 0 : index
    %0 = vector.load %arg1[%c0, %c0_0, %c0_1] : memref<1x32x512xf32, #tpu.memory_space<vmem>>, vector<1x32x512xf32>
    %1 = vector.shape_cast %0 : vector<1x32x512xf32> to vector<32x512xf32>
    %c0_2 = arith.constant 0 : index
    %c0_3 = arith.constant 0 : index
    %2 = vector.load %arg2[%c0_2, %c0_3] : memref<64x32xf32, #tpu.memory_space<vmem>>, vector<64x32xf32>
    %cst = arith.constant dense<0.000000e+00> : vector<64x512xf32>
    %3 = tpu.matmul %2, %1, %cst {dimension_numbers = #tpu.dot_dimension_numbers<[1], [0], [0], [1], [0, 0, 1, 1], [], []>, precision = #tpu.contract_precision<fp32>} : vector<64x32xf32>, vector<32x512xf32>, vector<64x512xf32> -> vector<64x512xf32>
    %c0_4 = arith.constant 0 : index
    %c0_5 = arith.constant 0 : index
    %4 = vector.load %arg3[%c0_4, %c0_5] : memref<64x1xf32, #tpu.memory_space<vmem>>, vector<64x1xf32>
    %5 = vector.broadcast %4 : vector<64x1xf32> to vector<64x512xf32>
    %6 = arith.addf %3, %5 : vector<64x512xf32>
    %c0_6 = arith.constant 0 : index
    %c0_7 = arith.constant 0 : index
    %7 = vector.load %arg4[%c0_6, %c0_7] : memref<64x9xf32, #tpu.memory_space<vmem>>, vector<64x9xf32>
    %c0_8 = arith.constant 0 : index
    %c0_9 = arith.constant 0 : index
    %8 = vector.load %arg8[%c0_8, %c0_9] : memref<9x512xf32, #tpu.memory_space<vmem>>, vector<9x512xf32>
    %9 = vector.extract_strided_slice %6 {offsets = [0, 495], sizes = [64, 17], strides = [1, 1]} : vector<64x512xf32> to vector<64x17xf32>
    %10 = vector.extract_strided_slice %6 {offsets = [0, 0], sizes = [64, 495], strides = [1, 1]} : vector<64x512xf32> to vector<64x495xf32>
    %11 = tpu.concatenate %9, %10 in 1 : vector<64x17xf32>, vector<64x495xf32> -> vector<64x512xf32>
    %12 = vector.extract_strided_slice %7 {offsets = [0, 0], sizes = [64, 1], strides = [1, 1]} : vector<64x9xf32> to vector<64x1xf32>
    %13 = vector.extract_strided_slice %8 {offsets = [0, 0], sizes = [1, 512], strides = [1, 1]} : vector<9x512xf32> to vector<1x512xf32>
    %14 = vector.broadcast %13 : vector<1x512xf32> to vector<64x512xf32>
    %15 = arith.mulf %11, %14 : vector<64x512xf32>
    %16 = vector.broadcast %12 : vector<64x1xf32> to vector<64x512xf32>
    %17 = arith.mulf %16, %15 : vector<64x512xf32>
    %18 = vector.extract_strided_slice %6 {offsets = [0, 496], sizes = [64, 16], strides = [1, 1]} : vector<64x512xf32> to vector<64x16xf32>
    %19 = vector.extract_strided_slice %6 {offsets = [0, 0], sizes = [64, 496], strides = [1, 1]} : vector<64x512xf32> to vector<64x496xf32>
    %20 = tpu.concatenate %18, %19 in 1 : vector<64x16xf32>, vector<64x496xf32> -> vector<64x512xf32>
    %21 = vector.extract_strided_slice %7 {offsets = [0, 1], sizes = [64, 1], strides = [1, 1]} : vector<64x9xf32> to vector<64x1xf32>
    %22 = vector.extract_strided_slice %8 {offsets = [1, 0], sizes = [1, 512], strides = [1, 1]} : vector<9x512xf32> to vector<1x512xf32>
    %23 = vector.broadcast %22 : vector<1x512xf32> to vector<64x512xf32>
    %24 = arith.mulf %20, %23 : vector<64x512xf32>
    %25 = vector.broadcast %21 : vector<64x1xf32> to vector<64x512xf32>
    %26 = arith.mulf %25, %24 : vector<64x512xf32>
    %27 = arith.addf %17, %26 : vector<64x512xf32>
    %28 = vector.extract_strided_slice %6 {offsets = [0, 497], sizes = [64, 15], strides = [1, 1]} : vector<64x512xf32> to vector<64x15xf32>
    %29 = vector.extract_strided_slice %6 {offsets = [0, 0], sizes = [64, 497], strides = [1, 1]} : vector<64x512xf32> to vector<64x497xf32>
    %30 = tpu.concatenate %28, %29 in 1 : vector<64x15xf32>, vector<64x497xf32> -> vector<64x512xf32>
    %31 = vector.extract_strided_slice %7 {offsets = [0, 2], sizes = [64, 1], strides = [1, 1]} : vector<64x9xf32> to vector<64x1xf32>
    %32 = vector.extract_strided_slice %8 {offsets = [2, 0], sizes = [1, 512], strides = [1, 1]} : vector<9x512xf32> to vector<1x512xf32>
    %33 = vector.broadcast %32 : vector<1x512xf32> to vector<64x512xf32>
    %34 = arith.mulf %30, %33 : vector<64x512xf32>
    %35 = vector.broadcast %31 : vector<64x1xf32> to vector<64x512xf32>
    %36 = arith.mulf %35, %34 : vector<64x512xf32>
    %37 = arith.addf %27, %36 : vector<64x512xf32>
    %38 = vector.extract_strided_slice %6 {offsets = [0, 511], sizes = [64, 1], strides = [1, 1]} : vector<64x512xf32> to vector<64x1xf32>
    %39 = vector.extract_strided_slice %6 {offsets = [0, 0], sizes = [64, 511], strides = [1, 1]} : vector<64x512xf32> to vector<64x511xf32>
    %40 = tpu.concatenate %38, %39 in 1 : vector<64x1xf32>, vector<64x511xf32> -> vector<64x512xf32>
    %41 = vector.extract_strided_slice %7 {offsets = [0, 3], sizes = [64, 1], strides = [1, 1]} : vector<64x9xf32> to vector<64x1xf32>
    %42 = vector.extract_strided_slice %8 {offsets = [3, 0], sizes = [1, 512], strides = [1, 1]} : vector<9x512xf32> to vector<1x512xf32>
    %43 = vector.broadcast %42 : vector<1x512xf32> to vector<64x512xf32>
    %44 = arith.mulf %40, %43 : vector<64x512xf32>
    %45 = vector.broadcast %41 : vector<64x1xf32> to vector<64x512xf32>
    %46 = arith.mulf %45, %44 : vector<64x512xf32>
    %47 = vector.extract_strided_slice %7 {offsets = [0, 4], sizes = [64, 1], strides = [1, 1]} : vector<64x9xf32> to vector<64x1xf32>
    %48 = vector.broadcast %47 : vector<64x1xf32> to vector<64x512xf32>
    %49 = arith.mulf %48, %6 : vector<64x512xf32>
    %50 = arith.addf %46, %49 : vector<64x512xf32>
    %51 = vector.extract_strided_slice %6 {offsets = [0, 1], sizes = [64, 511], strides = [1, 1]} : vector<64x512xf32> to vector<64x511xf32>
    %52 = vector.extract_strided_slice %6 {offsets = [0, 0], sizes = [64, 1], strides = [1, 1]} : vector<64x512xf32> to vector<64x1xf32>
    %53 = tpu.concatenate %51, %52 in 1 : vector<64x511xf32>, vector<64x1xf32> -> vector<64x512xf32>
    %54 = vector.extract_strided_slice %7 {offsets = [0, 5], sizes = [64, 1], strides = [1, 1]} : vector<64x9xf32> to vector<64x1xf32>
    %55 = vector.extract_strided_slice %8 {offsets = [5, 0], sizes = [1, 512], strides = [1, 1]} : vector<9x512xf32> to vector<1x512xf32>
    %56 = vector.broadcast %55 : vector<1x512xf32> to vector<64x512xf32>
    %57 = arith.mulf %53, %56 : vector<64x512xf32>
    %58 = vector.broadcast %54 : vector<64x1xf32> to vector<64x512xf32>
    %59 = arith.mulf %58, %57 : vector<64x512xf32>
    %60 = arith.addf %50, %59 : vector<64x512xf32>
    %61 = vector.extract_strided_slice %6 {offsets = [0, 15], sizes = [64, 497], strides = [1, 1]} : vector<64x512xf32> to vector<64x497xf32>
    %62 = vector.extract_strided_slice %6 {offsets = [0, 0], sizes = [64, 15], strides = [1, 1]} : vector<64x512xf32> to vector<64x15xf32>
    %63 = tpu.concatenate %61, %62 in 1 : vector<64x497xf32>, vector<64x15xf32> -> vector<64x512xf32>
    %64 = vector.extract_strided_slice %7 {offsets = [0, 6], sizes = [64, 1], strides = [1, 1]} : vector<64x9xf32> to vector<64x1xf32>
    %65 = vector.extract_strided_slice %8 {offsets = [6, 0], sizes = [1, 512], strides = [1, 1]} : vector<9x512xf32> to vector<1x512xf32>
    %66 = vector.broadcast %65 : vector<1x512xf32> to vector<64x512xf32>
    %67 = arith.mulf %63, %66 : vector<64x512xf32>
    %68 = vector.broadcast %64 : vector<64x1xf32> to vector<64x512xf32>
    %69 = arith.mulf %68, %67 : vector<64x512xf32>
    %70 = vector.extract_strided_slice %6 {offsets = [0, 16], sizes = [64, 496], strides = [1, 1]} : vector<64x512xf32> to vector<64x496xf32>
    %71 = vector.extract_strided_slice %6 {offsets = [0, 0], sizes = [64, 16], strides = [1, 1]} : vector<64x512xf32> to vector<64x16xf32>
    %72 = tpu.concatenate %70, %71 in 1 : vector<64x496xf32>, vector<64x16xf32> -> vector<64x512xf32>
    %73 = vector.extract_strided_slice %7 {offsets = [0, 7], sizes = [64, 1], strides = [1, 1]} : vector<64x9xf32> to vector<64x1xf32>
    %74 = vector.extract_strided_slice %8 {offsets = [7, 0], sizes = [1, 512], strides = [1, 1]} : vector<9x512xf32> to vector<1x512xf32>
    %75 = vector.broadcast %74 : vector<1x512xf32> to vector<64x512xf32>
    %76 = arith.mulf %72, %75 : vector<64x512xf32>
    %77 = vector.broadcast %73 : vector<64x1xf32> to vector<64x512xf32>
    %78 = arith.mulf %77, %76 : vector<64x512xf32>
    %79 = arith.addf %69, %78 : vector<64x512xf32>
    %80 = vector.extract_strided_slice %6 {offsets = [0, 17], sizes = [64, 495], strides = [1, 1]} : vector<64x512xf32> to vector<64x495xf32>
    %81 = vector.extract_strided_slice %6 {offsets = [0, 0], sizes = [64, 17], strides = [1, 1]} : vector<64x512xf32> to vector<64x17xf32>
    %82 = tpu.concatenate %80, %81 in 1 : vector<64x495xf32>, vector<64x17xf32> -> vector<64x512xf32>
    %83 = vector.extract_strided_slice %7 {offsets = [0, 8], sizes = [64, 1], strides = [1, 1]} : vector<64x9xf32> to vector<64x1xf32>
    %84 = vector.extract_strided_slice %8 {offsets = [8, 0], sizes = [1, 512], strides = [1, 1]} : vector<9x512xf32> to vector<1x512xf32>
    %85 = vector.broadcast %84 : vector<1x512xf32> to vector<64x512xf32>
    %86 = arith.mulf %82, %85 : vector<64x512xf32>
    %87 = vector.broadcast %83 : vector<64x1xf32> to vector<64x512xf32>
    %88 = arith.mulf %87, %86 : vector<64x512xf32>
    %89 = arith.addf %79, %88 : vector<64x512xf32>
    %90 = arith.addf %37, %60 : vector<64x512xf32>
    %91 = arith.addf %90, %89 : vector<64x512xf32>
    %c0_10 = arith.constant 0 : index
    %c0_11 = arith.constant 0 : index
    %92 = vector.load %arg5[%c0_10, %c0_11] : memref<64x1xf32, #tpu.memory_space<vmem>>, vector<64x1xf32>
    %93 = vector.broadcast %92 : vector<64x1xf32> to vector<64x512xf32>
    %94 = arith.addf %91, %93 : vector<64x512xf32>
    %cst_12 = arith.constant 5.000000e-01 : f32
    %95 = vector.broadcast %cst_12 : f32 to vector<64x512xf32>
    %96 = arith.mulf %95, %94 : vector<64x512xf32>
    %cst_13 = arith.constant 4.471500e-02 : f32
    %97 = vector.broadcast %cst_13 : f32 to vector<64x512xf32>
    %98 = arith.mulf %97, %94 : vector<64x512xf32>
    %99 = arith.mulf %98, %94 : vector<64x512xf32>
    %100 = arith.mulf %99, %94 : vector<64x512xf32>
    %101 = arith.addf %94, %100 : vector<64x512xf32>
    %cst_14 = arith.constant 0.797884583 : f32
    %102 = vector.broadcast %cst_14 : f32 to vector<64x512xf32>
    %103 = arith.mulf %102, %101 : vector<64x512xf32>
    %104 = math.tanh %103 : vector<64x512xf32>
    %cst_15 = arith.constant 1.000000e+00 : f32
    %105 = vector.broadcast %cst_15 : f32 to vector<64x512xf32>
    %106 = arith.addf %105, %104 : vector<64x512xf32>
    %107 = arith.mulf %96, %106 : vector<64x512xf32>
    %c0_16 = arith.constant 0 : index
    %c0_17 = arith.constant 0 : index
    %108 = vector.load %arg6[%c0_16, %c0_17] : memref<32x64xf32, #tpu.memory_space<vmem>>, vector<32x64xf32>
    %cst_18 = arith.constant dense<0.000000e+00> : vector<32x512xf32>
    %109 = tpu.matmul %108, %107, %cst_18 {dimension_numbers = #tpu.dot_dimension_numbers<[1], [0], [0], [1], [0, 0, 1, 1], [], []>, precision = #tpu.contract_precision<fp32>} : vector<32x64xf32>, vector<64x512xf32>, vector<32x512xf32> -> vector<32x512xf32>
    %c0_19 = arith.constant 0 : index
    %c0_20 = arith.constant 0 : index
    %110 = vector.load %arg7[%c0_19, %c0_20] : memref<32x1xf32, #tpu.memory_space<vmem>>, vector<32x1xf32>
    %111 = vector.broadcast %110 : vector<32x1xf32> to vector<32x512xf32>
    %112 = arith.addf %109, %111 : vector<32x512xf32>
    %c0_21 = arith.constant 0 : index
    %c0_22 = arith.constant 0 : index
    %c0_23 = arith.constant 0 : index
    %113 = vector.load %arg9[%c0_21, %c0_22, %c0_23] : memref<1x32x512xf32, #tpu.memory_space<vmem>>, vector<1x32x512xf32>
    %114 = vector.shape_cast %113 : vector<1x32x512xf32> to vector<32x512xf32>
    %115 = vector.shape_cast %112 : vector<32x512xf32> to vector<1x32x512xf32>
    tpu.vector_store %arg9[%c0_21, %c0_22, %c0_23], %115 {strides = array<i32>} : memref<1x32x512xf32, #tpu.memory_space<vmem>>, vector<1x32x512xf32>,
    return
  }
  func.func @transform_0(%arg0: i32) -> (i32, i32, i32) {
    %c0_i32 = arith.constant 0 : i32
    %c0_i32_0 = arith.constant 0 : i32
    %c0_i32_1 = arith.constant 0 : i32
    return %arg0, %c0_i32, %c0_i32_0 : i32, i32, i32
  }
  func.func @transform_1(%arg0: i32) -> (i32, i32) {
    %c0_i32 = arith.constant 0 : i32
    %c0_i32_0 = arith.constant 0 : i32
    %c0_i32_1 = arith.constant 0 : i32
    return %c0_i32, %c0_i32_0 : i32, i32
  }
  func.func @transform_2(%arg0: i32) -> (i32, i32) {
    %c0_i32 = arith.constant 0 : i32
    %c0_i32_0 = arith.constant 0 : i32
    %c0_i32_1 = arith.constant 0 : i32
    return %c0_i32, %c0_i32_0 : i32, i32
  }
  func.func @transform_3(%arg0: i32) -> (i32, i32) {
    %c0_i32 = arith.constant 0 : i32
    %c0_i32_0 = arith.constant 0 : i32
    %c0_i32_1 = arith.constant 0 : i32
    return %c0_i32, %c0_i32_0 : i32, i32
  }
  func.func @transform_4(%arg0: i32) -> (i32, i32) {
    %c0_i32 = arith.constant 0 : i32
    %c0_i32_0 = arith.constant 0 : i32
    %c0_i32_1 = arith.constant 0 : i32
    return %c0_i32, %c0_i32_0 : i32, i32
  }
  func.func @transform_5(%arg0: i32) -> (i32, i32) {
    %c0_i32 = arith.constant 0 : i32
    %c0_i32_0 = arith.constant 0 : i32
    %c0_i32_1 = arith.constant 0 : i32
    return %c0_i32, %c0_i32_0 : i32, i32
  }
  func.func @transform_6(%arg0: i32) -> (i32, i32) {
    %c0_i32 = arith.constant 0 : i32
    %c0_i32_0 = arith.constant 0 : i32
    %c0_i32_1 = arith.constant 0 : i32
    return %c0_i32, %c0_i32_0 : i32, i32
  }
  func.func @transform_7(%arg0: i32) -> (i32, i32) {
    %c0_i32 = arith.constant 0 : i32
    %c0_i32_0 = arith.constant 0 : i32
    %c0_i32_1 = arith.constant 0 : i32
    return %c0_i32, %c0_i32_0 : i32, i32
  }
  func.func @transform_8(%arg0: i32) -> (i32, i32, i32) {
    %c0_i32 = arith.constant 0 : i32
    %c0_i32_0 = arith.constant 0 : i32
    %c0_i32_1 = arith.constant 0 : i32
    return %arg0, %c0_i32, %c0_i32_0 : i32, i32, i32
  }
}

</mosaic_0001>

<bundles_post_ra>
// kernel: mlp_pallas.1
= control target key start
LH: loop header
LB: loop body
LE: loop exit
PB: predicated region body
PF: predicated region fallthrough
CT: control target
= control target key end

     0   :  { %v11240_v0 = vmov 0   ;;  %vm101_vm0 = vcmask 261120   ;;  %s5899_s30 = smov 1   ;;  %s5900_s9 = smov 16   ;;  %vm2099_vm1 = vcmask 130048   ;;  %vm2637_vm2 = vcmask 7168   ;;  %s11231_s2 = inlined_call_operand.vmem [shape: f32[64,1], index: 2, kind: input, shape index: {}]   ;;  %s11232_s0 = inlined_call_operand.vmem [shape: f32[1,32,512], index: 0, kind: input, shape index: {}]   ;;  %s11233_s1 = inlined_call_operand.vmem [shape: f32[64,32], index: 1, kind: input, shape index: {}]   ;;  %s11234_s3 = inlined_call_operand.vmem [shape: f32[64,9], index: 3, kind: input, shape index: {}]   ;;  %s11235_s7 = inlined_call_operand.vmem [shape: f32[9,512], index: 7, kind: input, shape index: {}]   ;;  %s11236_s4 = inlined_call_operand.vmem [shape: f32[64,1], index: 4, kind: input, shape index: {}]   ;;  %s11237_s6 = inlined_call_operand.vmem [shape: f32[32,1], index: 6, kind: input, shape index: {}]   ;;  %s11238_s5 = inlined_call_operand.vmem [shape: f32[32,64], index: 5, kind: input, shape index: {}]   ;;  %s11239_s8 = inlined_call_operand.vmem [shape: f32[1,32,512], index: 8, kind: output, shape index: {}]  }
   0x1   :  { %5773 = vset.pattern.permute.xlu1 %v11240_v0  ;;  %v55_v1 = vld [vmem:[%s11231_s2 + $0x10] sm:$0xff]  ;;  %v41_v2 = vld [vmem:[%s11232_s0 + $0x60] sm:$0xff]  ;;  %5774 = vset.pattern.permute.xlu2 %v11240_v0  ;;  %v46_v16 = vld [vmem:[%s11233_s1 + $0x8] sm:$0xff]  ;;  %s5901_s10 = smov 17   ;;  %s5902_s11 = smov 127   ;;  %vm1854_vm3 = vcmask 138240  }
   0x2   :  { %v37_v3 = vld [vmem:[%s11232_s0 + $0x40] sm:$0xff]  ;;  %73 = vperm.xlu1 %5773, %v55_v1   ;;  %v5967_v4 = vand.u32 4294901760, %v41_v2  ;;  %5772 = vset.pattern.permute.xlu0 %v11240_v0  ;;  %v106_v20 = vsel %vm101_vm0, %v46_v16, 0  ;;  %v47_v21 = vld [vmem:[%s11233_s1 + $0x10] sm:$0xff]  ;;  %v56_v25 = vld [vmem:[%s11231_s2 + $0x18] sm:$0xff]  ;;  %s5903_s12 = smov 15  }
   0x3   :  { %v5969_v5 = vand.u32 4294901760, %v37_v3  ;;  %v33_v6 = vld [vmem:[%s11232_s0 + $0x20] sm:$0xff]  ;;  %v6015_v24 = vand.u32 4294901760, %v106_v20  ;;  %v109_v32 = vsel %vm101_vm0, %v47_v21, 0  ;;  %v58_v40 = vld [vmem:[%s11231_s2 + $0x28] sm:$0xff]  ;;  %v48_v45 = vld [vmem:[%s11233_s1 + $0x18] sm:$0xff] }
   0x4   :  { %v29_v7 = vld [vmem:[%s11232_s0] sm:$0xff]  ;;  %v5978_v8 = vand.u32 4294901760, %v33_v6  ;;  %139 = vmatpush.msra.mxu0 %v5967_v4  ;;  %v224_v12 = vsub.f32 %v41_v2, %v5967_v4  ;;  %358 = vmatpush.msra.mxu3 %v5967_v4  ;;  %v6054_v41 = vand.u32 4294901760, %v109_v32  ;;  %v54_v43 = vld [vmem:[%s11231_s2 + $0x8] sm:$0xff]  ;;  %v60_v47 = vld [vmem:[%s11231_s2 + $0x38] sm:$0xff]  ;;  %v112_v51 = vsel %vm101_vm0, %v48_v45, 0 }
   0x5   :  { %v5980_v9 = vand.u32 4294901760, %v29_v7  ;;  %v45_v10 = vld [vmem:[%s11233_s1] sm:$0xff]  ;;  %v5991_v13 = vsub.f32 %v37_v3, %v5969_v5  ;;  %v6030_v31 = vsub.f32 %v106_v20, %v6015_v24  ;;  %v42_v50 = vld [vmem:[%s11232_s0 + $0x68] sm:$0xff]  ;;  %v6096_v57 = vand.u32 4294901760, %v112_v51  ;;  %v59_v58 = vld [vmem:[%s11231_s2 + $0x30] sm:$0xff]  ;;  %s5907_s15 = smov 112  }
   0x6   :  { %v57_v11 = vld [vmem:[%s11231_s2 + $0x20] sm:$0xff]  ;;  %v103_v14 = vsel %vm101_vm0, %v45_v10, 0  ;;  %v6002_v17 = vsub.f32 %v33_v6, %v5978_v8  ;;  %294 = vmatpush.msra.mxu2 %v224_v12  ;;  %141 = vmatpush.msra.mxu0 %v5969_v5  ;;  %v225_v22 = vand.u32 4294901760, %v224_v12  ;;  %v6074_v49 = vsub.f32 %v109_v32, %v6054_v41  ;;  %v6094_v56 = vld [vmem:[%s11234_s3 + $0x8] sm:$0xff]  ;;  %v6185_v20 = vld [vmem:[%s11234_s3 + $0x38] sm:$0xff]  ;;  %s5909_s18 = smov 111  }
   0x7   :  { %v53_v15 = vld [vmem:[%s11231_s2] sm:$0xff]  ;;  %v6005_v18 = vsub.f32 %v29_v7, %v5980_v9  ;;  %v6007_v19 = vand.u32 4294901760, %v103_v14  ;;  %83 = vperm.xlu2 %5774, %v57_v11   ;;  %v231_v23 = vand.u32 4294901760, %v5991_v13  ;;  %360 = vmatpush.msra.mxu3 %v5969_v5  ;;  %11701 = vst [vmem:[#allocation3_spill] sm:$0xff] %v6030_v31  ;;  %v6049_v39 = vand.u32 4294901760, %v6030_v31 }
   0x8   :  { %63 = vperm.xlu0 %5772, %v53_v15   ;;  %v237_v27 = vand.u32 4294901760, %v6002_v17  ;;  %297 = vmatpush.msra.mxu2 %v5991_v13  ;;  %v226_v29 = vsub.f32 %v224_v12, %v225_v22  ;;  %11704 = vst [vmem:[#allocation6_spill] sm:$0xff] %v6074_v49  ;;  %v6080_v52 = vand.u32 4294901760, %v42_v50  ;;  %v6089_v55 = vand.u32 4294901760, %v6074_v49  ;;  %v49_v60 = vld [vmem:[%s11233_s1 + $0x20] sm:$0xff] }
   0x9   :  { %v6022_v26 = vsub.f32 %v103_v14, %v6007_v19  ;;  %v243_v28 = vand.u32 4294901760, %v6005_v18  ;;  %143 = vmatpush.msra.mxu0 %v5978_v8  ;;  %v232_v30 = vsub.f32 %v5991_v13, %v231_v23  ;;  %362 = vmatpush.msra.mxu3 %v5978_v8  ;;  %11703 = vst [vmem:[#allocation5_spill] sm:$0xff] %v6049_v39  ;;  %v6118_v62 = vld [vmem:[%s11234_s3] sm:$0xff]  ;;  %v115_v2 = vsel %vm101_vm0, %v49_v60, 0  ;;  %v38_v13 = vld [vmem:[%s11232_s0 + $0x48] sm:$0xff] }
   0xa   :  { %v238_v34 = vsub.f32 %v6002_v17, %v237_v27  ;;  %78 = vperm.xlu1 %5773, %v56_v25   ;;  %300 = vmatpush.msra.mxu2 %v6002_v17  ;;  %v227_v35 = vand.u32 4294901760, %v226_v29  ;;  %v157_v48 = vsub.f32 %v6030_v31, %v6049_v39  ;;  %v6083_v53 = vsub.f32 %v42_v50, %v6080_v52  ;;  %v6139_v6 = vld [vmem:[%s11234_s3 + $0x20] sm:$0xff] }
   0xb   :  { %11700 = vst [vmem:[#allocation2_spill] sm:$0xff] %v6022_v26  ;;  %v6035_v33 = vand.u32 4294901760, %v6022_v26  ;;  %v233_v36 = vand.u32 4294901760, %v232_v30  ;;  %v244_v37 = vsub.f32 %v6005_v18, %v243_v28  ;;  %145 = vmatpush.msra.mxu0 %v5980_v9  ;;  %364 = vmatpush.msra.mxu3 %v5980_v9  ;;  %v165_v63 = vsub.f32 %v6074_v49, %v6089_v55 }
   0xc   :  { %228 = vmatpush.msra.mxu1 %v227_v35  ;;  %303 = vmatpush.msra.mxu2 %v6005_v18  ;;  %v239_v42 = vand.u32 4294901760, %v238_v34  ;;  %v6086_v54 = vand.u32 4294901760, %v157_v48  ;;  %11705 = vst [vmem:[#allocation7_spill] sm:$0xff] %v6089_v55  ;;  %v627_v59 = vand.u32 4294901760, %v6083_v53  ;;  %v6123_v1 = vsub.f32 %v112_v51, %v6096_v57  ;;  %v6210_v34 = vld [vmem:[%s11234_s3 + $0x30] sm:$0xff] }
   0xd   :  { %11702 = vst [vmem:[#allocation4_spill] sm:$0xff] %v6035_v33  ;;  %v149_v38 = vsub.f32 %v6022_v26, %v6035_v33  ;;  %306 = vmatmul.f32.vlgmr.msra.gmra.mxu2 %v6022_v26  ;;  %368 = vmatmul.f32.vlgmr.msra.gmra.mxu3 %v6035_v33  ;;  %v245_v46 = vand.u32 4294901760, %v244_v37  ;;  %v6141_v7 = vand.u32 4294901760, %v115_v2  ;;  %v5895_v11 = vmov 1  }
   0xe   :  { %234 = vmatpush.msra.mxu1 %v233_v36  ;;  %429 = vmatpush.msrb.mxu0 %v225_v22  ;;  %11706 = vst [vmem:[#allocation8_spill] sm:$0xff] %v6096_v57  ;;  %v628_v61 = vsub.f32 %v6083_v53, %v627_v59  ;;  %v6171_v15 = vand.u32 4294901760, %v38_v13  ;;  %v34_v22 = vld [vmem:[%s11232_s0 + $0x28] sm:$0xff]  ;;  %vm2368_vm4 = vcmask 121856   ;;  %vm2962_vm5 = vcmask 1039360  }
   0xf   :  { %v6060_v44 = vand.u32 4294901760, %v149_v38  ;;  %88 = vperm.xlu2 %5774, %v58_v40   ;;  %541 = vmatpush.msrb.mxu2 %v6080_v52  ;;  %11707 = vst [vmem:[#allocation9_spill] sm:$0xff] %v6123_v1  ;;  %v6164_v12 = vsub.f32 %v115_v2, %v6141_v7  ;;  %v6192_v25 = vand.u32 4294901760, %v34_v22  ;;  %vm3231_vm6 = vcmask 924672  }
  0x10   :  { %68 = vperm.xlu0 %5772, %v54_v43   ;;  %240 = vmatpush.msra.mxu1 %v239_v42  ;;  %v629_v3 = vand.u32 4294901760, %v628_v61  ;;  %11709 = vst [vmem:[#allocation11_spill] sm:$0xff] %v6141_v7  ;;  %v632_v16 = vsub.f32 %v38_v13, %v6171_v15  ;;  %v6247_v61 = vld [vmem:[%s11234_s3 + $0x10] sm:$0xff]  ;;  %vm3468_vm7 = vcmask 916480   ;;  %vm3737_vm8 = vcmask 908288  }
  0x11   :  { %151 = vmatmul.f32.vlgmr.msra.gmra.mxu0 %v6060_v44  ;;  %11710 = vst [vmem:[#allocation12_spill] sm:$0xff] %v6164_v12  ;;  %543 = vmatpush.msrb.mxu2 %v6171_v15  ;;  %v6180_v18 = vand.u32 4294901760, %v6164_v12  ;;  %v638_v32 = vsub.f32 %v34_v22, %v6192_v25  ;;  %v5897_v22 = vmov 3   ;;  %vm4402_vm9 = vcmask 523264  }
  0x12   :  { %98 = vperm.xlu1 %5773, %v60_v47   ;;  %246 = vmatpush.msra.mxu1 %v245_v46 }
  0x13   :  { %248 = vmatmul.f32.vlgmr.msra.gmra.mxu1 %v6007_v19  ;;  %433 = vmatpush.msrb.mxu0 %v231_v23  ;;  %v633_v23 = vand.u32 4294901760, %v632_v16  ;;  %v181_v35 = vsub.f32 %v6164_v12, %v6180_v18  ;;  %v639_v40 = vand.u32 4294901760, %v638_v32 }
  0x14   :  { %488 = vmatpush.msrb.mxu1 %v5967_v4  ;;  %630 = vmatpush.msrb.mxu3 %v629_v3  ;;  %v6131_v4 = vand.u32 4294901760, %v165_v63  ;;  %v5896_v63 = vmov 2  }
  0x15   :  { %311 = vmatmul.f32.gmra.mxu2 %v6030_v31  ;;  %374 = vmatmul.f32.gmra.mxu3 %v6049_v39  ;;  %v634_v29 = vsub.f32 %v632_v16, %v633_v23  ;;  %v640_v43 = vsub.f32 %v638_v32, %v639_v40  ;;  %v6224_v46 = vand.u32 4294901760, %v181_v35 }
  0x16   :  { %490 = vmatpush.msrb.mxu1 %v5969_v5  ;;  %437 = vmatpush.msrb.mxu0 %v237_v27  ;;  %v6134_v5 = vand.u32 4294901760, %v6123_v1  ;;  %v51_v27 = vld [vmem:[%s11233_s1 + $0x30] sm:$0xff] }
  0x17   :  { %1962 = vperm.xlu2 %5774, %v6094_v56   ;;  %545 = vmatpush.msrb.mxu2 %v6192_v25  ;;  %v121_v37 = vsel %vm101_vm0, %v51_v27, 0  ;;  %v635_v38 = vand.u32 4294901760, %v634_v29  ;;  %11712 = vst [vmem:[#allocation14_spill] sm:$0xff] %v6224_v46  ;;  %v641_v50 = vand.u32 4294901760, %v640_v43 }
  0x18   :  { %93 = vperm.xlu0 %5772, %v59_v58   ;;  %492 = vmatpush.msrb.mxu1 %v5978_v8  ;;  %11708 = vst [vmem:[#allocation10_spill] sm:$0xff] %v6134_v5  ;;  %v50_v8 = vld [vmem:[%s11233_s1 + $0x28] sm:$0xff]  ;;  %v173_v10 = vsub.f32 %v6123_v1, %v6134_v5  ;;  %v6229_v48 = vand.u32 4294901760, %v121_v37 }
  0x19   :  { %159 = vmatmul.f32.gmra.mxu0 %v6086_v54  ;;  %v118_v14 = vsel %vm101_vm0, %v50_v8, 0  ;;  %636 = vmatpush.msrb.mxu3 %v635_v38 }
  0x1a   :  { %1957 = vperm.xlu1 %5773, %v6118_v62   ;;  %441 = vmatpush.msrb.mxu0 %v243_v28  ;;  %v6177_v17 = vand.u32 4294901760, %v173_v10  ;;  %v6187_v21 = vand.u32 4294901760, %v118_v14  ;;  %v30_v28 = vld [vmem:[%s11232_s0 + $0x8] sm:$0xff]  ;;  %v6242_v60 = vsub.f32 %v121_v37, %v6229_v48 }
  0x1b   :  { %252 = vmatmul.f32.gmra.mxu1 %v6015_v24  ;;  %v546_v30 = vand.u32 4294901760, %v30_v28  ;;  %642 = vmatpush.msrb.mxu3 %v641_v50 }
  0x1c   :  { %494 = vmatpush.msrb.mxu1 %v5980_v9  ;;  %696 = vmatpush.msra.mxu0 %v6083_v53  ;;  %v6158_v9 = vld [vmem:[%s11234_s3 + $0x18] sm:$0xff]  ;;  %11711 = vst [vmem:[#allocation13_spill] sm:$0xff] %v6177_v17  ;;  %v6215_v36 = vsub.f32 %v118_v14, %v6187_v21  ;;  %v6258_v8 = vand.u32 4294901760, %v6242_v60 }
  0x1d   :  { %316 = vmatmul.f32.gmra.mxu2 %v6074_v49  ;;  %380 = vmatmul.f32.gmra.mxu3 %v6089_v55  ;;  %v644_v42 = vsub.f32 %v30_v28, %v546_v30  ;;  %v52_v53 = vld [vmem:[%s11233_s1 + $0x38] sm:$0xff] }
  0x1e   :  { %760 = vmatpush.msra.mxu1 %v6080_v52  ;;  %699 = vmatpush.msra.mxu0 %v632_v16  ;;  %v6227_v47 = vand.u32 4294901760, %v6215_v36  ;;  %v124_v2 = vsel %vm101_vm0, %v52_v53, 0 }
  0x1f   :  { %1977 = vperm.xlu2 %5774, %v6139_v6   ;;  %547 = vmatpush.msrb.mxu2 %v546_v30  ;;  %v645_v45 = vand.u32 4294901760, %v644_v42  ;;  %v6260_v10 = vand.u32 4294901760, %v124_v2 }
  0x20   :  { %5776 = vset.pattern.permute.xlu0 %v5895_v11  ;;  %762 = vmatpush.msra.mxu1 %v6171_v15 }
  0x21   :  { %167 = vmatmul.f32.gmra.mxu0 %v6131_v4  ;;  %2205 = vperm.xlu0 %5776, %v6094_v56   ;;  %v646_v51 = vsub.f32 %v644_v42, %v645_v45  ;;  %11714 = vst [vmem:[#allocation16_spill] sm:$0xff] %v6260_v10 }
  0x22   :  { %1972 = vperm.xlu1 %5773, %v6158_v9   ;;  %764 = vmatpush.msra.mxu1 %v6192_v25 }
  0x23   :  { %256 = vmatmul.f32.gmra.mxu1 %v6054_v41  ;;  %831 = vmatpush.msra.mxu2 %v627_v59  ;;  %v647_v58 = vand.u32 4294901760, %v646_v51  ;;  %v189_v59 = vsub.f32 %v6215_v36, %v6227_v47  ;;  %v39_v51 = vld [vmem:[%s11232_s0 + $0x50] sm:$0xff] }
  0x24   :  { %702 = vmatpush.msra.mxu0 %v638_v32  ;;  %766 = vmatpush.msra.mxu1 %v546_v30  ;;  %v6402_v53 = vand.u32 4294901760, %v39_v51 }
  0x25   :  { %321 = vmatmul.f32.gmra.mxu2 %v6123_v1  ;;  %386 = vmatmul.f32.gmra.mxu3 %v6134_v5  ;;  %v6255_v3 = vand.u32 4294901760, %v189_v59 }
  0x26   :  { %835 = vmatpush.msra.mxu2 %v633_v23  ;;  %705 = vmatpush.msra.mxu0 %v644_v42 }
  0x27   :  { %1992 = vperm.xlu2 %5774, %v6185_v20   ;;  %648 = vmatpush.msrb.mxu3 %v647_v58  ;;  %11713 = vst [vmem:[#allocation15_spill] sm:$0xff] %v6255_v3 }
  0x28   :  { %839 = vmatpush.msra.mxu2 %v639_v40 }
  0x29   :  { %175 = vmatmul.f32.gmra.mxu0 %v6177_v17  ;;  %2225 = vperm.xlu0 %5776, %v6210_v34  }
  0x2a   :  { %1987 = vperm.xlu1 %5773, %v6210_v34   ;;  %890 = vmatpush.msra.mxu3 %v6080_v52  ;;  %v197_v52 = vsub.f32 %v6242_v60, %v6258_v8 }
  0x2b   :  { %260 = vmatmul.f32.gmra.mxu1 %v6096_v57  ;;  %843 = vmatpush.msra.mxu2 %v645_v45 }
  0x2c   :  { %892 = vmatpush.msra.mxu3 %v6171_v15  ;;  %v6276_v13 = vand.u32 4294901760, %v197_v52  ;;  %v1739_v15 = vld [vmem:[%s11234_s3 + $0x28] sm:$0xff] }
  0x2d   :  { %326 = vmatmul.f32.gmra.mxu2 %v6164_v12  ;;  %392 = vmatmul.f32.gmra.mxu3 %v6180_v18 }
  0x2e   :  { %894 = vmatpush.msra.mxu3 %v6192_v25  ;;  %11716 = vst [vmem:[#allocation18_spill] sm:$0xff] %v6276_v13  ;;  %v5898_v25 = vmov 4  }
  0x2f   :  { %5775 = vset.pattern.permute.xlu2 %v5895_v11 }
  0x30   :  { %2201 = vperm.xlu2 %5775, %v6118_v62   ;;  %896 = vmatpush.msra.mxu3 %v546_v30 }
  0x31   :  { %183 = vmatmul.f32.gmra.mxu0 %v6224_v46  ;;  %5780 = vset.pattern.permute.xlu0 %v5896_v63 }
  0x32   :  { %2478 = vperm.xlu0 %5780, %v6247_v61   ;;  %5777 = vset.pattern.permute.xlu1 %v5895_v11  ;;  %v6271_v11 = vsub.f32 %v124_v2, %v6260_v10 }
  0x33   :  { %2209 = vperm.xlu1 %5777, %v6247_v61   ;;  %264 = vmatmul.f32.gmra.mxu1 %v6141_v7 }
  0x34   :  { %11715 = vst [vmem:[#allocation17_spill] sm:$0xff] %v6271_v11  ;;  %v6279_v14 = vand.u32 4294901760, %v6271_v11 }
  0x35   :  { %331 = vmatmul.f32.gmra.mxu2 %v6215_v36  ;;  %398 = vmatmul.f32.gmra.mxu3 %v6227_v47 }
  0x36   :  { %v205_v16 = vsub.f32 %v6271_v11, %v6279_v14 }
  0x38   :  { %2213 = vperm.xlu2 %5775, %v6158_v9   ;;  %v6292_v23 = vand.u32 4294901760, %v205_v16 }
  0x39   :  { %191 = vmatmul.f32.gmra.mxu0 %v6255_v3 }
  0x3a   :  { %2498 = vperm.xlu0 %5780, %v6185_v20   ;;  %11717 = vst [vmem:[#allocation19_spill] sm:$0xff] %v6292_v23 }
  0x3b   :  { %2217 = vperm.xlu1 %5777, %v6139_v6   ;;  %268 = vmatmul.f32.gmra.mxu1 %v6187_v21 }
  0x3d   :  { %336 = vmatmul.f32.gmra.mxu2 %v6242_v60  ;;  %404 = vmatmul.f32.gmra.mxu3 %v6258_v8 }
  0x40   :  { %2221 = vperm.xlu2 %5775, %v1739_v15  }
  0x41   :  { %199 = vmatmul.f32.gmra.mxu0 %v6276_v13 }
  0x42   :  { %5781 = vset.pattern.permute.xlu0 %v5897_v22 }
  0x43   :  { %2739 = vperm.xlu0 %5781, %v6118_v62   ;;  %2229 = vperm.xlu1 %5777, %v6185_v20  }
  0x44   :  { %272 = vmatmul.f32.gmra.mxu1 %v6229_v48 }
  0x45   :  { %341 = vmatmul.f32.gmra.mxu2 %v6271_v11  ;;  %410 = vmatmul.f32.gmra.mxu3 %v6279_v14 }
  0x48   :  { %5779 = vset.pattern.permute.xlu2 %v5896_v63 }
  0x49   :  { %207 = vmatmul.f32.gmra.mxu0 %v6292_v23  ;;  %2474 = vperm.xlu2 %5779, %v6094_v56  }
  0x4b   :  { %2759 = vperm.xlu0 %5781, %v1739_v15   ;;  %5778 = vset.pattern.permute.xlu1 %v5896_v63  ;;  %v1034_v63 = vsub.f32 %v39_v51, %v6402_v53 }
  0x4c   :  { %276 = vmatmul.f32.gmra.mxu1 %v6260_v10  ;;  %2470 = vperm.xlu1 %5778, %v6118_v62  }
  0x4d   :  { %553 = vmatmul.f32.vlgmr.msrb.gmra.mxu2 %v6060_v44  ;;  %650 = vmatmul.f32.vlgmr.msrb.gmra.mxu3 %v6007_v19  ;;  %v1035_v52 = vand.u32 4294901760, %v1034_v63 }
  0x4f   :  { %v1036_v16 = vsub.f32 %v1034_v63, %v1035_v52 }
  0x51   :  { %443 = vmatmul.f32.vlgmr.msrb.gmra.mxu0 %v6007_v19  ;;  %2486 = vperm.xlu2 %5779, %v6139_v6  }
  0x53   :  { %5784 = vset.pattern.permute.xlu0 %v5898_v25 }
  0x54   :  { %496 = vmatmul.f32.vlgmr.msrb.gmra.mxu1 %v6007_v19  ;;  %2803 = vperm.xlu0 %5784, %v6118_v62  }
  0x55   :  { %2482 = vperm.xlu1 %5778, %v6158_v9   ;;  %561 = vmatmul.f32.gmra.mxu2 %v6086_v54 }
  0x56   :  { %654 = vmatmul.f32.gmra.mxu3 %v6015_v24 }
  0x59   :  { %447 = vmatmul.f32.gmra.mxu0 %v6015_v24  ;;  %2494 = vperm.xlu2 %5779, %v6210_v34  }
  0x5c   :  { %500 = vmatmul.f32.gmra.mxu1 %v6015_v24  ;;  %2823 = vperm.xlu0 %5784, %v1739_v15  }
  0x5d   :  { %2490 = vperm.xlu1 %5778, %v1739_v15   ;;  %569 = vmatmul.f32.gmra.mxu2 %v6131_v4 }
  0x5e   :  { %658 = vmatmul.f32.gmra.mxu3 %v6054_v41 }
  0x61   :  { %451 = vmatmul.f32.gmra.mxu0 %v6054_v41  ;;  %5783 = vset.pattern.permute.xlu2 %v5897_v22  ;;  %v6345_v62 = vpop.permute.xlu2 %83 }
  0x62   :  { %2747 = vperm.xlu2 %5783, %v6247_v61   ;;  %11718 = vst [vmem:[#allocation20_spill] sm:$0xff] %v6345_v62 }
  0x64   :  { %504 = vmatmul.f32.gmra.mxu1 %v6054_v41 }
  0x65   :  { %5782 = vset.pattern.permute.xlu1 %v5897_v22  ;;  %577 = vmatmul.f32.gmra.mxu2 %v6177_v17  ;;  %v1037_v22 = vand.u32 4294901760, %v1036_v16  ;;  %v31_v16 = vld [vmem:[%s11232_s0 + $0x10] sm:$0xff] }
  0x66   :  { %2743 = vperm.xlu1 %5782, %v6094_v56   ;;  %662 = vmatmul.f32.gmra.mxu3 %v6096_v57 }
  0x69   :  { %455 = vmatmul.f32.gmra.mxu0 %v6096_v57  ;;  %v6373_v32 = vpop.permute.xlu2 %88 }
  0x6a   :  { %2755 = vperm.xlu2 %5783, %v6139_v6   ;;  %11719 = vst [vmem:[#allocation21_spill] sm:$0xff] %v6373_v32 }
  0x6c   :  { %508 = vmatmul.f32.gmra.mxu1 %v6096_v57 }
  0x6d   :  { %585 = vmatmul.f32.gmra.mxu2 %v6224_v46 }
  0x6e   :  { %2751 = vperm.xlu1 %5782, %v6158_v9   ;;  %666 = vmatmul.f32.gmra.mxu3 %v6141_v7 }
  0x71   :  { %459 = vmatmul.f32.gmra.mxu0 %v6141_v7  ;;  %v6395_v50 = vpop.permute.xlu2 %1962 }
  0x72   :  { %2767 = vperm.xlu2 %5783, %v6185_v20   ;;  %11720 = vst [vmem:[#allocation22_spill] sm:$0xff] %v6395_v50 }
  0x74   :  { %512 = vmatmul.f32.gmra.mxu1 %v6141_v7  ;;  %v6381_v37 = vpop.permute.xlu1 %73 }
  0x75   :  { %593 = vmatmul.f32.gmra.mxu2 %v6255_v3 }
  0x76   :  { %2763 = vperm.xlu1 %5782, %v6210_v34   ;;  %670 = vmatmul.f32.gmra.mxu3 %v6187_v21 }
  0x79   :  { %463 = vmatmul.f32.gmra.mxu0 %v6187_v21 }
  0x7a   :  { %5786 = vset.pattern.permute.xlu2 %v5898_v25 }
  0x7b   :  { %2811 = vperm.xlu2 %5786, %v6247_v61  }
  0x7c   :  { %516 = vmatmul.f32.gmra.mxu1 %v6187_v21  ;;  %v6404_v58 = vpop.permute.xlu1 %78 }
  0x7d   :  { %601 = vmatmul.f32.gmra.mxu2 %v6276_v13 }
  0x7e   :  { %5785 = vset.pattern.permute.xlu1 %v5898_v25  ;;  %674 = vmatmul.f32.gmra.mxu3 %v6229_v48  ;;  %v6421_v25 = vpop.permute.xlu2 %1977 }
  0x7f   :  { %2807 = vperm.xlu1 %5785, %v6094_v56   ;;  %11721 = vst [vmem:[#allocation23_spill] sm:$0xff] %v6421_v25  ;;  %v948_v25 = vand.u32 4294901760, %v31_v16 }
  0x81   :  { %467 = vmatmul.f32.gmra.mxu0 %v6229_v48 }
  0x83   :  { %2819 = vperm.xlu2 %5786, %v6139_v6   ;;  %v43_v6 = vld [vmem:[%s11232_s0 + $0x70] sm:$0xff] }
  0x84   :  { %520 = vmatmul.f32.gmra.mxu1 %v6229_v48 }
  0x85   :  { %609 = vmatmul.f32.gmra.mxu2 %v6292_v23 }
  0x86   :  { %678 = vmatmul.f32.gmra.mxu3 %v6260_v10 }
  0x87   :  { %2815 = vperm.xlu1 %5785, %v6158_v9   ;;  %v6357_v9 = vand.u32 4294901760, %v43_v6 }
  0x89   :  { %471 = vmatmul.f32.gmra.mxu0 %v6260_v10  ;;  %v6366_v28 = vsub.f32 %v43_v6, %v6357_v9  ;;  %1162 = vmatpush.msrb.mxu3 %v6357_v9  ;;  %v35_v6 = vld [vmem:[%s11232_s0 + $0x30] sm:$0xff] }
  0x8a   :  { %943 = vmatpush.msrb.mxu0 %v6357_v9  ;;  %v946_v51 = vand.u32 4294901760, %v35_v6 }
  0x8b   :  { %2831 = vperm.xlu2 %5786, %v6185_v20   ;;  %v11242_v30 = vand.u32 4294901760, %v6366_v28  ;;  %1098 = vmatpush.msrb.mxu2 %v6366_v28  ;;  %v11723_v32 = vand.u32 4294901760, %v6366_v28 }
  0x8c   :  { %524 = vmatmul.f32.gmra.mxu1 %v6260_v10  ;;  %945 = vmatpush.msrb.mxu0 %v6402_v53 }
  0x8d   :  { %845 = vmatmul.f32.vlgmr.msra.gmra.mxu2 %v6007_v19  ;;  %v1030_v35 = vsub.f32 %v6366_v28, %v11242_v30  ;;  %1164 = vmatpush.msrb.mxu3 %v6402_v53  ;;  %v1040_v30 = vsub.f32 %v35_v6, %v946_v51 }
  0x8e   :  { %v6349_v56 = vpop.f32.mrf.mxu0  ;;  %898 = vmatmul.f32.vlgmr.msra.gmra.mxu3 %v6007_v19  ;;  %1101 = vmatpush.msrb.mxu2 %v1034_v63  ;;  %v6431_v63 = vpop.permute.xlu1 %98 }
  0x8f   :  { %2827 = vperm.xlu1 %5785, %v6210_v34   ;;  %v1031_v38 = vand.u32 4294901760, %v1030_v35  ;;  %11722 = vst [vmem:[#allocation24_spill] sm:$0xff] %v6431_v63  ;;  %947 = vmatpush.msrb.mxu0 %v946_v51  ;;  %v1041_v23 = vand.u32 4294901760, %v1040_v30 }
  0x90   :  { %v6360_v27 = vpop.f32.mrf.mxu1  ;;  %v6362_v20 = vpop.f32.mrf.mxu2  ;;  %1166 = vmatpush.msrb.mxu3 %v946_v51  ;;  %1104 = vmatpush.msrb.mxu2 %v1040_v30 }
  0x91   :  { %708 = vmatmul.f32.vlgmr.msra.gmra.mxu0 %v6022_v26  ;;  %v6369_v29 = vpop.f32.mrf.mxu3  ;;  %1032 = vmatpush.msrb.mxu1 %v1031_v38  ;;  %v1042_v13 = vsub.f32 %v1040_v30, %v1041_v23 }
  0x92   :  { %949 = vmatpush.msrb.mxu0 %v948_v25  ;;  %1168 = vmatpush.msrb.mxu3 %v948_v25 }
  0x93   :  { %1038 = vmatpush.msrb.mxu1 %v1037_v22  ;;  %v1046_v22 = vsub.f32 %v31_v16, %v948_v25  ;;  %v1043_v46 = vand.u32 4294901760, %v1042_v13  ;;  %v6450_v16 = vpop.permute.xlu2 %1992 }
  0x94   :  { %770 = vmatmul.f32.vlgmr.msra.gmra.mxu1 %v6035_v33  ;;  %1233 = vmatpush.msra.mxu0 %v11723_v32  ;;  %11724 = vst [vmem:[#allocation25_spill] sm:$0xff] %v6450_v16 }
  0x95   :  { %849 = vmatmul.f32.gmra.mxu2 %v6015_v24  ;;  %v1047_v63 = vand.u32 4294901760, %v1046_v22  ;;  %1044 = vmatpush.msrb.mxu1 %v1043_v46 }
  0x96   :  { %v6376_v34 = vpop.f32.mrf.mxu0  ;;  %902 = vmatmul.f32.gmra.mxu3 %v6015_v24  ;;  %1107 = vmatpush.msrb.mxu2 %v1046_v22  ;;  %v6454_v30 = vpop.permute.xlu1 %1957 }
  0x97   :  { %1237 = vmatpush.msra.mxu0 %v1035_v52  ;;  %11725 = vst [vmem:[#allocation26_spill] sm:$0xff] %v6454_v30 }
  0x98   :  { %v6386_v40 = vpop.f32.mrf.mxu1  ;;  %v6388_v42 = vpop.f32.mrf.mxu2 }
  0x99   :  { %713 = vmatmul.f32.gmra.mxu0 %v6030_v31  ;;  %v6390_v43 = vpop.f32.mrf.mxu3 }
  0x9a   :  { %1241 = vmatpush.msra.mxu0 %v1041_v23 }
  0x9c   :  { %776 = vmatmul.f32.gmra.mxu1 %v6049_v39  ;;  %1245 = vmatpush.msra.mxu0 %v1047_v63 }
  0x9d   :  { %853 = vmatmul.f32.gmra.mxu2 %v6054_v41 }
  0x9e   :  { %v6393_v45 = vpop.f32.mrf.mxu0  ;;  %906 = vmatmul.f32.gmra.mxu3 %v6054_v41  ;;  %v6477_v28 = vpop.permute.xlu1 %1972 }
  0x9f   :  { %11728 = vst [vmem:[#allocation29_spill] sm:$0xff] %v6477_v28 }
  0xa0   :  { %v6407_v59 = vpop.f32.mrf.mxu1  ;;  %v6409_v61 = vpop.f32.mrf.mxu2 }
  0xa1   :  { %718 = vmatmul.f32.gmra.mxu0 %v6074_v49  ;;  %v6414_v2 = vpop.f32.mrf.mxu3 }
  0xa4   :  { %782 = vmatmul.f32.gmra.mxu1 %v6089_v55 }
  0xa5   :  { %857 = vmatmul.f32.gmra.mxu2 %v6096_v57 }
  0xa6   :  { %v6417_v15 = vpop.f32.mrf.mxu0  ;;  %910 = vmatmul.f32.gmra.mxu3 %v6096_v57  ;;  %v1048_v57 = vsub.f32 %v1046_v22, %v1047_v63  ;;  %v6500_v16 = vpop.permute.xlu1 %1987 }
  0xa7   :  { %11731 = vst [vmem:[#allocation32_spill] sm:$0xff] %v6500_v16 }
  0xa8   :  { %v6427_v35 = vpop.f32.mrf.mxu1  ;;  %v6429_v38 = vpop.f32.mrf.mxu2 }
  0xa9   :  { %723 = vmatmul.f32.gmra.mxu0 %v6123_v1  ;;  %v6433_v0 = vpop.f32.mrf.mxu3 }
  0xac   :  { %788 = vmatmul.f32.gmra.mxu1 %v6134_v5 }
  0xad   :  { %861 = vmatmul.f32.gmra.mxu2 %v6141_v7 }
  0xae   :  { %v6439_v50 = vpop.f32.mrf.mxu0  ;;  %914 = vmatmul.f32.gmra.mxu3 %v6141_v7  ;;  %v1049_v7 = vand.u32 4294901760, %v1048_v57 }
  0xb0   :  { %v6444_v6 = vpop.f32.mrf.mxu1  ;;  %v6446_v3 = vpop.f32.mrf.mxu2  ;;  %1050 = vmatpush.msrb.mxu1 %v1049_v7 }
  0xb1   :  { %728 = vmatmul.f32.gmra.mxu0 %v6164_v12  ;;  %v6452_v17 = vpop.f32.mrf.mxu3  ;;  %v6470_v7 = vpop.permute.xlu2 %2201 }
  0xb2   :  { %1292 = vmatpush.msra.mxu1 %v6357_v9  ;;  %11726 = vst [vmem:[#allocation27_spill] sm:$0xff] %v6470_v7  ;;  %v6475_v9 = vpop.permute.xlu0 %63 }
  0xb3   :  { %11727 = vst [vmem:[#allocation28_spill] sm:$0xff] %v6475_v9  ;;  %v153_v52 = vadd.f32 %v6349_v56, %v6475_v9 }
  0xb4   :  { %794 = vmatmul.f32.gmra.mxu1 %v6180_v18 }
  0xb5   :  { %865 = vmatmul.f32.gmra.mxu2 %v6187_v21  ;;  %1294 = vmatpush.msra.mxu1 %v6402_v53  ;;  %v250_v63 = vadd.f32 %v6360_v27, %v153_v52 }
  0xb6   :  { %v6457_v12 = vpop.f32.mrf.mxu0  ;;  %918 = vmatmul.f32.gmra.mxu3 %v6187_v21 }
  0xb7   :  { %1296 = vmatpush.msra.mxu1 %v946_v51  ;;  %v308_v7 = vadd.f32 %v6362_v20, %v250_v63 }
  0xb8   :  { %v6464_v57 = vpop.f32.mrf.mxu1  ;;  %v6466_v46 = vpop.f32.mrf.mxu2 }
  0xb9   :  { %733 = vmatmul.f32.gmra.mxu0 %v6215_v36  ;;  %v6468_v13 = vpop.f32.mrf.mxu3  ;;  %1298 = vmatpush.msra.mxu1 %v948_v25  ;;  %v6494_v22 = vpop.permute.xlu2 %2213 }
  0xba   :  { %11729 = vst [vmem:[#allocation30_spill] sm:$0xff] %v6494_v22  ;;  %v6498_v28 = vpop.permute.xlu0 %68 }
  0xbb   :  { %11730 = vst [vmem:[#allocation31_spill] sm:$0xff] %v6498_v28  ;;  %v161_v27 = vadd.f32 %v6376_v34, %v6498_v28  ;;  %v169_v28 = vadd.f32 %v6393_v45, %v6381_v37 }
  0xbc   :  { %800 = vmatmul.f32.gmra.mxu1 %v6227_v47 }
  0xbd   :  { %869 = vmatmul.f32.gmra.mxu2 %v6229_v48  ;;  %v254_v16 = vadd.f32 %v6386_v40, %v161_v27 }
  0xbe   :  { %v6473_v23 = vpop.f32.mrf.mxu0  ;;  %922 = vmatmul.f32.gmra.mxu3 %v6229_v48 }
  0xbf   :  { %v313_v63 = vadd.f32 %v6388_v42, %v254_v16  ;;  %v258_v42 = vadd.f32 %v6407_v59, %v169_v28 }
  0xc0   :  { %v6484_v53 = vpop.f32.mrf.mxu2 }
  0xc1   :  { %738 = vmatmul.f32.gmra.mxu0 %v6242_v60  ;;  %v6482_v32 = vpop.f32.mrf.mxu1  ;;  %v6488_v51 = vpop.f32.mrf.mxu3  ;;  %v318_v27 = vadd.f32 %v6409_v61, %v258_v42 }
  0xc2   :  { %v6517_v9 = vpop.permute.xlu2 %2221 }
  0xc3   :  { %11732 = vst [vmem:[#allocation33_spill] sm:$0xff] %v6517_v9  ;;  %v382_v61 = vadd.f32 %v6414_v2, %v318_v27 }
  0xc4   :  { %806 = vmatmul.f32.gmra.mxu1 %v6258_v8 }
  0xc5   :  { %873 = vmatmul.f32.gmra.mxu2 %v6260_v10 }
  0xc6   :  { %v6491_v25 = vpop.f32.mrf.mxu0  ;;  %926 = vmatmul.f32.gmra.mxu3 %v6260_v10  ;;  %v370_v10 = vadd.f32 %v6369_v29, %v308_v7  ;;  %v6529_v7 = vpop.permute.xlu1 %2209 }
  0xc7   :  { %11734 = vst [vmem:[#allocation35_spill] sm:$0xff] %v6529_v7 }
  0xc8   :  { %v6505_v30 = vpop.f32.mrf.mxu2 }
  0xc9   :  { %743 = vmatmul.f32.gmra.mxu0 %v6271_v11  ;;  %v6503_v56 = vpop.f32.mrf.mxu1  ;;  %v6510_v52 = vpop.f32.mrf.mxu3 }
  0xca   :  { %v6552_v59 = vpop.permute.xlu2 %2474 }
  0xcb   :  { %11736 = vst [vmem:[#allocation37_spill] sm:$0xff] %v6552_v59 }
  0xcc   :  { %812 = vmatmul.f32.gmra.mxu1 %v6279_v14 }
  0xcd   :  { %1110 = vmatmul.f32.vlgmr.msrb.gmra.mxu2 %v6022_v26 }
  0xce   :  { %v444_v22 = vpop.f32.mrf.mxu0  ;;  %1172 = vmatmul.f32.vlgmr.msrb.gmra.mxu3 %v6035_v33  ;;  %v6557_v28 = vpop.permute.xlu1 %2217 }
  0xcf   :  { %v445_v11 = vadd.f32 %v444_v22, %v370_v10  ;;  %11737 = vst [vmem:[#allocation38_spill] sm:$0xff] %v6557_v28 }
  0xd0   :  { %v6520_v34 = vpop.f32.mrf.mxu2 }
  0xd1   :  { %955 = vmatmul.f32.vlgmr.msrb.gmra.mxu0 %v6060_v44  ;;  %v497_v20 = vpop.f32.mrf.mxu1  ;;  %v6527_v40 = vpop.f32.mrf.mxu3 }
  0xd2   :  { %v6525_v29 = vadd.f32 %v497_v20, %v445_v11  ;;  %v376_v11 = vadd.f32 %v6390_v43, %v313_v63  ;;  %v177_v20 = vadd.f32 %v6417_v15, %v6404_v58 }
  0xd4   :  { %11733 = vst [vmem:[#allocation34_spill] sm:$0xff] %v6525_v29  ;;  %1052 = vmatmul.f32.vlgmr.msrb.gmra.mxu1 %v6007_v19  ;;  %2589 = vrot.lane.b32.xlu0 %v6525_v29, %s5899_s30  ;;  %v262_v15 = vadd.f32 %v6427_v35, %v177_v20  ;;  %v185_v35 = vadd.f32 %v6439_v50, %v6345_v62  ;;  %v36_v50 = vld [vmem:[%s11232_s0 + $0x38] sm:$0xff] }
  0xd5   :  { %2051 = vrot.lane.b32.xlu2 %v6525_v29, %s5900_s9  ;;  %1806 = vrot.lane.b32.xlu1 %v6525_v29, %s5901_s10 }
  0xd6   :  { %v448_v10 = vpop.f32.mrf.mxu0  ;;  %1115 = vmatmul.f32.gmra.mxu2 %v6030_v31  ;;  %1178 = vmatmul.f32.gmra.mxu3 %v6049_v39  ;;  %v323_v2 = vadd.f32 %v6429_v38, %v262_v15  ;;  %v6596_v38 = vpop.permute.xlu2 %2486  ;;  %v266_v59 = vadd.f32 %v6444_v6, %v185_v35  ;;  %v11742_v31 = vld [vmem:[#allocation21_spill] sm:$0xff] }
  0xd7   :  { %v449_v45 = vadd.f32 %v448_v10, %v376_v11  ;;  %v44_v11 = vld [vmem:[%s11232_s0 + $0x78] sm:$0xff]  ;;  %11739 = vst [vmem:[#allocation40_spill] sm:$0xff] %v6596_v38 }
  0xd8   :  { %v6543_v22 = vpop.f32.mrf.mxu2  ;;  %v388_v7 = vadd.f32 %v6433_v0, %v323_v2  ;;  %v32_v38 = vld [vmem:[%s11232_s0 + $0x18] sm:$0xff] }
  0xd9   :  { %963 = vmatmul.f32.gmra.mxu0 %v6086_v54  ;;  %v501_v16 = vpop.f32.mrf.mxu1  ;;  %v6550_v43 = vpop.f32.mrf.mxu3  ;;  %v11741_v2 = vld [vmem:[#allocation13_spill] sm:$0xff] }
  0xda   :  { %v6548_v9 = vadd.f32 %v501_v16, %v449_v45  ;;  %v6573_v16 = vand.u32 4294901760, %v44_v11 }
  0xdc   :  { %11735 = vst [vmem:[#allocation36_spill] sm:$0xff] %v6548_v9  ;;  %1056 = vmatmul.f32.gmra.mxu1 %v6015_v24  ;;  %2898 = vrot.lane.b32.xlu0 %v6525_v29, %s5902_s11 }
  0xdd   :  { %2057 = vrot.lane.b32.xlu2 %v6548_v9, %s5900_s9  ;;  %2320 = vrot.lane.b32.xlu1 %v6525_v29, %s5903_s12  ;;  %v6611_v29 = vpop.permute.xlu1 %2229 }
  0xde   :  { %v452_v63 = vpop.f32.mrf.mxu0  ;;  %1120 = vmatmul.f32.gmra.mxu2 %v6074_v49  ;;  %1184 = vmatmul.f32.gmra.mxu3 %v6089_v55  ;;  %11740 = vst [vmem:[#allocation41_spill] sm:$0xff] %v6611_v29 }
  0xdf   :  { %v453_v10 = vadd.f32 %v452_v63, %v382_v61  ;;  %v40_v63 = vld [vmem:[%s11232_s0 + $0x58] sm:$0xff]  ;;  %1345 = vmatpush.msra.mxu2 %v6573_v16  ;;  %v1430_v61 = vsub.f32 %v44_v11, %v6573_v16  ;;  %1564 = vmatpush.msrb.mxu1 %v6573_v16  ;;  %v6602_v11 = vand.u32 4294901760, %v36_v50 }
  0xe0   :  { %v6571_v45 = vpop.f32.mrf.mxu2  ;;  %v6587_v28 = vand.u32 4294901760, %v40_v63 }
  0xe1   :  { %971 = vmatmul.f32.gmra.mxu0 %v6131_v4  ;;  %v505_v42 = vpop.f32.mrf.mxu1  ;;  %v6580_v20 = vpop.f32.mrf.mxu3  ;;  %v6618_v0 = vsub.f32 %v36_v50, %v6602_v11  ;;  %v328_v50 = vadd.f32 %v6446_v3, %v266_v59 }
  0xe2   :  { %v6578_v27 = vadd.f32 %v505_v42, %v453_v10  ;;  %v1431_v10 = vand.u32 4294901760, %v1430_v61  ;;  %v1436_v42 = vsub.f32 %v40_v63, %v6587_v28  ;;  %1500 = vmatpush.msrb.mxu0 %v1430_v61  ;;  %1347 = vmatpush.msra.mxu2 %v6587_v28  ;;  %v6615_v63 = vand.u32 4294901760, %v32_v38 }
  0xe3   :  { %1566 = vmatpush.msrb.mxu1 %v6587_v28  ;;  %v394_v59 = vadd.f32 %v6452_v17, %v328_v50 }
  0xe4   :  { %11738 = vst [vmem:[#allocation39_spill] sm:$0xff] %v6578_v27  ;;  %1060 = vmatmul.f32.gmra.mxu1 %v6054_v41  ;;  %2595 = vrot.lane.b32.xlu0 %v6548_v9, %s5899_s30  ;;  %v1432_v55 = vsub.f32 %v1430_v61, %v1431_v10  ;;  %v1437_v49 = vand.u32 4294901760, %v1436_v42  ;;  %v1448_v39 = vsub.f32 %v32_v38, %v6615_v63  ;;  %v11744_v38 = vld [vmem:[#allocation8_spill] sm:$0xff] }
  0xe5   :  { %2063 = vrot.lane.b32.xlu2 %v6578_v27, %s5900_s9  ;;  %1812 = vrot.lane.b32.xlu1 %v6548_v9, %s5901_s10 }
  0xe6   :  { %v456_v15 = vpop.f32.mrf.mxu0  ;;  %1125 = vmatmul.f32.gmra.mxu2 %v6123_v1  ;;  %1190 = vmatmul.f32.gmra.mxu3 %v6134_v5  ;;  %v1433_v29 = vand.u32 4294901760, %v1432_v55  ;;  %v1438_v61 = vsub.f32 %v1436_v42, %v1437_v49  ;;  %v1443_v5 = vand.u32 4294901760, %v6618_v0  ;;  %v1449_v62 = vand.u32 4294901760, %v1448_v39 }
  0xe7   :  { %v457_v6 = vadd.f32 %v456_v15, %v388_v7  ;;  %1349 = vmatpush.msra.mxu2 %v6602_v11  ;;  %1503 = vmatpush.msrb.mxu0 %v1436_v42  ;;  %v193_v7 = vadd.f32 %v6457_v12, %v11742_v31  ;;  %v6650_v31 = vpop.permute.xlu0 %93 }
  0xe8   :  { %v6622_v1 = vpop.f32.mrf.mxu2  ;;  %1568 = vmatpush.msrb.mxu1 %v6602_v11  ;;  %1434 = vmatpush.msra.mxu3 %v1433_v29  ;;  %v1439_v55 = vand.u32 4294901760, %v1438_v61  ;;  %v1444_v26 = vsub.f32 %v6618_v0, %v1443_v5  ;;  %v1450_v29 = vsub.f32 %v1448_v39, %v1449_v62  ;;  %v201_v50 = vadd.f32 %v6473_v23, %v6650_v31 }
  0xe9   :  { %979 = vmatmul.f32.gmra.mxu0 %v11741_v2  ;;  %v509_v35 = vpop.f32.mrf.mxu1  ;;  %v6632_v33 = vpop.f32.mrf.mxu3  ;;  %1351 = vmatpush.msra.mxu2 %v6615_v63  ;;  %v270_v42 = vadd.f32 %v6464_v57, %v193_v7  ;;  %v11747_v2 = vld [vmem:[#allocation14_spill] sm:$0xff] }
  0xea   :  { %v6630_v15 = vadd.f32 %v509_v35, %v457_v6  ;;  %v1445_v12 = vand.u32 4294901760, %v1444_v26  ;;  %v11745_v6 = vld [vmem:[#allocation12_spill] sm:$0xff]  ;;  %1440 = vmatpush.msra.mxu3 %v1439_v55  ;;  %v6647_v35 = vpop.permute.xlu2 %2494  ;;  %v1451_v61 = vand.u32 4294901760, %v1450_v29  ;;  %v6653_v26 = vpop.permute.xlu1 %2470  ;;  %1506 = vmatpush.msrb.mxu0 %v6618_v0  ;;  %v274_v23 = vadd.f32 %v6482_v32, %v201_v50 }
  0xeb   :  { %11746 = vst [vmem:[#allocation12_spill] sm:$0xff] %v6647_v35  ;;  %1635 = vmatpush.msrb.mxu2 %v1431_v10  ;;  %v333_v57 = vadd.f32 %v6466_v46, %v270_v42  ;;  %1570 = vmatpush.msrb.mxu1 %v6615_v63  ;;  %v11756_v42 = vld [vmem:[#allocation18_spill] sm:$0xff] }
  0xec   :  { %11743 = vst [vmem:[#allocation42_spill] sm:$0xff] %v6630_v15  ;;  %1064 = vmatmul.f32.gmra.mxu1 %v11744_v38  ;;  %2601 = vrot.lane.b32.xlu0 %v6578_v27, %s5899_s30 }
  0xed   :  { %2069 = vrot.lane.b32.xlu2 %v6630_v15, %s5900_s9  ;;  %2326 = vrot.lane.b32.xlu1 %v6548_v9, %s5903_s12  ;;  %11748 = vst [vmem:[#allocation14_spill] sm:$0xff] %v6653_v26  ;;  %v400_v46 = vadd.f32 %v6468_v13, %v333_v57  ;;  %v338_v13 = vadd.f32 %v6484_v53, %v274_v23  ;;  %v11759_v23 = vld [vmem:[#allocation17_spill] sm:$0xff] }
  0xee   :  { %v460_v3 = vpop.f32.mrf.mxu0  ;;  %1130 = vmatmul.f32.gmra.mxu2 %v11745_v6  ;;  %1196 = vmatmul.f32.gmra.mxu3 %v6180_v18 }
  0xef   :  { %v461_v38 = vadd.f32 %v460_v3, %v394_v59  ;;  %1446 = vmatpush.msra.mxu3 %v1445_v12  ;;  %1639 = vmatpush.msrb.mxu2 %v1437_v49  ;;  %v11750_v3 = vld [vmem:[#allocation11_spill] sm:$0xff] }
  0xf0   :  { %v6661_v10 = vpop.f32.mrf.mxu2  ;;  %1509 = vmatpush.msrb.mxu0 %v1448_v39 }
  0xf1   :  { %987 = vmatmul.f32.gmra.mxu0 %v11747_v2  ;;  %v513_v17 = vpop.f32.mrf.mxu1  ;;  %v6663_v55 = vpop.f32.mrf.mxu3  ;;  %1452 = vmatpush.msra.mxu3 %v1451_v61 }
  0xf2   :  { %v6659_v7 = vadd.f32 %v513_v17, %v461_v38  ;;  %1643 = vmatpush.msrb.mxu2 %v1443_v5  ;;  %v6681_v0 = vpop.permute.xlu2 %2747  ;;  %v6691_v5 = vpop.permute.xlu1 %2482 }
  0xf3   :  { %1694 = vmatpush.msrb.mxu3 %v6573_v16  ;;  %v11751_v16 = vld [vmem:[#allocation15_spill] sm:$0xff]  ;;  %11752 = vst [vmem:[#allocation11_spill] sm:$0xff] %v6681_v0 }
  0xf4   :  { %11749 = vst [vmem:[#allocation43_spill] sm:$0xff] %v6659_v7  ;;  %1068 = vmatmul.f32.gmra.mxu1 %v11750_v3  ;;  %2607 = vrot.lane.b32.xlu0 %v6630_v15, %s5899_s30 }
  0xf5   :  { %2075 = vrot.lane.b32.xlu2 %v6659_v7, %s5900_s9  ;;  %1818 = vrot.lane.b32.xlu1 %v6578_v27, %s5901_s10  ;;  %11753 = vst [vmem:[#allocation15_spill] sm:$0xff] %v6691_v5 }
  0xf6   :  { %v464_v49 = vpop.f32.mrf.mxu0  ;;  %1135 = vmatmul.f32.gmra.mxu2 %v6215_v36  ;;  %1696 = vmatpush.msrb.mxu3 %v6587_v28  ;;  %v11754_v28 = vld [vmem:[#allocation24_spill] sm:$0xff] }
  0xf7   :  { %1202 = vmatmul.f32.gmra.mxu3 %v6227_v47  ;;  %v465_v39 = vadd.f32 %v464_v49, %v400_v46  ;;  %1647 = vmatpush.msrb.mxu2 %v1449_v62  ;;  %v209_v59 = vadd.f32 %v6491_v25, %v11754_v28  ;;  %v6698_v62 = vpop.permute.xlu0 %2205 }
  0xf8   :  { %1698 = vmatpush.msrb.mxu3 %v6602_v11  ;;  %v6686_v32 = vpop.f32.mrf.mxu2  ;;  %11755 = vst [vmem:[#allocation24_spill] sm:$0xff] %v6698_v62  ;;  %v406_v11 = vadd.f32 %v6488_v51, %v338_v13  ;;  %v11761_v13 = vld [vmem:[#allocation19_spill] sm:$0xff] }
  0xf9   :  { %995 = vmatmul.f32.gmra.mxu0 %v11751_v16  ;;  %v517_v38 = vpop.f32.mrf.mxu1  ;;  %v6688_v29 = vpop.f32.mrf.mxu3 }
  0xfa   :  { %v6684_v12 = vadd.f32 %v517_v38, %v465_v39  ;;  %1700 = vmatpush.msrb.mxu3 %v6615_v63  ;;  %v278_v63 = vadd.f32 %v6503_v56, %v209_v59  ;;  %v6716_v46 = vpop.permute.xlu2 %2755  ;;  %v6721_v51 = vpop.permute.xlu1 %2490 }
  0xfb   :  { %11757 = vst [vmem:[#allocation18_spill] sm:$0xff] %v6716_v46 }
  0xfc   :  { %1072 = vmatmul.f32.gmra.mxu1 %v6187_v21  ;;  %2613 = vrot.lane.b32.xlu0 %v6659_v7, %s5899_s30  ;;  %v343_v17 = vadd.f32 %v6505_v30, %v278_v63  ;;  %11758 = vst [vmem:[#allocation44_spill] sm:$0xff] %v6721_v51  ;;  %v11767_v51 = vld [vmem:[#allocation31_spill] sm:$0xff] }
  0xfd   :  { %2081 = vrot.lane.b32.xlu2 %v6684_v12, %s5900_s9  ;;  %2332 = vrot.lane.b32.xlu1 %v6578_v27, %s5903_s12  ;;  %v563_v0 = vadd.f32 %v6543_v22, %v11767_v51 }
  0xfe   :  { %v468_v53 = vpop.f32.mrf.mxu0  ;;  %1140 = vmatmul.f32.gmra.mxu2 %v6242_v60  ;;  %v412_v30 = vadd.f32 %v6510_v52, %v343_v17  ;;  %v11763_v52 = vld [vmem:[#allocation16_spill] sm:$0xff] }
  0xff   :  { %1208 = vmatmul.f32.gmra.mxu3 %v6258_v8  ;;  %v469_v25 = vadd.f32 %v468_v53, %v406_v11  ;;  %v6729_v39 = vpop.permute.xlu0 %2225  ;;  %v11762_v53 = vld [vmem:[#allocation28_spill] sm:$0xff] }
 0x100   :  { %v6712_v50 = vpop.f32.mrf.mxu2  ;;  %11760 = vst [vmem:[#allocation17_spill] sm:$0xff] %v6729_v39  ;;  %v555_v11 = vadd.f32 %v6520_v34, %v11762_v53 }
 0x101   :  { %1003 = vmatmul.f32.gmra.mxu0 %v11756_v42  ;;  %v521_v61 = vpop.f32.mrf.mxu1  ;;  %v6714_v49 = vpop.f32.mrf.mxu3 }
 0x102   :  { %v6710_v57 = vadd.f32 %v521_v61, %v469_v25  ;;  %v6744_v17 = vpop.permute.xlu2 %2767  ;;  %v652_v34 = vadd.f32 %v6527_v40, %v555_v11  ;;  %v656_v40 = vadd.f32 %v6550_v43, %v563_v0  ;;  %v571_v43 = vadd.f32 %v6571_v45, %v6381_v37 }
 0x103   :  { %11764 = vst [vmem:[#allocation19_spill] sm:$0xff] %v6744_v17 }
 0x104   :  { %1076 = vmatmul.f32.gmra.mxu1 %v6229_v48  ;;  %2619 = vrot.lane.b32.xlu0 %v6684_v12, %s5899_s30 }
 0x105   :  { %2087 = vrot.lane.b32.xlu2 %v6710_v57, %s5900_s9  ;;  %1824 = vrot.lane.b32.xlu1 %v6630_v15, %s5901_s10 }
 0x106   :  { %v472_v56 = vpop.f32.mrf.mxu0  ;;  %1145 = vmatmul.f32.gmra.mxu2 %v11759_v23 }
 0x107   :  { %1214 = vmatmul.f32.gmra.mxu3 %v6279_v14  ;;  %v473_v38 = vadd.f32 %v472_v56, %v412_v30  ;;  %v6752_v30 = vpop.permute.xlu1 %2743 }
 0x108   :  { %v6737_v25 = vpop.f32.mrf.mxu2  ;;  %11765 = vst [vmem:[#allocation28_spill] sm:$0xff] %v6752_v30  ;;  %v11779_v30 = vld [vmem:[#allocation20_spill] sm:$0xff] }
 0x109   :  { %1011 = vmatmul.f32.gmra.mxu0 %v11761_v13  ;;  %v525_v59 = vpop.f32.mrf.mxu1  ;;  %v6739_v61 = vpop.f32.mrf.mxu3 }
 0x10a   :  { %v6735_v63 = vadd.f32 %v525_v59, %v473_v38  ;;  %v6756_v59 = vpop.permute.xlu0 %2478  ;;  %v6769_v22 = vpop.permute.xlu2 %2811 }
 0x10b   :  { %11766 = vst [vmem:[#allocation16_spill] sm:$0xff] %v6756_v59  ;;  %v587_v59 = vadd.f32 %v6661_v10, %v11779_v30 }
 0x10c   :  { %1080 = vmatmul.f32.gmra.mxu1 %v11763_v52  ;;  %2625 = vrot.lane.b32.xlu0 %v6710_v57, %s5899_s30  ;;  %11769 = vst [vmem:[#allocation45_spill] sm:$0xff] %v6769_v22 }
 0x10d   :  { %2093 = vrot.lane.b32.xlu2 %v6735_v63, %s5900_s9  ;;  %2338 = vrot.lane.b32.xlu1 %v6630_v15, %s5903_s12 }
 0x10e   :  { %v709_v56 = vpop.f32.mrf.mxu0  ;;  %1357 = vmatmul.f32.vlgmr.msra.gmra.mxu2 %v6060_v44 }
 0x10f   :  { %1454 = vmatmul.f32.vlgmr.msra.gmra.mxu3 %v6007_v19  ;;  %v710_v38 = vadd.f32 %v709_v56, %v652_v34  ;;  %v660_v34 = vadd.f32 %v6580_v20, %v571_v43 }
 0x110   :  { %v846_v62 = vpop.f32.mrf.mxu2 }
 0x111   :  { %1247 = vmatmul.f32.vlgmr.msra.gmra.mxu0 %v6007_v19  ;;  %v771_v46 = vpop.f32.mrf.mxu1  ;;  %v899_v35 = vpop.f32.mrf.mxu3 }
 0x112   :  { %v772_v5 = vadd.f32 %v771_v46, %v710_v38  ;;  %v6788_v45 = vpop.permute.xlu2 %2819 }
 0x113   :  { %11772 = vst [vmem:[#allocation48_spill] sm:$0xff] %v6788_v45 }
 0x114   :  { %v847_v39 = vadd.f32 %v846_v62, %v772_v5  ;;  %1300 = vmatmul.f32.vlgmr.msra.gmra.mxu1 %v6007_v19  ;;  %2631 = vrot.lane.b32.xlu0 %v6735_v63, %s5899_s30  ;;  %v6775_v62 = vpop.permute.xlu1 %2751 }
 0x115   :  { %1830 = vrot.lane.b32.xlu1 %v6659_v7, %s5901_s10  ;;  %11770 = vst [vmem:[#allocation46_spill] sm:$0xff] %v6775_v62 }
 0x116   :  { %v714_v44 = vpop.f32.mrf.mxu0  ;;  %v6766_v11 = vadd.f32 %v899_v35, %v847_v39  ;;  %1365 = vmatmul.f32.gmra.mxu2 %v6086_v54  ;;  %v6779_v54 = vpop.permute.xlu0 %2498 }
 0x117   :  { %1458 = vmatmul.f32.gmra.mxu3 %v6015_v24  ;;  %v715_v5 = vadd.f32 %v714_v44, %v656_v40  ;;  %11771 = vst [vmem:[#allocation47_spill] sm:$0xff] %v6779_v54 }
 0x118   :  { %11768 = vst [vmem:[#allocation31_spill] sm:$0xff] %v6766_v11  ;;  %1808 = vrot.lane.b32.xlu2 %v6766_v11, %s5901_s10  ;;  %v850_v0 = vpop.f32.mrf.mxu2 }
 0x119   :  { %1251 = vmatmul.f32.gmra.mxu0 %v6015_v24  ;;  %v777_v46 = vpop.f32.mrf.mxu1  ;;  %v903_v39 = vpop.f32.mrf.mxu3 }
 0x11a   :  { %v778_v35 = vadd.f32 %v777_v46, %v715_v5  ;;  %v579_v5 = vadd.f32 %v6622_v1, %v6404_v58 }
 0x11c   :  { %1304 = vmatmul.f32.gmra.mxu1 %v6015_v24  ;;  %2053 = vrot.lane.b32.xlu0 %v6766_v11, %s5900_s9  ;;  %v851_v38 = vadd.f32 %v850_v0, %v778_v35  ;;  %v664_v1 = vadd.f32 %v6632_v33, %v579_v5 }
 0x11d   :  { %2344 = vrot.lane.b32.xlu1 %v6659_v7, %s5903_s12 }
 0x11e   :  { %v719_v56 = vpop.f32.mrf.mxu0  ;;  %1373 = vmatmul.f32.gmra.mxu2 %v6131_v4  ;;  %v6796_v46 = vadd.f32 %v903_v39, %v851_v38  ;;  %v6798_v4 = vpop.permute.xlu1 %2763 }
 0x11f   :  { %1462 = vmatmul.f32.gmra.mxu3 %v6054_v41  ;;  %v720_v44 = vadd.f32 %v719_v56, %v660_v34  ;;  %11774 = vst [vmem:[#allocation50_spill] sm:$0xff] %v6798_v4  ;;  %v6803_v0 = vpop.permute.xlu0 %2739  ;;  %v11776_v34 = vld [vmem:[#allocation13_spill] sm:$0xff]  ;;  %v6809_v38 = vpop.permute.xlu2 %2831 }
 0x120   :  { %2322 = vrot.lane.b32.xlu2 %v6766_v11, %s5903_s12  ;;  %11773 = vst [vmem:[#allocation49_spill] sm:$0xff] %v6796_v46  ;;  %v854_v43 = vpop.f32.mrf.mxu2 }
 0x121   :  { %1255 = vmatmul.f32.gmra.mxu0 %v6054_v41  ;;  %v783_v40 = vpop.f32.mrf.mxu1  ;;  %v907_v35 = vpop.f32.mrf.mxu3  ;;  %11775 = vst [vmem:[#allocation51_spill] sm:$0xff] %v6803_v0 }
 0x122   :  { %v784_v20 = vadd.f32 %v783_v40, %v720_v44  ;;  %11777 = vst [vmem:[#allocation13_spill] sm:$0xff] %v6809_v38  ;;  %v11778_v44 = vld [vmem:[#allocation8_spill] sm:$0xff]  ;;  %v11813_v38 = vld [vmem:[#allocation10_spill] sm:$0xff] }
 0x124   :  { %1308 = vmatmul.f32.gmra.mxu1 %v6054_v41  ;;  %2059 = vrot.lane.b32.xlu0 %v6796_v46, %s5900_s9  ;;  %v855_v39 = vadd.f32 %v854_v43, %v784_v20 }
 0x125   :  { %1836 = vrot.lane.b32.xlu1 %v6684_v12, %s5901_s10 }
 0x126   :  { %v724_v56 = vpop.f32.mrf.mxu0  ;;  %1381 = vmatmul.f32.gmra.mxu2 %v11776_v34  ;;  %v6817_v45 = vadd.f32 %v907_v35, %v855_v39  ;;  %v6822_v43 = vpop.permute.xlu1 %2807 }
 0x127   :  { %1466 = vmatmul.f32.gmra.mxu3 %v11778_v44  ;;  %v725_v40 = vadd.f32 %v724_v56, %v664_v1  ;;  %11781 = vst [vmem:[#allocation20_spill] sm:$0xff] %v6822_v43  ;;  %v668_v1 = vadd.f32 %v6663_v55, %v587_v59  ;;  %v6828_v10 = vpop.permute.xlu0 %2759 }
 0x128   :  { %1814 = vrot.lane.b32.xlu2 %v6796_v46, %s5901_s10  ;;  %11780 = vst [vmem:[#allocation8_spill] sm:$0xff] %v6817_v45  ;;  %v858_v5 = vpop.f32.mrf.mxu2 }
 0x129   :  { %1259 = vmatmul.f32.gmra.mxu0 %v11778_v44  ;;  %v789_v62 = vpop.f32.mrf.mxu1  ;;  %v911_v20 = vpop.f32.mrf.mxu3  ;;  %11782 = vst [vmem:[#allocation52_spill] sm:$0xff] %v6828_v10 }
 0x12a   :  { %v790_v33 = vadd.f32 %v789_v62, %v725_v40  ;;  %v11784_v40 = vld [vmem:[#allocation21_spill] sm:$0xff] }
 0x12b   :  { %v595_v43 = vadd.f32 %v6686_v32, %v11784_v40 }
 0x12c   :  { %1312 = vmatmul.f32.gmra.mxu1 %v11778_v44  ;;  %2065 = vrot.lane.b32.xlu0 %v6817_v45, %s5900_s9  ;;  %v859_v34 = vadd.f32 %v858_v5, %v790_v33 }
 0x12d   :  { %2350 = vrot.lane.b32.xlu1 %v6684_v12, %s5903_s12 }
 0x12e   :  { %v729_v56 = vpop.f32.mrf.mxu0  ;;  %1389 = vmatmul.f32.gmra.mxu2 %v11747_v2  ;;  %v6838_v55 = vadd.f32 %v911_v20, %v859_v34  ;;  %v6847_v32 = vpop.permute.xlu1 %2815 }
 0x12f   :  { %v6830_v62 = vpop.permute.xlu2 %2051  ;;  %1470 = vmatmul.f32.gmra.mxu3 %v11750_v3  ;;  %v730_v35 = vadd.f32 %v729_v56, %v668_v1  ;;  %v672_v56 = vadd.f32 %v6688_v29, %v595_v43  ;;  %11786 = vst [vmem:[#allocation54_spill] sm:$0xff] %v6847_v32  ;;  %v603_v29 = vadd.f32 %v6712_v50, %v6650_v31 }
 0x130   :  { %11783 = vst [vmem:[#allocation53_spill] sm:$0xff] %v6830_v62  ;;  %2328 = vrot.lane.b32.xlu2 %v6796_v46, %s5903_s12  ;;  %v862_v2 = vpop.f32.mrf.mxu2 }
 0x131   :  { %1263 = vmatmul.f32.gmra.mxu0 %v11750_v3  ;;  %v795_v39 = vpop.f32.mrf.mxu1  ;;  %11785 = vst [vmem:[#allocation21_spill] sm:$0xff] %v6838_v55  ;;  %v915_v33 = vpop.f32.mrf.mxu3 }
 0x132   :  { %v796_v59 = vadd.f32 %v795_v39, %v730_v35  ;;  %v6855_v35 = vpop.permute.xlu0 %2803 }
 0x133   :  { %11788 = vst [vmem:[#allocation56_spill] sm:$0xff] %v6855_v35 }
 0x134   :  { %1316 = vmatmul.f32.gmra.mxu1 %v11750_v3  ;;  %2071 = vrot.lane.b32.xlu0 %v6838_v55, %s5900_s9  ;;  %v863_v1 = vadd.f32 %v862_v2, %v796_v59 }
 0x135   :  { %1842 = vrot.lane.b32.xlu1 %v6710_v57, %s5901_s10 }
 0x136   :  { %v734_v5 = vpop.f32.mrf.mxu0  ;;  %1397 = vmatmul.f32.gmra.mxu2 %v11751_v16  ;;  %v6859_v43 = vadd.f32 %v915_v33, %v863_v1  ;;  %v6868_v50 = vpop.permute.xlu1 %2827 }
 0x137   :  { %v6849_v20 = vpop.permute.xlu2 %2057  ;;  %1474 = vmatmul.f32.gmra.mxu3 %v6187_v21  ;;  %v735_v34 = vadd.f32 %v734_v5, %v672_v56  ;;  %v676_v56 = vadd.f32 %v6714_v49, %v603_v29  ;;  %11789 = vst [vmem:[#allocation57_spill] sm:$0xff] %v6868_v50  ;;  %v611_v49 = vadd.f32 %v6737_v25, %v11754_v28  ;;  %v11811_v50 = vld [vmem:[#allocation9_spill] sm:$0xff] }
 0x138   :  { %11787 = vst [vmem:[#allocation55_spill] sm:$0xff] %v6849_v20  ;;  %1820 = vrot.lane.b32.xlu2 %v6817_v45, %s5901_s10  ;;  %v866_v59 = vpop.f32.mrf.mxu2 }
 0x139   :  { %1267 = vmatmul.f32.gmra.mxu0 %v6187_v21  ;;  %v801_v39 = vpop.f32.mrf.mxu1  ;;  %v919_v2 = vpop.f32.mrf.mxu3 }
 0x13a   :  { %v802_v16 = vadd.f32 %v801_v39, %v735_v34  ;;  %v6876_v34 = vpop.permute.xlu0 %2823 }
 0x13b   :  { %11791 = vst [vmem:[#allocation59_spill] sm:$0xff] %v6876_v34 }
 0x13c   :  { %1320 = vmatmul.f32.gmra.mxu1 %v6187_v21  ;;  %2077 = vrot.lane.b32.xlu0 %v6859_v43, %s5900_s9  ;;  %v867_v10 = vadd.f32 %v866_v59, %v802_v16 }
 0x13d   :  { %2356 = vrot.lane.b32.xlu1 %v6710_v57, %s5903_s12 }
 0x13e   :  { %v739_v5 = vpop.f32.mrf.mxu0  ;;  %1405 = vmatmul.f32.gmra.mxu2 %v11756_v42  ;;  %v6880_v29 = vadd.f32 %v919_v2, %v867_v10 }
 0x13f   :  { %v6870_v33 = vpop.permute.xlu2 %2063  ;;  %1478 = vmatmul.f32.gmra.mxu3 %v6229_v48  ;;  %v740_v1 = vadd.f32 %v739_v5, %v676_v56  ;;  %v680_v56 = vadd.f32 %v6739_v61, %v611_v49 }
 0x140   :  { %11790 = vst [vmem:[#allocation58_spill] sm:$0xff] %v6870_v33  ;;  %2334 = vrot.lane.b32.xlu2 %v6817_v45, %s5903_s12  ;;  %v870_v16 = vpop.f32.mrf.mxu2 }
 0x141   :  { %1271 = vmatmul.f32.gmra.mxu0 %v6229_v48  ;;  %v807_v39 = vpop.f32.mrf.mxu1  ;;  %v923_v59 = vpop.f32.mrf.mxu3 }
 0x142   :  { %v808_v42 = vadd.f32 %v807_v39, %v740_v1 }
 0x144   :  { %1324 = vmatmul.f32.gmra.mxu1 %v6229_v48  ;;  %2083 = vrot.lane.b32.xlu0 %v6880_v29, %s5900_s9  ;;  %v871_v33 = vadd.f32 %v870_v16, %v808_v42 }
 0x145   :  { %1848 = vrot.lane.b32.xlu1 %v6735_v63, %s5901_s10 }
 0x146   :  { %v744_v5 = vpop.f32.mrf.mxu0  ;;  %1413 = vmatmul.f32.gmra.mxu2 %v11761_v13  ;;  %v6897_v1 = vpop.permute.xlu0 %2589  ;;  %v6899_v34 = vadd.f32 %v923_v59, %v871_v33  ;;  %v11797_v59 = vld [vmem:[#allocation2_spill] sm:$0xff] }
 0x147   :  { %v6889_v25 = vpop.permute.xlu2 %2069  ;;  %v6891_v10 = vpop.permute.xlu1 %1806  ;;  %1482 = vmatmul.f32.gmra.mxu3 %v11763_v52  ;;  %v745_v2 = vadd.f32 %v744_v5, %v680_v56  ;;  %11794 = vst [vmem:[#allocation62_spill] sm:$0xff] %v6897_v1 }
 0x148   :  { %11792 = vst [vmem:[#allocation60_spill] sm:$0xff] %v6889_v25  ;;  %1826 = vrot.lane.b32.xlu2 %v6838_v55, %s5901_s10  ;;  %v874_v49 = vpop.f32.mrf.mxu2 }
 0x149   :  { %11793 = vst [vmem:[#allocation61_spill] sm:$0xff] %v6891_v10  ;;  %1275 = vmatmul.f32.gmra.mxu0 %v11763_v52  ;;  %v813_v39 = vpop.f32.mrf.mxu1  ;;  %v927_v13 = vpop.f32.mrf.mxu3 }
 0x14a   :  { %v814_v61 = vadd.f32 %v813_v39, %v745_v2 }
 0x14c   :  { %1328 = vmatmul.f32.gmra.mxu1 %v11763_v52  ;;  %2089 = vrot.lane.b32.xlu0 %v6899_v34, %s5900_s9  ;;  %v875_v16 = vadd.f32 %v874_v49, %v814_v61  ;;  %v11799_v49 = vld [vmem:[#allocation4_spill] sm:$0xff] }
 0x14d   :  { %2362 = vrot.lane.b32.xlu1 %v6735_v63, %s5903_s12 }
 0x14e   :  { %v6904_v42 = vpop.f32.mrf.mxu0  ;;  %1649 = vmatmul.f32.vlgmr.msrb.gmra.mxu2 %v6007_v19  ;;  %v6919_v2 = vadd.f32 %v927_v13, %v875_v16  ;;  %v6921_v39 = vpop.permute.xlu0 %2898 }
 0x14f   :  { %v6909_v5 = vpop.permute.xlu2 %2075  ;;  %v6911_v33 = vpop.permute.xlu1 %2320  ;;  %1702 = vmatmul.f32.vlgmr.msrb.gmra.mxu3 %v6007_v19  ;;  %11798 = vst [vmem:[#allocation2_spill] sm:$0xff] %v6921_v39  ;;  %v11803_v39 = vld [vmem:[#allocation5_spill] sm:$0xff] }
 0x150   :  { %11795 = vst [vmem:[#allocation63_spill] sm:$0xff] %v6909_v5  ;;  %2340 = vrot.lane.b32.xlu2 %v6838_v55, %s5903_s12  ;;  %v6923_v61 = vpop.f32.mrf.mxu2 }
 0x151   :  { %11796 = vst [vmem:[#allocation64_spill] sm:$0xff] %v6911_v33  ;;  %1512 = vmatmul.f32.vlgmr.msrb.gmra.mxu0 %v11797_v59  ;;  %v6917_v56 = vpop.f32.mrf.mxu1  ;;  %v6932_v19 = vpop.f32.mrf.mxu3  ;;  %v11802_v59 = vld [vmem:[#allocation3_spill] sm:$0xff] }
 0x154   :  { %1574 = vmatmul.f32.vlgmr.msrb.gmra.mxu1 %v11799_v49  ;;  %2095 = vrot.lane.b32.xlu0 %v6919_v2, %s5900_s9 }
 0x155   :  { %2591 = vrot.lane.b32.xlu1 %v6766_v11, %s5899_s30 }
 0x156   :  { %v6928_v5 = vpop.f32.mrf.mxu0  ;;  %1653 = vmatmul.f32.gmra.mxu2 %v6015_v24  ;;  %v6948_v25 = vpop.permute.xlu0 %2595 }
 0x157   :  { %v6935_v13 = vpop.permute.xlu2 %2081  ;;  %v6937_v16 = vpop.permute.xlu1 %1812  ;;  %1706 = vmatmul.f32.gmra.mxu3 %v6015_v24  ;;  %11804 = vst [vmem:[#allocation3_spill] sm:$0xff] %v6948_v25 }
 0x158   :  { %11800 = vst [vmem:[#allocation4_spill] sm:$0xff] %v6935_v13  ;;  %1832 = vrot.lane.b32.xlu2 %v6859_v43, %s5901_s10  ;;  %v11806_v13 = vld [vmem:[#allocation6_spill] sm:$0xff] }
 0x159   :  { %11801 = vst [vmem:[#allocation65_spill] sm:$0xff] %v6937_v16  ;;  %1517 = vmatmul.f32.gmra.mxu0 %v11802_v59  ;;  %v6943_v49 = vpop.f32.mrf.mxu1  ;;  %v6954_v24 = vpop.f32.mrf.mxu2  ;;  %v11808_v16 = vld [vmem:[#allocation7_spill] sm:$0xff] }
 0x15a   :  { %v6965_v25 = vpop.f32.mrf.mxu3 }
 0x15c   :  { %1580 = vmatmul.f32.gmra.mxu1 %v11803_v39  ;;  %2916 = vrot.lane.b32.xlu0 %v6817_v45, %s5902_s11 }
 0x15d   :  { %2597 = vrot.lane.b32.xlu1 %v6796_v46, %s5899_s30 }
 0x15e   :  { %v6950_v32 = vpop.f32.mrf.mxu0  ;;  %1657 = vmatmul.f32.gmra.mxu2 %v6054_v41 }
 0x15f   :  { %v6957_v59 = vpop.permute.xlu1 %2326  ;;  %1710 = vmatmul.f32.gmra.mxu3 %v6054_v41  ;;  %v6961_v39 = vpop.permute.xlu2 %2087 }
 0x160   :  { %11805 = vst [vmem:[#allocation5_spill] sm:$0xff] %v6957_v59  ;;  %2346 = vrot.lane.b32.xlu2 %v6859_v43, %s5903_s12  ;;  %v6977_v41 = vpop.permute.xlu0 %2601 }
 0x161   :  { %1522 = vmatmul.f32.gmra.mxu0 %v11806_v13  ;;  %11807 = vst [vmem:[#allocation6_spill] sm:$0xff] %v6961_v39  ;;  %v6967_v22 = vpop.f32.mrf.mxu1  ;;  %v6982_v59 = vpop.f32.mrf.mxu2 }
 0x162   :  { %11809 = vst [vmem:[#allocation7_spill] sm:$0xff] %v6977_v41  ;;  %v6991_v39 = vpop.f32.mrf.mxu3 }
 0x164   :  { %1586 = vmatmul.f32.gmra.mxu1 %v11808_v16  ;;  %2922 = vrot.lane.b32.xlu0 %v6630_v15, %s5902_s11 }
 0x165   :  { %2603 = vrot.lane.b32.xlu1 %v6817_v45, %s5899_s30 }
 0x166   :  { %v6972_v20 = vpop.f32.mrf.mxu0  ;;  %1661 = vmatmul.f32.gmra.mxu2 %v11778_v44 }
 0x167   :  { %v6979_v13 = vpop.permute.xlu1 %1818  ;;  %1714 = vmatmul.f32.gmra.mxu3 %v11778_v44  ;;  %v6989_v4 = vpop.permute.xlu2 %2093 }
 0x168   :  { %11810 = vst [vmem:[#allocation66_spill] sm:$0xff] %v6979_v13  ;;  %1838 = vrot.lane.b32.xlu2 %v6880_v29, %s5901_s10 }
 0x169   :  { %1527 = vmatmul.f32.gmra.mxu0 %v11811_v50  ;;  %v6987_v16 = vpop.f32.mrf.mxu1  ;;  %11812 = vst [vmem:[#allocation9_spill] sm:$0xff] %v6989_v4  ;;  %v7005_v50 = vpop.permute.xlu0 %2607 }
 0x16a   :  { %11815 = vst [vmem:[#allocation67_spill] sm:$0xff] %v7005_v50  ;;  %v7014_v17 = vpop.f32.mrf.mxu3 }
 0x16c   :  { %1592 = vmatmul.f32.gmra.mxu1 %v11813_v38  ;;  %v7009_v38 = vpop.f32.mrf.mxu2 }
 0x16d   :  { %2609 = vrot.lane.b32.xlu1 %v6838_v55, %s5899_s30 }
 0x16e   :  { %v6994_v41 = vpop.f32.mrf.mxu0  ;;  %1665 = vmatmul.f32.gmra.mxu2 %v11750_v3 }
 0x16f   :  { %v6999_v44 = vpop.permute.xlu1 %2332  ;;  %1718 = vmatmul.f32.gmra.mxu3 %v11750_v3 }
 0x170   :  { %11814 = vst [vmem:[#allocation10_spill] sm:$0xff] %v6999_v44  ;;  %2352 = vrot.lane.b32.xlu2 %v6880_v29, %s5903_s12 }
 0x171   :  { %1532 = vmatmul.f32.gmra.mxu0 %v11745_v6  ;;  %v7007_v13 = vpop.f32.mrf.mxu1  ;;  %v7031_v50 = vpop.permute.xlu0 %2613 }
 0x172   :  { %v7011_v54 = vpop.permute.xlu2 %1808  ;;  %11819 = vst [vmem:[#allocation71_spill] sm:$0xff] %v7031_v50 }
 0x173   :  { %11816 = vst [vmem:[#allocation68_spill] sm:$0xff] %v7011_v54  ;;  %v989_v54 = vadd.f32 %v6994_v41, %v11779_v30 }
 0x174   :  { %1598 = vmatmul.f32.gmra.mxu1 %v6180_v18  ;;  %v7033_v4 = vpop.f32.mrf.mxu2 }
 0x175   :  { %2615 = vrot.lane.b32.xlu1 %v6859_v43, %s5899_s30 }
 0x176   :  { %v7016_v44 = vpop.f32.mrf.mxu0  ;;  %1669 = vmatmul.f32.gmra.mxu2 %v6187_v21 }
 0x177   :  { %v7021_v6 = vpop.permute.xlu1 %1824  ;;  %1722 = vmatmul.f32.gmra.mxu3 %v6187_v21  ;;  %v7041_v21 = vpop.f32.mrf.mxu3 }
 0x178   :  { %11817 = vst [vmem:[#allocation69_spill] sm:$0xff] %v7021_v6  ;;  %1844 = vrot.lane.b32.xlu2 %v6899_v34, %s5901_s10  ;;  %v957_v6 = vadd.f32 %v6904_v42, %v11762_v53 }
 0x179   :  { %1537 = vmatmul.f32.gmra.mxu0 %v6215_v36  ;;  %v7027_v3 = vpop.f32.mrf.mxu1  ;;  %v7056_v35 = vpop.permute.xlu0 %2619 }
 0x17a   :  { %v7029_v18 = vpop.permute.xlu2 %2322  ;;  %11822 = vst [vmem:[#allocation74_spill] sm:$0xff] %v7056_v35 }
 0x17b   :  { %11818 = vst [vmem:[#allocation70_spill] sm:$0xff] %v7029_v18 }
 0x17c   :  { %1604 = vmatmul.f32.gmra.mxu1 %v6227_v47 }
 0x17d   :  { %2621 = vrot.lane.b32.xlu1 %v6880_v29, %s5899_s30 }
 0x17e   :  { %v7036_v26 = vpop.f32.mrf.mxu0  ;;  %1673 = vmatmul.f32.gmra.mxu2 %v6229_v48 }
 0x17f   :  { %v7043_v36 = vpop.permute.xlu1 %2338  ;;  %1726 = vmatmul.f32.gmra.mxu3 %v6229_v48  ;;  %v1054_v48 = vadd.f32 %v6917_v56, %v957_v6 }
 0x180   :  { %11820 = vst [vmem:[#allocation72_spill] sm:$0xff] %v7043_v36  ;;  %2358 = vrot.lane.b32.xlu2 %v6899_v34, %s5903_s12 }
 0x181   :  { %1542 = vmatmul.f32.gmra.mxu0 %v6242_v60  ;;  %v7049_v50 = vpop.f32.mrf.mxu1  ;;  %v7063_v60 = vpop.f32.mrf.mxu2  ;;  %v1112_v35 = vadd.f32 %v6923_v61, %v1054_v48 }
 0x182   :  { %v7051_v47 = vpop.permute.xlu2 %1814 }
 0x183   :  { %11821 = vst [vmem:[#allocation73_spill] sm:$0xff] %v7051_v47 }
 0x184   :  { %1610 = vmatmul.f32.gmra.mxu1 %v6258_v8  ;;  %v7072_v8 = vpop.f32.mrf.mxu3 }
 0x185   :  { %2627 = vrot.lane.b32.xlu1 %v6899_v34, %s5899_s30 }
 0x186   :  { %v7058_v0 = vpop.f32.mrf.mxu0  ;;  %1677 = vmatmul.f32.gmra.mxu2 %v11763_v52 }
 0x187   :  { %v7066_v36 = vpop.permute.xlu1 %1830  ;;  %1730 = vmatmul.f32.gmra.mxu3 %v11763_v52  ;;  %v1174_v52 = vadd.f32 %v6932_v19, %v1112_v35  ;;  %v965_v35 = vadd.f32 %v6928_v5, %v11767_v51 }
 0x188   :  { %11823 = vst [vmem:[#allocation75_spill] sm:$0xff] %v7066_v36  ;;  %1850 = vrot.lane.b32.xlu2 %v6919_v2, %s5901_s10 }
 0x189   :  { %1547 = vmatmul.f32.gmra.mxu0 %v11759_v23  ;;  %v7074_v42 = vpop.f32.mrf.mxu1  ;;  %v7083_v23 = vpop.permute.xlu0 %2625  ;;  %v1058_v19 = vadd.f32 %v6943_v49, %v965_v35 }
 0x18a   :  { %v7077_v56 = vpop.permute.xlu2 %2328  ;;  %11825 = vst [vmem:[#allocation77_spill] sm:$0xff] %v7083_v23  ;;  %v7087_v47 = vpop.f32.mrf.mxu2 }
 0x18b   :  { %11824 = vst [vmem:[#allocation76_spill] sm:$0xff] %v7077_v56 }
 0x18c   :  { %1616 = vmatmul.f32.gmra.mxu1 %v6279_v14  ;;  %v7095_v56 = vpop.f32.mrf.mxu3 }
 0x18d   :  { %2633 = vrot.lane.b32.xlu1 %v6919_v2, %s5899_s30 }
 0x18e   :  { %v1248_v6 = vpop.f32.mrf.mxu0 }
 0x18f   :  { %v7085_v36 = vpop.permute.xlu1 %2344  ;;  %v1249_v33 = vadd.f32 %v1248_v6, %v1174_v52  ;;  %v1117_v52 = vadd.f32 %v6954_v24, %v1058_v19 }
 0x190   :  { %11826 = vst [vmem:[#allocation78_spill] sm:$0xff] %v7085_v36  ;;  %2364 = vrot.lane.b32.xlu2 %v6919_v2, %s5903_s12 }
 0x191   :  { %v1301_v61 = vpop.f32.mrf.mxu1  ;;  %v1180_v49 = vadd.f32 %v6965_v25, %v1117_v52  ;;  %v973_v52 = vadd.f32 %v6950_v32, %v6381_v37 }
 0x192   :  { %v7091_v48 = vadd.f32 %v1301_v61, %v1249_v33  ;;  %v7093_v14 = vpop.permute.xlu2 %1820  ;;  %v7108_v33 = vpop.permute.xlu0 %2631 }
 0x193   :  { %11828 = vst [vmem:[#allocation80_spill] sm:$0xff] %v7093_v14  ;;  %v7111_v61 = vpop.f32.mrf.mxu2 }
 0x194   :  { %11827 = vst [vmem:[#allocation79_spill] sm:$0xff] %v7091_v48  ;;  %1810 = vrot.lane.b32.xlu0 %v7091_v48, %s5901_s10  ;;  %v7117_v36 = vpop.f32.mrf.mxu3 }
 0x195   :  { %2900 = vrot.lane.b32.xlu1 %v6766_v11, %s5902_s11  ;;  %11830 = vst [vmem:[#allocation82_spill] sm:$0xff] %v7108_v33 }
 0x196   :  { %v1252_v14 = vpop.f32.mrf.mxu0 }
 0x197   :  { %v7104_v6 = vpop.permute.xlu1 %1836  ;;  %v1253_v23 = vadd.f32 %v1252_v14, %v1180_v49 }
 0x198   :  { %11829 = vst [vmem:[#allocation81_spill] sm:$0xff] %v7104_v6  ;;  %2908 = vrot.lane.b32.xlu2 %v6796_v46, %s5902_s11 }
 0x199   :  { %v1305_v35 = vpop.f32.mrf.mxu1 }
 0x19a   :  { %v7113_v5 = vpop.permute.xlu2 %2334  ;;  %v7126_v24 = vadd.f32 %v1305_v35, %v1253_v23  ;;  %v1062_v35 = vadd.f32 %v6967_v22, %v973_v52 }
 0x19b   :  { %11831 = vst [vmem:[#allocation83_spill] sm:$0xff] %v7113_v5  ;;  %v7130_v5 = vpop.permute.xlu0 %2053  ;;  %v7132_v33 = vpop.f32.mrf.mxu2 }
 0x19c   :  { %2324 = vrot.lane.b32.xlu0 %v7091_v48, %s5903_s12  ;;  %11833 = vst [vmem:[#allocation85_spill] sm:$0xff] %v7126_v24  ;;  %v7138_v25 = vpop.f32.mrf.mxu3  ;;  %v1122_v32 = vadd.f32 %v6982_v59, %v1062_v35 }
 0x19d   :  { %2906 = vrot.lane.b32.xlu1 %v6548_v9, %s5902_s11  ;;  %11835 = vst [vmem:[#allocation87_spill] sm:$0xff] %v7130_v5 }
 0x19e   :  { %v1186_v22 = vadd.f32 %v6991_v39, %v1122_v32  ;;  %v981_v39 = vadd.f32 %v6972_v20, %v6404_v58 }
 0x19f   :  { %v7122_v6 = vpop.permute.xlu1 %2350 }
 0x1a0   :  { %11832 = vst [vmem:[#allocation84_spill] sm:$0xff] %v7122_v6  ;;  %2914 = vrot.lane.b32.xlu2 %v6578_v27, %s5902_s11 }
 0x1a2   :  { %v7128_v19 = vpop.permute.xlu2 %1826 }
 0x1a3   :  { %11834 = vst [vmem:[#allocation86_spill] sm:$0xff] %v7128_v19  ;;  %v7150_v49 = vpop.permute.xlu0 %2059  ;;  %v7155_v6 = vpop.f32.mrf.mxu2 }
 0x1a4   :  { %1816 = vrot.lane.b32.xlu0 %v7126_v24, %s5901_s10  ;;  %11838 = vst [vmem:[#allocation90_spill] sm:$0xff] %v7150_v49 }
 0x1a5   :  { %2924 = vrot.lane.b32.xlu1 %v6838_v55, %s5902_s11  ;;  %v1309_v55 = vpop.f32.mrf.mxu1 }
 0x1a7   :  { %v7140_v14 = vpop.permute.xlu1 %1842 }
 0x1a8   :  { %11836 = vst [vmem:[#allocation88_spill] sm:$0xff] %v7140_v14  ;;  %2932 = vrot.lane.b32.xlu2 %v6859_v43, %s5902_s11  ;;  %v1256_v14 = vpop.f32.mrf.mxu0 }
 0x1aa   :  { %v7144_v23 = vpop.permute.xlu2 %2340 }
 0x1ab   :  { %11837 = vst [vmem:[#allocation89_spill] sm:$0xff] %v7144_v23  ;;  %v7161_v23 = vpop.f32.mrf.mxu3  ;;  %v7171_v52 = vpop.permute.xlu0 %2065 }
 0x1ac   :  { %2330 = vrot.lane.b32.xlu0 %v7126_v24, %s5903_s12  ;;  %11841 = vst [vmem:[#allocation93_spill] sm:$0xff] %v7171_v52 }
 0x1ad   :  { %2930 = vrot.lane.b32.xlu1 %v6659_v7, %s5902_s11  ;;  %v7175_v7 = vpop.f32.mrf.mxu2  ;;  %v1313_v32 = vpop.f32.mrf.mxu1 }
 0x1af   :  { %v7157_v19 = vpop.permute.xlu1 %2356 }
 0x1b0   :  { %11839 = vst [vmem:[#allocation91_spill] sm:$0xff] %v7157_v19  ;;  %2593 = vrot.lane.b32.xlu2 %v7091_v48, %s5899_s30  ;;  %v1257_v19 = vadd.f32 %v1256_v14, %v1186_v22  ;;  %v1260_v35 = vpop.f32.mrf.mxu0  ;;  %v1066_v14 = vadd.f32 %v6987_v16, %v981_v39 }
 0x1b2   :  { %v7164_v18 = vpop.permute.xlu2 %1832  ;;  %v7179_v59 = vadd.f32 %v1309_v55, %v1257_v19  ;;  %v1127_v19 = vadd.f32 %v7009_v38, %v1066_v14 }
 0x1b3   :  { %11840 = vst [vmem:[#allocation92_spill] sm:$0xff] %v7164_v18  ;;  %v7183_v10 = vpop.f32.mrf.mxu3  ;;  %v7196_v55 = vpop.permute.xlu0 %2071 }
 0x1b4   :  { %2910 = vrot.lane.b32.xlu0 %v7126_v24, %s5902_s11  ;;  %11843 = vst [vmem:[#allocation95_spill] sm:$0xff] %v7179_v59  ;;  %v1192_v16 = vadd.f32 %v7014_v17, %v1127_v19  ;;  %v1070_v17 = vadd.f32 %v7007_v13, %v989_v54 }
 0x1b5   :  { %2055 = vrot.lane.b32.xlu1 %v7091_v48, %s5900_s9  ;;  %11846 = vst [vmem:[#allocation98_spill] sm:$0xff] %v7196_v55  ;;  %v1317_v39 = vpop.f32.mrf.mxu1 }
 0x1b6   :  { %v1261_v55 = vadd.f32 %v1260_v35, %v1192_v16  ;;  %v1132_v41 = vadd.f32 %v7033_v4, %v1070_v17 }
 0x1b7   :  { %v7173_v49 = vpop.permute.xlu1 %1848 }
 0x1b8   :  { %11842 = vst [vmem:[#allocation94_spill] sm:$0xff] %v7173_v49  ;;  %2902 = vrot.lane.b32.xlu2 %v7091_v48, %s5902_s11  ;;  %v1264_v52 = vpop.f32.mrf.mxu0  ;;  %v7214_v38 = vadd.f32 %v1313_v32, %v1261_v55  ;;  %v1198_v13 = vadd.f32 %v7041_v21, %v1132_v41 }
 0x1ba   :  { %v7181_v18 = vpop.permute.xlu2 %2346  ;;  %11849 = vst [vmem:[#allocation101_spill] sm:$0xff] %v7214_v38  ;;  %v1265_v17 = vadd.f32 %v1264_v52, %v1198_v13 }
 0x1bb   :  { %11844 = vst [vmem:[#allocation96_spill] sm:$0xff] %v7181_v18  ;;  %v7199_v18 = vpop.f32.mrf.mxu2  ;;  %v7205_v49 = vpop.f32.mrf.mxu3 }
 0x1bc   :  { %1822 = vrot.lane.b32.xlu0 %v7179_v59, %s5901_s10 }
 0x1bd   :  { %2061 = vrot.lane.b32.xlu1 %v7126_v24, %s5900_s9  ;;  %v1321_v19 = vpop.f32.mrf.mxu1 }
 0x1bf   :  { %v7192_v22 = vpop.permute.xlu1 %2362 }
 0x1c0   :  { %11845 = vst [vmem:[#allocation97_spill] sm:$0xff] %v7192_v22  ;;  %2599 = vrot.lane.b32.xlu2 %v7126_v24, %s5899_s30  ;;  %v1268_v35 = vpop.f32.mrf.mxu0 }
 0x1c2   :  { %v7201_v20 = vpop.permute.xlu2 %1838 }
 0x1c3   :  { %11847 = vst [vmem:[#allocation99_spill] sm:$0xff] %v7201_v20  ;;  %v7218_v20 = vpop.permute.xlu0 %2077  ;;  %v7222_v1 = vpop.f32.mrf.mxu2 }
 0x1c4   :  { %2336 = vrot.lane.b32.xlu0 %v7179_v59, %s5903_s12  ;;  %11851 = vst [vmem:[#allocation103_spill] sm:$0xff] %v7218_v20  ;;  %v7229_v32 = vpop.f32.mrf.mxu3 }
 0x1c5   :  { %2067 = vrot.lane.b32.xlu1 %v7179_v59, %s5900_s9 }
 0x1c7   :  { %v7210_v22 = vpop.permute.xlu1 %2591 }
 0x1c8   :  { %11848 = vst [vmem:[#allocation100_spill] sm:$0xff] %v7210_v22  ;;  %2605 = vrot.lane.b32.xlu2 %v7179_v59, %s5899_s30 }
 0x1ca   :  { %v7216_v14 = vpop.permute.xlu2 %2352 }
 0x1cb   :  { %11850 = vst [vmem:[#allocation102_spill] sm:$0xff] %v7216_v14  ;;  %v997_v14 = vadd.f32 %v7016_v44, %v11784_v40  ;;  %v7242_v54 = vpop.permute.xlu0 %2083  ;;  %v7256_v44 = vadd.f32 %v1317_v39, %v1265_v17 }
 0x1cc   :  { %1828 = vrot.lane.b32.xlu0 %v7214_v38, %s5901_s10  ;;  %11854 = vst [vmem:[#allocation106_spill] sm:$0xff] %v7242_v54  ;;  %v1325_v54 = vpop.f32.mrf.mxu1 }
 0x1cd   :  { %2918 = vrot.lane.b32.xlu1 %v7179_v59, %s5902_s11  ;;  %v1074_v20 = vadd.f32 %v7027_v3, %v997_v14  ;;  %v7254_v59 = vpop.f32.mrf.mxu3  ;;  %11856 = vst [vmem:[#allocation108_spill] sm:$0xff] %v7256_v44  ;;  %v1005_v3 = vadd.f32 %v7036_v26, %v6650_v31 }
 0x1cf   :  { %v7231_v55 = vpop.permute.xlu1 %2597  ;;  %v1137_v21 = vadd.f32 %v7063_v60, %v1074_v20  ;;  %v1078_v14 = vadd.f32 %v7049_v50, %v1005_v3 }
 0x1d0   :  { %11852 = vst [vmem:[#allocation104_spill] sm:$0xff] %v7231_v55  ;;  %2611 = vrot.lane.b32.xlu2 %v7214_v38, %s5899_s30  ;;  %v7247_v55 = vpop.f32.mrf.mxu2 }
 0x1d1   :  { %v1204_v52 = vadd.f32 %v7072_v8, %v1137_v21  ;;  %v1142_v26 = vadd.f32 %v7087_v47, %v1078_v14  ;;  %v1013_v21 = vadd.f32 %v7058_v0, %v11754_v28 }
 0x1d2   :  { %v7236_v16 = vpop.permute.xlu2 %1844 }
 0x1d3   :  { %11853 = vst [vmem:[#allocation105_spill] sm:$0xff] %v7236_v16  ;;  %v1272_v16 = vpop.f32.mrf.mxu0  ;;  %v7269_v39 = vpop.permute.xlu0 %2089  ;;  %v1269_v60 = vadd.f32 %v1268_v35, %v1204_v52  ;;  %v1210_v35 = vadd.f32 %v7095_v56, %v1142_v26  ;;  %v1082_v3 = vadd.f32 %v7074_v42, %v1013_v21 }
 0x1d4   :  { %2342 = vrot.lane.b32.xlu0 %v7214_v38, %s5903_s12  ;;  %11858 = vst [vmem:[#allocation110_spill] sm:$0xff] %v7269_v39  ;;  %v1329_v50 = vpop.f32.mrf.mxu1 }
 0x1d5   :  { %2073 = vrot.lane.b32.xlu1 %v7214_v38, %s5900_s9  ;;  %v7282_v8 = vpop.f32.mrf.mxu3  ;;  %v1273_v47 = vadd.f32 %v1272_v16, %v1210_v35  ;;  %v1147_v0 = vadd.f32 %v7111_v61, %v1082_v3 }
 0x1d7   :  { %v7250_v4 = vpop.permute.xlu1 %2603  ;;  %v7305_v56 = vadd.f32 %v1325_v54, %v1273_v47  ;;  %v1216_v21 = vadd.f32 %v7117_v36, %v1147_v0  ;;  %v1367_v47 = vadd.f32 %v7155_v6, %v11767_v51 }
 0x1d8   :  { %11855 = vst [vmem:[#allocation107_spill] sm:$0xff] %v7250_v4  ;;  %2926 = vrot.lane.b32.xlu2 %v7214_v38, %s5902_s11  ;;  %v7273_v13 = vpop.f32.mrf.mxu2 }
 0x1d9   :  { %11865 = vst [vmem:[#allocation117_spill] sm:$0xff] %v7305_v56 }
 0x1da   :  { %v7258_v22 = vpop.permute.xlu2 %2358 }
 0x1db   :  { %11857 = vst [vmem:[#allocation109_spill] sm:$0xff] %v7258_v22  ;;  %v1276_v20 = vpop.f32.mrf.mxu0  ;;  %v7280_v22 = vadd.f32 %v1321_v19, %v1269_v60  ;;  %v7296_v19 = vpop.permute.xlu0 %2095 }
 0x1dc   :  { %1834 = vrot.lane.b32.xlu0 %v7256_v44, %s5901_s10  ;;  %11863 = vst [vmem:[#allocation115_spill] sm:$0xff] %v7296_v19  ;;  %v1575_v26 = vpop.f32.mrf.mxu1 }
 0x1dd   :  { %2079 = vrot.lane.b32.xlu1 %v7256_v44, %s5900_s9  ;;  %11861 = vst [vmem:[#allocation113_spill] sm:$0xff] %v7280_v22  ;;  %v7311_v16 = vpop.f32.mrf.mxu3 }
 0x1df   :  { %v7271_v41 = vpop.permute.xlu1 %2609 }
 0x1e0   :  { %11859 = vst [vmem:[#allocation111_spill] sm:$0xff] %v7271_v41  ;;  %2617 = vrot.lane.b32.xlu2 %v7256_v44, %s5899_s30  ;;  %v7298_v14 = vpop.f32.mrf.mxu2 }
 0x1e2   :  { %v7277_v17 = vpop.permute.xlu2 %1850 }
 0x1e3   :  { %11860 = vst [vmem:[#allocation112_spill] sm:$0xff] %v7277_v17  ;;  %v1359_v17 = vadd.f32 %v7132_v33, %v11762_v53  ;;  %v1513_v42 = vpop.f32.mrf.mxu0  ;;  %v1277_v53 = vadd.f32 %v1276_v20, %v1216_v21  ;;  %v7325_v41 = vpop.permute.xlu0 %2916  ;;  %v1460_v20 = vadd.f32 %v7161_v23, %v1367_v47 }
 0x1e4   :  { %2348 = vrot.lane.b32.xlu0 %v7256_v44, %s5903_s12  ;;  %11869 = vst [vmem:[#allocation121_spill] sm:$0xff] %v7325_v41 }
 0x1e5   :  { %2085 = vrot.lane.b32.xlu1 %v7280_v22, %s5900_s9  ;;  %v1456_v35 = vadd.f32 %v7138_v25, %v1359_v17  ;;  %v1703_v25 = vpop.f32.mrf.mxu3 }
 0x1e7   :  { %v7292_v52 = vpop.permute.xlu1 %2615  ;;  %v1514_v33 = vadd.f32 %v1513_v42, %v1456_v35  ;;  %v1581_v42 = vpop.f32.mrf.mxu1 }
 0x1e8   :  { %11862 = vst [vmem:[#allocation114_spill] sm:$0xff] %v7292_v52  ;;  %2623 = vrot.lane.b32.xlu2 %v7280_v22, %s5899_s30  ;;  %v1650_v54 = vpop.f32.mrf.mxu2 }
 0x1e9   :  { %v1576_v52 = vadd.f32 %v1575_v26, %v1514_v33 }
 0x1ea   :  { %v7300_v60 = vpop.permute.xlu2 %2364 }
 0x1eb   :  { %11864 = vst [vmem:[#allocation116_spill] sm:$0xff] %v7300_v60  ;;  %v7323_v60 = vadd.f32 %v1329_v50, %v1277_v53  ;;  %v1518_v36 = vpop.f32.mrf.mxu0  ;;  %v1651_v17 = vadd.f32 %v1650_v54, %v1576_v52  ;;  %v7344_v23 = vpop.permute.xlu0 %2922  ;;  %v1375_v54 = vadd.f32 %v7175_v7, %v6381_v37 }
 0x1ec   :  { %2934 = vrot.lane.b32.xlu0 %v7256_v44, %s5902_s11  ;;  %v1519_v51 = vadd.f32 %v1518_v36, %v1460_v20  ;;  %11873 = vst [vmem:[#allocation125_spill] sm:$0xff] %v7344_v23 }
 0x1ed   :  { %2091 = vrot.lane.b32.xlu1 %v7305_v56, %s5900_s9  ;;  %11868 = vst [vmem:[#allocation120_spill] sm:$0xff] %v7323_v60  ;;  %v7338_v50 = vadd.f32 %v1703_v25, %v1651_v17  ;;  %v1707_v53 = vpop.f32.mrf.mxu3  ;;  %v1464_v20 = vadd.f32 %v7183_v10, %v1375_v54 }
 0x1ee   :  { %v1582_v26 = vadd.f32 %v1581_v42, %v1519_v51 }
 0x1ef   :  { %v7315_v61 = vpop.permute.xlu1 %2621  ;;  %11872 = vst [vmem:[#allocation124_spill] sm:$0xff] %v7338_v50  ;;  %v1587_v42 = vpop.f32.mrf.mxu1 }
 0x1f0   :  { %11866 = vst [vmem:[#allocation118_spill] sm:$0xff] %v7315_v61  ;;  %2629 = vrot.lane.b32.xlu2 %v7305_v56, %s5899_s30  ;;  %v1654_v21 = vpop.f32.mrf.mxu2 }
 0x1f1   :  { %v1655_v52 = vadd.f32 %v1654_v21, %v1582_v26 }
 0x1f2   :  { %v7319_v3 = vpop.permute.xlu2 %2908 }
 0x1f3   :  { %11867 = vst [vmem:[#allocation119_spill] sm:$0xff] %v7319_v3  ;;  %v7354_v47 = vadd.f32 %v1707_v53, %v1655_v52  ;;  %v1523_v36 = vpop.f32.mrf.mxu0 }
 0x1f4   :  { %1840 = vrot.lane.b32.xlu0 %v7280_v22, %s5901_s10  ;;  %v1524_v37 = vadd.f32 %v1523_v36, %v1464_v20  ;;  %v1383_v20 = vadd.f32 %v7199_v18, %v6404_v58 }
 0x1f5   :  { %2097 = vrot.lane.b32.xlu1 %v7323_v60, %s5900_s9  ;;  %11876 = vst [vmem:[#allocation128_spill] sm:$0xff] %v7354_v47  ;;  %v1711_v53 = vpop.f32.mrf.mxu3 }
 0x1f6   :  { %v1588_v51 = vadd.f32 %v1587_v42, %v1524_v37 }
 0x1f7   :  { %v7332_v0 = vpop.permute.xlu1 %2627  ;;  %v1593_v37 = vpop.f32.mrf.mxu1 }
 0x1f8   :  { %11870 = vst [vmem:[#allocation122_spill] sm:$0xff] %v7332_v0  ;;  %2635 = vrot.lane.b32.xlu2 %v7323_v60, %s5899_s30  ;;  %v1658_v26 = vpop.f32.mrf.mxu2  ;;  %v11967_v0 = vld [vmem:[#allocation61_spill] sm:$0xff] }
 0x1f9   :  { %v1659_v10 = vadd.f32 %v1658_v26, %v1588_v51  ;;  %v1468_v26 = vadd.f32 %v7205_v49, %v1383_v20 }
 0x1fa   :  { %v7336_v6 = vpop.permute.xlu2 %2914 }
 0x1fb   :  { %11871 = vst [vmem:[#allocation123_spill] sm:$0xff] %v7336_v6  ;;  %v1528_v54 = vpop.f32.mrf.mxu0  ;;  %v7383_v42 = vadd.f32 %v1711_v53, %v1659_v10  ;;  %v1391_v10 = vadd.f32 %v7222_v1, %v11779_v30 }
 0x1fc   :  { %2354 = vrot.lane.b32.xlu0 %v7280_v22, %s5903_s12  ;;  %v1529_v58 = vadd.f32 %v1528_v54, %v1468_v26 }
 0x1fd   :  { %2565 = vrot.lane.b32.xlu1 %v7338_v50, %s5899_s30  ;;  %11883 = vst [vmem:[#allocation135_spill] sm:$0xff] %v7383_v42 }
 0x1fe   :  { %v1594_v53 = vadd.f32 %v1593_v37, %v1529_v58  ;;  %v1399_v58 = vadd.f32 %v7247_v55, %v11784_v40 }
 0x1ff   :  { %v7346_v35 = vpop.permute.xlu1 %2633  ;;  %v1599_v49 = vpop.f32.mrf.mxu1 }
 0x200   :  { %11874 = vst [vmem:[#allocation126_spill] sm:$0xff] %v7346_v35  ;;  %1758 = vrot.lane.b32.xlu2 %v7338_v50, %s5901_s10  ;;  %v1662_v23 = vpop.f32.mrf.mxu2  ;;  %v11966_v35 = vld [vmem:[#allocation68_spill] sm:$0xff] }
 0x201   :  { %v1663_v54 = vadd.f32 %v1662_v23, %v1594_v53  ;;  %v1855_v61 = vsel %vm1854_vm3, %v11967_v0, %v11966_v35  ;;  %v11971_v0 = vld [vmem:[#allocation70_spill] sm:$0xff]  ;;  %v11972_v35 = vld [vmem:[#allocation64_spill] sm:$0xff] }
 0x202   :  { %v7350_v33 = vpop.permute.xlu2 %2932 }
 0x203   :  { %11875 = vst [vmem:[#allocation127_spill] sm:$0xff] %v7350_v33  ;;  %v1533_v3 = vpop.f32.mrf.mxu0 }
 0x204   :  { %1846 = vrot.lane.b32.xlu0 %v7305_v56, %s5901_s10 }
 0x205   :  { %2029 = vrot.lane.b32.xlu1 %v7354_v47, %s5900_s9 }
 0x206   :  { %v7360_v25 = vpop.permute.xlu0 %1810 }
 0x207   :  { %11877 = vst [vmem:[#allocation129_spill] sm:$0xff] %v7360_v25  ;;  %v7363_v17 = vpop.permute.xlu1 %2900 }
 0x208   :  { %11878 = vst [vmem:[#allocation130_spill] sm:$0xff] %v7363_v17  ;;  %2296 = vrot.lane.b32.xlu2 %v7338_v50, %s5903_s12  ;;  %v1666_v1 = vpop.f32.mrf.mxu2 }
 0x20a   :  { %v7367_v7 = vpop.permute.xlu2 %2593 }
 0x20b   :  { %11879 = vst [vmem:[#allocation131_spill] sm:$0xff] %v7367_v7  ;;  %v1538_v23 = vpop.f32.mrf.mxu0  ;;  %v11963_v7 = vld [vmem:[#allocation100_spill] sm:$0xff] }
 0x20c   :  { %2360 = vrot.lane.b32.xlu0 %v7305_v56, %s5903_s12 }
 0x20d   :  { %2912 = vrot.lane.b32.xlu1 %v7354_v47, %s5902_s11 }
 0x20e   :  { %v7373_v21 = vpop.permute.xlu0 %2324 }
 0x20f   :  { %11880 = vst [vmem:[#allocation132_spill] sm:$0xff] %v7373_v21  ;;  %v7375_v52 = vpop.permute.xlu1 %2906 }
 0x210   :  { %11881 = vst [vmem:[#allocation133_spill] sm:$0xff] %v7375_v52  ;;  %2567 = vrot.lane.b32.xlu2 %v7354_v47, %s5899_s30  ;;  %v1715_v52 = vpop.f32.mrf.mxu3 }
 0x212   :  { %v7379_v36 = vpop.permute.xlu2 %2902 }
 0x213   :  { %11882 = vst [vmem:[#allocation134_spill] sm:$0xff] %v7379_v36 }
 0x214   :  { %1852 = vrot.lane.b32.xlu0 %v7323_v60, %s5901_s10 }
 0x215   :  { %1762 = vrot.lane.b32.xlu1 %v7383_v42, %s5901_s10 }
 0x216   :  { %v7389_v51 = vpop.permute.xlu0 %1816 }
 0x217   :  { %11884 = vst [vmem:[#allocation136_spill] sm:$0xff] %v7389_v51  ;;  %v7392_v33 = vpop.permute.xlu1 %2924  ;;  %v7415_v51 = vadd.f32 %v1715_v52, %v1663_v54  ;;  %v1670_v54 = vpop.f32.mrf.mxu2 }
 0x218   :  { %11885 = vst [vmem:[#allocation137_spill] sm:$0xff] %v7392_v33  ;;  %2031 = vrot.lane.b32.xlu2 %v7383_v42, %s5900_s9  ;;  %v1472_v33 = vadd.f32 %v7229_v32, %v1391_v10  ;;  %v1719_v32 = vpop.f32.mrf.mxu3 }
 0x219   :  { %11890 = vst [vmem:[#allocation142_spill] sm:$0xff] %v7415_v51 }
 0x21a   :  { %v7396_v18 = vpop.permute.xlu2 %2599  ;;  %v1534_v30 = vadd.f32 %v1533_v3, %v1472_v33  ;;  %v1476_v3 = vadd.f32 %v7254_v59, %v1399_v58 }
 0x21b   :  { %11886 = vst [vmem:[#allocation138_spill] sm:$0xff] %v7396_v18  ;;  %v7676_v18 = vld [vmem:[%s11234_s3 + $0x30] sm:$0xff] }
 0x21c   :  { %2366 = vrot.lane.b32.xlu0 %v7323_v60, %s5903_s12  ;;  %v1600_v21 = vadd.f32 %v1599_v49, %v1534_v30  ;;  %v1539_v40 = vadd.f32 %v1538_v23, %v1476_v3  ;;  %v1543_v23 = vpop.f32.mrf.mxu0 }
 0x21d   :  { %2300 = vrot.lane.b32.xlu1 %v7383_v42, %s5903_s12 }
 0x21e   :  { %v7404_v20 = vpop.permute.xlu0 %2330  ;;  %v1667_v33 = vadd.f32 %v1666_v1, %v1600_v21 }
 0x21f   :  { %11887 = vst [vmem:[#allocation139_spill] sm:$0xff] %v7404_v20  ;;  %v7407_v26 = vpop.permute.xlu1 %2930 }
 0x220   :  { %11888 = vst [vmem:[#allocation140_spill] sm:$0xff] %v7407_v26  ;;  %2920 = vrot.lane.b32.xlu2 %v7383_v42, %s5902_s11  ;;  %v1605_v26 = vpop.f32.mrf.mxu1  ;;  %v7430_v52 = vadd.f32 %v1719_v32, %v1667_v33  ;;  %v1723_v1 = vpop.f32.mrf.mxu3 }
 0x221   :  { %v1606_v49 = vadd.f32 %v1605_v26, %v1539_v40  ;;  %v1407_v26 = vadd.f32 %v7273_v13, %v6650_v31  ;;  %v1674_v13 = vpop.f32.mrf.mxu2 }
 0x222   :  { %v7411_v37 = vpop.permute.xlu2 %2605  ;;  %11894 = vst [vmem:[#allocation146_spill] sm:$0xff] %v7430_v52 }
 0x223   :  { %11889 = vst [vmem:[#allocation141_spill] sm:$0xff] %v7411_v37  ;;  %v1671_v21 = vadd.f32 %v1670_v54, %v1606_v49  ;;  %v1480_v40 = vadd.f32 %v7282_v8, %v1407_v26 }
 0x224   :  { %2027 = vrot.lane.b32.xlu0 %v7338_v50, %s5900_s9  ;;  %v1548_v8 = vpop.f32.mrf.mxu0 }
 0x225   :  { %2571 = vrot.lane.b32.xlu1 %v7415_v51, %s5899_s30  ;;  %v7446_v32 = vadd.f32 %v1723_v1, %v1671_v21  ;;  %v1544_v31 = vadd.f32 %v1543_v23, %v1480_v40  ;;  %v1415_v21 = vadd.f32 %v7298_v14, %v11754_v28 }
 0x226   :  { %v7421_v10 = vpop.permute.xlu0 %2910 }
 0x227   :  { %11891 = vst [vmem:[#allocation143_spill] sm:$0xff] %v7421_v10  ;;  %v7424_v53 = vpop.permute.xlu1 %2055 }
 0x228   :  { %11892 = vst [vmem:[#allocation144_spill] sm:$0xff] %v7424_v53  ;;  %1764 = vrot.lane.b32.xlu2 %v7415_v51, %s5901_s10  ;;  %v1611_v3 = vpop.f32.mrf.mxu1 }
 0x229   :  { %11898 = vst [vmem:[#allocation150_spill] sm:$0xff] %v7446_v32  ;;  %v1612_v1 = vadd.f32 %v1611_v3, %v1544_v31 }
 0x22a   :  { %v7428_v55 = vpop.permute.xlu2 %2611 }
 0x22b   :  { %11893 = vst [vmem:[#allocation145_spill] sm:$0xff] %v7428_v55  ;;  %v1675_v23 = vadd.f32 %v1674_v13, %v1612_v1 }
 0x22c   :  { %2904 = vrot.lane.b32.xlu0 %v7338_v50, %s5902_s11 }
 0x22d   :  { %2035 = vrot.lane.b32.xlu1 %v7430_v52, %s5900_s9 }
 0x22e   :  { %v7436_v59 = vpop.permute.xlu0 %1822 }
 0x22f   :  { %11895 = vst [vmem:[#allocation147_spill] sm:$0xff] %v7436_v59  ;;  %v7438_v30 = vpop.permute.xlu1 %2061 }
 0x230   :  { %11896 = vst [vmem:[#allocation148_spill] sm:$0xff] %v7438_v30  ;;  %2302 = vrot.lane.b32.xlu2 %v7415_v51, %s5903_s12  ;;  %v1617_v59 = vpop.f32.mrf.mxu1 }
 0x232   :  { %v7442_v58 = vpop.permute.xlu2 %2926 }
 0x233   :  { %11897 = vst [vmem:[#allocation149_spill] sm:$0xff] %v7442_v58  ;;  %v1727_v58 = vpop.f32.mrf.mxu3 }
 0x234   :  { %1760 = vrot.lane.b32.xlu0 %v7354_v47, %s5901_s10  ;;  %v7476_v3 = vadd.f32 %v1727_v58, %v1675_v23 }
 0x235   :  { %1768 = vrot.lane.b32.xlu1 %v7446_v32, %s5901_s10 }
 0x236   :  { %v7452_v33 = vpop.permute.xlu0 %2336  ;;  %11905 = vst [vmem:[#allocation157_spill] sm:$0xff] %v7476_v3 }
 0x237   :  { %11899 = vst [vmem:[#allocation151_spill] sm:$0xff] %v7452_v33  ;;  %v7455_v49 = vpop.permute.xlu1 %2067 }
 0x238   :  { %11900 = vst [vmem:[#allocation152_spill] sm:$0xff] %v7455_v49  ;;  %2573 = vrot.lane.b32.xlu2 %v7430_v52, %s5899_s30  ;;  %v1484_v49 = vadd.f32 %v7311_v16, %v1415_v21 }
 0x23a   :  { %v7459_v54 = vpop.permute.xlu2 %2617  ;;  %v1549_v28 = vadd.f32 %v1548_v8, %v1484_v49 }
 0x23b   :  { %11901 = vst [vmem:[#allocation153_spill] sm:$0xff] %v7459_v54  ;;  %v1678_v54 = vpop.f32.mrf.mxu2  ;;  %v1731_v1 = vpop.f32.mrf.mxu3 }
 0x23c   :  { %2298 = vrot.lane.b32.xlu0 %v7354_v47, %s5903_s12  ;;  %v1618_v31 = vadd.f32 %v1617_v59, %v1549_v28 }
 0x23d   :  { %2306 = vrot.lane.b32.xlu1 %v7446_v32, %s5903_s12 }
 0x23e   :  { %v7467_v26 = vpop.permute.xlu0 %1828  ;;  %v1679_v13 = vadd.f32 %v1678_v54, %v1618_v31 }
 0x23f   :  { %11902 = vst [vmem:[#allocation154_spill] sm:$0xff] %v7467_v26  ;;  %v7470_v40 = vpop.permute.xlu1 %2918  ;;  %v7606_v26 = vld [vmem:[%s11234_s3 + $0x38] sm:$0xff] }
 0x240   :  { %11903 = vst [vmem:[#allocation155_spill] sm:$0xff] %v7470_v40  ;;  %2037 = vrot.lane.b32.xlu2 %v7446_v32, %s5900_s9  ;;  %v7490_v58 = vadd.f32 %v1731_v1, %v1679_v13  ;;  %v5904_v1 = vmov 5  }
 0x241   :  { %5789 = vset.pattern.permute.xlu1 %v5904_v1  ;;  %5787 = vset.pattern.permute.xlu2 %v5904_v1 }
 0x242   :  { %v7474_v14 = vpop.permute.xlu2 %2623  ;;  %11909 = vst [vmem:[#allocation161_spill] sm:$0xff] %v7490_v58  ;;  %5788 = vset.pattern.permute.xlu0 %v5904_v1 }
 0x243   :  { %11904 = vst [vmem:[#allocation156_spill] sm:$0xff] %v7474_v14 }
 0x244   :  { %2569 = vrot.lane.b32.xlu0 %v7383_v42, %s5899_s30 }
 0x245   :  { %2577 = vrot.lane.b32.xlu1 %v7476_v3, %s5899_s30 }
 0x246   :  { %v7482_v16 = vpop.permute.xlu0 %2342 }
 0x247   :  { %11906 = vst [vmem:[#allocation158_spill] sm:$0xff] %v7482_v16  ;;  %v7484_v21 = vpop.permute.xlu1 %2073 }
 0x248   :  { %11907 = vst [vmem:[#allocation159_spill] sm:$0xff] %v7484_v21  ;;  %1770 = vrot.lane.b32.xlu2 %v7476_v3, %s5901_s10  ;;  %v7616_v21 = vld [vmem:[%s11234_s3 + $0x28] sm:$0xff] }
 0x24a   :  { %v7488_v49 = vpop.permute.xlu2 %2629 }
 0x24b   :  { %11908 = vst [vmem:[#allocation160_spill] sm:$0xff] %v7488_v49 }
 0x24c   :  { %2033 = vrot.lane.b32.xlu0 %v7415_v51, %s5900_s9 }
 0x24d   :  { %2041 = vrot.lane.b32.xlu1 %v7490_v58, %s5900_s9 }
 0x24e   :  { %v7496_v59 = vpop.permute.xlu0 %1834 }
 0x24f   :  { %11910 = vst [vmem:[#allocation162_spill] sm:$0xff] %v7496_v59  ;;  %v7498_v8 = vpop.permute.xlu1 %2079  ;;  %v7586_v59 = vld [vmem:[%s11234_s3 + $0x20] sm:$0xff] }
 0x250   :  { %11911 = vst [vmem:[#allocation163_spill] sm:$0xff] %v7498_v8  ;;  %2308 = vrot.lane.b32.xlu2 %v7476_v3, %s5903_s12 }
 0x251   :  { %11932 = vst [vmem:[#allocation184_spill] sm:$0xff] %v7586_v59 }
 0x252   :  { %v7502_v54 = vpop.permute.xlu2 %2635 }
 0x253   :  { %11912 = vst [vmem:[#allocation164_spill] sm:$0xff] %v7502_v54 }
 0x254   :  { %2928 = vrot.lane.b32.xlu0 %v7415_v51, %s5902_s11 }
 0x255   :  { %2936 = vrot.lane.b32.xlu1 %v7430_v52, %s5902_s11 }
 0x256   :  { %v7508_v23 = vpop.permute.xlu0 %2348 }
 0x257   :  { %11913 = vst [vmem:[#allocation165_spill] sm:$0xff] %v7508_v23  ;;  %v7510_v28 = vpop.permute.xlu1 %2085 }
 0x258   :  { %11914 = vst [vmem:[#allocation166_spill] sm:$0xff] %v7510_v28  ;;  %2579 = vrot.lane.b32.xlu2 %v7490_v58, %s5899_s30 }
 0x25a   :  { %v7514_v31 = vpop.permute.xlu2 %1758 }
 0x25b   :  { %11915 = vst [vmem:[#allocation167_spill] sm:$0xff] %v7514_v31 }
 0x25c   :  { %1766 = vrot.lane.b32.xlu0 %v7430_v52, %s5901_s10 }
 0x25d   :  { %2942 = vrot.lane.b32.xlu1 %v7280_v22, %s5902_s11 }
 0x25e   :  { %v7520_v13 = vpop.permute.xlu0 %2934 }
 0x25f   :  { %11916 = vst [vmem:[#allocation168_spill] sm:$0xff] %v7520_v13  ;;  %v7522_v40 = vpop.permute.xlu1 %2091 }
 0x260   :  { %11917 = vst [vmem:[#allocation169_spill] sm:$0xff] %v7522_v40  ;;  %2938 = vrot.lane.b32.xlu2 %v6684_v12, %s5902_s11 }
 0x262   :  { %v7526_v28 = vpop.permute.xlu2 %2296 }
 0x263   :  { %11918 = vst [vmem:[#allocation170_spill] sm:$0xff] %v7526_v28 }
 0x264   :  { %2304 = vrot.lane.b32.xlu0 %v7430_v52, %s5903_s12 }
 0x265   :  { %2948 = vrot.lane.b32.xlu1 %v6899_v34, %s5902_s11 }
 0x266   :  { %v7532_v31 = vpop.permute.xlu0 %1840 }
 0x267   :  { %11919 = vst [vmem:[#allocation171_spill] sm:$0xff] %v7532_v31  ;;  %v7534_v13 = vpop.permute.xlu1 %2097 }
 0x268   :  { %11920 = vst [vmem:[#allocation172_spill] sm:$0xff] %v7534_v13  ;;  %2944 = vrot.lane.b32.xlu2 %v7446_v32, %s5902_s11 }
 0x26a   :  { %v7538_v23 = vpop.permute.xlu2 %2567 }
 0x26b   :  { %11921 = vst [vmem:[#allocation173_spill] sm:$0xff] %v7538_v23 }
 0x26c   :  { %2575 = vrot.lane.b32.xlu0 %v7446_v32, %s5899_s30  ;;  %s5905_s30 = smov 113  }
 0x26d   :  { %2954 = vrot.lane.b32.xlu1 %v6735_v63, %s5902_s11 }
 0x26e   :  { %v7544_v1 = vpop.permute.xlu0 %2354 }
 0x26f   :  { %11922 = vst [vmem:[#allocation174_spill] sm:$0xff] %v7544_v1  ;;  %v7546_v28 = vpop.permute.xlu1 %2565 }
 0x270   :  { %11923 = vst [vmem:[#allocation175_spill] sm:$0xff] %v7546_v28  ;;  %2950 = vrot.lane.b32.xlu2 %v7305_v56, %s5902_s11 }
 0x272   :  { %v7550_v31 = vpop.permute.xlu2 %2031 }
 0x273   :  { %11924 = vst [vmem:[#allocation176_spill] sm:$0xff] %v7550_v31  ;;  %v7569_v31 = vld [vmem:[%s11234_s3 + $0x10] sm:$0xff] }
 0x274   :  { %2039 = vrot.lane.b32.xlu0 %v7476_v3, %s5900_s9  ;;  %11928 = vst [vmem:[#allocation180_spill] sm:$0xff] %v7569_v31 }
 0x275   :  { %2960 = vrot.lane.b32.xlu1 %v7490_v58, %s5902_s11 }
 0x276   :  { %v7556_v23 = vpop.permute.xlu0 %1846 }
 0x277   :  { %11925 = vst [vmem:[#allocation177_spill] sm:$0xff] %v7556_v23  ;;  %v7558_v16 = vpop.permute.xlu1 %2029 }
 0x278   :  { %11926 = vst [vmem:[#allocation178_spill] sm:$0xff] %v7558_v16  ;;  %2956 = vrot.lane.b32.xlu2 %v6919_v2, %s5902_s11  ;;  %v5880_v16 = vld [vmem:[%s11234_s3] sm:$0xff] }
 0x27a   :  { %v7562_v1 = vpop.permute.xlu2 %2920 }
 0x27b   :  { %11927 = vst [vmem:[#allocation179_spill] sm:$0xff] %v7562_v1 }
 0x27c   :  { %1772 = vrot.lane.b32.xlu0 %v7490_v58, %s5901_s10 }
 0x27d   :  { %3080 = vperm.xlu1 %5789, %v7569_v31  }
 0x27e   :  { %v7572_v28 = vpop.permute.xlu0 %2360 }
 0x27f   :  { %11929 = vst [vmem:[#allocation181_spill] sm:$0xff] %v7572_v28  ;;  %v7574_v8 = vpop.permute.xlu1 %2912 }
 0x280   :  { %11930 = vst [vmem:[#allocation182_spill] sm:$0xff] %v7574_v8  ;;  %3072 = vperm.xlu2 %5787, %v5880_v16   ;;  %v7596_v16 = vld [vmem:[%s11234_s3 + $0x18] sm:$0xff] }
 0x281   :  { %11935 = vst [vmem:[#allocation187_spill] sm:$0xff] %v7596_v16 }
 0x282   :  { %v7579_v1 = vpop.permute.xlu2 %1764 }
 0x283   :  { %11931 = vst [vmem:[#allocation183_spill] sm:$0xff] %v7579_v1 }
 0x284   :  { %2310 = vrot.lane.b32.xlu0 %v7490_v58, %s5903_s12 }
 0x285   :  { %3088 = vperm.xlu1 %5789, %v7586_v59   ;;  %v12006_v59 = vld [vmem:[#allocation47_spill] sm:$0xff] }
 0x286   :  { %v7589_v14 = vpop.permute.xlu0 %1852 }
 0x287   :  { %11933 = vst [vmem:[#allocation185_spill] sm:$0xff] %v7589_v14  ;;  %v7591_v8 = vpop.permute.xlu1 %1762 }
 0x288   :  { %11934 = vst [vmem:[#allocation186_spill] sm:$0xff] %v7591_v8  ;;  %3084 = vperm.xlu2 %5787, %v7596_v16  }
 0x28a   :  { %v7599_v1 = vpop.permute.xlu2 %2302 }
 0x28b   :  { %11936 = vst [vmem:[#allocation188_spill] sm:$0xff] %v7599_v1 }
 0x28c   :  { %2940 = vrot.lane.b32.xlu0 %v6880_v29, %s5902_s11 }
 0x28d   :  { %3100 = vperm.xlu1 %5789, %v7606_v26  }
 0x28e   :  { %v7609_v8 = vpop.permute.xlu0 %2366 }
 0x28f   :  { %11937 = vst [vmem:[#allocation189_spill] sm:$0xff] %v7609_v8  ;;  %v7611_v33 = vpop.permute.xlu1 %2300 }
 0x290   :  { %11938 = vst [vmem:[#allocation190_spill] sm:$0xff] %v7611_v33  ;;  %3092 = vperm.xlu2 %5787, %v7616_v21   ;;  %v11942_v33 = vld [vmem:[#allocation34_spill] sm:$0xff] }
 0x292   :  { %v7619_v1 = vpop.permute.xlu2 %2573 }
 0x293   :  { %11939 = vst [vmem:[#allocation191_spill] sm:$0xff] %v7619_v1 }
 0x294   :  { %2946 = vrot.lane.b32.xlu0 %v6710_v57, %s5902_s11 }
 0x295   :  { %3171 = vrot.lane.b32.xlu1 %v7091_v48, %s5905_s30 }
 0x296   :  { %v7625_v10 = vpop.permute.xlu0 %2027 }
 0x297   :  { %11940 = vst [vmem:[#allocation192_spill] sm:$0xff] %v7625_v10  ;;  %v7627_v30 = vpop.permute.xlu1 %2571 }
 0x298   :  { %11941 = vst [vmem:[#allocation193_spill] sm:$0xff] %v7627_v30  ;;  %3167 = vrot.lane.b32.xlu2 %v11942_v33, %s5905_s30  ;;  %v12003_v33 = vld [vmem:[#allocation97_spill] sm:$0xff] }
 0x29a   :  { %v7631_v20 = vpop.permute.xlu2 %2037 }
 0x29b   :  { %11943 = vst [vmem:[#allocation194_spill] sm:$0xff] %v7631_v20 }
 0x29c   :  { %2952 = vrot.lane.b32.xlu0 %v7476_v3, %s5902_s11 }
 0x29d   :  { %3177 = vrot.lane.b32.xlu1 %v6796_v46, %s5905_s30 }
 0x29e   :  { %v7637_v1 = vpop.permute.xlu0 %2904 }
 0x29f   :  { %11944 = vst [vmem:[#allocation195_spill] sm:$0xff] %v7637_v1  ;;  %v7639_v55 = vpop.permute.xlu1 %2035 }
 0x2a0   :  { %11945 = vst [vmem:[#allocation196_spill] sm:$0xff] %v7639_v55  ;;  %3173 = vrot.lane.b32.xlu2 %v7338_v50, %s5905_s30  ;;  %v7660_v55 = vld [vmem:[%s11234_s3 + $0x8] sm:$0xff]  ;;  %v11964_v50 = vld [vmem:[#allocation62_spill] sm:$0xff] }
 0x2a1   :  { %11948 = vst [vmem:[#allocation199_spill] sm:$0xff] %v7660_v55 }
 0x2a2   :  { %v7643_v10 = vpop.permute.xlu2 %1770 }
 0x2a4   :  { %2958 = vrot.lane.b32.xlu0 %v7323_v60, %s5902_s11  ;;  %v2638_v60 = vsel %vm2637_vm2, %v11964_v50, %v11963_v7 }
 0x2a5   :  { %3183 = vrot.lane.b32.xlu1 %v6578_v27, %s5905_s30 }
 0x2a6   :  { %v7649_v20 = vpop.permute.xlu0 %1760 }
 0x2a7   :  { %11946 = vst [vmem:[#allocation197_spill] sm:$0xff] %v7649_v20  ;;  %v7651_v30 = vpop.permute.xlu1 %1768 }
 0x2a8   :  { %11947 = vst [vmem:[#allocation198_spill] sm:$0xff] %v7651_v30  ;;  %3179 = vrot.lane.b32.xlu2 %v7126_v24, %s5905_s30 }
 0x2aa   :  { %v7655_v1 = vpop.permute.xlu2 %2308 }
 0x2ac   :  { %3076 = vperm.xlu0 %5788, %v7660_v55  }
 0x2ad   :  { %3189 = vrot.lane.b32.xlu1 %v7383_v42, %s5905_s30 }
 0x2ae   :  { %v7665_v37 = vpop.permute.xlu0 %2298 }
 0x2af   :  { %11949 = vst [vmem:[#allocation200_spill] sm:$0xff] %v7665_v37  ;;  %v7667_v20 = vpop.permute.xlu1 %2306 }
 0x2b0   :  { %11950 = vst [vmem:[#allocation201_spill] sm:$0xff] %v7667_v20  ;;  %3185 = vrot.lane.b32.xlu2 %v6817_v45, %s5905_s30 }
 0x2b2   :  { %v7671_v30 = vpop.permute.xlu2 %2579 }
 0x2b4   :  { %3096 = vperm.xlu0 %5788, %v7676_v18  }
 0x2b5   :  { %3195 = vrot.lane.b32.xlu1 %v7214_v38, %s5905_s30 }
 0x2b6   :  { %v7681_v53 = vpop.permute.xlu0 %2569 }
 0x2b7   :  { %11951 = vst [vmem:[#allocation202_spill] sm:$0xff] %v7681_v53  ;;  %v7683_v37 = vpop.permute.xlu1 %2577 }
 0x2b8   :  { %3191 = vrot.lane.b32.xlu2 %v6630_v15, %s5905_s30 }
 0x2ba   :  { %v7687_v20 = vpop.permute.xlu2 %2938 }
 0x2bb   :  { %11952 = vst [vmem:[#allocation203_spill] sm:$0xff] %v7687_v20 }
 0x2bc   :  { %3169 = vrot.lane.b32.xlu0 %v6766_v11, %s5905_s30 }
 0x2bd   :  { %3201 = vrot.lane.b32.xlu1 %v6859_v43, %s5905_s30 }
 0x2be   :  { %v7693_v42 = vpop.permute.xlu0 %2033 }
 0x2bf   :  { %11953 = vst [vmem:[#allocation204_spill] sm:$0xff] %v7693_v42  ;;  %v7695_v25 = vpop.permute.xlu1 %2041 }
 0x2c0   :  { %3197 = vrot.lane.b32.xlu2 %v7415_v51, %s5905_s30 }
 0x2c2   :  { %v7699_v53 = vpop.permute.xlu2 %2944 }
 0x2c3   :  { %11954 = vst [vmem:[#allocation205_spill] sm:$0xff] %v7699_v53  ;;  %v7720_v53 = vld [vmem:[%s11235_s7 + $0x8] sm:$0xff] }
 0x2c4   :  { %3175 = vrot.lane.b32.xlu0 %v6548_v9, %s5905_s30  ;;  %11958 = vst [vmem:[#allocation209_spill] sm:$0xff] %v7720_v53  ;;  %v7728_v51 = vperm.slane %v7720_v53, 3  ;;  %v7754_v7 = vperm.slane %v7720_v53, 2  ;;  %v7757_v19 = vperm.slane %v7720_v53, 5 }
 0x2c5   :  { %3207 = vrot.lane.b32.xlu1 %v6684_v12, %s5905_s30 }
 0x2c6   :  { %v7705_v6 = vpop.permute.xlu0 %2928  ;;  %11961 = vst [vmem:[#allocation212_spill] sm:$0xff] %v7728_v51 }
 0x2c7   :  { %11955 = vst [vmem:[#allocation206_spill] sm:$0xff] %v7705_v6  ;;  %v7707_v41 = vpop.permute.xlu1 %2936 }
 0x2c8   :  { %11956 = vst [vmem:[#allocation207_spill] sm:$0xff] %v7707_v41  ;;  %3203 = vrot.lane.b32.xlu2 %v7256_v44, %s5905_s30  ;;  %v7725_v41 = vperm.slane %v7720_v53, 1 }
 0x2c9   :  { %11969 = vst [vmem:[#allocation215_spill] sm:$0xff] %v7754_v7 }
 0x2ca   :  { %v7711_v42 = vpop.permute.xlu2 %2950  ;;  %11960 = vst [vmem:[#allocation211_spill] sm:$0xff] %v7725_v41 }
 0x2cb   :  { %11957 = vst [vmem:[#allocation208_spill] sm:$0xff] %v7711_v42 }
 0x2cc   :  { %3181 = vrot.lane.b32.xlu0 %v7354_v47, %s5905_s30  ;;  %11970 = vst [vmem:[#allocation216_spill] sm:$0xff] %v7757_v19 }
 0x2cd   :  { %3213 = vrot.lane.b32.xlu1 %v7446_v32, %s5905_s30  ;;  %v2100_v32 = vsel %vm2099_vm1, %v6830_v62, %v7130_v5  ;;  %v2707_v62 = vmul.f32 %v7728_v51, %v2638_v60  ;;  %v11968_v5 = vld [vmem:[#allocation95_spill] sm:$0xff]  ;;  %v2964_v60 = vsel %vm2962_vm5, %v7363_v17, %v7379_v36  ;;  %v11488_v17 = vmov 6  }
 0x2ce   :  { %v7722_v6 = vpop.permute.xlu0 %1766  ;;  %v2169_v44 = vmul.f32 %v7725_v41, %v2100_v32  ;;  %v2369_v32 = vsel %vm2368_vm4, %v11972_v35, %v11971_v0  ;;  %v11978_v35 = vld [vmem:[#allocation56_spill] sm:$0xff]  ;;  %v3040_v36 = vmul.f32 %v7757_v19, %v2964_v60  ;;  %5790 = vset.pattern.permute.xlu2 %v11488_v17  ;;  %v12002_v41 = vld [vmem:[#allocation41_spill] sm:$0xff] }
 0x2cf   :  { %11959 = vst [vmem:[#allocation210_spill] sm:$0xff] %v7722_v6  ;;  %v7730_v47 = vpop.permute.xlu1 %2942  ;;  %v7741_v6 = vperm.slane %v7720_v53, 0  ;;  %v11977_v53 = vld [vmem:[#allocation26_spill] sm:$0xff]  ;;  %v2438_v39 = vmul.f32 %v7754_v7, %v2369_v32  ;;  %v2835_v0 = vmul.f32 %v11978_v35, %v6766_v11 }
 0x2d0   :  { %11962 = vst [vmem:[#allocation213_spill] sm:$0xff] %v7730_v47  ;;  %3209 = vrot.lane.b32.xlu2 %v6880_v29, %s5905_s30 }
 0x2d1   :  { %11965 = vst [vmem:[#allocation214_spill] sm:$0xff] %v7741_v6  ;;  %v1924_v50 = vmul.f32 %v7741_v6, %v1855_v61  ;;  %v11974_v61 = vld [vmem:[#allocation27_spill] sm:$0xff] }
 0x2d2   :  { %v7746_v4 = vpop.permute.xlu2 %2956  ;;  %v2233_v38 = vmul.f32 %v11974_v61, %v2169_v44 }
 0x2d4   :  { %3187 = vrot.lane.b32.xlu0 %v11968_v5, %s5905_s30  ;;  %v11975_v5 = vld [vmem:[#allocation51_spill] sm:$0xff] }
 0x2d5   :  { %3219 = vrot.lane.b32.xlu1 %v7305_v56, %s5905_s30  ;;  %v2771_v55 = vmul.f32 %v11975_v5, %v2707_v62  ;;  %v1996_v56 = vmul.f32 %v11977_v53, %v1924_v50  ;;  %v11980_v5 = vld [vmem:[#allocation21_spill] sm:$0xff]  ;;  %v11981_v50 = vld [vmem:[#allocation14_spill] sm:$0xff] }
 0x2d6   :  { %v7767_v51 = vpop.permute.xlu0 %2304  ;;  %v2502_v53 = vmul.f32 %v11981_v50, %v2438_v39  ;;  %v11996_v50 = vld [vmem:[#allocation82_spill] sm:$0xff] }
 0x2d7   :  { %11973 = vst [vmem:[#allocation217_spill] sm:$0xff] %v7767_v51  ;;  %v7771_v24 = vpop.permute.xlu1 %2948  ;;  %v2265_v62 = vadd.f32 %v2233_v38, %v1996_v56  ;;  %v2867_v51 = vadd.f32 %v2835_v0, %v2771_v55  ;;  %v11985_v0 = vld [vmem:[#allocation43_spill] sm:$0xff]  ;;  %v7818_v55 = vld [vmem:[%s11235_s7 + $0x18] sm:$0xff] }
 0x2d8   :  { %11976 = vst [vmem:[#allocation218_spill] sm:$0xff] %v7771_v24  ;;  %3215 = vrot.lane.b32.xlu2 %v6710_v57, %s5905_s30 }
 0x2d9   :  { %v2534_v60 = vadd.f32 %v2502_v53, %v2265_v62  ;;  %11987 = vst [vmem:[#allocation222_spill] sm:$0xff] %v7818_v55  ;;  %v7825_v62 = vld [vmem:[%s11235_s7] sm:$0xff] }
 0x2da   :  { %v7781_v44 = vpop.permute.xlu2 %3072  ;;  %11988 = vst [vmem:[#allocation223_spill] sm:$0xff] %v7825_v62  ;;  %v7861_v7 = vperm.slane %v7825_v62, 3 }
 0x2db   :  { %11979 = vst [vmem:[#allocation219_spill] sm:$0xff] %v7781_v44  ;;  %v3104_v61 = vmul.f32 %v7781_v44, %v3040_v36  ;;  %v11486_v36 = vmov 7   ;;  %v7837_v44 = vperm.slane %v7818_v55, 0 }
 0x2dc   :  { %3193 = vrot.lane.b32.xlu0 %v11980_v5, %s5905_s30  ;;  %5792 = vset.pattern.permute.xlu1 %v11486_v36  ;;  %11997 = vst [vmem:[#allocation229_spill] sm:$0xff] %v7861_v7 }
 0x2dd   :  { %v3136_v32 = vadd.f32 %v3104_v61, %v2867_v51  ;;  %3225 = vrot.lane.b32.xlu1 %v6919_v2, %s5905_s30  ;;  %5791 = vset.pattern.permute.xlu0 %v11486_v36  ;;  %11992 = vst [vmem:[#allocation226_spill] sm:$0xff] %v7837_v44 }
 0x2de   :  { %v7789_v11 = vpop.permute.xlu0 %2575 }
 0x2df   :  { %11982 = vst [vmem:[#allocation21_spill] sm:$0xff] %v7789_v11  ;;  %v7791_v48 = vpop.permute.xlu1 %2954  ;;  %v7795_v38 = vadd.f32 %v3136_v32, %v2534_v60  ;;  %v11989_v60 = vld [vmem:[#allocation94_spill] sm:$0xff]  ;;  %v11993_v11 = vld [vmem:[#allocation9_spill] sm:$0xff] }
 0x2e0   :  { %3221 = vrot.lane.b32.xlu2 %v7476_v3, %s5905_s30 }
 0x2e1   :  { %11983 = vst [vmem:[#allocation220_spill] sm:$0xff] %v7795_v38  ;;  %v7834_v38 = vperm.slane %v7825_v62, 0 }
 0x2e2   :  { %v7797_v56 = vpop.permute.xlu2 %3084 }
 0x2e3   :  { %11984 = vst [vmem:[#allocation221_spill] sm:$0xff] %v7797_v56  ;;  %v2163_v56 = vsel %vm2099_vm1, %v7695_v25, %v11993_v11 }
 0x2e4   :  { %3199 = vrot.lane.b32.xlu0 %v11985_v0, %s5905_s30  ;;  %11991 = vst [vmem:[#allocation225_spill] sm:$0xff] %v7834_v38 }
 0x2e5   :  { %3452 = vrot.lane.b32.xlu1 %v6710_v57, %s5907_s15 }
 0x2e6   :  { %v7803_v39 = vpop.permute.xlu0 %2039 }
 0x2e7   :  { %v7807_v51 = vpop.permute.xlu1 %2960 }
 0x2e8   :  { %3460 = vrot.lane.b32.xlu2 %v6735_v63, %s5907_s15 }
 0x2ea   :  { %v7811_v53 = vpop.permute.xlu2 %3092 }
 0x2eb   :  { %11986 = vst [vmem:[#allocation43_spill] sm:$0xff] %v7811_v53 }
 0x2ec   :  { %3205 = vrot.lane.b32.xlu0 %v7430_v52, %s5905_s30  ;;  %v2701_v52 = vsel %vm2637_vm2, %v7671_v30, %v11996_v50  ;;  %v7877_v50 = vperm.slane %v7825_v62, 2 }
 0x2ed   :  { %3731 = vrot.lane.b32.xlu1 %v6919_v2, %s5909_s18 }
 0x2ee   :  { %v1773_v61 = vpop.permute.xlu0 %1772  ;;  %11999 = vst [vmem:[#allocation231_spill] sm:$0xff] %v7877_v50 }
 0x2ef   :  { %v1878_v32 = vsel %vm1854_vm3, %v7589_v14, %v1773_v61  ;;  %v1918_v36 = vsel %vm1854_vm3, %v1773_v61, %v11989_v60  ;;  %v7831_v17 = vpop.permute.xlu1 %3080  ;;  %v7845_v14 = vperm.slane %v7825_v62, 1  ;;  %v2123_v61 = vsel %vm2099_vm1, %v7534_v13, %v7695_v25 }
 0x2f0   :  { %11990 = vst [vmem:[#allocation224_spill] sm:$0xff] %v7831_v17  ;;  %3454 = vrot.lane.b32.xlu2 %v6899_v34, %s5907_s15  ;;  %v7851_v17 = vperm.slane %v7818_v55, 1  ;;  %v1951_v60 = vmul.f32 %v7834_v38, %v1918_v36  ;;  %v1954_v11 = vmul.f32 %v7837_v44, %v1878_v32  ;;  %v2661_v25 = vsel %vm2637_vm2, %v7502_v54, %v7671_v30  ;;  %v12001_v30 = vld [vmem:[#allocation25_spill] sm:$0xff] }
 0x2f1   :  { %11994 = vst [vmem:[#allocation227_spill] sm:$0xff] %v7845_v14  ;;  %v2196_v6 = vmul.f32 %v7845_v14, %v2163_v56  ;;  %v7871_v36 = vperm.slane %v7818_v55, 3  ;;  %v2734_v32 = vmul.f32 %v7861_v7, %v2701_v52  ;;  %v7880_v56 = vperm.slane %v7818_v55, 2 }
 0x2f2   :  { %11995 = vst [vmem:[#allocation228_spill] sm:$0xff] %v7851_v17  ;;  %v7858_v31 = vpop.permute.xlu2 %3167  ;;  %v2199_v13 = vmul.f32 %v7851_v17, %v2123_v61  ;;  %v2023_v54 = vmul.f32 %v12001_v30, %v1951_v60  ;;  %v2026_v61 = vmul.f32 %v12001_v30, %v1954_v11  ;;  %v12005_v11 = vld [vmem:[#allocation19_spill] sm:$0xff] }
 0x2f3   :  { %11998 = vst [vmem:[#allocation230_spill] sm:$0xff] %v7871_v36  ;;  %v2260_v35 = vmul.f32 %v12002_v41, %v2196_v6 }
 0x2f4   :  { %3211 = vrot.lane.b32.xlu0 %v7280_v22, %s5905_s30  ;;  %12000 = vst [vmem:[#allocation232_spill] sm:$0xff] %v7880_v56  ;;  %v2737_v22 = vmul.f32 %v7871_v36, %v2661_v25  ;;  %v2263_v45 = vmul.f32 %v12002_v41, %v2199_v13  ;;  %v2798_v25 = vmul.f32 %v12005_v11, %v2734_v32 }
 0x2f5   :  { %3444 = vrot.lane.b32.xlu1 %v6684_v12, %s5907_s15  ;;  %v2292_v6 = vadd.f32 %v2260_v35, %v2023_v54  ;;  %v3034_v13 = vsel %vm2962_vm5, %v7807_v51, %v7791_v48  ;;  %v12010_v54 = vld [vmem:[#allocation13_spill] sm:$0xff] }
 0x2f6   :  { %v2311_v9 = vpop.permute.xlu0 %2310  ;;  %v2295_v30 = vadd.f32 %v2263_v45, %v2026_v61  ;;  %v7911_v45 = vperm.slane %v7825_v62, 5  ;;  %v2862_v61 = vmul.f32 %v12010_v54, %v6735_v63 }
 0x2f7   :  { %v2392_v52 = vsel %vm2368_vm4, %v7609_v8, %v2311_v9  ;;  %v2432_v46 = vsel %vm2368_vm4, %v2311_v9, %v12003_v33  ;;  %v7890_v16 = vpop.permute.xlu1 %3088 }
 0x2f8   :  { %12004 = vst [vmem:[#allocation97_spill] sm:$0xff] %v7890_v16  ;;  %v2465_v27 = vmul.f32 %v7877_v50, %v2432_v46  ;;  %v2468_v60 = vmul.f32 %v7880_v56, %v2392_v52  ;;  %3369 = vperm.xlu2 %5790, %v7606_v26   ;;  %v2801_v16 = vmul.f32 %v12005_v11, %v2737_v22 }
 0x2f9   :  { %v2984_v46 = vsel %vm2962_vm5, %v7791_v48, %v7746_v4  ;;  %12008 = vst [vmem:[#allocation234_spill] sm:$0xff] %v7911_v45  ;;  %v2865_v48 = vmul.f32 %v12010_v54, %v7490_v58  ;;  %v2894_v62 = vadd.f32 %v2862_v61, %v2798_v25 }
 0x2fa   :  { %v2529_v8 = vmul.f32 %v12006_v59, %v2465_v27  ;;  %v2532_v15 = vmul.f32 %v12006_v59, %v2468_v60  ;;  %v3174_v9 = vpop.permute.xlu2 %3173  ;;  %v7914_v27 = vperm.slane %v7818_v55, 5  ;;  %v3067_v52 = vmul.f32 %v7911_v45, %v2984_v46 }
 0x2fb   :  { %v7908_v32 = vsel %vm3231_vm6, %v3174_v9, %v7858_v31  ;;  %v11533_v46 = vmov 8  }
 0x2fc   :  { %12007 = vst [vmem:[#allocation233_spill] sm:$0xff] %v7908_v32  ;;  %v2561_v35 = vadd.f32 %v2529_v8, %v2292_v6  ;;  %v2564_v22 = vadd.f32 %v2532_v15, %v2295_v30  ;;  %3217 = vrot.lane.b32.xlu0 %v6899_v34, %s5905_s30  ;;  %v3070_v60 = vmul.f32 %v7914_v27, %v3034_v13 }
 0x2fd   :  { %12009 = vst [vmem:[#allocation235_spill] sm:$0xff] %v7914_v27  ;;  %3721 = vrot.lane.b32.xlu1 %v6710_v57, %s5909_s18  ;;  %v2897_v8 = vadd.f32 %v2865_v48, %v2801_v16 }
 0x2fe   :  { %v2941_v32 = vpop.permute.xlu0 %2940 }
 0x2ff   :  { %v2978_v15 = vsel %vm2962_vm5, %v7687_v20, %v2941_v32  ;;  %v2979_v30 = vsel %vm2962_vm5, %v2941_v32, %v7730_v47  ;;  %v3101_v6 = vpop.permute.xlu1 %3100 }
 0x300   :  { %v3059_v55 = vmul.f32 %v7911_v45, %v2978_v15  ;;  %v3060_v58 = vmul.f32 %v7757_v19, %v2979_v30  ;;  %v3131_v11 = vmul.f32 %v3101_v6, %v3067_v52  ;;  %v3134_v59 = vmul.f32 %v3101_v6, %v3070_v60  ;;  %3446 = vrot.lane.b32.xlu2 %v6880_v29, %s5907_s15 }
 0x301   :  { %5793 = vset.pattern.permute.xlu2 %v11533_v46 }
 0x302   :  { %v7936_v16 = vmul.f32 %v7811_v53, %v3059_v55  ;;  %v7939_v25 = vmul.f32 %v7811_v53, %v3060_v58  ;;  %v3163_v13 = vadd.f32 %v3131_v11, %v2894_v62  ;;  %v3166_v32 = vadd.f32 %v3134_v59, %v2897_v8  ;;  %v7941_v61 = vpop.permute.xlu2 %3179  ;;  %v12023_v53 = vld [vmem:[#allocation77_spill] sm:$0xff] }
 0x303   :  { %v2700_v47 = vsel %vm2637_vm2, %v7683_v37, %v12023_v53 }
 0x304   :  { %12011 = vst [vmem:[#allocation13_spill] sm:$0xff] %v7936_v16  ;;  %v7943_v48 = vadd.f32 %v3166_v32, %v2564_v22  ;;  %3223 = vrot.lane.b32.xlu0 %v6735_v63, %s5905_s30  ;;  %v7947_v52 = vadd.f32 %v3163_v13, %v2561_v35  ;;  %v7981_v22 = vld [vmem:[%s11235_s7 + $0x10] sm:$0xff] }
 0x305   :  { %12012 = vst [vmem:[#allocation236_spill] sm:$0xff] %v7939_v25  ;;  %3602 = vperm.xlu1 %5792, %v7676_v18   ;;  %v7986_v8 = vperm.slane %v7981_v22, 5  ;;  %v2120_v25 = vsel %vm2099_vm1, %v7522_v40, %v7803_v39 }
 0x306   :  { %12013 = vst [vmem:[#allocation237_spill] sm:$0xff] %v7943_v48  ;;  %v2947_v60 = vpop.permute.xlu0 %2946 }
 0x307   :  { %12014 = vst [vmem:[#allocation238_spill] sm:$0xff] %v7947_v52  ;;  %v7950_v15 = vpop.permute.xlu1 %3171 }
 0x308   :  { %v7954_v58 = vsel %vm3231_vm6, %v7950_v15, %v3174_v9  ;;  %3723 = vrot.lane.b32.xlu2 %v6899_v34, %s5909_s18  ;;  %12017 = vst [vmem:[#allocation241_spill] sm:$0xff] %v7986_v8 }
 0x309   :  { %12015 = vst [vmem:[#allocation239_spill] sm:$0xff] %v7954_v58 }
 0x30a   :  { %v7958_v59 = vpop.permute.xlu2 %3185 }
 0x30c   :  { %3462 = vrot.lane.b32.xlu0 %v6919_v2, %s5907_s15 }
 0x30d   :  { %3436 = vrot.lane.b32.xlu1 %v11985_v0, %s5907_s15 }
 0x30e   :  { %v2953_v55 = vpop.permute.xlu0 %2952  ;;  %5796 = vset.pattern.permute.xlu1 %v11533_v46 }
 0x30f   :  { %v3033_v62 = vsel %vm2962_vm5, %v2953_v55, %v2947_v60  ;;  %v7966_v11 = vpop.permute.xlu1 %3177 }
 0x310   :  { %v7971_v9 = vsel %vm3231_vm6, %v7966_v11, %v7941_v61  ;;  %3875 = vperm.xlu2 %5793, %v7606_v26  }
 0x311   :  { %12016 = vst [vmem:[#allocation240_spill] sm:$0xff] %v7971_v9  ;;  %v12025_v9 = vld [vmem:[#allocation88_spill] sm:$0xff] }
 0x312   :  { %v7974_v35 = vpop.permute.xlu2 %3191  ;;  %v1917_v52 = vsel %vm1854_vm3, %v7643_v10, %v12025_v9 }
 0x314   :  { %3729 = vrot.lane.b32.xlu0 %v6735_v63, %s5909_s18 }
 0x315   :  { %3715 = vrot.lane.b32.xlu1 %v6880_v29, %s5909_s18 }
 0x316   :  { %v2959_v30 = vpop.permute.xlu0 %2958 }
 0x317   :  { %v2985_v13 = vsel %vm2962_vm5, %v7746_v4, %v2959_v30  ;;  %v2986_v32 = vsel %vm2962_vm5, %v2959_v30, %v7807_v51  ;;  %v3184_v46 = vpop.permute.xlu1 %3183  ;;  %v12019_v4 = vmov 6   ;;  %v1875_v51 = vsel %vm1854_vm3, %v7556_v23, %v7643_v10  ;;  %v12020_v30 = vld [vmem:[#allocation6_spill] sm:$0xff] }
 0x318   :  { %v3068_v63 = vmul.f32 %v7757_v19, %v2985_v13  ;;  %v3069_v48 = vmul.f32 %v7986_v8, %v2986_v32  ;;  %v7996_v58 = vsel %vm3231_vm6, %v3184_v46, %v7958_v59  ;;  %3438 = vrot.lane.b32.xlu2 %v6859_v43, %s5907_s15  ;;  %v2162_v13 = vsel %vm2099_vm1, %v7803_v39, %v12020_v30  ;;  %v12095_v19 = vld [vmem:[#allocation10_spill] sm:$0xff] }
 0x319   :  { %12018 = vst [vmem:[#allocation242_spill] sm:$0xff] %v7996_v58  ;;  %5794 = vset.pattern.permute.xlu2 %v12019_v4  ;;  %v2658_v39 = vsel %vm2637_vm2, %v7488_v49, %v7683_v37  ;;  %v2730_v10 = vmul.f32 %v7861_v7, %v2700_v47  ;;  %v1947_v37 = vmul.f32 %v7834_v38, %v1917_v52  ;;  %v12030_v47 = vld [vmem:[#allocation32_spill] sm:$0xff]  ;;  %v12088_v38 = vld [vmem:[#allocation98_spill] sm:$0xff]  ;;  %v12094_v49 = vld [vmem:[#allocation83_spill] sm:$0xff] }
 0x31a   :  { %v8010_v32 = vmul.f32 %v3101_v6, %v3068_v63  ;;  %v8012_v58 = vmul.f32 %v3101_v6, %v3069_v48  ;;  %v3198_v16 = vpop.permute.xlu2 %3197  ;;  %v2195_v6 = vmul.f32 %v7851_v17, %v2120_v25  ;;  %v1950_v48 = vmul.f32 %v7837_v44, %v1875_v51 }
 0x31b   :  { %v8019_v20 = vsel %vm3231_vm6, %v3198_v16, %v7974_v35  ;;  %v2192_v63 = vmul.f32 %v7845_v14, %v2162_v13  ;;  %v2733_v25 = vmul.f32 %v7871_v36, %v2658_v39  ;;  %v12028_v13 = vld [vmem:[#allocation17_spill] sm:$0xff]  ;;  %v2981_v36 = vsel %vm2962_vm5, %v2947_v60, %v7771_v24 }
 0x31c   :  { %12021 = vst [vmem:[#allocation6_spill] sm:$0xff] %v8010_v32  ;;  %3606 = vperm.xlu0 %5791, %v7606_v26   ;;  %v2389_v26 = vsel %vm2368_vm4, %v7572_v28, %v7655_v1  ;;  %v2259_v17 = vmul.f32 %v12028_v13, %v2195_v6  ;;  %v12031_v28 = vld [vmem:[#allocation50_spill] sm:$0xff]  ;;  %v2983_v6 = vsel %vm2962_vm5, %v7711_v42, %v2953_v55 }
 0x31d   :  { %12022 = vst [vmem:[#allocation243_spill] sm:$0xff] %v8012_v58  ;;  %3871 = vperm.xlu1 %5796, %v7676_v18   ;;  %v12026_v58 = vld [vmem:[#allocation91_spill] sm:$0xff]  ;;  %v2256_v23 = vmul.f32 %v12028_v13, %v2192_v63  ;;  %v2794_v39 = vmul.f32 %v12031_v28, %v2730_v10  ;;  %v3063_v10 = vmul.f32 %v7911_v45, %v2981_v36  ;;  %v12108_v45 = vld [vmem:[#allocation66_spill] sm:$0xff] }
 0x31e   :  { %12024 = vst [vmem:[#allocation77_spill] sm:$0xff] %v8019_v20  ;;  %v2431_v32 = vsel %vm2368_vm4, %v7655_v1, %v12026_v58  ;;  %v8036_v20 = vpop.permute.xlu0 %3076  ;;  %v2464_v1 = vmul.f32 %v7880_v56, %v2389_v26  ;;  %v3065_v55 = vmul.f32 %v7986_v8, %v2983_v6  ;;  %v3066_v24 = vmul.f32 %v7914_v27, %v3033_v62 }
 0x31f   :  { %12027 = vst [vmem:[#allocation88_spill] sm:$0xff] %v8036_v20  ;;  %v8043_v51 = vpop.permute.xlu1 %3189  ;;  %v2022_v20 = vmul.f32 %v12030_v47, %v1950_v48  ;;  %v2461_v52 = vmul.f32 %v7877_v50, %v2431_v32  ;;  %v2797_v48 = vmul.f32 %v12031_v28, %v2733_v25  ;;  %v12032_v32 = vld [vmem:[#allocation57_spill] sm:$0xff]  ;;  %v12038_v27 = vmov 7  }
 0x320   :  { %v8048_v14 = vsel %vm3231_vm6, %v8043_v51, %v3184_v46  ;;  %3361 = vperm.xlu2 %5794, %v7616_v21   ;;  %v2858_v50 = vmul.f32 %v12032_v32, %v6710_v57  ;;  %v2861_v63 = vmul.f32 %v12032_v32, %v7476_v3 }
 0x321   :  { %12029 = vst [vmem:[#allocation91_spill] sm:$0xff] %v8048_v14  ;;  %v2019_v14 = vmul.f32 %v12030_v47, %v1947_v37  ;;  %v2291_v26 = vadd.f32 %v2259_v17, %v2022_v20  ;;  %v12033_v37 = vld [vmem:[#allocation12_spill] sm:$0xff] }
 0x322   :  { %v8060_v46 = vpop.permute.xlu2 %3203  ;;  %v2525_v25 = vmul.f32 %v12033_v37, %v2461_v52  ;;  %v2528_v57 = vmul.f32 %v12033_v37, %v2464_v1  ;;  %v2890_v42 = vadd.f32 %v2858_v50, %v2794_v39  ;;  %v2893_v17 = vadd.f32 %v2861_v63, %v2797_v48  ;;  %v12037_v52 = vld [vmem:[#allocation42_spill] sm:$0xff] }
 0x323   :  { %v2288_v60 = vadd.f32 %v2256_v23, %v2019_v14 }
 0x324   :  { %3713 = vrot.lane.b32.xlu0 %v6684_v12, %s5909_s18  ;;  %v2560_v1 = vadd.f32 %v2528_v57, %v2291_v26 }
 0x325   :  { %3430 = vrot.lane.b32.xlu1 %v11980_v5, %s5907_s15  ;;  %v2557_v50 = vadd.f32 %v2525_v25, %v2288_v60 }
 0x326   :  { %v8077_v3 = vpop.permute.xlu0 %3096  ;;  %5797 = vset.pattern.permute.xlu1 %v12019_v4 }
 0x327   :  { %12034 = vst [vmem:[#allocation50_spill] sm:$0xff] %v8077_v3  ;;  %v3127_v20 = vmul.f32 %v8077_v3, %v3063_v10  ;;  %v8082_v14 = vmul.f32 %v8077_v3, %v3065_v55  ;;  %v3130_v23 = vmul.f32 %v8077_v3, %v3066_v24  ;;  %v3196_v36 = vpop.permute.xlu1 %3195  ;;  %v12041_v24 = vld [vmem:[#allocation184_spill] sm:$0xff] }
 0x328   :  { %v8086_v62 = vsel %vm3231_vm6, %v3196_v36, %v3198_v16  ;;  %3428 = vrot.lane.b32.xlu2 %v12037_v52, %s5907_s15 }
 0x329   :  { %12035 = vst [vmem:[#allocation57_spill] sm:$0xff] %v8082_v14  ;;  %v3159_v39 = vadd.f32 %v3127_v20, %v2890_v42  ;;  %v3162_v6 = vadd.f32 %v3130_v23, %v2893_v17  ;;  %5798 = vset.pattern.permute.xlu2 %v12038_v27 }
 0x32a   :  { %12036 = vst [vmem:[#allocation244_spill] sm:$0xff] %v8086_v62  ;;  %v8091_v48 = vpop.permute.xlu2 %3209 }
 0x32b   :  { %v8093_v63 = vadd.f32 %v3162_v6, %v2560_v1  ;;  %v8095_v10 = vadd.f32 %v3159_v39, %v2557_v50 }
 0x32c   :  { %3598 = vperm.xlu0 %5791, %v7616_v21  }
 0x32d   :  { %12039 = vst [vmem:[#allocation42_spill] sm:$0xff] %v8093_v63  ;;  %3357 = vperm.xlu1 %5797, %v12041_v24   ;;  %v12053_v63 = vmov 8  }
 0x32e   :  { %12040 = vst [vmem:[#allocation245_spill] sm:$0xff] %v8095_v10  ;;  %v3170_v16 = vpop.permute.xlu0 %3169  ;;  %v12067_v10 = vld [vmem:[#allocation73_spill] sm:$0xff] }
 0x32f   :  { %v8101_v55 = vsel %vm3231_vm6, %v7858_v31, %v3170_v16  ;;  %v8105_v42 = vsel %vm3231_vm6, %v3170_v16, %v7950_v15  ;;  %v8107_v26 = vpop.permute.xlu1 %3201  ;;  %v12045_v31 = vld [vmem:[#allocation39_spill] sm:$0xff]  ;;  %v12052_v16 = vld [vmem:[#allocation8_spill] sm:$0xff] }
 0x330   :  { %12042 = vst [vmem:[#allocation184_spill] sm:$0xff] %v8101_v55  ;;  %v8112_v60 = vsel %vm3231_vm6, %v8107_v26, %v8060_v46  ;;  %3705 = vrot.lane.b32.xlu2 %v11985_v0, %s5909_s18  ;;  %v12055_v55 = vld [vmem:[#allocation187_spill] sm:$0xff] }
 0x331   :  { %12043 = vst [vmem:[#allocation246_spill] sm:$0xff] %v8105_v42 }
 0x332   :  { %12044 = vst [vmem:[#allocation247_spill] sm:$0xff] %v8112_v60  ;;  %v8116_v25 = vpop.permute.xlu2 %3215  ;;  %v12073_v60 = vld [vmem:[#allocation5_spill] sm:$0xff] }
 0x334   :  { %5795 = vset.pattern.permute.xlu0 %v12019_v4 }
 0x335   :  { %3420 = vrot.lane.b32.xlu1 %v12045_v31, %s5907_s15  ;;  %3365 = vperm.xlu0 %5795, %v7676_v18  }
 0x336   :  { %v3176_v15 = vpop.permute.xlu0 %3175  ;;  %5799 = vset.pattern.permute.xlu1 %v12038_v27 }
 0x337   :  { %v8125_v57 = vsel %vm3231_vm6, %v3176_v15, %v7966_v11  ;;  %v3208_v17 = vpop.permute.xlu1 %3207 }
 0x338   :  { %12046 = vst [vmem:[#allocation39_spill] sm:$0xff] %v8125_v57  ;;  %v8129_v20 = vsel %vm3231_vm6, %v3208_v17, %v8091_v48  ;;  %3594 = vperm.xlu2 %5798, %v12041_v24   ;;  %v12060_v57 = vmov 0  }
 0x339   :  { %12047 = vst [vmem:[#allocation248_spill] sm:$0xff] %v8129_v20  ;;  %v12100_v20 = vld [vmem:[#allocation93_spill] sm:$0xff] }
 0x33a   :  { %v3222_v23 = vpop.permute.xlu2 %3221 }
 0x33b   :  { %v8134_v50 = vsel %vm3231_vm6, %v3222_v23, %v8116_v25 }
 0x33c   :  { %12048 = vst [vmem:[#allocation249_spill] sm:$0xff] %v8134_v50  ;;  %v12069_v50 = vld [vmem:[#allocation34_spill] sm:$0xff] }
 0x33d   :  { %3697 = vrot.lane.b32.xlu1 %v12037_v52, %s5909_s18  ;;  %3707 = vrot.lane.b32.xlu0 %v6859_v43, %s5909_s18 }
 0x33e   :  { %v3182_v18 = vpop.permute.xlu0 %3181 }
 0x33f   :  { %v8142_v11 = vsel %vm3231_vm6, %v7941_v61, %v3182_v18  ;;  %v8145_v1 = vsel %vm3231_vm6, %v3182_v18, %v3176_v15  ;;  %v8147_v39 = vpop.permute.xlu1 %3213 }
 0x340   :  { %12049 = vst [vmem:[#allocation250_spill] sm:$0xff] %v8142_v11  ;;  %v8151_v6 = vsel %vm3231_vm6, %v8147_v39, %v3208_v17  ;;  %3422 = vrot.lane.b32.xlu2 %v12052_v16, %s5907_s15  ;;  %v12063_v11 = vld [vmem:[#allocation55_spill] sm:$0xff] }
 0x341   :  { %12050 = vst [vmem:[#allocation251_spill] sm:$0xff] %v8145_v1  ;;  %5800 = vset.pattern.permute.xlu2 %v12053_v63  ;;  %v12062_v1 = vld [vmem:[#allocation90_spill] sm:$0xff] }
 0x342   :  { %12051 = vst [vmem:[#allocation252_spill] sm:$0xff] %v8151_v6  ;;  %v8156_v14 = vpop.permute.xlu2 %3460  ;;  %v12099_v6 = vld [vmem:[#allocation72_spill] sm:$0xff] }
 0x343   :  { %12054 = vst [vmem:[#allocation8_spill] sm:$0xff] %v8156_v14  ;;  %v12068_v14 = vld [vmem:[#allocation65_spill] sm:$0xff] }
 0x345   :  { %3590 = vperm.xlu1 %5799, %v12055_v55   ;;  %3353 = vperm.xlu0 %5795, %v12055_v55  }
 0x346   :  { %v3188_v61 = vpop.permute.xlu0 %3187 }
 0x347   :  { %v8162_v15 = vsel %vm3231_vm6, %v7958_v59, %v3188_v61  ;;  %v8166_v17 = vsel %vm3231_vm6, %v3188_v61, %v8043_v51  ;;  %v8168_v18 = vpop.permute.xlu1 %3219  ;;  %v4013_v59 = vld [vmem:[%s11236_s4 + $0x38] sm:$0xff] }
 0x348   :  { %12056 = vst [vmem:[#allocation187_spill] sm:$0xff] %v8162_v15  ;;  %v8172_v42 = vsel %vm3231_vm6, %v8168_v18, %v3222_v23  ;;  %3699 = vrot.lane.b32.xlu2 %v11980_v5, %s5909_s18  ;;  %v12061_v51 = vld [vmem:[#allocation49_spill] sm:$0xff]  ;;  %v2103_v23 = vsel %vm2099_vm1, %v12063_v11, %v12062_v1 }
 0x349   :  { %12057 = vst [vmem:[#allocation253_spill] sm:$0xff] %v8166_v17 }
 0x34a   :  { %12058 = vst [vmem:[#allocation254_spill] sm:$0xff] %v8172_v42  ;;  %v8176_v3 = vpop.permute.xlu2 %3454  ;;  %v12070_v42 = vld [vmem:[#allocation56_spill] sm:$0xff] }
 0x34b   :  { %12059 = vst [vmem:[#allocation255_spill] sm:$0xff] %v8176_v3  ;;  %v8202_v8 = vmul.f32 %v12070_v42, %v12069_v50  ;;  %v12072_v3 = vld [vmem:[#allocation76_spill] sm:$0xff] }
 0x34d   :  { %5801 = vset.pattern.permute.xlu1 %v12060_v57  ;;  %3414 = vrot.lane.b32.xlu0 %v12061_v51, %s5907_s15  ;;  %12071 = vst [vmem:[#allocation34_spill] sm:$0xff] %v8202_v8  ;;  %v12083_v8 = vld [vmem:[#allocation54_spill] sm:$0xff]  ;;  %v12097_v57 = vld [vmem:[#allocation69_spill] sm:$0xff] }
 0x34e   :  { %4051 = vperm.xlu1 %5801, %v4013_v59   ;;  %v3194_v61 = vpop.permute.xlu0 %3193  ;;  %v1858_v59 = vsel %vm1854_vm3, %v12068_v14, %v12067_v10  ;;  %v12081_v14 = vld [vmem:[#allocation48_spill] sm:$0xff]  ;;  %v8224_v44 = vmul.f32 %v12083_v8, %v12037_v52 }
 0x34f   :  { %v8189_v17 = vsel %vm3231_vm6, %v7974_v35, %v3194_v61  ;;  %v8192_v15 = vsel %vm3231_vm6, %v3194_v61, %v3196_v36  ;;  %v8194_v62 = vpop.permute.xlu1 %3225  ;;  %v2372_v35 = vsel %vm2368_vm4, %v12073_v60, %v12072_v3  ;;  %v12076_v61 = vld [vmem:[#allocation45_spill] sm:$0xff]  ;;  %v8220_v7 = vmul.f32 %v12081_v14, %v11985_v0  ;;  %v12090_v0 = vld [vmem:[#allocation215_spill] sm:$0xff]  ;;  %v12102_v10 = vld [vmem:[#allocation92_spill] sm:$0xff] }
 0x350   :  { %12064 = vst [vmem:[#allocation256_spill] sm:$0xff] %v8189_v17  ;;  %3863 = vperm.xlu2 %5800, %v12041_v24   ;;  %v12074_v17 = vld [vmem:[#allocation211_spill] sm:$0xff]  ;;  %v12078_v24 = vld [vmem:[#allocation36_spill] sm:$0xff]  ;;  %v8241_v52 = vmul.f32 %v12076_v61, %v12052_v16  ;;  %v12098_v3 = vld [vmem:[#allocation89_spill] sm:$0xff] }
 0x351   :  { %12065 = vst [vmem:[#allocation257_spill] sm:$0xff] %v8192_v15  ;;  %v2173_v11 = vmul.f32 %v12074_v17, %v2103_v23  ;;  %v8212_v15 = vmul.f32 %v12076_v61, %v12045_v31  ;;  %v12085_v23 = vld [vmem:[#allocation59_spill] sm:$0xff] }
 0x352   :  { %12066 = vst [vmem:[#allocation258_spill] sm:$0xff] %v8194_v62  ;;  %v8208_v36 = vpop.permute.xlu2 %3369  ;;  %v12079_v62 = vld [vmem:[#allocation20_spill] sm:$0xff]  ;;  %v8228_v60 = vmul.f32 %v12085_v23, %v6684_v12  ;;  %v8245_v12 = vmul.f32 %v12083_v8, %v11980_v5  ;;  %v2378_v5 = vsel %vm2368_vm4, %v12099_v6, %v12098_v3 }
 0x353   :  { %12075 = vst [vmem:[#allocation56_spill] sm:$0xff] %v8208_v36  ;;  %v8216_v56 = vmul.f32 %v12079_v62, %v12078_v24  ;;  %v12087_v36 = vld [vmem:[#allocation214_spill] sm:$0xff]  ;;  %v12107_v3 = vld [vmem:[#allocation80_spill] sm:$0xff] }
 0x354   :  { %12077 = vst [vmem:[#allocation211_spill] sm:$0xff] %v8212_v15  ;;  %v1928_v40 = vmul.f32 %v12087_v36, %v1858_v59  ;;  %v12089_v15 = vld [vmem:[#allocation60_spill] sm:$0xff]  ;;  %v8249_v59 = vmul.f32 %v12081_v14, %v6859_v43 }
 0x355   :  { %12080 = vst [vmem:[#allocation45_spill] sm:$0xff] %v8216_v56  ;;  %v2109_v4 = vsel %vm2099_vm1, %v12089_v15, %v12088_v38  ;;  %v8236_v56 = vmul.f32 %v12079_v62, %v12061_v51  ;;  %v12096_v38 = vld [vmem:[#allocation86_spill] sm:$0xff] }
 0x356   :  { %12082 = vst [vmem:[#allocation36_spill] sm:$0xff] %v8220_v7  ;;  %v2442_v7 = vmul.f32 %v12090_v0, %v2372_v35  ;;  %v2375_v35 = vsel %vm2368_vm4, %v12095_v19, %v12094_v49  ;;  %v1864_v1 = vsel %vm1854_vm3, %v12097_v57, %v12096_v38  ;;  %3689 = vrot.lane.b32.xlu1 %v12045_v31, %s5909_s18  ;;  %v3200_v43 = vpop.permute.xlu0 %3199  ;;  %v12101_v51 = vld [vmem:[#allocation58_spill] sm:$0xff]  ;;  %v12103_v19 = vld [vmem:[#allocation75_spill] sm:$0xff] }
 0x357   :  { %12084 = vst [vmem:[#allocation20_spill] sm:$0xff] %v8224_v44  ;;  %v12093_v44 = vld [vmem:[#allocation24_spill] sm:$0xff]  ;;  %v1867_v49 = vsel %vm1854_vm3, %v12103_v19, %v12102_v10  ;;  %v8273_v57 = vsel %vm3231_vm6, %v3200_v43, %v8107_v26  ;;  %v8275_v38 = vpop.permute.xlu1 %3452  ;;  %5802 = vset.pattern.permute.xlu1 %v12038_v27  ;;  %v12106_v31 = vld [vmem:[#allocation22_spill] sm:$0xff]  ;;  %v8288_v19 = vmul.f32 %v12032_v32, %v6899_v34 }
 0x358   :  { %12086 = vst [vmem:[#allocation48_spill] sm:$0xff] %v8228_v60  ;;  %v12092_v60 = vld [vmem:[#allocation180_spill] sm:$0xff]  ;;  %v2237_v15 = vmul.f32 %v12093_v44, %v2173_v11  ;;  %v2106_v11 = vsel %vm2099_vm1, %v12101_v51, %v12100_v20  ;;  %v2181_v44 = vmul.f32 %v12074_v17, %v2109_v4  ;;  %v2000_v6 = vmul.f32 %v12106_v31, %v1928_v40  ;;  %v12111_v40 = vld [vmem:[#allocation103_spill] sm:$0xff]  ;;  %v12114_v10 = vld [vmem:[#allocation78_spill] sm:$0xff] }
 0x359   :  { %12091 = vst [vmem:[#allocation54_spill] sm:$0xff] %v8249_v59  ;;  %3349 = vperm.xlu0 %5795, %v12092_v60   ;;  %v1861_v51 = vsel %vm1854_vm3, %v12108_v45, %v12107_v3  ;;  %v8284_v4 = vmul.f32 %v12085_v23, %v6880_v29  ;;  %3412 = vrot.lane.b32.xlu2 %v12078_v24, %s5907_s15  ;;  %v12113_v45 = vld [vmem:[#allocation96_spill] sm:$0xff]  ;;  %v12118_v59 = vld [vmem:[#allocation30_spill] sm:$0xff] }
 0x35a   :  { %12104 = vst [vmem:[#allocation59_spill] sm:$0xff] %v8273_v57  ;;  %v1936_v26 = vmul.f32 %v12087_v36, %v1864_v1  ;;  %v12112_v57 = vld [vmem:[#allocation63_spill] sm:$0xff]  ;;  %v2381_v29 = vsel %vm2368_vm4, %v12114_v10, %v12113_v45  ;;  %v2269_v20 = vadd.f32 %v2237_v15, %v2000_v6  ;;  %v2446_v3 = vmul.f32 %v12090_v0, %v2375_v35  ;;  %v12116_v1 = vld [vmem:[#allocation37_spill] sm:$0xff]  ;;  %v12119_v15 = vld [vmem:[#allocation106_spill] sm:$0xff] }
 0x35b   :  { %12105 = vst [vmem:[#allocation214_spill] sm:$0xff] %v8275_v38  ;;  %v2450_v38 = vmul.f32 %v12090_v0, %v2378_v5  ;;  %v2112_v27 = vsel %vm2099_vm1, %v12112_v57, %v12111_v40  ;;  %v2177_v34 = vmul.f32 %v12074_v17, %v2106_v11  ;;  %v1940_v31 = vmul.f32 %v12087_v36, %v1867_v49  ;;  %v12120_v35 = vld [vmem:[#allocation4_spill] sm:$0xff]  ;;  %v12124_v10 = vld [vmem:[#allocation15_spill] sm:$0xff]  ;;  %v12125_v45 = vld [vmem:[#allocation110_spill] sm:$0xff] }
 0x35c   :  { %12109 = vst [vmem:[#allocation215_spill] sm:$0xff] %v8284_v4  ;;  %v2506_v4 = vmul.f32 %v12116_v1, %v2442_v7  ;;  %v8307_v5 = vmul.f32 %v12087_v36, %v1861_v51  ;;  %v2245_v57 = vmul.f32 %v12118_v59, %v2181_v44  ;;  %v8312_v40 = vmul.f32 %v12010_v54, %v6919_v2  ;;  %v12123_v51 = vld [vmem:[#allocation29_spill] sm:$0xff]  ;;  %v12127_v1 = vld [vmem:[#allocation199_spill] sm:$0xff] }
 0x35d   :  { %12110 = vst [vmem:[#allocation180_spill] sm:$0xff] %v8288_v19  ;;  %v8303_v19 = vpop.permute.xlu2 %3446  ;;  %v2185_v6 = vmul.f32 %v12074_v17, %v2112_v27  ;;  %v2115_v11 = vsel %vm2099_vm1, %v12120_v35, %v12119_v15  ;;  %v2454_v49 = vmul.f32 %v12090_v0, %v2381_v29  ;;  %v2514_v44 = vmul.f32 %v12124_v10, %v2450_v38  ;;  %v12126_v59 = vld [vmem:[#allocation85_spill] sm:$0xff]  ;;  %v12129_v29 = vld [vmem:[#allocation16_spill] sm:$0xff] }
 0x35e   :  { %12115 = vst [vmem:[#allocation259_spill] sm:$0xff] %v8303_v19  ;;  %v12121_v19 = vld [vmem:[#allocation79_spill] sm:$0xff]  ;;  %v2118_v2 = vsel %vm2099_vm1, %v12020_v30, %v12125_v45  ;;  %v8330_v27 = vmul.f32 %v12079_v62, %v12126_v59  ;;  %v8333_v35 = vadd.f32 %v2506_v4, %v2269_v20  ;;  %v8336_v15 = vmul.f32 %v12129_v29, %v2446_v3  ;;  %v3206_v10 = vpop.permute.xlu0 %3205  ;;  %v12137_v4 = vld [vmem:[#allocation38_spill] sm:$0xff] }
 0x35f   :  { %12117 = vst [vmem:[#allocation260_spill] sm:$0xff] %v8307_v5  ;;  %v8321_v7 = vmul.f32 %v12070_v42, %v12121_v19  ;;  %v2008_v5 = vmul.f32 %v12123_v51, %v1936_v26  ;;  %v12131_v19 = vld [vmem:[#allocation35_spill] sm:$0xff]  ;;  %3586 = vperm.xlu1 %5802, %v12092_v60   ;;  %v2189_v45 = vmul.f32 %v12074_v17, %v2115_v11  ;;  %v8351_v3 = vpop.permute.xlu1 %3731  ;;  %v12143_v11 = vld [vmem:[#allocation104_spill] sm:$0xff] }
 0x360   :  { %12128 = vst [vmem:[#allocation29_spill] sm:$0xff] %v8333_v35  ;;  %v12133_v26 = vld [vmem:[#allocation23_spill] sm:$0xff]  ;;  %v8346_v59 = vsel %vm3231_vm6, %v8060_v46, %v3206_v10  ;;  %v8349_v20 = vsel %vm3231_vm6, %v3206_v10, %v3200_v43  ;;  %v12142_v10 = vld [vmem:[#allocation81_spill] sm:$0xff] }
 0x361   :  { %12122 = vst [vmem:[#allocation261_spill] sm:$0xff] %v8321_v7  ;;  %3345 = vperm.xlu0 %5795, %v12127_v1   ;;  %v8339_v7 = vmul.f32 %v12131_v19, %v2177_v34  ;;  %v2012_v38 = vmul.f32 %v12133_v26, %v1940_v31  ;;  %v2277_v30 = vadd.f32 %v2245_v57, %v2008_v5  ;;  %v12139_v60 = vld [vmem:[#allocation95_spill] sm:$0xff]  ;;  %v12179_v26 = vld [vmem:[#allocation126_spill] sm:$0xff] }
 0x362   :  { %12130 = vst [vmem:[#allocation199_spill] sm:$0xff] %v8336_v15  ;;  %v2249_v34 = vmul.f32 %v12137_v4, %v2185_v6  ;;  %v12138_v15 = vld [vmem:[#allocation40_spill] sm:$0xff]  ;;  %v2193_v31 = vmul.f32 %v12074_v17, %v2118_v2  ;;  %v8358_v57 = vmul.f32 %v12076_v61, %v12139_v60  ;;  %3691 = vrot.lane.b32.xlu2 %v12052_v16, %s5909_s18  ;;  %v12141_v5 = vld [vmem:[#allocation99_spill] sm:$0xff]  ;;  %v12148_v16 = vld [vmem:[#allocation105_spill] sm:$0xff] }
 0x363   :  { %12132 = vst [vmem:[#allocation35_spill] sm:$0xff] %v8339_v7  ;;  %v2518_v7 = vmul.f32 %v12138_v15, %v2454_v49  ;;  %v8362_v46 = vadd.f32 %v2514_v44, %v2277_v30  ;;  %v1870_v43 = vsel %vm1854_vm3, %v12142_v10, %v12141_v5  ;;  %v12144_v35 = vld [vmem:[#allocation3_spill] sm:$0xff]  ;;  %v12145_v49 = vld [vmem:[#allocation101_spill] sm:$0xff]  ;;  %v1873_v44 = vsel %vm1854_vm3, %v12025_v9, %v12148_v16  ;;  %v12149_v30 = vld [vmem:[#allocation108_spill] sm:$0xff] }
 0x364   :  { %12134 = vst [vmem:[#allocation262_spill] sm:$0xff] %v8346_v59  ;;  %v2641_v6 = vsel %vm2637_vm2, %v12144_v35, %v12143_v11  ;;  %v8372_v2 = vmul.f32 %v12083_v8, %v12145_v49  ;;  %v12146_v60 = vld [vmem:[#allocation115_spill] sm:$0xff]  ;;  %v12152_v5 = vld [vmem:[#allocation33_spill] sm:$0xff]  ;;  %v12154_v49 = vld [vmem:[#allocation102_spill] sm:$0xff] }
 0x365   :  { %12135 = vst [vmem:[#allocation263_spill] sm:$0xff] %v8349_v20  ;;  %v12147_v20 = vld [vmem:[#allocation9_spill] sm:$0xff]  ;;  %v8384_v10 = vpop.permute.xlu2 %3723  ;;  %v8387_v15 = vmul.f32 %v12152_v5, %v2189_v45  ;;  %v12155_v35 = vld [vmem:[#allocation84_spill] sm:$0xff]  ;;  %v12157_v4 = vld [vmem:[#allocation7_spill] sm:$0xff] }
 0x366   :  { %12136 = vst [vmem:[#allocation264_spill] sm:$0xff] %v8351_v3  ;;  %v2281_v3 = vadd.f32 %v2249_v34, %v2012_v38  ;;  %v2121_v59 = vsel %vm2099_vm1, %v12147_v20, %v12146_v60  ;;  %v2384_v38 = vsel %vm2368_vm4, %v12155_v35, %v12154_v49  ;;  %v12156_v34 = vld [vmem:[#allocation107_spill] sm:$0xff]  ;;  %v12158_v60 = vld [vmem:[#allocation113_spill] sm:$0xff]  ;;  %v12162_v45 = vld [vmem:[#allocation212_spill] sm:$0xff]  ;;  %v1948_v35 = vmul.f32 %v12087_v36, %v1873_v44 }
 0x367   :  { %12140 = vst [vmem:[#allocation265_spill] sm:$0xff] %v8362_v46  ;;  %v8382_v46 = vmul.f32 %v12081_v14, %v12149_v30  ;;  %v2644_v20 = vsel %vm2637_vm2, %v12157_v4, %v12156_v34  ;;  %v8397_v9 = vmul.f32 %v12085_v23, %v12158_v60  ;;  %v2257_v30 = vmul.f32 %v12028_v13, %v2193_v31  ;;  %v12163_v49 = vld [vmem:[#allocation109_spill] sm:$0xff]  ;;  %v12165_v60 = vld [vmem:[#allocation67_spill] sm:$0xff]  ;;  %v12174_v13 = vld [vmem:[#allocation74_spill] sm:$0xff] }
 0x368   :  { %12151 = vst [vmem:[#allocation9_spill] sm:$0xff] %v8384_v10  ;;  %v8399_v16 = vadd.f32 %v2518_v7, %v2281_v3  ;;  %v8403_v10 = vmul.f32 %v12087_v36, %v1870_v43  ;;  %v2197_v5 = vmul.f32 %v12074_v17, %v2121_v59  ;;  %v2387_v4 = vsel %vm2368_vm4, %v12026_v58, %v12163_v49  ;;  %v12166_v43 = vld [vmem:[#allocation112_spill] sm:$0xff]  ;;  %v3212_v58 = vpop.permute.xlu0 %3211  ;;  %v12168_v59 = vld [vmem:[#allocation114_spill] sm:$0xff]  ;;  %v12169_v44 = vld [vmem:[#allocation71_spill] sm:$0xff] }
 0x369   :  { %12150 = vst [vmem:[#allocation104_spill] sm:$0xff] %v8382_v46  ;;  %v12164_v46 = vld [vmem:[#allocation111_spill] sm:$0xff]  ;;  %5803 = vset.pattern.permute.xlu0 %v12053_v63  ;;  %v2458_v3 = vmul.f32 %v12090_v0, %v2384_v38  ;;  %v2715_v31 = vmul.f32 %v12162_v45, %v2644_v20  ;;  %3404 = vrot.lane.b32.xlu1 %v12069_v50, %s5907_s15  ;;  %v12173_v63 = vld [vmem:[#allocation118_spill] sm:$0xff] }
 0x36a   :  { %12153 = vst [vmem:[#allocation266_spill] sm:$0xff] %v8387_v15  ;;  %v2711_v15 = vmul.f32 %v12162_v45, %v2641_v6  ;;  %v2647_v7 = vsel %vm2637_vm2, %v12165_v60, %v12164_v46  ;;  %v12167_v6 = vld [vmem:[#allocation94_spill] sm:$0xff]  ;;  %3867 = vperm.xlu0 %5803, %v7616_v21   ;;  %v8431_v20 = vsel %vm3231_vm6, %v8091_v48, %v3212_v58  ;;  %v8437_v60 = vpop.permute.xlu1 %3444  ;;  %v12172_v21 = vld [vmem:[#allocation28_spill] sm:$0xff] }
 0x36b   :  { %12159 = vst [vmem:[#allocation107_spill] sm:$0xff] %v8397_v9  ;;  %v1876_v17 = vsel %vm1854_vm3, %v12167_v6, %v12166_v43  ;;  %v8435_v6 = vsel %vm3231_vm6, %v3212_v58, %v8147_v39  ;;  %v2462_v49 = vmul.f32 %v12090_v0, %v2387_v4  ;;  %3859 = vperm.xlu2 %5800, %v12055_v55   ;;  %v12175_v39 = vld [vmem:[#allocation122_spill] sm:$0xff]  ;;  %v12178_v4 = vld [vmem:[#allocation11_spill] sm:$0xff] }
 0x36c   :  { %12160 = vst [vmem:[#allocation267_spill] sm:$0xff] %v8399_v16  ;;  %v12170_v16 = vld [vmem:[#allocation116_spill] sm:$0xff]  ;;  %v2775_v43 = vmul.f32 %v12172_v21, %v2711_v15  ;;  %v2020_v48 = vmul.f32 %v12030_v47, %v1948_v35  ;;  %v2656_v58 = vsel %vm2637_vm2, %v12023_v53, %v12175_v39  ;;  %v12180_v55 = vld [vmem:[#allocation82_spill] sm:$0xff] }
 0x36d   :  { %12161 = vst [vmem:[#allocation268_spill] sm:$0xff] %v8403_v10  ;;  %v2650_v10 = vsel %vm2637_vm2, %v12169_v44, %v12168_v59  ;;  %v2390_v38 = vsel %vm2368_vm4, %v12003_v33, %v12170_v16  ;;  %v2719_v44 = vmul.f32 %v12162_v45, %v2647_v7  ;;  %v2653_v33 = vsel %vm2637_vm2, %v12174_v13, %v12173_v63  ;;  %v8461_v47 = vpop.permute.xlu2 %3875 }
 0x36e   :  { %12171 = vst [vmem:[#allocation212_spill] sm:$0xff] %v8437_v60  ;;  %v1952_v16 = vmul.f32 %v12087_v36, %v1876_v17  ;;  %v12176_v60 = vld [vmem:[#allocation117_spill] sm:$0xff]  ;;  %v2779_v7 = vmul.f32 %v12178_v4, %v2715_v31  ;;  %v2723_v9 = vmul.f32 %v12162_v45, %v2650_v10  ;;  %v2466_v13 = vmul.f32 %v12090_v0, %v2390_v38  ;;  %v12182_v17 = vld [vmem:[#allocation44_spill] sm:$0xff]  ;;  %v12186_v38 = vld [vmem:[#allocation46_spill] sm:$0xff] }
 0x36f   :  { %v8453_v15 = vmul.f32 %v12032_v32, %v12176_v60  ;;  %v2659_v35 = vsel %vm2637_vm2, %v12180_v55, %v12179_v26  ;;  %12181 = vst [vmem:[#allocation94_spill] sm:$0xff] %v8461_v47  ;;  %v2261_v36 = vmul.f32 %v12002_v41, %v2197_v5  ;;  %v8465_v53 = vmul.f32 %v12182_v17, %v2458_v3  ;;  %v12184_v60 = vld [vmem:[#allocation120_spill] sm:$0xff]  ;;  %v12187_v5 = vld [vmem:[#allocation25_spill] sm:$0xff] }
 0x370   :  { %v2727_v32 = vmul.f32 %v12162_v45, %v2653_v33  ;;  %v8470_v31 = vmul.f32 %v12010_v54, %v12184_v60  ;;  %v8473_v10 = vadd.f32 %v8236_v56, %v2775_v43  ;;  %v2526_v0 = vmul.f32 %v12033_v37, %v2462_v49  ;;  %v12191_v56 = vld [vmem:[#allocation18_spill] sm:$0xff] }
 0x371   :  { %12177 = vst [vmem:[#allocation111_spill] sm:$0xff] %v8453_v15  ;;  %v2783_v55 = vmul.f32 %v12186_v38, %v2719_v44  ;;  %v2731_v47 = vmul.f32 %v12162_v45, %v2656_v58  ;;  %v2289_v15 = vadd.f32 %v2257_v30, %v2020_v48  ;;  %v2024_v41 = vmul.f32 %v12187_v5, %v1952_v16  ;;  %v12193_v16 = vld [vmem:[#allocation31_spill] sm:$0xff]  ;;  %v3218_v30 = vpop.permute.xlu0 %3217  ;;  %v12196_v58 = vld [vmem:[#allocation100_spill] sm:$0xff]  ;;  %v12216_v37 = vld [vmem:[#allocation146_spill] sm:$0xff] }
 0x372   :  { %12183 = vst [vmem:[#allocation114_spill] sm:$0xff] %v8465_v53  ;;  %v2735_v3 = vmul.f32 %v12162_v45, %v2659_v35  ;;  %v12188_v53 = vld [vmem:[#allocation124_spill] sm:$0xff]  ;;  %v8485_v54 = vadd.f32 %v8241_v52, %v2779_v7  ;;  %v2787_v43 = vmul.f32 %v12191_v56, %v2723_v9  ;;  %v8490_v44 = vperm.slane %v7981_v22, 3  ;;  %3681 = vrot.lane.b32.xlu1 %v12078_v24, %s5909_s18  ;;  %v12195_v48 = vld [vmem:[#allocation131_spill] sm:$0xff]  ;;  %v8508_v7 = vpop.permute.xlu1 %3721 }
 0x373   :  { %12185 = vst [vmem:[#allocation28_spill] sm:$0xff] %v8473_v10  ;;  %v8482_v33 = vmul.f32 %v12070_v42, %v12188_v53  ;;  %v12192_v10 = vld [vmem:[#allocation47_spill] sm:$0xff]  ;;  %3675 = vrot.lane.b32.xlu0 %v12193_v16, %s5909_s18  ;;  %v12194_v45 = vld [vmem:[#allocation52_spill] sm:$0xff]  ;;  %v2639_v52 = vsel %vm2637_vm2, %v12196_v58, %v12195_v48  ;;  %v8502_v9 = vsel %vm3231_vm6, %v8116_v25, %v3218_v30 }
 0x374   :  { %12190 = vst [vmem:[#allocation122_spill] sm:$0xff] %v8485_v54  ;;  %v2530_v49 = vmul.f32 %v12192_v10, %v2466_v13  ;;  %v2791_v42 = vmul.f32 %v12194_v45, %v2727_v32  ;;  %v8506_v13 = vsel %vm3231_vm6, %v3218_v30, %v8168_v18  ;;  %v8510_v24 = vadd.f32 %v2526_v0, %v2289_v15  ;;  %v12202_v53 = vld [vmem:[#allocation128_spill] sm:$0xff]  ;;  %v12203_v54 = vld [vmem:[#allocation121_spill] sm:$0xff]  ;;  %v12204_v18 = vld [vmem:[#allocation123_spill] sm:$0xff] }
 0x375   :  { %12189 = vst [vmem:[#allocation118_spill] sm:$0xff] %v8482_v33  ;;  %v8513_v35 = vadd.f32 %v8245_v12, %v2783_v55  ;;  %v2795_v32 = vmul.f32 %v12031_v28, %v2731_v47  ;;  %v8518_v58 = vmul.f32 %v12079_v62, %v12202_v53  ;;  %3406 = vrot.lane.b32.xlu2 %v12193_v16, %s5907_s15  ;;  %v12205_v10 = vld [vmem:[#allocation19_spill] sm:$0xff]  ;;  %v8527_v0 = vperm.slane %v7981_v22, 0  ;;  %v12206_v12 = vld [vmem:[#allocation54_spill] sm:$0xff]  ;;  %v12208_v47 = vld [vmem:[#allocation129_spill] sm:$0xff] }
 0x376   :  { %12197 = vst [vmem:[#allocation126_spill] sm:$0xff] %v8502_v9  ;;  %v2293_v25 = vadd.f32 %v2261_v36, %v2024_v41  ;;  %v2969_v30 = vsel %vm2962_vm5, %v12204_v18, %v12203_v54  ;;  %v2799_v15 = vmul.f32 %v12205_v10, %v2735_v3  ;;  %v8530_v55 = vadd.f32 %v12206_v12, %v2787_v43  ;;  %v12210_v16 = vld [vmem:[#allocation135_spill] sm:$0xff]  ;;  %v8540_v36 = vpop.permute.xlu2 %3438  ;;  %v12218_v12 = vld [vmem:[#allocation142_spill] sm:$0xff] }
 0x377   :  { %12198 = vst [vmem:[#allocation82_spill] sm:$0xff] %v8506_v13  ;;  %v2708_v53 = vmul.f32 %v8490_v44, %v2639_v52  ;;  %v8538_v41 = vmul.f32 %v12076_v61, %v12210_v16  ;;  %v12214_v3 = vld [vmem:[#allocation215_spill] sm:$0xff]  ;;  %v8549_v43 = vmul.f32 %v12081_v14, %v12216_v37  ;;  %v12220_v52 = vld [vmem:[#allocation180_spill] sm:$0xff]  ;;  %v12222_v61 = vld [vmem:[#allocation234_spill] sm:$0xff] }
 0x378   :  { %12199 = vst [vmem:[#allocation18_spill] sm:$0xff] %v8508_v7  ;;  %v8545_v5 = vadd.f32 %v12214_v3, %v2791_v42  ;;  %v8559_v16 = vmul.f32 %v12222_v61, %v2969_v30  ;;  %v8569_v14 = vadd.f32 %v8312_v40, %v2799_v15  ;;  %v12233_v15 = vld [vmem:[#allocation141_spill] sm:$0xff]  ;;  %v12250_v13 = vld [vmem:[#allocation76_spill] sm:$0xff]  ;;  %v12252_v9 = vld [vmem:[#allocation90_spill] sm:$0xff] }
 0x379   :  { %12200 = vst [vmem:[#allocation31_spill] sm:$0xff] %v8510_v24  ;;  %v12209_v24 = vld [vmem:[#allocation68_spill] sm:$0xff] }
 0x37a   :  { %12201 = vst [vmem:[#allocation131_spill] sm:$0xff] %v8513_v35  ;;  %v1856_v62 = vsel %vm1854_vm3, %v12209_v24, %v12208_v47  ;;  %v8542_v35 = vadd.f32 %v2530_v49, %v2293_v25  ;;  %v8553_v24 = vmul.f32 %v12083_v8, %v12218_v12  ;;  %v8562_v49 = vperm.slane %v7981_v22, 1  ;;  %v12224_v25 = vld [vmem:[#allocation150_spill] sm:$0xff]  ;;  %3582 = vperm.xlu1 %5802, %v12127_v1  }
 0x37b   :  { %12207 = vst [vmem:[#allocation100_spill] sm:$0xff] %v8530_v55  ;;  %v8556_v55 = vadd.f32 %v12220_v52, %v2795_v32  ;;  %v8566_v42 = vmul.f32 %v12085_v23, %v12224_v25  ;;  %v1925_v3 = vmul.f32 %v8527_v0, %v1856_v62  ;;  %v12227_v8 = vld [vmem:[#allocation130_spill] sm:$0xff]  ;;  %v12229_v52 = vld [vmem:[#allocation144_spill] sm:$0xff]  ;;  %v2645_v62 = vsel %vm2637_vm2, %v12156_v34, %v12233_v15  ;;  %v8604_v25 = vpop.permute.xlu1 %3602 }
 0x37c   :  { %12211 = vst [vmem:[#allocation121_spill] sm:$0xff] %v8538_v41  ;;  %v12232_v23 = vld [vmem:[#allocation138_spill] sm:$0xff]  ;;  %3851 = vperm.xlu0 %5803, %v12127_v1   ;;  %v12241_v34 = vld [vmem:[#allocation132_spill] sm:$0xff] }
 0x37d   :  { %12212 = vst [vmem:[#allocation19_spill] sm:$0xff] %v8540_v36  ;;  %v2642_v40 = vsel %vm2637_vm2, %v12143_v11, %v12232_v23  ;;  %v12239_v11 = vld [vmem:[#allocation223_spill] sm:$0xff]  ;;  %v12242_v15 = vld [vmem:[#allocation70_spill] sm:$0xff]  ;;  %v12248_v36 = vld [vmem:[#allocation252_spill] sm:$0xff] }
 0x37e   :  { %12213 = vst [vmem:[#allocation54_spill] sm:$0xff] %v8542_v35  ;;  %v12228_v35 = vld [vmem:[#allocation2_spill] sm:$0xff]  ;;  %v8602_v41 = vperm.slane %v12239_v11, 6  ;;  %v2370_v1 = vsel %vm2368_vm4, %v12242_v15, %v12241_v34  ;;  %v12247_v11 = vld [vmem:[#allocation248_spill] sm:$0xff]  ;;  %v3362_v7 = vpop.permute.xlu2 %3361 }
 0x37f   :  { %12215 = vst [vmem:[#allocation129_spill] sm:$0xff] %v8545_v5  ;;  %v2963_v32 = vsel %vm2962_vm5, %v12228_v35, %v12227_v8  ;;  %v12231_v5 = vld [vmem:[#allocation51_spill] sm:$0xff]  ;;  %v8590_v8 = vpop.permute.xlu0 %3223  ;;  %v12243_v35 = vld [vmem:[#allocation136_spill] sm:$0xff] }
 0x380   :  { %12217 = vst [vmem:[#allocation68_spill] sm:$0xff] %v8549_v43  ;;  %v2772_v37 = vmul.f32 %v12231_v5, %v2708_v53  ;;  %v8596_v53 = vperm.slane %v7981_v22, 6 }
 0x381   :  { %12219 = vst [vmem:[#allocation215_spill] sm:$0xff] %v8553_v24  ;;  %v12244_v24 = vld [vmem:[#allocation73_spill] sm:$0xff] }
 0x382   :  { %12221 = vst [vmem:[#allocation180_spill] sm:$0xff] %v8556_v55  ;;  %v12230_v55 = vld [vmem:[#allocation87_spill] sm:$0xff] }
 0x383   :  { %12223 = vst [vmem:[#allocation234_spill] sm:$0xff] %v8559_v16  ;;  %v2101_v30 = vsel %vm2099_vm1, %v12230_v55, %v12229_v52  ;;  %v8580_v16 = vperm.slane %v7981_v22, 2  ;;  %v12235_v55 = vld [vmem:[#allocation222_spill] sm:$0xff]  ;;  %v12245_v22 = vld [vmem:[#allocation145_spill] sm:$0xff] }
 0x384   :  { %12225 = vst [vmem:[#allocation269_spill] sm:$0xff] %v8566_v42  ;;  %v12237_v42 = vld [vmem:[#allocation209_spill] sm:$0xff]  ;;  %v2170_v43 = vmul.f32 %v8562_v49, %v2101_v30  ;;  %v2712_v30 = vmul.f32 %v8490_v44, %v2642_v40  ;;  %v8643_v40 = vmul.f32 %v12222_v61, %v2963_v32 }
 0x385   :  { %12226 = vst [vmem:[#allocation270_spill] sm:$0xff] %v8569_v14  ;;  %v8593_v14 = vperm.slane %v12235_v55, 6  ;;  %v8599_v12 = vperm.slane %v12237_v42, 6  ;;  %v1859_v55 = vsel %vm1854_vm3, %v12244_v24, %v12243_v35  ;;  %v2648_v42 = vsel %vm2637_vm2, %v12164_v46, %v12245_v22  ;;  %v12246_v52 = vld [vmem:[#allocation49_spill] sm:$0xff]  ;;  %v12249_v35 = vld [vmem:[#allocation139_spill] sm:$0xff]  ;;  %v12251_v22 = vld [vmem:[#allocation148_spill] sm:$0xff] }
 0x386   :  { %12234 = vst [vmem:[#allocation130_spill] sm:$0xff] %v8590_v8  ;;  %3683 = vrot.lane.b32.xlu2 %v12246_v52, %s5909_s18  ;;  %v3328_v8 = vmul.f32 %v8602_v41, %v12247_v11  ;;  %v3330_v24 = vmul.f32 %v8596_v53, %v8435_v6  ;;  %v2373_v46 = vsel %vm2368_vm4, %v12250_v13, %v12249_v35  ;;  %v12258_v35 = vld [vmem:[#allocation27_spill] sm:$0xff] }
 0x387   :  { %12236 = vst [vmem:[#allocation87_spill] sm:$0xff] %v8593_v14  ;;  %v3329_v15 = vmul.f32 %v8599_v12, %v8431_v20  ;;  %v2716_v52 = vmul.f32 %v8490_v44, %v2645_v62  ;;  %v2104_v11 = vsel %vm2099_vm1, %v12252_v9, %v12251_v22  ;;  %v2439_v13 = vmul.f32 %v8580_v16, %v2370_v1  ;;  %v4011_v9 = vld [vmem:[%s11236_s4 + $0x28] sm:$0xff]  ;;  %v12263_v1 = vld [vmem:[#allocation125_spill] sm:$0xff] }
 0x388   :  { %12238 = vst [vmem:[#allocation51_spill] sm:$0xff] %v8599_v12  ;;  %v8638_v20 = vmul.f32 %v3362_v7, %v3330_v24  ;;  %v2234_v62 = vmul.f32 %v12258_v35, %v2170_v43  ;;  %v2720_v33 = vmul.f32 %v8490_v44, %v2648_v42  ;;  %v12261_v24 = vld [vmem:[#allocation133_spill] sm:$0xff]  ;;  %v2174_v32 = vmul.f32 %v8562_v49, %v2104_v11 }
 0x389   :  { %12240 = vst [vmem:[#allocation138_spill] sm:$0xff] %v8604_v25  ;;  %v3331_v25 = vmul.f32 %v8593_v14, %v12248_v36  ;;  %v8634_v36 = vmul.f32 %v3362_v7, %v3328_v8  ;;  %v8636_v18 = vmul.f32 %v3362_v7, %v3329_v15  ;;  %v12259_v8 = vld [vmem:[#allocation26_spill] sm:$0xff]  ;;  %v2776_v42 = vmul.f32 %v12172_v21, %v2712_v30  ;;  %v5887_v30 = vld [vmem:[%s11234_s3 + $0x10] sm:$0xff] }
 0x38a   :  { %12255 = vst [vmem:[#allocation223_spill] sm:$0xff] %v8638_v20  ;;  %v1997_v15 = vmul.f32 %v12259_v8, %v1925_v3  ;;  %v2443_v20 = vmul.f32 %v8580_v16, %v2373_v46  ;;  %v8664_v3 = vpop.permute.xlu0 %3462  ;;  %v2780_v17 = vmul.f32 %v12178_v4, %v2716_v52  ;;  %v12271_v46 = vld [vmem:[#allocation14_spill] sm:$0xff] }
 0x38b   :  { %12253 = vst [vmem:[#allocation222_spill] sm:$0xff] %v8634_v36  ;;  %v8640_v6 = vmul.f32 %v3362_v7, %v3331_v25  ;;  %v1929_v25 = vmul.f32 %v8527_v0, %v1859_v55  ;;  %v12264_v36 = vmov 0   ;;  %v12268_v55 = vld [vmem:[#allocation127_spill] sm:$0xff]  ;;  %v2503_v60 = vmul.f32 %v12271_v46, %v2439_v13 }
 0x38c   :  { %12254 = vst [vmem:[#allocation209_spill] sm:$0xff] %v8636_v18  ;;  %v12260_v18 = vld [vmem:[#allocation119_spill] sm:$0xff]  ;;  %5804 = vset.pattern.permute.xlu1 %v12264_v36  ;;  %5807 = vset.pattern.permute.xlu0 %v12264_v36  ;;  %v8692_v13 = vadd.f32 %v8330_v27, %v2776_v42  ;;  %v12285_v27 = vld [vmem:[#allocation153_spill] sm:$0xff]  ;;  %v12286_v42 = vld [vmem:[#allocation154_spill] sm:$0xff] }
 0x38d   :  { %12256 = vst [vmem:[#allocation132_spill] sm:$0xff] %v8640_v6  ;;  %v2966_v7 = vsel %vm2962_vm5, %v12261_v24, %v12260_v18  ;;  %v12262_v6 = vld [vmem:[#allocation137_spill] sm:$0xff]  ;;  %v12269_v24 = vld [vmem:[#allocation140_spill] sm:$0xff]  ;;  %4041 = vperm.xlu1 %5804, %v4011_v9   ;;  %1967 = vperm.xlu0 %5807, %v5887_v30   ;;  %v12275_v9 = vld [vmem:[#allocation143_spill] sm:$0xff] }
 0x38e   :  { %12257 = vst [vmem:[#allocation70_spill] sm:$0xff] %v8643_v40  ;;  %v2972_v43 = vsel %vm2962_vm5, %v12263_v1, %v12262_v6  ;;  %v12266_v40 = vld [vmem:[#allocation261_spill] sm:$0xff]  ;;  %v2975_v11 = vsel %vm2962_vm5, %v12269_v24, %v12268_v55  ;;  %v8673_v1 = vpop.permute.xlu1 %3436  ;;  %3855 = vperm.xlu2 %5800, %v5887_v30   ;;  %v2967_v4 = vsel %vm2962_vm5, %v12260_v18, %v12275_v9  ;;  %v12283_v18 = vld [vmem:[#allocation151_spill] sm:$0xff] }
 0x38f   :  { %12265 = vst [vmem:[#allocation73_spill] sm:$0xff] %v8664_v3  ;;  %v8667_v35 = vadd.f32 %v12266_v40, %v2772_v37  ;;  %v8680_v3 = vmul.f32 %v12222_v61, %v2966_v7  ;;  %v2266_v37 = vadd.f32 %v2234_v62, %v1997_v15  ;;  %v2784_v40 = vmul.f32 %v12186_v38, %v2720_v33  ;;  %v12278_v7 = vld [vmem:[#allocation37_spill] sm:$0xff]  ;;  %v12279_v33 = vld [vmem:[#allocation159_spill] sm:$0xff]  ;;  %v12280_v15 = vld [vmem:[#allocation98_spill] sm:$0xff] }
 0x390   :  { %12270 = vst [vmem:[#allocation248_spill] sm:$0xff] %v8673_v1  ;;  %v8685_v52 = vmul.f32 %v12222_v61, %v2972_v43  ;;  %v12276_v1 = vld [vmem:[#allocation24_spill] sm:$0xff]  ;;  %v8696_v62 = vmul.f32 %v12222_v61, %v2975_v11  ;;  %v8701_v43 = vpop.permute.xlu2 %3428  ;;  %v8704_v30 = vadd.f32 %v8358_v57, %v2780_v17  ;;  %v12287_v61 = vld [vmem:[#allocation86_spill] sm:$0xff]  ;;  %v12292_v17 = vld [vmem:[#allocation147_spill] sm:$0xff] }
 0x391   :  { %12267 = vst [vmem:[#allocation49_spill] sm:$0xff] %v8667_v35  ;;  %v12273_v35 = vld [vmem:[#allocation22_spill] sm:$0xff]  ;;  %v2238_v14 = vmul.f32 %v12276_v1, %v2174_v32  ;;  %v1865_v11 = vsel %vm1854_vm3, %v12287_v61, %v12286_v42  ;;  %v8721_v57 = vadd.f32 %v8372_v2, %v2784_v40  ;;  %v12297_v40 = vld [vmem:[#allocation156_spill] sm:$0xff] }
 0x392   :  { %12272 = vst [vmem:[#allocation252_spill] sm:$0xff] %v8680_v3  ;;  %v2001_v24 = vmul.f32 %v12273_v35, %v1929_v25  ;;  %v2507_v3 = vmul.f32 %v12278_v7, %v2443_v20  ;;  %v2110_v25 = vsel %vm2099_vm1, %v12280_v15, %v12279_v33  ;;  %v12284_v35 = vld [vmem:[#allocation83_spill] sm:$0xff]  ;;  %v2651_v20 = vsel %vm2637_vm2, %v12168_v59, %v12285_v27  ;;  %v12295_v27 = vld [vmem:[#allocation152_spill] sm:$0xff] }
 0x393   :  { %12274 = vst [vmem:[#allocation76_spill] sm:$0xff] %v8685_v52  ;;  %v2376_v32 = vsel %vm2368_vm4, %v12284_v35, %v12283_v18  ;;  %v8718_v15 = vadd.f32 %v2503_v60, %v2266_v37  ;;  %v12294_v52 = vld [vmem:[#allocation149_spill] sm:$0xff]  ;;  %v2724_v2 = vmul.f32 %v8490_v44, %v2651_v20  ;;  %v1937_v37 = vmul.f32 %v8527_v0, %v1865_v11 }
 0x394   :  { %12277 = vst [vmem:[#allocation148_spill] sm:$0xff] %v8692_v13  ;;  %v12288_v13 = vld [vmem:[#allocation216_spill] sm:$0xff]  ;;  %v2270_v33 = vadd.f32 %v2238_v14, %v2001_v24  ;;  %v2973_v59 = vsel %vm2962_vm5, %v12262_v6, %v12294_v52  ;;  %v12296_v18 = vld [vmem:[#allocation93_spill] sm:$0xff]  ;;  %v2447_v60 = vmul.f32 %v8580_v16, %v2376_v32  ;;  %v2654_v14 = vsel %vm2637_vm2, %v12173_v63, %v12297_v40  ;;  %v8739_v24 = vpop.permute.xlu0 %3729  ;;  %v12303_v32 = vld [vmem:[#allocation103_spill] sm:$0xff] }
 0x395   :  { %12281 = vst [vmem:[#allocation90_spill] sm:$0xff] %v8701_v43  ;;  %v8716_v7 = vmul.f32 %v12288_v13, %v2967_v4  ;;  %v2107_v61 = vsel %vm2099_vm1, %v12296_v18, %v12295_v27  ;;  %v2182_v4 = vmul.f32 %v8562_v49, %v2110_v25  ;;  %v12301_v18 = vld [vmem:[#allocation92_spill] sm:$0xff]  ;;  %v5888_v63 = vld [vmem:[%s11234_s3 + $0x28] sm:$0xff]  ;;  %v12313_v43 = vld [vmem:[#allocation165_spill] sm:$0xff] }
 0x396   :  { %12282 = vst [vmem:[#allocation26_spill] sm:$0xff] %v8704_v30  ;;  %v12293_v30 = vld [vmem:[#allocation80_spill] sm:$0xff]  ;;  %v8751_v11 = vpop.permute.xlu1 %3715  ;;  %1982 = vperm.xlu0 %5807, %v5888_v63   ;;  %v2178_v40 = vmul.f32 %v8562_v49, %v2107_v61  ;;  %3673 = vrot.lane.b32.xlu2 %v12069_v50, %s5909_s18  ;;  %v2728_v63 = vmul.f32 %v8490_v44, %v2654_v14 }
 0x397   :  { %12289 = vst [vmem:[#allocation119_spill] sm:$0xff] %v8716_v7  ;;  %v1862_v35 = vsel %vm1854_vm3, %v12293_v30, %v12292_v17  ;;  %v12299_v30 = vld [vmem:[#allocation160_spill] sm:$0xff]  ;;  %v12300_v7 = vld [vmem:[#allocation162_spill] sm:$0xff]  ;;  %v2009_v14 = vmul.f32 %v12123_v51, %v1937_v37 }
 0x398   :  { %12290 = vst [vmem:[#allocation137_spill] sm:$0xff] %v8718_v15  ;;  %v2657_v6 = vsel %vm2637_vm2, %v12175_v39, %v12299_v30  ;;  %v1868_v25 = vsel %vm1854_vm3, %v12301_v18, %v12300_v7  ;;  %v12304_v15 = vmov 6   ;;  %v12306_v39 = vld [vmem:[#allocation158_spill] sm:$0xff]  ;;  %v12307_v30 = vld [vmem:[#allocation89_spill] sm:$0xff]  ;;  %v12308_v18 = vld [vmem:[#allocation164_spill] sm:$0xff]  ;;  %v8772_v61 = vmul.f32 %v8527_v0, %v1862_v35 }
 0x399   :  { %12291 = vst [vmem:[#allocation261_spill] sm:$0xff] %v8721_v57  ;;  %v12302_v57 = vld [vmem:[#allocation163_spill] sm:$0xff]  ;;  %5805 = vset.pattern.permute.xlu1 %v12304_v15  ;;  %v2379_v52 = vsel %vm2368_vm4, %v12307_v30, %v12306_v39  ;;  %v2660_v7 = vsel %vm2637_vm2, %v12179_v26, %v12308_v18  ;;  %v8766_v15 = vld [vmem:[%s11234_s3] sm:$0xff]  ;;  %v12312_v18 = vmov 7   ;;  %v12314_v50 = vld [vmem:[#allocation96_spill] sm:$0xff] }
 0x39a   :  { %12298 = vst [vmem:[#allocation127_spill] sm:$0xff] %v8739_v24  ;;  %v2113_v20 = vsel %vm2099_vm1, %v12303_v32, %v12302_v57  ;;  %3341 = vperm.xlu1 %5805, %v8766_v15   ;;  %v8775_v32 = vmul.f32 %v12288_v13, %v2973_v59  ;;  %v12311_v30 = vld [vmem:[#allocation30_spill] sm:$0xff]  ;;  %5806 = vset.pattern.permute.xlu2 %v12312_v18 }
 0x39b   :  { %12305 = vst [vmem:[#allocation14_spill] sm:$0xff] %v8751_v11  ;;  %v2246_v26 = vmul.f32 %v12311_v30, %v2182_v4  ;;  %v2732_v11 = vmul.f32 %v8490_v44, %v2657_v6  ;;  %v1941_v57 = vmul.f32 %v8527_v0, %v1868_v25  ;;  %v2186_v38 = vmul.f32 %v8562_v49, %v2113_v20  ;;  %v12319_v20 = vld [vmem:[#allocation155_spill] sm:$0xff] }
 0x39c   :  { %12309 = vst [vmem:[#allocation143_spill] sm:$0xff] %v8772_v61  ;;  %v2382_v35 = vsel %vm2368_vm4, %v12314_v50, %v12313_v43  ;;  %v8786_v61 = vpop.permute.xlu2 %3705  ;;  %v2788_v59 = vmul.f32 %v12191_v56, %v2724_v2  ;;  %v2451_v4 = vmul.f32 %v8580_v16, %v2379_v52  ;;  %v2736_v18 = vmul.f32 %v8490_v44, %v2660_v7  ;;  %v4012_v2 = vld [vmem:[%s11236_s4 + $0x30] sm:$0xff]  ;;  %v12321_v7 = vld [vmem:[#allocation106_spill] sm:$0xff]  ;;  %v12325_v43 = vld [vmem:[#allocation167_spill] sm:$0xff]  ;;  %v8817_v30 = vpop.permute.xlu0 %3606 }
 0x39d   :  { %12310 = vst [vmem:[#allocation24_spill] sm:$0xff] %v8775_v32  ;;  %v8792_v32 = vadd.f32 %v2507_v3, %v2270_v33  ;;  %v8795_v6 = vmul.f32 %v12129_v29, %v2447_v60  ;;  %v8798_v25 = vmul.f32 %v12131_v19, %v2178_v40  ;;  %v2970_v50 = vsel %vm2962_vm5, %v12203_v54, %v12319_v20  ;;  %v12320_v3 = vld [vmem:[#allocation166_spill] sm:$0xff]  ;;  %v12322_v40 = vld [vmem:[#allocation23_spill] sm:$0xff]  ;;  %v12324_v54 = vld [vmem:[#allocation61_spill] sm:$0xff] }
 0x39e   :  { %12315 = vst [vmem:[#allocation98_spill] sm:$0xff] %v8786_v61  ;;  %v2792_v52 = vmul.f32 %v12194_v45, %v2728_v63  ;;  %v2278_v37 = vadd.f32 %v2246_v26, %v2009_v14  ;;  %v2455_v44 = vmul.f32 %v8580_v16, %v2382_v35  ;;  %v2116_v33 = vsel %vm2099_vm1, %v12321_v7, %v12320_v3  ;;  %v4010_v63 = vld [vmem:[%s11236_s4 + $0x20] sm:$0xff]  ;;  %v12327_v26 = vld [vmem:[#allocation104_spill] sm:$0xff]  ;;  %v12332_v45 = vld [vmem:[#allocation3_spill] sm:$0xff] }
 0x39f   :  { %12316 = vst [vmem:[#allocation83_spill] sm:$0xff] %v8792_v32  ;;  %v2796_v60 = vmul.f32 %v12031_v28, %v2732_v11  ;;  %v1911_v29 = vsel %vm1854_vm3, %v12325_v43, %v12324_v54  ;;  %v8823_v35 = vadd.f32 %v12327_v26, %v2788_v59  ;;  %v8826_v14 = vmul.f32 %v12288_v13, %v2970_v50  ;;  %v12330_v28 = vld [vmem:[#allocation15_spill] sm:$0xff]  ;;  %v8830_v11 = vpop.permute.xlu1 %3871  ;;  %v12333_v3 = vld [vmem:[#allocation173_spill] sm:$0xff] }
 0x3a0   :  { %12317 = vst [vmem:[#allocation154_spill] sm:$0xff] %v8795_v6  ;;  %v2013_v6 = vmul.f32 %v12322_v40, %v1941_v57  ;;  %v2515_v57 = vmul.f32 %v12330_v28, %v2451_v4  ;;  %4046 = vperm.xlu0 %5807, %v4012_v2   ;;  %v2190_v7 = vmul.f32 %v8562_v49, %v2116_v33  ;;  %v12334_v4 = vld [vmem:[#allocation40_spill] sm:$0xff]  ;;  %v12336_v26 = vld [vmem:[#allocation169_spill] sm:$0xff]  ;;  %v12337_v2 = vld [vmem:[#allocation110_spill] sm:$0xff] }
 0x3a1   :  { %12318 = vst [vmem:[#allocation86_spill] sm:$0xff] %v8798_v25  ;;  %v12323_v25 = vld [vmem:[#allocation38_spill] sm:$0xff]  ;;  %v1857_v54 = vsel %vm1854_vm3, %v12208_v47, %v12325_v43  ;;  %v2695_v59 = vsel %vm2637_vm2, %v12333_v3, %v12332_v45  ;;  %3578 = vperm.xlu2 %5806, %v8766_v15   ;;  %v2519_v50 = vmul.f32 %v12334_v4, %v2455_v44  ;;  %v12338_v43 = vld [vmem:[#allocation107_spill] sm:$0xff] }
 0x3a2   :  { %v2250_v32 = vmul.f32 %v12323_v25, %v2186_v38  ;;  %12326 = vst [vmem:[#allocation80_spill] sm:$0xff] %v8817_v30  ;;  %v2800_v38 = vmul.f32 %v12205_v10, %v2736_v18  ;;  %5808 = vset.pattern.permute.xlu1 %v12264_v36  ;;  %v12335_v10 = vld [vmem:[#allocation225_spill] sm:$0xff]  ;;  %v2119_v33 = vsel %vm2099_vm1, %v12337_v2, %v12336_v26  ;;  %v12345_v30 = vld [vmem:[#allocation170_spill] sm:$0xff]  ;;  %v12346_v2 = vld [vmem:[#allocation64_spill] sm:$0xff] }
 0x3a3   :  { %12328 = vst [vmem:[#allocation152_spill] sm:$0xff] %v8823_v35  ;;  %v1923_v18 = vmul.f32 %v12335_v10, %v1911_v29  ;;  %v2643_v47 = vsel %vm2637_vm2, %v12232_v23, %v12333_v3  ;;  %4036 = vperm.xlu1 %5808, %v4010_v63   ;;  %v8850_v35 = vadd.f32 %v12338_v43, %v2792_v52  ;;  %v12344_v29 = vld [vmem:[#allocation226_spill] sm:$0xff]  ;;  %v12347_v52 = vld [vmem:[#allocation229_spill] sm:$0xff]  ;;  %v12350_v63 = vld [vmem:[#allocation115_spill] sm:$0xff] }
 0x3a4   :  { %12329 = vst [vmem:[#allocation93_spill] sm:$0xff] %v8826_v14  ;;  %v8852_v45 = vadd.f32 %v2515_v57, %v2278_v37  ;;  %v12341_v14 = vld [vmem:[#allocation111_spill] sm:$0xff]  ;;  %v2282_v44 = vadd.f32 %v2250_v32, %v2013_v6  ;;  %v8857_v39 = vpop.permute.xlu2 %3594  ;;  %v1926_v17 = vmul.f32 %v12344_v29, %v1857_v54  ;;  %v2371_v26 = vsel %vm2368_vm4, %v12241_v34, %v12345_v30  ;;  %v12348_v37 = vld [vmem:[#allocation168_spill] sm:$0xff]  ;;  %v12351_v57 = vld [vmem:[#allocation230_spill] sm:$0xff] }
 0x3a5   :  { %12331 = vst [vmem:[#allocation160_spill] sm:$0xff] %v8830_v11  ;;  %v8855_v28 = vadd.f32 %v12341_v14, %v2796_v60  ;;  %v2425_v23 = vsel %vm2368_vm4, %v12345_v30, %v12346_v2  ;;  %v2710_v3 = vmul.f32 %v12347_v52, %v2695_v59  ;;  %v2976_v60 = vsel %vm2962_vm5, %v12268_v55, %v12348_v37  ;;  %v12349_v6 = vld [vmem:[#allocation172_spill] sm:$0xff]  ;;  %v4007_v34 = vld [vmem:[%s11236_s4 + $0x8] sm:$0xff]  ;;  %v12354_v43 = vld [vmem:[#allocation33_spill] sm:$0xff] }
 0x3a6   :  { %12339 = vst [vmem:[#allocation92_spill] sm:$0xff] %v8850_v35  ;;  %v2194_v32 = vmul.f32 %v8562_v49, %v2119_v33  ;;  %v2122_v14 = vsel %vm2099_vm1, %v12350_v63, %v12349_v6  ;;  %v2713_v54 = vmul.f32 %v12351_v57, %v2643_v47  ;;  %v8879_v30 = vadd.f32 %v8470_v31, %v2800_v38  ;;  %v12356_v33 = vld [vmem:[#allocation231_spill] sm:$0xff]  ;;  %v12357_v6 = vld [vmem:[#allocation232_spill] sm:$0xff]  ;;  %v8897_v38 = vpop.permute.xlu0 %3713 }
 0x3a7   :  { %12340 = vst [vmem:[#allocation103_spill] sm:$0xff] %v8852_v45  ;;  %v8881_v59 = vadd.f32 %v2519_v50, %v2282_v44  ;;  %v8884_v2 = vmul.f32 %v12354_v43, %v2190_v7  ;;  %v8887_v55 = vmul.f32 %v12259_v8, %v1923_v18  ;;  %v2440_v63 = vmul.f32 %v12357_v6, %v2371_v26  ;;  %v12358_v47 = vld [vmem:[#allocation175_spill] sm:$0xff]  ;;  %v12359_v45 = vld [vmem:[#allocation62_spill] sm:$0xff]  ;;  %v4009_v7 = vld [vmem:[%s11236_s4 + $0x18] sm:$0xff]  ;;  %v8910_v26 = vpop.permute.xlu1 %3430 }
 0x3a8   :  { %12342 = vst [vmem:[#allocation89_spill] sm:$0xff] %v8855_v28  ;;  %v2437_v28 = vmul.f32 %v12356_v33, %v2425_v23  ;;  %v2640_v35 = vsel %vm2637_vm2, %v12195_v48, %v12358_v47  ;;  %v2694_v31 = vsel %vm2637_vm2, %v12358_v47, %v12359_v45  ;;  %v8903_v50 = vmul.f32 %v12259_v8, %v1926_v17  ;;  %v12363_v45 = vld [vmem:[#allocation17_spill] sm:$0xff]  ;;  %v12364_v47 = vld [vmem:[#allocation171_spill] sm:$0xff] }
 0x3a9   :  { %12343 = vst [vmem:[#allocation164_spill] sm:$0xff] %v8857_v39  ;;  %v8906_v18 = vmul.f32 %v12288_v13, %v2976_v60  ;;  %v2198_v44 = vmul.f32 %v8562_v49, %v2122_v14  ;;  %v2774_v48 = vmul.f32 %v12172_v21, %v2710_v3  ;;  %4021 = vperm.xlu0 %5807, %v4007_v34   ;;  %v12366_v8 = vld [vmem:[#allocation177_spill] sm:$0xff]  ;;  %v12369_v49 = vld [vmem:[#allocation174_spill] sm:$0xff] }
 0x3aa   :  { %12352 = vst [vmem:[#allocation96_spill] sm:$0xff] %v8879_v30  ;;  %v2258_v23 = vmul.f32 %v12363_v45, %v2194_v32  ;;  %v2777_v30 = vmul.f32 %v12172_v21, %v2713_v54  ;;  %v12367_v17 = vld [vmem:[#allocation105_spill] sm:$0xff]  ;;  %v12370_v14 = vld [vmem:[#allocation102_spill] sm:$0xff]  ;;  %v2706_v34 = vmul.f32 %v12347_v52, %v2694_v31  ;;  %v2709_v32 = vmul.f32 %v12351_v57, %v2640_v35  ;;  %v12372_v54 = vld [vmem:[#allocation176_spill] sm:$0xff] }
 0x3ab   :  { %12353 = vst [vmem:[#allocation155_spill] sm:$0xff] %v8881_v59  ;;  %v1874_v60 = vsel %vm1854_vm3, %v12367_v17, %v12366_v8  ;;  %v12368_v59 = vmov 8   ;;  %v2385_v3 = vsel %vm2368_vm4, %v12370_v14, %v12369_v49  ;;  %4031 = vperm.xlu1 %5808, %v4009_v7   ;;  %v8931_v21 = vmul.f32 %v12271_v46, %v2440_v63  ;;  %v12373_v45 = vld [vmem:[#allocation58_spill] sm:$0xff] }
 0x3ac   :  { %12355 = vst [vmem:[#allocation106_spill] sm:$0xff] %v8884_v2  ;;  %v12365_v2 = vld [vmem:[#allocation99_spill] sm:$0xff]  ;;  %5809 = vset.pattern.permute.xlu2 %v12368_v59  ;;  %v2108_v59 = vsel %vm2099_vm1, %v12295_v27, %v12372_v54  ;;  %v2158_v8 = vsel %vm2099_vm1, %v12372_v54, %v12373_v45  ;;  %v8939_v31 = vpop.permute.xlu2 %3422  ;;  %v8952_v63 = vadd.f32 %v8518_v58, %v2777_v30  ;;  %v12380_v14 = vld [vmem:[#allocation178_spill] sm:$0xff] }
 0x3ad   :  { %12360 = vst [vmem:[#allocation38_spill] sm:$0xff] %v8897_v38  ;;  %v1871_v38 = vsel %vm1854_vm3, %v12365_v2, %v12364_v47  ;;  %3847 = vperm.xlu2 %5809, %v8766_v15   ;;  %v8928_v2 = vmul.f32 %v12271_v46, %v2437_v28  ;;  %v12376_v15 = vld [vmem:[#allocation41_spill] sm:$0xff]  ;;  %v1949_v46 = vmul.f32 %v8527_v0, %v1874_v60  ;;  %v12381_v45 = vld [vmem:[#allocation55_spill] sm:$0xff]  ;;  %v12383_v60 = vld [vmem:[#allocation228_spill] sm:$0xff] }
 0x3ae   :  { %12361 = vst [vmem:[#allocation61_spill] sm:$0xff] %v8906_v18  ;;  %v8942_v35 = vmul.f32 %v8527_v0, %v1871_v38  ;;  %v8945_v7 = vmul.f32 %v12376_v15, %v2198_v44  ;;  %v12377_v28 = vld [vmem:[#allocation45_spill] sm:$0xff]  ;;  %v2459_v27 = vmul.f32 %v8580_v16, %v2385_v3  ;;  %v2105_v54 = vsel %vm2099_vm1, %v12251_v22, %v12380_v14  ;;  %v12382_v15 = vld [vmem:[#allocation227_spill] sm:$0xff]  ;;  %v12399_v47 = vld [vmem:[#allocation118_spill] sm:$0xff] }
 0x3af   :  { %12362 = vst [vmem:[#allocation167_spill] sm:$0xff] %v8910_v26  ;;  %v8948_v17 = vadd.f32 %v12377_v28, %v2774_v48  ;;  %v2157_v38 = vsel %vm2099_vm1, %v12380_v14, %v12381_v45  ;;  %v2770_v44 = vmul.f32 %v12231_v5, %v2706_v34  ;;  %v2773_v48 = vmul.f32 %v12231_v5, %v2709_v32  ;;  %v12384_v58 = vld [vmem:[#allocation247_spill] sm:$0xff]  ;;  %v8973_v45 = vpop.permute.xlu0 %3598  ;;  %v4006_v5 = vld [vmem:[%s11236_s4] sm:$0xff]  ;;  %v12390_v34 = vld [vmem:[#allocation32_spill] sm:$0xff] }
 0x3b0   :  { %12371 = vst [vmem:[#allocation104_spill] sm:$0xff] %v8931_v21  ;;  %v2176_v28 = vmul.f32 %v12382_v15, %v2158_v8  ;;  %v3325_v30 = vmul.f32 %v8599_v12, %v12384_v58  ;;  %v12385_v3 = vld [vmem:[#allocation59_spill] sm:$0xff]  ;;  %v2021_v32 = vmul.f32 %v12390_v34, %v1949_v46  ;;  %v2175_v8 = vmul.f32 %v12383_v60, %v2105_v54  ;;  %v3358_v58 = vpop.permute.xlu1 %3357  ;;  %v12397_v54 = vld [vmem:[#allocation34_spill] sm:$0xff]  ;;  %v12435_v21 = vld [vmem:[#allocation69_spill] sm:$0xff] }
 0x3b1   :  { %12374 = vst [vmem:[#allocation3_spill] sm:$0xff] %v8939_v31  ;;  %v12386_v31 = vld [vmem:[#allocation262_spill] sm:$0xff]  ;;  %v12388_v18 = vld [vmem:[#allocation87_spill] sm:$0xff]  ;;  %v8998_v37 = vadd.f32 %v12397_v54, %v2770_v44  ;;  %v9001_v49 = vadd.f32 %v12399_v47, %v2773_v48 }
 0x3b2   :  { %12375 = vst [vmem:[#allocation173_spill] sm:$0xff] %v8942_v35  ;;  %v2179_v35 = vmul.f32 %v12383_v60, %v2108_v59  ;;  %v3326_v22 = vmul.f32 %v8596_v53, %v12386_v31  ;;  %v2172_v59 = vmul.f32 %v12382_v15, %v2157_v38  ;;  %v4008_v31 = vld [vmem:[%s11236_s4 + $0x10] sm:$0xff]  ;;  %v5890_v47 = vld [vmem:[%s11235_s7] sm:$0xff] }
 0x3b3   :  { %12378 = vst [vmem:[#allocation40_spill] sm:$0xff] %v8948_v17  ;;  %v12387_v17 = vld [vmem:[#allocation263_spill] sm:$0xff]  ;;  %v12395_v38 = vld [vmem:[#allocation44_spill] sm:$0xff]  ;;  %4016 = vperm.xlu1 %5808, %v4006_v5   ;;  %v9016_v44 = vperm.slane %v5890_v47, 7  ;;  %v12410_v54 = vld [vmem:[#allocation214_spill] sm:$0xff] }
 0x3b4   :  { %12379 = vst [vmem:[#allocation225_spill] sm:$0xff] %v8952_v63  ;;  %v3324_v63 = vmul.f32 %v8602_v41, %v12385_v3  ;;  %v3327_v14 = vmul.f32 %v12388_v18, %v12387_v17  ;;  %v12391_v3 = vld [vmem:[#allocation120_spill] sm:$0xff]  ;;  %v8990_v13 = vmul.f32 %v3358_v58, %v3326_v22  ;;  %v8995_v34 = vmul.f32 %v12395_v38, %v2459_v27  ;;  %v12404_v27 = vld [vmem:[#allocation191_spill] sm:$0xff]  ;;  %v9018_v48 = vpop.permute.xlu2 %3699  ;;  %v9035_v47 = vld [vmem:[%s11235_s7 + $0x20] ss:$0 sm:$0xff] }
 0x3b5   :  { %12389 = vst [vmem:[#allocation169_spill] sm:$0xff] %v8973_v45  ;;  %3733 = vrot.lane.b32.xlu0 %v12391_v3, %s5909_s18  ;;  %v8988_v45 = vmul.f32 %v3358_v58, %v3325_v30  ;;  %5810 = vset.pattern.permute.xlu2 %v12264_v36  ;;  %v12402_v30 = vld [vmem:[#allocation179_spill] sm:$0xff]  ;;  %v9021_v36 = vmul.f32 %v12131_v19, %v2179_v35  ;;  %v12427_v38 = vld [vmem:[#allocation249_spill] sm:$0xff] }
 0x3b6   :  { %v8986_v17 = vmul.f32 %v3358_v58, %v3324_v63  ;;  %12393 = vst [vmem:[#allocation107_spill] sm:$0xff] %v8990_v13  ;;  %v8992_v46 = vmul.f32 %v3358_v58, %v3327_v14  ;;  %v9005_v63 = vmul.f32 %v12131_v19, %v2176_v28  ;;  %v2971_v22 = vsel %vm2962_vm5, %v12319_v20, %v12402_v30  ;;  %v12403_v14 = vld [vmem:[#allocation71_spill] sm:$0xff]  ;;  %v12415_v13 = vld [vmem:[#allocation18_spill] sm:$0xff] }
 0x3b7   :  { %12392 = vst [vmem:[#allocation110_spill] sm:$0xff] %v8988_v45  ;;  %v2698_v58 = vsel %vm2637_vm2, %v12404_v27, %v12403_v14  ;;  %4026 = vperm.xlu2 %5810, %v4008_v31   ;;  %v9024_v28 = vmul.f32 %v12276_v1, %v2172_v59  ;;  %v9027_v20 = vmul.f32 %v12276_v1, %v2175_v8  ;;  %v12409_v5 = vld [vmem:[#allocation255_spill] sm:$0xff]  ;;  %v12413_v59 = vld [vmem:[#allocation210_spill] sm:$0xff]  ;;  %v12414_v8 = vld [vmem:[#allocation9_spill] sm:$0xff] }
 0x3b8   :  { %12394 = vst [vmem:[#allocation111_spill] sm:$0xff] %v8992_v46  ;;  %v3487_v14 = vsel %vm3468_vm7, %v12410_v54, %v12409_v5  ;;  %v9037_v31 = vadd.f32 %v2258_v23, %v2021_v32  ;;  %v12411_v46 = vld [vmem:[#allocation123_spill] sm:$0xff]  ;;  %v3756_v45 = vsel %vm3737_vm8, %v12415_v13, %v12414_v8  ;;  %v12416_v54 = vld [vmem:[#allocation241_spill] sm:$0xff]  ;;  %v2722_v32 = vmul.f32 %v12347_v52, %v2698_v58 }
 0x3b9   :  { %12396 = vst [vmem:[#allocation226_spill] sm:$0xff] %v8995_v34  ;;  %v3029_v19 = vsel %vm2962_vm5, %v12402_v30, %v12411_v46  ;;  %v12412_v35 = vld [vmem:[#allocation75_spill] sm:$0xff]  ;;  %v9049_v5 = vmul.f32 %v12416_v54, %v2971_v22  ;;  %v12419_v34 = vld [vmem:[#allocation109_spill] sm:$0xff]  ;;  %v12422_v30 = vld [vmem:[#allocation254_spill] sm:$0xff] }
 0x3ba   :  { %12398 = vst [vmem:[#allocation170_spill] sm:$0xff] %v8998_v37  ;;  %v1915_v1 = vsel %vm1854_vm3, %v12413_v59, %v12412_v35  ;;  %v12421_v37 = vld [vmem:[#allocation196_spill] sm:$0xff]  ;;  %v3334_v35 = vmul.f32 %v8596_v53, %v12422_v30  ;;  %v12423_v59 = vld [vmem:[#allocation126_spill] sm:$0xff]  ;;  %v9072_v30 = vpop.permute.xlu1 %3420 }
 0x3bb   :  { %12400 = vst [vmem:[#allocation64_spill] sm:$0xff] %v9001_v49  ;;  %v3569_v49 = vmul.f32 %v9016_v44, %v3487_v14  ;;  %v3332_v13 = vmul.f32 %v8602_v41, %v12423_v59  ;;  %v12424_v22 = vld [vmem:[#allocation82_spill] sm:$0xff]  ;;  %v12429_v14 = vld [vmem:[#allocation108_spill] sm:$0xff]  ;;  %v3366_v59 = vpop.permute.xlu0 %3365  ;;  %3464 = vrot.lane.b32.xlu1 %v12391_v3, %s5907_s15 }
 0x3bc   :  { %12401 = vst [vmem:[#allocation229_spill] sm:$0xff] %v9005_v63  ;;  %v12420_v63 = vld [vmem:[#allocation63_spill] sm:$0xff]  ;;  %v3333_v8 = vmul.f32 %v8599_v12, %v12424_v22 }
 0x3bd   :  { %12405 = vst [vmem:[#allocation172_spill] sm:$0xff] %v9018_v48  ;;  %v2160_v46 = vsel %vm2099_vm1, %v12421_v37, %v12420_v63  ;;  %v3335_v63 = vmul.f32 %v12388_v18, %v12427_v38  ;;  %3440 = vrot.lane.b32.xlu0 %v12429_v14, %s5907_s15  ;;  %v3396_v22 = vmul.f32 %v3366_v59, %v3332_v13 }
 0x3be   :  { %12406 = vst [vmem:[#allocation115_spill] sm:$0xff] %v9021_v36  ;;  %v12418_v36 = vld [vmem:[#allocation181_spill] sm:$0xff]  ;;  %v9077_v43 = vmul.f32 %v3366_v59, %v3333_v8  ;;  %v2184_v8 = vmul.f32 %v12382_v15, %v2160_v46 }
 0x3bf   :  { %12407 = vst [vmem:[#allocation230_spill] sm:$0xff] %v9024_v28  ;;  %v2388_v23 = vsel %vm2368_vm4, %v12419_v34, %v12418_v36  ;;  %v12425_v34 = vld [vmem:[#allocation78_spill] sm:$0xff]  ;;  %v12426_v36 = vld [vmem:[#allocation217_spill] sm:$0xff]  ;;  %3227 = vrot.lane.b32.xlu2 %v12391_v3, %s5905_s30 }
 0x3c0   :  { %12408 = vst [vmem:[#allocation231_spill] sm:$0xff] %v9027_v20  ;;  %v2429_v58 = vsel %vm2368_vm4, %v12426_v36, %v12425_v34  ;;  %v3838_v20 = vmul.f32 %v9035_v47, %v3756_v45  ;;  %v12430_v28 = vld [vmem:[#allocation138_spill] sm:$0xff]  ;;  %v2463_v34 = vmul.f32 %v8580_v16, %v2388_v23  ;;  %v2786_v45 = vmul.f32 %v12191_v56, %v2722_v32  ;;  %v12438_v32 = vld [vmem:[#allocation235_spill] sm:$0xff] }
 0x3c1   :  { %12417 = vst [vmem:[#allocation232_spill] sm:$0xff] %v9049_v5  ;;  %v1939_v5 = vmul.f32 %v12335_v10, %v1915_v1  ;;  %v3633_v37 = vmul.f32 %v12430_v28, %v3569_v49  ;;  %v9079_v1 = vmul.f32 %v3366_v59, %v3334_v35  ;;  %v12433_v36 = vld [vmem:[#allocation182_spill] sm:$0xff]  ;;  %v12436_v49 = vld [vmem:[#allocation183_spill] sm:$0xff]  ;;  %v2453_v46 = vmul.f32 %v12356_v33, %v2429_v58 }
 0x3c2   :  { %12428 = vst [vmem:[#allocation175_spill] sm:$0xff] %v9072_v30  ;;  %v2968_v38 = vsel %vm2962_vm5, %v12275_v9, %v12433_v36  ;;  %v9086_v30 = vmul.f32 %v3366_v59, %v3335_v63  ;;  %v1914_v13 = vsel %vm1854_vm3, %v12436_v49, %v12435_v21  ;;  %v3902_v35 = vmul.f32 %v8830_v11, %v3838_v20  ;;  %v9097_v9 = vpop.permute.xlu2 %3863  ;;  %v12440_v59 = vld [vmem:[#allocation133_spill] sm:$0xff] }
 0x3c3   :  { %12431 = vst [vmem:[#allocation62_spill] sm:$0xff] %v9077_v43  ;;  %v3665_v23 = vadd.f32 %v3633_v37, %v3396_v22  ;;  %v9100_v63 = vmul.f32 %v12438_v32, %v3029_v19  ;;  %v1866_v21 = vsel %vm1854_vm3, %v12286_v42, %v12436_v49  ;;  %v2011_v37 = vmul.f32 %v12322_v40, %v1939_v5  ;;  %v12441_v20 = vld [vmem:[#allocation97_spill] sm:$0xff]  ;;  %v12442_v22 = vld [vmem:[#allocation19_spill] sm:$0xff]  ;;  %v12444_v43 = vld [vmem:[#allocation12_spill] sm:$0xff] }
 0x3c4   :  { %12432 = vst [vmem:[#allocation17_spill] sm:$0xff] %v9079_v1  ;;  %v3119_v3 = vmul.f32 %v12441_v20, %v8696_v62  ;;  %v12443_v1 = vld [vmem:[#allocation248_spill] sm:$0xff]  ;;  %v2527_v28 = vmul.f32 %v12444_v43, %v2463_v34  ;;  %v2248_v58 = vmul.f32 %v12323_v25, %v2184_v8  ;;  %v12447_v5 = vld [vmem:[#allocation258_spill] sm:$0xff]  ;;  %v12449_v20 = vld [vmem:[#allocation73_spill] sm:$0xff]  ;;  %v1938_v34 = vmul.f32 %v12344_v29, %v1866_v21  ;;  %v9141_v8 = vpop.permute.xlu0 %3707 }
 0x3c5   :  { %12434 = vst [vmem:[#allocation99_spill] sm:$0xff] %v9086_v30  ;;  %v3028_v30 = vsel %vm2962_vm5, %v12433_v36, %v12440_v59  ;;  %v3481_v19 = vsel %vm3468_vm7, %v12443_v1, %v12442_v22  ;;  %v3934_v11 = vadd.f32 %v3902_v35, %v3665_v23  ;;  %v9117_v36 = vmul.f32 %v12416_v54, %v2968_v38  ;;  %v12446_v42 = vld [vmem:[#allocation36_spill] sm:$0xff]  ;;  %v12451_v35 = vld [vmem:[#allocation245_spill] sm:$0xff] }
 0x3c6   :  { %12437 = vst [vmem:[#allocation177_spill] sm:$0xff] %v9097_v9  ;;  %v1935_v59 = vmul.f32 %v12335_v10, %v1914_v13  ;;  %v2882_v49 = vadd.f32 %v12446_v42, %v2786_v45  ;;  %v12450_v40 = vld [vmem:[#allocation8_spill] sm:$0xff]  ;;  %v9132_v43 = vmul.f32 %v12438_v32, %v3028_v30  ;;  %v2517_v38 = vmul.f32 %v12334_v4, %v2453_v46  ;;  %v9137_v13 = vpop.permute.xlu1 %3697  ;;  %v12456_v42 = vld [vmem:[#allocation185_spill] sm:$0xff] }
 0x3c7   :  { %12439 = vst [vmem:[#allocation105_spill] sm:$0xff] %v9100_v63  ;;  %v12448_v63 = vld [vmem:[#allocation130_spill] sm:$0xff]  ;;  %v3490_v1 = vsel %vm3468_vm7, %v12450_v40, %v12449_v20  ;;  %v9129_v23 = vadd.f32 %v12451_v35, %v3934_v11  ;;  %v3561_v45 = vmul.f32 %v9016_v44, %v3481_v19  ;;  %3709 = vrot.lane.b32.xlu0 %v12429_v14, %s5909_s18  ;;  %v12457_v40 = vld [vmem:[#allocation112_spill] sm:$0xff]  ;;  %v12458_v20 = vld [vmem:[#allocation113_spill] sm:$0xff] }
 0x3c8   :  { %12445 = vst [vmem:[#allocation102_spill] sm:$0xff] %v9117_v36  ;;  %v3253_v62 = vsel %vm3231_vm6, %v12448_v63, %v12447_v5  ;;  %v1877_v11 = vsel %vm1854_vm3, %v12457_v40, %v12456_v42  ;;  %v2280_v35 = vadd.f32 %v2248_v58, %v2011_v37  ;;  %v3151_v30 = vadd.f32 %v3119_v3, %v2882_v49  ;;  %v12460_v37 = vld [vmem:[#allocation67_spill] sm:$0xff]  ;;  %v12461_v3 = vld [vmem:[#allocation193_spill] sm:$0xff]  ;;  %v12462_v58 = vld [vmem:[#allocation264_spill] sm:$0xff] }
 0x3c9   :  { %12452 = vst [vmem:[#allocation176_spill] sm:$0xff] %v9129_v23  ;;  %v3750_v21 = vsel %vm3737_vm8, %v8786_v61, %v9141_v8  ;;  %v3336_v46 = vmul.f32 %v8602_v41, %v3253_v62  ;;  %v3573_v19 = vmul.f32 %v9016_v44, %v3490_v1  ;;  %v3625_v63 = vmul.f32 %v8857_v39, %v3561_v45  ;;  %v12463_v62 = vld [vmem:[#allocation117_spill] sm:$0xff]  ;;  %v12467_v39 = vld [vmem:[#allocation186_spill] sm:$0xff]  ;;  %v12469_v5 = vld [vmem:[#allocation204_spill] sm:$0xff] }
 0x3ca   :  { %12453 = vst [vmem:[#allocation58_spill] sm:$0xff] %v9132_v43  ;;  %v3830_v14 = vmul.f32 %v9035_v47, %v3750_v21  ;;  %3448 = vrot.lane.b32.xlu1 %v12458_v20, %s5907_s15  ;;  %v9156_v22 = vadd.f32 %v2527_v28, %v9037_v31  ;;  %v2007_v40 = vmul.f32 %v12123_v51, %v1935_v59  ;;  %v9167_v45 = vpop.permute.xlu2 %3412  ;;  %v12465_v21 = vld [vmem:[#allocation80_spill] sm:$0xff]  ;;  %v12484_v43 = vld [vmem:[#allocation94_spill] sm:$0xff] }
 0x3cb   :  { %12454 = vst [vmem:[#allocation41_spill] sm:$0xff] %v9137_v13  ;;  %v2697_v49 = vsel %vm2637_vm2, %v12461_v3, %v12460_v37  ;;  %v3759_v1 = vsel %vm3737_vm8, %v8739_v24, %v12462_v58  ;;  %3456 = vrot.lane.b32.xlu2 %v12463_v62, %s5907_s15  ;;  %v2549_v42 = vadd.f32 %v2517_v38, %v2280_v35  ;;  %v12468_v58 = vld [vmem:[#allocation60_spill] sm:$0xff] }
 0x3cc   :  { %12455 = vst [vmem:[#allocation45_spill] sm:$0xff] %v9141_v8  ;;  %v3637_v61 = vmul.f32 %v12465_v21, %v3573_v19  ;;  %v3657_v28 = vadd.f32 %v3625_v63, %v8986_v17  ;;  %v3894_v31 = vmul.f32 %v9097_v9, %v3830_v14  ;;  %v9173_v59 = vmul.f32 %v12123_v51, %v1938_v34  ;;  %v12466_v8 = vld [vmem:[#allocation66_spill] sm:$0xff]  ;;  %v12470_v38 = vld [vmem:[#allocation56_spill] sm:$0xff]  ;;  %v12473_v9 = vld [vmem:[#allocation257_spill] sm:$0xff] }
 0x3cd   :  { %12459 = vst [vmem:[#allocation178_spill] sm:$0xff] %v9156_v22  ;;  %v1953_v37 = vmul.f32 %v8527_v0, %v1877_v11  ;;  %v1913_v24 = vsel %vm1854_vm3, %v12467_v39, %v12466_v8  ;;  %v2159_v22 = vsel %vm2099_vm1, %v12469_v5, %v12468_v58  ;;  %v3400_v35 = vmul.f32 %v12470_v38, %v3336_v46  ;;  %v12471_v51 = vld [vmem:[#allocation244_spill] sm:$0xff]  ;;  %v12474_v58 = vld [vmem:[#allocation77_spill] sm:$0xff] }
 0x3ce   :  { %12464 = vst [vmem:[#allocation55_spill] sm:$0xff] %v9167_v45  ;;  %v3842_v19 = vmul.f32 %v9035_v47, %v3759_v1  ;;  %v3926_v17 = vadd.f32 %v3894_v31, %v3657_v28  ;;  %v3958_v63 = vadd.f32 %v3151_v30, %v2549_v42  ;;  %v2718_v14 = vmul.f32 %v12347_v52, %v2697_v49  ;;  %v12472_v0 = vld [vmem:[#allocation256_spill] sm:$0xff]  ;;  %v9194_v1 = vpop.permute.xlu1 %3590  ;;  %v12476_v30 = vld [vmem:[#allocation85_spill] sm:$0xff]  ;;  %v3354_v49 = vpop.permute.xlu0 %3353 }
 0x3cf   :  { %v3322_v34 = vmul.f32 %v8596_v53, %v12471_v51  ;;  %v3320_v11 = vmul.f32 %v8602_v41, %v12472_v0  ;;  %v3321_v8 = vmul.f32 %v8599_v12, %v12473_v9  ;;  %v2180_v21 = vmul.f32 %v12382_v15, %v2159_v22  ;;  %12475 = vst [vmem:[#allocation227_spill] sm:$0xff] %v9194_v1  ;;  %v12478_v28 = vld [vmem:[#allocation25_spill] sm:$0xff]  ;;  %v12481_v22 = vld [vmem:[#allocation147_spill] sm:$0xff] }
 0x3d0   :  { %v3323_v46 = vmul.f32 %v12388_v18, %v12474_v58  ;;  %v3669_v38 = vadd.f32 %v3637_v61, %v3400_v35  ;;  %3416 = vrot.lane.b32.xlu0 %v12476_v30, %s5907_s15  ;;  %v9198_v42 = vadd.f32 %v3958_v63, %v3926_v17  ;;  %v2025_v31 = vmul.f32 %v12478_v28, %v1953_v37  ;;  %v12482_v61 = vld [vmem:[#allocation72_spill] sm:$0xff]  ;;  %v12487_v63 = vld [vmem:[#allocation158_spill] sm:$0xff] }
 0x3d1   :  { %v3384_v51 = vmul.f32 %v3354_v49, %v3320_v11  ;;  %v9201_v0 = vmul.f32 %v3354_v49, %v3321_v8  ;;  %v9203_v9 = vmul.f32 %v3354_v49, %v3322_v34  ;;  %v9208_v58 = vsel %vm1854_vm3, %v12481_v22, %v12467_v39  ;;  %v12483_v35 = vld [vmem:[#allocation188_spill] sm:$0xff]  ;;  %v12488_v39 = vld [vmem:[#allocation53_spill] sm:$0xff]  ;;  %v12490_v28 = vld [vmem:[#allocation90_spill] sm:$0xff] }
 0x3d2   :  { %12477 = vst [vmem:[#allocation228_spill] sm:$0xff] %v9198_v42  ;;  %v2428_v23 = vsel %vm2368_vm4, %v12483_v35, %v12482_v61  ;;  %v3906_v36 = vmul.f32 %v12484_v43, %v3842_v19  ;;  %v9214_v17 = vmul.f32 %v3354_v49, %v3323_v46  ;;  %3717 = vrot.lane.b32.xlu1 %v12458_v20, %s5909_s18  ;;  %v12489_v11 = vld [vmem:[#allocation192_spill] sm:$0xff]  ;;  %v9232_v46 = vpop.permute.xlu2 %3691  ;;  %v12493_v49 = vld [vmem:[#allocation46_spill] sm:$0xff]  ;;  %v12498_v43 = vld [vmem:[#allocation151_spill] sm:$0xff] }
 0x3d3   :  { %12479 = vst [vmem:[#allocation247_spill] sm:$0xff] %v9201_v0  ;;  %v9219_v37 = vmul.f32 %v12335_v10, %v1913_v24  ;;  %v2380_v34 = vsel %vm2368_vm4, %v12487_v63, %v12483_v35  ;;  %v2156_v8 = vsel %vm2099_vm1, %v12489_v11, %v12488_v39  ;;  %v3478_v19 = vsel %vm3468_vm7, %v12490_v28, %v8910_v26  ;;  %v12492_v24 = vld [vmem:[#allocation144_spill] sm:$0xff]  ;;  %v12494_v61 = vld [vmem:[#allocation30_spill] sm:$0xff] }
 0x3d4   :  { %12480 = vst [vmem:[#allocation59_spill] sm:$0xff] %v9203_v9  ;;  %3725 = vrot.lane.b32.xlu2 %v12463_v62, %s5909_s18  ;;  %v2102_v20 = vsel %vm2099_vm1, %v12492_v24, %v12489_v11  ;;  %v2782_v22 = vmul.f32 %v12493_v49, %v2718_v14  ;;  %v2244_v35 = vmul.f32 %v12494_v61, %v2180_v21  ;;  %v12495_v9 = vld [vmem:[#allocation189_spill] sm:$0xff]  ;;  %v12496_v28 = vld [vmem:[#allocation116_spill] sm:$0xff]  ;;  %v12497_v0 = vld [vmem:[#allocation190_spill] sm:$0xff] }
 0x3d5   :  { %12485 = vst [vmem:[#allocation262_spill] sm:$0xff] %v9214_v17  ;;  %v3938_v63 = vadd.f32 %v3906_v36, %v3669_v38  ;;  %v9240_v39 = vadd.f32 %v8945_v7, %v2025_v31  ;;  %v2449_v17 = vmul.f32 %v12356_v33, %v2428_v23  ;;  %v2391_v62 = vsel %vm2368_vm4, %v12496_v28, %v12495_v9  ;;  %v12499_v11 = vld [vmem:[#allocation153_spill] sm:$0xff]  ;;  %v12500_v36 = vld [vmem:[#allocation76_spill] sm:$0xff]  ;;  %v12502_v23 = vld [vmem:[#allocation10_spill] sm:$0xff] }
 0x3d6   :  { %12486 = vst [vmem:[#allocation263_spill] sm:$0xff] %v9219_v37  ;;  %v2377_v26 = vsel %vm2368_vm4, %v12498_v43, %v12497_v0  ;;  %v2652_v14 = vsel %vm2637_vm2, %v12499_v11, %v12404_v27  ;;  %v2168_v21 = vmul.f32 %v12382_v15, %v2156_v8  ;;  %v12501_v38 = vld [vmem:[#allocation221_spill] sm:$0xff]  ;;  %v3557_v31 = vmul.f32 %v9016_v44, %v3478_v19  ;;  %v12504_v8 = vld [vmem:[#allocation20_spill] sm:$0xff]  ;;  %v9270_v19 = vpop.permute.xlu0 %3414  ;;  %v12506_v37 = vld [vmem:[#allocation15_spill] sm:$0xff] }
 0x3d7   :  { %12491 = vst [vmem:[#allocation32_spill] sm:$0xff] %v9232_v46  ;;  %v3115_v7 = vmul.f32 %v12501_v38, %v12500_v36  ;;  %v2427_v24 = vsel %vm2368_vm4, %v12497_v0, %v12502_v23  ;;  %v2171_v9 = vmul.f32 %v12383_v60, %v2102_v20  ;;  %v12503_v28 = vld [vmem:[#allocation145_spill] sm:$0xff]  ;;  %v3747_v27 = vsel %vm3737_vm8, %v9137_v13, %v9018_v48  ;;  %v12505_v0 = vld [vmem:[#allocation238_spill] sm:$0xff]  ;;  %v9277_v48 = vpop.permute.xlu1 %4051 }
 0x3d8   :  { %v2649_v43 = vsel %vm2637_vm2, %v12503_v28, %v12461_v3  ;;  %v2878_v11 = vadd.f32 %v12504_v8, %v2782_v22  ;;  %v2276_v42 = vadd.f32 %v2244_v35, %v2007_v40  ;;  %v3621_v36 = vmul.f32 %v9194_v1, %v3557_v31  ;;  %3685 = vrot.lane.b32.xlu0 %v12476_v30, %s5909_s18  ;;  %v12508_v40 = vld [vmem:[#allocation27_spill] sm:$0xff] }
 0x3d9   :  { %v4002_v20 = vadd.f32 %v12505_v0, %v3938_v63  ;;  %v2452_v23 = vmul.f32 %v12357_v6, %v2380_v34  ;;  %v2513_v3 = vmul.f32 %v12506_v37, %v2449_v17  ;;  %v2467_v28 = vmul.f32 %v8580_v16, %v2391_v62  ;;  %12507 = vst [vmem:[#allocation120_spill] sm:$0xff] %v9277_v48  ;;  %v12509_v63 = vld [vmem:[#allocation95_spill] sm:$0xff] }
 0x3da   :  { %v2725_v13 = vmul.f32 %v12351_v57, %v2652_v14  ;;  %v2232_v22 = vmul.f32 %v12508_v40, %v2168_v21  ;;  %v3147_v35 = vadd.f32 %v3115_v7, %v2878_v11  ;;  %v3826_v31 = vmul.f32 %v9035_v47, %v3747_v27  ;;  %3424 = vrot.lane.b32.xlu1 %v12509_v63, %s5907_s15  ;;  %v12510_v14 = vld [vmem:[#allocation101_spill] sm:$0xff]  ;;  %v9292_v21 = vpop.permute.xlu2 %3859  ;;  %v12512_v0 = vld [vmem:[#allocation47_spill] sm:$0xff] }
 0x3db   :  { %v9282_v30 = vadd.f32 %v9277_v48, %v4002_v20  ;;  %v2445_v34 = vmul.f32 %v12356_v33, %v2427_v24  ;;  %v2448_v17 = vmul.f32 %v12357_v6, %v2377_v26  ;;  %v2235_v16 = vmul.f32 %v12508_v40, %v2171_v9  ;;  %12511 = vst [vmem:[#allocation34_spill] sm:$0xff] %v9292_v21  ;;  %v12513_v26 = vld [vmem:[#allocation194_spill] sm:$0xff] }
 0x3dc   :  { %v2721_v62 = vmul.f32 %v12351_v57, %v2649_v43  ;;  %3432 = vrot.lane.b32.xlu2 %v12510_v14, %s5907_s15  ;;  %v2545_v7 = vadd.f32 %v2513_v3, %v2276_v42  ;;  %v3653_v27 = vadd.f32 %v3621_v36, %v3384_v51  ;;  %v3890_v11 = vmul.f32 %v9292_v21, %v3826_v31  ;;  %v12514_v48 = vld [vmem:[#allocation166_spill] sm:$0xff]  ;;  %v12515_v43 = vld [vmem:[#allocation4_spill] sm:$0xff]  ;;  %v12516_v31 = vld [vmem:[#allocation91_spill] sm:$0xff] }
 0x3dd   :  { %v4146_v8 = vmul.f32 0.044715, %v9282_v30  ;;  %v2531_v20 = vmul.f32 %v12512_v0, %v2467_v28  ;;  %v2789_v24 = vmul.f32 %v12191_v56, %v2725_v13  ;;  %v2117_v9 = vsel %vm2099_vm1, %v12514_v48, %v12513_v26  ;;  %v12517_v56 = vld [vmem:[#allocation187_spill] sm:$0xff]  ;;  %v12518_v0 = vld [vmem:[#allocation253_spill] sm:$0xff] }
 0x3de   :  { %v2161_v40 = vsel %vm2099_vm1, %v12513_v26, %v12515_v43  ;;  %v2264_v1 = vadd.f32 %v2232_v22, %v8887_v55  ;;  %v3922_v42 = vadd.f32 %v3890_v11, %v3653_v27  ;;  %v3954_v36 = vadd.f32 %v3147_v35, %v2545_v7  ;;  %v12519_v55 = vld [vmem:[#allocation161_spill] sm:$0xff]  ;;  %v9317_v22 = vpop.permute.xlu0 %3349  ;;  %v12526_v11 = vld [vmem:[#allocation16_spill] sm:$0xff] }
 0x3df   :  { %v4178_v51 = vmul.f32 %v4146_v8, %v9282_v30  ;;  %v2267_v3 = vadd.f32 %v2235_v16, %v8903_v50  ;;  %v3319_v28 = vmul.f32 %v12388_v18, %v12516_v31  ;;  %v3317_v13 = vmul.f32 %v8599_v12, %v12517_v56  ;;  %v12538_v56 = vld [vmem:[#allocation136_spill] sm:$0xff] }
 0x3e0   :  { %v3318_v48 = vmul.f32 %v8596_v53, %v12518_v0  ;;  %v2785_v21 = vmul.f32 %v12493_v49, %v2721_v62  ;;  %v2188_v26 = vmul.f32 %v12382_v15, %v2161_v40  ;;  %3466 = vrot.lane.b32.xlu0 %v12519_v55, %s5907_s15  ;;  %v9320_v35 = vadd.f32 %v3954_v36, %v3922_v42  ;;  %v9332_v15 = vpop.permute.xlu1 %3689  ;;  %v12531_v36 = vld [vmem:[#allocation215_spill] sm:$0xff]  ;;  %v12540_v0 = vld [vmem:[#allocation2_spill] sm:$0xff] }
 0x3e1   :  { %v4210_v50 = vmul.f32 %v4178_v51, %v9282_v30  ;;  %v2191_v16 = vmul.f32 %v12383_v60, %v2117_v9  ;;  %v9324_v7 = vmul.f32 %v9317_v22, %v3317_v13  ;;  %v9330_v49 = vmul.f32 %v9317_v22, %v3319_v28  ;;  %12524 = vst [vmem:[#allocation123_spill] sm:$0xff] %v9332_v15  ;;  %v12528_v51 = vld [vmem:[#allocation68_spill] sm:$0xff] }
 0x3e2   :  { %12520 = vst [vmem:[#allocation118_spill] sm:$0xff] %v9320_v35  ;;  %v9327_v27 = vmul.f32 %v9317_v22, %v3318_v48  ;;  %v9336_v62 = vmul.f32 %v12344_v29, %v9208_v58  ;;  %v9339_v8 = vmul.f32 %v12506_v37, %v2452_v23  ;;  %v9342_v9 = vmul.f32 %v12526_v11, %v2445_v34  ;;  %v9361_v23 = vpop.permute.xlu2 %3406  ;;  %v12557_v35 = vld [vmem:[#allocation84_spill] sm:$0xff] }
 0x3e3   :  { %12521 = vst [vmem:[#allocation179_spill] sm:$0xff] %v9324_v7  ;;  %3693 = vrot.lane.b32.xlu1 %v12509_v63, %s5909_s18  ;;  %v4242_v43 = vadd.f32 %v4210_v50, %v9282_v30  ;;  %v9348_v40 = vadd.f32 %v2531_v20, %v9240_v39  ;;  %v9351_v42 = vmul.f32 %v12526_v11, %v2448_v17  ;;  %v12530_v63 = vld [vmem:[#allocation104_spill] sm:$0xff]  ;;  %v12532_v20 = vld [vmem:[#allocation33_spill] sm:$0xff]  ;;  %v12542_v50 = vld [vmem:[#allocation163_spill] sm:$0xff] }
 0x3e4   :  { %12522 = vst [vmem:[#allocation71_spill] sm:$0xff] %v9327_v27  ;;  %v9354_v58 = vadd.f32 %v12528_v51, %v2789_v24  ;;  %v9357_v37 = vadd.f32 %v8928_v2, %v2264_v1  ;;  %3701 = vrot.lane.b32.xlu2 %v12510_v14, %s5909_s18  ;;  %v9364_v34 = vadd.f32 %v12530_v63, %v2267_v3  ;;  %v12535_v2 = vld [vmem:[#allocation195_spill] sm:$0xff]  ;;  %v12536_v1 = vld [vmem:[#allocation134_spill] sm:$0xff]  ;;  %v12537_v14 = vld [vmem:[#allocation197_spill] sm:$0xff] }
 0x3e5   :  { %12523 = vst [vmem:[#allocation191_spill] sm:$0xff] %v9330_v49  ;;  %v9367_v39 = vadd.f32 %v12531_v36, %v2785_v21  ;;  %v9370_v17 = vmul.f32 %v12532_v20, %v2188_v26  ;;  %v4274_v31 = vmul.f32 0.7978846, %v4242_v43  ;;  %v9373_v24 = vmul.f32 %v12532_v20, %v2191_v16  ;;  %v12539_v3 = vld [vmem:[#allocation65_spill] sm:$0xff]  ;;  %v12541_v26 = vld [vmem:[#allocation196_spill] sm:$0xff]  ;;  %v12544_v43 = vld [vmem:[#allocation139_spill] sm:$0xff] }
 0x3e6   :  { %12525 = vst [vmem:[#allocation75_spill] sm:$0xff] %v9336_v62  ;;  %v2965_v28 = vsel %vm2962_vm5, %v12536_v1, %v12535_v2  ;;  %v1860_v13 = vsel %vm1854_vm3, %v12538_v56, %v12537_v14  ;;  %v1912_v21 = vsel %vm1854_vm3, %v12537_v14, %v12539_v3  ;;  %v3027_v48 = vsel %vm2962_vm5, %v12535_v2, %v12540_v0  ;;  %v12543_v11 = vld [vmem:[#allocation200_spill] sm:$0xff]  ;;  %v12545_v63 = vld [vmem:[#allocation5_spill] sm:$0xff]  ;;  %v12547_v14 = vld [vmem:[#allocation250_spill] sm:$0xff] }
 0x3e7   :  { %12527 = vst [vmem:[#allocation241_spill] sm:$0xff] %v9351_v42  ;;  %v2114_v16 = vsel %vm2099_vm1, %v12542_v50, %v12541_v26  ;;  %v2374_v51 = vsel %vm2368_vm4, %v12544_v43, %v12543_v11  ;;  %5815 = vtanh.f32 %v4274_v31  ;;  %v2426_v36 = vsel %vm2368_vm4, %v12543_v11, %v12545_v63  ;;  %v12546_v20 = vld [vmem:[#allocation240_spill] sm:$0xff]  ;;  %v12548_v2 = vld [vmem:[#allocation251_spill] sm:$0xff]  ;;  %v12549_v50 = vld [vmem:[#allocation202_spill] sm:$0xff] }
 0x3e8   :  { %12529 = vst [vmem:[#allocation181_spill] sm:$0xff] %v9361_v23  ;;  %v3313_v1 = vmul.f32 %v8599_v12, %v12546_v20  ;;  %v3314_v56 = vmul.f32 %v8596_v53, %v12547_v14  ;;  %v3315_v3 = vmul.f32 %v12388_v18, %v12548_v2  ;;  %v1927_v0 = vmul.f32 %v12335_v10, %v1912_v21  ;;  %v12550_v43 = vld [vmem:[#allocation141_spill] sm:$0xff]  ;;  %v12551_v49 = vld [vmem:[#allocation159_spill] sm:$0xff]  ;;  %v12552_v63 = vld [vmem:[#allocation150_spill] sm:$0xff]  ;;  %v9412_v20 = vpop.permute.xlu0 %3345  ;;  %v9426_v27 = vpop.permute.xlu1 %3586 }
 0x3e9   :  { %12533 = vst [vmem:[#allocation109_spill] sm:$0xff] %v9370_v17  ;;  %v1930_v26 = vmul.f32 %v12344_v29, %v1860_v13  ;;  %v2646_v31 = vsel %vm2637_vm2, %v12550_v43, %v12549_v50  ;;  %v2111_v11 = vsel %vm2099_vm1, %v12551_v49, %v12469_v5  ;;  %3450 = vrot.lane.b32.xlu0 %v12552_v63, %s5907_s15  ;;  %v12553_v14 = vld [vmem:[#allocation7_spill] sm:$0xff]  ;;  %v12558_v42 = vld [vmem:[#allocation201_spill] sm:$0xff] }
 0x3ea   :  { %12534 = vst [vmem:[#allocation63_spill] sm:$0xff] %v9373_v24  ;;  %v2696_v2 = vsel %vm2637_vm2, %v12549_v50, %v12553_v14  ;;  %v9418_v21 = vmul.f32 %v9412_v20, %v3313_v1  ;;  %v9421_v13 = vmul.f32 %v9412_v20, %v3314_v56  ;;  %v9424_v43 = vmul.f32 %v9412_v20, %v3315_v3  ;;  %v12559_v1 = vld [vmem:[#allocation79_spill] sm:$0xff]  ;;  %v12560_v14 = vld [vmem:[#allocation81_spill] sm:$0xff]  ;;  %v12561_v3 = vld [vmem:[#allocation198_spill] sm:$0xff] }
 0x3eb   :  { %v3041_v5 = vmul.f32 %v12416_v54, %v2965_v28  ;;  %v2441_v49 = vmul.f32 %v12356_v33, %v2426_v36  ;;  %v2444_v7 = vmul.f32 %v12357_v6, %v2374_v51  ;;  %v2430_v50 = vsel %vm2368_vm4, %v12558_v42, %v12557_v35  ;;  %3677 = vrot.lane.b32.xlu1 %v12559_v1, %s5909_s18  ;;  %v9446_v51 = vpop.permute.xlu2 %3683  ;;  %v12565_v17 = vld [vmem:[#allocation37_spill] sm:$0xff] }
 0x3ec   :  { %12554 = vst [vmem:[#allocation254_spill] sm:$0xff] %v9418_v21  ;;  %v2187_v56 = vmul.f32 %v12383_v60, %v2114_v16  ;;  %v2183_v36 = vmul.f32 %v12383_v60, %v2111_v11  ;;  %3408 = vrot.lane.b32.xlu2 %v12559_v1, %s5907_s15  ;;  %v12563_v21 = vld [vmem:[#allocation22_spill] sm:$0xff]  ;;  %v2714_v23 = vmul.f32 %v12347_v52, %v2696_v2  ;;  %v4114_v60 = vmul.f32 0.5, %v9282_v30 }
 0x3ed   :  { %12555 = vst [vmem:[#allocation126_spill] sm:$0xff] %v9421_v13  ;;  %v12562_v13 = vld [vmem:[#allocation174_spill] sm:$0xff]  ;;  %v5816_v35 = vpop.eup %5815  ;;  %v1999_v62 = vmul.f32 %v12563_v21, %v1927_v0  ;;  %v2002_v16 = vmul.f32 %v12563_v21, %v1930_v26  ;;  %v3042_v24 = vmul.f32 %v12438_v32, %v3027_v48  ;;  %v2505_v12 = vmul.f32 %v12565_v17, %v2441_v49 }
 0x3ee   :  { %12556 = vst [vmem:[#allocation82_spill] sm:$0xff] %v9424_v43  ;;  %v1916_v43 = vsel %vm1854_vm3, %v12561_v3, %v12560_v14  ;;  %v2386_v28 = vsel %vm2368_vm4, %v12562_v13, %v12558_v42  ;;  %v2717_v14 = vmul.f32 %v12351_v57, %v2646_v31  ;;  %v2457_v42 = vmul.f32 %v12356_v33, %v2430_v50  ;;  %v12564_v13 = vld [vmem:[#allocation171_spill] sm:$0xff]  ;;  %v12567_v31 = vld [vmem:[#allocation230_spill] sm:$0xff] }
 0x3ef   :  { %v4338_v11 = vadd.f32 1.0, %v5816_v35  ;;  %v1872_v1 = vsel %vm1854_vm3, %v12564_v13, %v12561_v3  ;;  %v2508_v0 = vmul.f32 %v12565_v17, %v2444_v7  ;;  %v2460_v26 = vmul.f32 %v12357_v6, %v2386_v28  ;;  %v12568_v50 = vld [vmem:[#allocation231_spill] sm:$0xff]  ;;  %v12571_v7 = vld [vmem:[#allocation44_spill] sm:$0xff]  ;;  %v12573_v17 = vld [vmem:[#allocation210_spill] sm:$0xff] }
 0x3f0   :  { %v9462_v2 = vmul.f32 %v12323_v25, %v2187_v56  ;;  %v9465_v48 = vmul.f32 %v12335_v10, %v1916_v43  ;;  %v2247_v33 = vmul.f32 %v12494_v61, %v2183_v36  ;;  %v2268_v21 = vadd.f32 %v12567_v31, %v1999_v62  ;;  %v12569_v3 = vld [vmem:[#allocation11_spill] sm:$0xff]  ;;  %v12574_v61 = vld [vmem:[#allocation162_spill] sm:$0xff]  ;;  %v9483_v62 = vpop.permute.xlu1 %3404  ;;  %v9485_v56 = vpop.permute.xlu0 %3867  ;;  %v12582_v31 = vld [vmem:[#allocation165_spill] sm:$0xff] }
 0x3f1   :  { %v4370_v30 = vmul.f32 %v4338_v11, %v4114_v60  ;;  %v2271_v35 = vadd.f32 %v12568_v50, %v2002_v16  ;;  %v2778_v13 = vmul.f32 %v12569_v3, %v2714_v23  ;;  %v2781_v49 = vmul.f32 %v12569_v3, %v2717_v14  ;;  %3719 = vrot.lane.b32.xlu0 %v12552_v63, %s5909_s18  ;;  %v12578_v16 = vld [vmem:[#allocation203_spill] sm:$0xff]  ;;  %v12579_v14 = vld [vmem:[#allocation205_spill] sm:$0xff] }
 0x3f2   :  { %12566 = vst [vmem:[#allocation78_spill] sm:$0xff] %v9465_v48  ;;  %v9475_v25 = vmul.f32 %v12344_v29, %v1872_v1  ;;  %v9478_v10 = vmul.f32 %v12571_v7, %v2457_v42  ;;  %v1869_v43 = vsel %vm1854_vm3, %v12574_v61, %v12573_v17  ;;  %v9489_v28 = vadd.f32 %v2505_v12, %v2268_v21  ;;  %v12580_v60 = vld [vmem:[#allocation157_spill] sm:$0xff]  ;;  %v12608_v48 = vld [vmem:[#allocation52_spill] sm:$0xff] }
 0x3f3   :  { %12575 = vst [vmem:[#allocation182_spill] sm:$0xff] %v9483_v62  ;;  %v9487_v23 = vand.u32 4294901760, %v4370_v30  ;;  %v9491_v36 = vadd.f32 %v2508_v0, %v2271_v35  ;;  %v9494_v63 = vmul.f32 %v12571_v7, %v2460_v26  ;;  %v3032_v42 = vsel %vm2962_vm5, %v12579_v14, %v12578_v16  ;;  %3458 = vrot.lane.b32.xlu1 %v12580_v60, %s5907_s15  ;;  %v12581_v1 = vld [vmem:[#allocation217_spill] sm:$0xff]  ;;  %v9507_v12 = vpop.permute.xlu2 %3855  ;;  %v12585_v26 = vld [vmem:[#allocation211_spill] sm:$0xff] }
 0x3f4   :  { %12570 = vst [vmem:[#allocation249_spill] sm:$0xff] %v9475_v25  ;;  %v2279_v11 = vadd.f32 %v2247_v33, %v9173_v59  ;;  %v2383_v50 = vsel %vm2368_vm4, %v12582_v31, %v12581_v1  ;;  %v9513_v21 = vadd.f32 %v12585_v26, %v2778_v13  ;;  %v12586_v35 = vld [vmem:[#allocation121_spill] sm:$0xff]  ;;  %v1942_v59 = vmul.f32 %v12344_v29, %v1869_v43  ;;  %v12587_v33 = vld [vmem:[#allocation74_spill] sm:$0xff]  ;;  %v12592_v43 = vld [vmem:[#allocation207_spill] sm:$0xff] }
 0x3f5   :  { %12572 = vst [vmem:[#allocation108_spill] sm:$0xff] %v9478_v10  ;;  %4424 = vmatpush.msra.mxu0 %v9487_v23  ;;  %4607 = vmatpush.msra.mxu3 %v9487_v23  ;;  %v9510_v0 = vsub.f32 %v4370_v30, %v9487_v23  ;;  %v9516_v3 = vadd.f32 %v12586_v35, %v2781_v49  ;;  %v12588_v7 = vld [vmem:[#allocation21_spill] sm:$0xff]  ;;  %v12589_v30 = vld [vmem:[#allocation206_spill] sm:$0xff]  ;;  %v12593_v31 = vld [vmem:[#allocation168_spill] sm:$0xff] }
 0x3f6   :  { %12576 = vst [vmem:[#allocation69_spill] sm:$0xff] %v9487_v23  ;;  %v2699_v17 = vsel %vm2637_vm2, %v12588_v7, %v12587_v33  ;;  %3229 = vrot.lane.b32.xlu2 %v12519_v55, %s5905_s30  ;;  %v9525_v61 = vmul.f32 %v12438_v32, %v3032_v42  ;;  %v12590_v16 = vld [vmem:[#allocation149_spill] sm:$0xff]  ;;  %v2977_v26 = vsel %vm2962_vm5, %v12593_v31, %v12592_v43  ;;  %v12594_v42 = vld [vmem:[#allocation219_spill] sm:$0xff] }
 0x3f7   :  { %12577 = vst [vmem:[#allocation183_spill] sm:$0xff] %v9494_v63  ;;  %v2974_v13 = vsel %vm2962_vm5, %v12590_v16, %v12589_v30  ;;  %v12591_v1 = vld [vmem:[#allocation125_spill] sm:$0xff]  ;;  %4555 = vmatpush.msra.mxu2 %v9510_v0  ;;  %v11634_v29 = vand.u32 4294901760, %v9510_v0  ;;  %v2456_v35 = vmul.f32 %v12357_v6, %v2383_v50  ;;  %v3105_v33 = vmul.f32 %v12594_v42, %v3041_v5  ;;  %v12595_v63 = vld [vmem:[#allocation70_spill] sm:$0xff]  ;;  %v12596_v50 = vld [vmem:[#allocation23_spill] sm:$0xff] }
 0x3f8   :  { %12583 = vst [vmem:[#allocation235_spill] sm:$0xff] %v9507_v12  ;;  %v3030_v49 = vsel %vm2962_vm5, %v12589_v30, %v12591_v1  ;;  %v3106_v23 = vmul.f32 %v12594_v42, %v3042_v24  ;;  %v9542_v16 = vadd.f32 %v9339_v8, %v2279_v11  ;;  %v3103_v30 = vmul.f32 %v12594_v42, %v12595_v63  ;;  %v12597_v24 = vld [vmem:[#allocation156_spill] sm:$0xff]  ;;  %v12598_v11 = vld [vmem:[#allocation135_spill] sm:$0xff]  ;;  %v12600_v42 = vld [vmem:[#allocation213_spill] sm:$0xff] }
 0x3f9   :  { %12584 = vst [vmem:[#allocation133_spill] sm:$0xff] %v9510_v0  ;;  %v2726_v1 = vmul.f32 %v12347_v52, %v2699_v17  ;;  %v4483_v10 = vsub.f32 %v9510_v0, %v11634_v29  ;;  %v3053_v31 = vmul.f32 %v12416_v54, %v2974_v13  ;;  %v3054_v6 = vmul.f32 %v12438_v32, %v3030_v49  ;;  %v12599_v63 = vld [vmem:[#allocation140_spill] sm:$0xff]  ;;  %v9565_v49 = vpop.permute.xlu1 %3681  ;;  %v12604_v29 = vld [vmem:[#allocation218_spill] sm:$0xff]  ;;  %v12605_v62 = vld [vmem:[#allocation49_spill] sm:$0xff] }
 0x3fa   :  { %v2014_v5 = vmul.f32 %v12596_v50, %v1942_v59  ;;  %v2655_v8 = vsel %vm2637_vm2, %v12597_v24, %v12588_v7  ;;  %3426 = vrot.lane.b32.xlu0 %v12598_v11, %s5907_s15  ;;  %v3031_v52 = vsel %vm2962_vm5, %v12592_v43, %v12599_v63  ;;  %v3057_v17 = vmul.f32 %v12416_v54, %v2977_v26  ;;  %v9567_v59 = vpop.permute.xlu0 %3675  ;;  %v12603_v24 = vld [vmem:[#allocation208_spill] sm:$0xff]  ;;  %v12607_v26 = vld [vmem:[#allocation170_spill] sm:$0xff] }
 0x3fb   :  { %v2980_v13 = vsel %vm2962_vm5, %v12600_v42, %v12579_v14  ;;  %12601 = vst [vmem:[#allocation12_spill] sm:$0xff] %v9565_v49  ;;  %v4484_v50 = vand.u32 4294901760, %v4483_v10  ;;  %v2520_v7 = vmul.f32 %v12334_v4, %v2456_v35  ;;  %v2982_v0 = vsel %vm2962_vm5, %v12604_v29, %v12603_v24  ;;  %v12606_v43 = vld [vmem:[#allocation64_spill] sm:$0xff]  ;;  %3727 = vrot.lane.b32.xlu1 %v12580_v60, %s5909_s18  ;;  %v9582_v35 = vpop.permute.xlu2 %3673 }
 0x3fc   :  { %12602 = vst [vmem:[#allocation36_spill] sm:$0xff] %v9567_v59  ;;  %v3137_v25 = vadd.f32 %v3105_v33, %v12605_v62  ;;  %v3138_v63 = vadd.f32 %v3106_v23, %v12606_v43  ;;  %v3135_v14 = vadd.f32 %v3103_v30, %v12607_v26  ;;  %v2729_v42 = vmul.f32 %v12351_v57, %v2655_v8  ;;  %v12609_v10 = vld [vmem:[#allocation24_spill] sm:$0xff]  ;;  %v12619_v43 = vld [vmem:[#allocation261_spill] sm:$0xff]  ;;  %v12620_v26 = vld [vmem:[#allocation39_spill] sm:$0xff] }
 0x3fd   :  { %v2790_v59 = vmul.f32 %v12608_v48, %v2726_v1  ;;  %v3116_v4 = vmul.f32 %v12501_v38, %v12609_v10  ;;  %4485 = vmatpush.msra.mxu1 %v4484_v50  ;;  %12610 = vst [vmem:[#allocation245_spill] sm:$0xff] %v9582_v35  ;;  %v3058_v29 = vmul.f32 %v12438_v32, %v3031_v52  ;;  %v12611_v57 = vld [vmem:[#allocation216_spill] sm:$0xff] }
 0x3fe   :  { %v2283_v62 = vadd.f32 %v9462_v2, %v2014_v5  ;;  %v3061_v23 = vmul.f32 %v12416_v54, %v2980_v13  ;;  %v3117_v60 = vmul.f32 %v12501_v38, %v3053_v31  ;;  %3735 = vrot.lane.b32.xlu2 %v12519_v55, %s5909_s18  ;;  %v9591_v33 = vmul.f32 %v12611_v57, %v2982_v0  ;;  %v12612_v54 = vld [vmem:[#allocation137_spill] sm:$0xff]  ;;  %v12615_v55 = vld [vmem:[#allocation252_spill] sm:$0xff]  ;;  %v12618_v13 = vld [vmem:[#allocation131_spill] sm:$0xff] }
 0x3ff   :  { %v3118_v30 = vmul.f32 %v12501_v38, %v3054_v6  ;;  %v3472_v1 = vsel %vm3468_vm7, %v9167_v45, %v9270_v19  ;;  %v3741_v32 = vsel %vm3737_vm8, %v9565_v49, %v9446_v51  ;;  %v9601_v5 = vadd.f32 %v3137_v25, %v12612_v54  ;;  %v12616_v0 = vld [vmem:[#allocation88_spill] sm:$0xff] }
 0x400   :  { %v2552_v2 = vadd.f32 %v2520_v7, %v2283_v62  ;;  %v9604_v31 = vadd.f32 %v3138_v63, %v9364_v34  ;;  %v3107_v8 = vmul.f32 %v12616_v0, %v12615_v55  ;;  %v2793_v38 = vmul.f32 %v12608_v48, %v2729_v42  ;;  %v12617_v6 = vld [vmem:[#allocation48_spill] sm:$0xff]  ;;  %v12622_v42 = vld [vmem:[#allocation97_spill] sm:$0xff] }
 0x401   :  { %12613 = vst [vmem:[#allocation185_spill] sm:$0xff] %v9601_v5  ;;  %v2886_v52 = vadd.f32 %v12617_v6, %v2790_v59  ;;  %v3148_v50 = vadd.f32 %v3116_v4, %v12618_v13  ;;  %v9612_v24 = vadd.f32 %v3135_v14, %v9357_v37  ;;  %v3149_v7 = vadd.f32 %v3117_v60, %v12619_v43  ;;  %v12621_v59 = vld [vmem:[#allocation61_spill] sm:$0xff]  ;;  %v9626_v4 = vpop.permute.xlu1 %3582  ;;  %v12623_v60 = vld [vmem:[#allocation40_spill] sm:$0xff]  ;;  %v12627_v6 = vld [vmem:[#allocation234_spill] sm:$0xff] }
 0x402   :  { %12614 = vst [vmem:[#allocation112_spill] sm:$0xff] %v9604_v31  ;;  %v3312_v25 = vmul.f32 %v8602_v41, %v12620_v26  ;;  %v3549_v34 = vmul.f32 %v9016_v44, %v3472_v1  ;;  %v3818_v63 = vmul.f32 %v9035_v47, %v3741_v32  ;;  %3695 = vrot.lane.b32.xlu0 %v12598_v11, %s5909_s18  ;;  %v9628_v62 = vpop.permute.xlu0 %3851  ;;  %v12628_v13 = vld [vmem:[#allocation224_spill] sm:$0xff] }
 0x403   :  { %v3150_v48 = vadd.f32 %v3118_v30, %v9367_v39  ;;  %v3120_v10 = vmul.f32 %v12622_v42, %v12621_v59  ;;  %v3121_v37 = vmul.f32 %v12622_v42, %v3057_v17  ;;  %v3122_v14 = vmul.f32 %v12622_v42, %v3058_v29  ;;  %v12624_v39 = vld [vmem:[#allocation142_spill] sm:$0xff]  ;;  %v12625_v30 = vld [vmem:[#allocation269_spill] sm:$0xff]  ;;  %v12626_v17 = vld [vmem:[#allocation43_spill] sm:$0xff] }
 0x404   :  { %v3139_v57 = vadd.f32 %v3107_v8, %v12623_v60  ;;  %v3376_v1 = vmul.f32 %v9412_v20, %v3312_v25  ;;  %v3613_v32 = vmul.f32 %v9626_v4, %v3549_v34  ;;  %v3882_v11 = vmul.f32 %v9628_v62, %v3818_v63  ;;  %3434 = vrot.lane.b32.xlu1 %v12624_v39, %s5907_s15  ;;  %v9642_v8 = vpop.permute.xlu2 %3578  ;;  %v12629_v20 = vld [vmem:[#allocation265_spill] sm:$0xff]  ;;  %v12631_v63 = vld [vmem:[#allocation232_spill] sm:$0xff]  ;;  %v12633_v42 = vld [vmem:[#allocation103_spill] sm:$0xff] }
 0x405   :  { %v2889_v54 = vadd.f32 %v12625_v30, %v2793_v38  ;;  %v3125_v55 = vmul.f32 %v12626_v17, %v3061_v23  ;;  %v3126_v29 = vmul.f32 %v12626_v17, %v9525_v61  ;;  %v3111_v43 = vmul.f32 %v12628_v13, %v12627_v6  ;;  %v12630_v25 = vld [vmem:[#allocation93_spill] sm:$0xff]  ;;  %v12632_v23 = vld [vmem:[#allocation146_spill] sm:$0xff]  ;;  %v12637_v17 = vld [vmem:[#allocation100_spill] sm:$0xff] }
 0x406   :  { %v9645_v26 = vadd.f32 %v3148_v50, %v12629_v20  ;;  %v3112_v34 = vmul.f32 %v12628_v13, %v12630_v25  ;;  %v3113_v59 = vmul.f32 %v12628_v13, %v12631_v63  ;;  %v3645_v38 = vadd.f32 %v3613_v32, %v3376_v1  ;;  %3442 = vrot.lane.b32.xlu2 %v12632_v23, %s5907_s15  ;;  %v12636_v30 = vld [vmem:[#allocation105_spill] sm:$0xff]  ;;  %v12638_v20 = vld [vmem:[#allocation152_spill] sm:$0xff] }
 0x407   :  { %v9654_v61 = vadd.f32 %v3149_v7, %v12633_v42  ;;  %v9657_v60 = vadd.f32 %v3150_v48, %v9542_v16  ;;  %v3114_v50 = vmul.f32 %v12628_v13, %v12636_v30  ;;  %v3152_v6 = vadd.f32 %v3120_v10, %v12637_v17  ;;  %v12639_v32 = vld [vmem:[#allocation92_spill] sm:$0xff]  ;;  %v12640_v48 = vld [vmem:[#allocation119_spill] sm:$0xff]  ;;  %v12641_v13 = vld [vmem:[#allocation122_spill] sm:$0xff] }
 0x408   :  { %v3153_v25 = vadd.f32 %v3121_v37, %v12638_v20  ;;  %v3154_v31 = vadd.f32 %v3122_v14, %v9354_v58  ;;  %v3914_v63 = vadd.f32 %v3882_v11, %v3645_v38  ;;  %v3946_v1 = vadd.f32 %v3139_v57, %v9489_v28  ;;  %v12642_v10 = vld [vmem:[#allocation26_spill] sm:$0xff]  ;;  %v12644_v28 = vld [vmem:[#allocation124_spill] sm:$0xff]  ;;  %v12649_v38 = vld [vmem:[#allocation155_spill] sm:$0xff] }
 0x409   :  { %12634 = vst [vmem:[#allocation113_spill] sm:$0xff] %v9654_v61  ;;  %v9666_v5 = vadd.f32 %v3125_v55, %v12639_v32  ;;  %v9668_v7 = vadd.f32 %v3126_v29, %v2889_v54  ;;  %v3143_v16 = vadd.f32 %v3111_v43, %v9513_v21  ;;  %v3108_v42 = vmul.f32 %v12616_v0, %v12640_v48  ;;  %v12643_v58 = vld [vmem:[#allocation102_spill] sm:$0xff]  ;;  %v12645_v21 = vld [vmem:[#allocation267_spill] sm:$0xff]  ;;  %v12655_v48 = vld [vmem:[#allocation96_spill] sm:$0xff] }
 0x40a   :  { %12635 = vst [vmem:[#allocation67_spill] sm:$0xff] %v9657_v60  ;;  %v9674_v30 = vadd.f32 %v3112_v34, %v12641_v13  ;;  %v9677_v37 = vadd.f32 %v3113_v59, %v12642_v10  ;;  %v3109_v14 = vmul.f32 %v12616_v0, %v12643_v58  ;;  %3679 = vrot.lane.b32.xlu0 %v12644_v28, %s5909_s18  ;;  %v12646_v55 = vld [vmem:[#allocation58_spill] sm:$0xff]  ;;  %v12647_v43 = vld [vmem:[#allocation3_spill] sm:$0xff]  ;;  %v12666_v49 = vld [vmem:[#allocation212_spill] sm:$0xff] }
 0x40b   :  { %v9683_v57 = vadd.f32 %v3946_v1, %v3914_v63  ;;  %v9686_v11 = vadd.f32 %v3114_v50, %v9516_v3  ;;  %v9689_v54 = vadd.f32 %v3152_v6, %v12645_v21  ;;  %v3110_v29 = vmul.f32 %v12616_v0, %v12646_v55  ;;  %v12648_v34 = vld [vmem:[#allocation175_spill] sm:$0xff]  ;;  %v12652_v63 = vld [vmem:[#allocation233_spill] sm:$0xff]  ;;  %v12653_v3 = vld [vmem:[#allocation270_spill] sm:$0xff]  ;;  %v9707_v6 = vpop.permute.xlu0 %1967  ;;  %v9709_v0 = vpop.permute.xlu1 %4041 }
 0x40c   :  { %v3475_v59 = vsel %vm3468_vm7, %v12648_v34, %v12647_v43  ;;  %v9697_v17 = vadd.f32 %v3153_v25, %v12649_v38  ;;  %v9699_v20 = vadd.f32 %v3154_v31, %v2552_v2  ;;  %v3311_v1 = vmul.f32 %v12388_v18, %v12652_v63  ;;  %v12654_v50 = vld [vmem:[#allocation6_spill] sm:$0xff]  ;;  %3703 = vrot.lane.b32.xlu1 %v12624_v39, %s5909_s18  ;;  %v12656_v13 = vld [vmem:[#allocation243_spill] sm:$0xff]  ;;  %v12657_v25 = vld [vmem:[#allocation28_spill] sm:$0xff] }
 0x40d   :  { %v3164_v32 = vadd.f32 %v12654_v50, %v12653_v3  ;;  %v3165_v10 = vadd.f32 %v12656_v13, %v12655_v48  ;;  %v3140_v58 = vadd.f32 %v3108_v42, %v12657_v25  ;;  %v3744_v2 = vsel %vm3737_vm8, %v9332_v15, %v9232_v46  ;;  %v12658_v31 = vld [vmem:[#allocation263_spill] sm:$0xff]  ;;  %v12659_v55 = vld [vmem:[#allocation13_spill] sm:$0xff]  ;;  %v12661_v39 = vld [vmem:[#allocation236_spill] sm:$0xff]  ;;  %v9726_v42 = vpop.permute.xlu2 %3847 }
 0x40e   :  { %12650 = vst [vmem:[#allocation193_spill] sm:$0xff] %v9697_v17  ;;  %v2003_v21 = vmul.f32 %v9707_v6, %v12658_v31  ;;  %v3155_v38 = vadd.f32 %v12659_v55, %v2886_v52  ;;  %v12660_v63 = vld [vmem:[#allocation129_spill] sm:$0xff]  ;;  %v12662_v50 = vld [vmem:[#allocation148_spill] sm:$0xff]  ;;  %v3553_v61 = vmul.f32 %v9016_v44, %v3475_v59  ;;  %3711 = vrot.lane.b32.xlu2 %v12632_v23, %s5909_s18  ;;  %v12665_v25 = vld [vmem:[#allocation259_spill] sm:$0xff] }
 0x40f   :  { %12651 = vst [vmem:[#allocation117_spill] sm:$0xff] %v9699_v20  ;;  %v3156_v3 = vadd.f32 %v12661_v39, %v12660_v63  ;;  %v3141_v60 = vadd.f32 %v3109_v14, %v12662_v50  ;;  %v12664_v48 = vld [vmem:[#allocation225_spill] sm:$0xff]  ;;  %v3484_v31 = vsel %vm3468_vm7, %v12666_v49, %v12665_v25  ;;  %v12667_v15 = vld [vmem:[#allocation14_spill] sm:$0xff]  ;;  %v4380_v14 = vld [vmem:[%s11237_s6 + $0x10] sm:$0xff]  ;;  %v9749_v34 = vadd.f32 %v3165_v10, %v9348_v40 }
 0x410   :  { %12663 = vst [vmem:[#allocation66_spill] sm:$0xff] %v9726_v42  ;;  %v3142_v13 = vadd.f32 %v3110_v29, %v12664_v48  ;;  %v12668_v52 = vld [vmem:[#allocation38_spill] sm:$0xff]  ;;  %v12669_v63 = vld [vmem:[#allocation229_spill] sm:$0xff]  ;;  %v12670_v59 = vld [vmem:[#allocation239_spill] sm:$0xff]  ;;  %v3822_v48 = vmul.f32 %v9035_v47, %v3744_v2  ;;  %v3617_v45 = vmul.f32 %v9426_v27, %v3553_v61 }
 0x411   :  { %v3753_v55 = vsel %vm3737_vm8, %v12668_v52, %v12667_v15  ;;  %v2272_v39 = vadd.f32 %v12669_v63, %v2003_v21  ;;  %v3310_v23 = vmul.f32 %v8596_v53, %v12670_v59  ;;  %v12671_v50 = vld [vmem:[#allocation242_spill] sm:$0xff]  ;;  %12673 = vst [vmem:[#allocation186_spill] sm:$0xff] %v9749_v34  ;;  %v12674_v21 = vld [vmem:[#allocation29_spill] sm:$0xff]  ;;  %v3565_v59 = vmul.f32 %v9016_v44, %v3484_v31  ;;  %v12675_v61 = vld [vmem:[#allocation83_spill] sm:$0xff] }
 0x412   :  { %v3316_v29 = vmul.f32 %v8602_v41, %v12671_v50  ;;  %v12672_v20 = vld [vmem:[#allocation54_spill] sm:$0xff]  ;;  %v9752_v63 = vadd.f32 %v3140_v58, %v12674_v21  ;;  %v3834_v49 = vmul.f32 %v9035_v47, %v3753_v55  ;;  %v3886_v2 = vmul.f32 %v9507_v12, %v3822_v48  ;;  %4394 = vperm.xlu0 %5807, %v4380_v14   ;;  %v12681_v31 = vld [vmem:[#allocation169_spill] sm:$0xff]  ;;  %v12698_v46 = vld [vmem:[#allocation108_spill] sm:$0xff] }
 0x413   :  { %v9746_v17 = vadd.f32 %v3164_v32, %v12672_v20  ;;  %v2541_v52 = vadd.f32 %v9342_v9, %v2272_v39  ;;  %v9760_v20 = vadd.f32 %v3141_v60, %v12675_v61  ;;  %v9763_v40 = vadd.f32 %v3142_v13, %v9491_v36  ;;  %v12678_v32 = vld [vmem:[#allocation50_spill] sm:$0xff]  ;;  %v12680_v9 = vld [vmem:[#allocation51_spill] sm:$0xff]  ;;  %v1983_v14 = vpop.permute.xlu0 %1982  ;;  %v12683_v36 = vld [vmem:[#allocation268_spill] sm:$0xff] }
 0x414   :  { %v3380_v50 = vmul.f32 %v9317_v22, %v3316_v29  ;;  %v3128_v10 = vmul.f32 %v12678_v32, %v9591_v33  ;;  %v12679_v58 = vld [vmem:[#allocation246_spill] sm:$0xff]  ;;  %v3629_v21 = vmul.f32 %v12681_v31, %v3565_v59  ;;  %v3898_v22 = vmul.f32 %v9485_v56, %v3834_v49  ;;  %3410 = vrot.lane.b32.xlu1 %v12644_v28, %s5907_s15  ;;  %v12684_v61 = vld [vmem:[#allocation173_spill] sm:$0xff]  ;;  %v12688_v28 = vld [vmem:[#allocation128_spill] sm:$0xff] }
 0x415   :  { %12676 = vst [vmem:[#allocation60_spill] sm:$0xff] %v9760_v20  ;;  %v3309_v39 = vmul.f32 %v12680_v9, %v12679_v58  ;;  %v3950_v60 = vadd.f32 %v3143_v16, %v2541_v52  ;;  %v12682_v29 = vld [vmem:[#allocation78_spill] sm:$0xff]  ;;  %v2016_v13 = vmul.f32 %v1983_v14, %v12683_v36  ;;  %v12685_v33 = vld [vmem:[#allocation249_spill] sm:$0xff]  ;;  %v3342_v20 = vpop.permute.xlu1 %3341 }
 0x416   :  { %12677 = vst [vmem:[#allocation204_spill] sm:$0xff] %v9763_v40  ;;  %v3649_v55 = vadd.f32 %v3617_v45, %v3380_v50  ;;  %v2015_v48 = vmul.f32 %v1983_v14, %v12682_v29  ;;  %v2017_v40 = vmul.f32 %v1983_v14, %v12684_v61  ;;  %v2018_v32 = vmul.f32 %v1983_v14, %v12685_v33  ;;  %v12689_v16 = vld [vmem:[#allocation109_spill] sm:$0xff]  ;;  %v12690_v59 = vld [vmem:[#allocation266_spill] sm:$0xff]  ;;  %v12692_v61 = vld [vmem:[#allocation63_spill] sm:$0xff]  ;;  %v9789_v14 = vpop.permute.xlu2 %4026 }
 0x417   :  { %v9777_v34 = vmul.f32 %v3342_v20, %v3309_v39  ;;  %v9779_v45 = vmul.f32 %v3342_v20, %v3310_v23  ;;  %v9781_v49 = vmul.f32 %v3342_v20, %v3311_v1  ;;  %3418 = vrot.lane.b32.xlu2 %v12688_v28, %s5907_s15  ;;  %v2285_v50 = vadd.f32 %v12690_v59, %v2016_v13  ;;  %v12691_v29 = vld [vmem:[#allocation106_spill] sm:$0xff]  ;;  %v12696_v33 = vld [vmem:[#allocation181_spill] sm:$0xff] }
 0x418   :  { %v3918_v58 = vadd.f32 %v3886_v2, %v3649_v55  ;;  %v2284_v52 = vadd.f32 %v12689_v16, %v2015_v48  ;;  %v2286_v36 = vadd.f32 %v12691_v29, %v2017_v40  ;;  %v2287_v12 = vadd.f32 %v12692_v61, %v2018_v32  ;;  %12693 = vst [vmem:[#allocation257_spill] sm:$0xff] %v9789_v14  ;;  %v12694_v2 = vld [vmem:[#allocation180_spill] sm:$0xff]  ;;  %v12695_v55 = vld [vmem:[#allocation222_spill] sm:$0xff]  ;;  %v12701_v40 = vld [vmem:[#allocation183_spill] sm:$0xff] }
 0x419   :  { %12686 = vst [vmem:[#allocation244_spill] sm:$0xff] %v9779_v45  ;;  %v3160_v39 = vadd.f32 %v3128_v10, %v12694_v2  ;;  %v3661_v23 = vadd.f32 %v3629_v21, %v12695_v55  ;;  %v12697_v1 = vld [vmem:[#allocation182_spill] sm:$0xff]  ;;  %v12702_v61 = vld [vmem:[#allocation36_spill] sm:$0xff]  ;;  %v12707_v55 = vld [vmem:[#allocation143_spill] sm:$0xff] }
 0x41a   :  { %12687 = vst [vmem:[#allocation256_spill] sm:$0xff] %v9781_v49  ;;  %v3469_v49 = vsel %vm3468_vm7, %v12697_v1, %v12696_v33  ;;  %v3982_v45 = vadd.f32 %v3950_v60, %v3918_v58  ;;  %v2553_v18 = vadd.f32 %v12698_v46, %v2284_v52  ;;  %v12699_v48 = vld [vmem:[#allocation114_spill] sm:$0xff]  ;;  %v2556_v29 = vadd.f32 %v12701_v40, %v2287_v12  ;;  %v12703_v2 = vld [vmem:[#allocation260_spill] sm:$0xff] }
 0x41b   :  { %v2554_v16 = vadd.f32 %v12699_v48, %v2285_v50  ;;  %v12700_v13 = vld [vmem:[#allocation226_spill] sm:$0xff]  ;;  %v3930_v10 = vadd.f32 %v3898_v22, %v3661_v23  ;;  %v3738_v21 = vsel %vm3737_vm8, %v9582_v35, %v12702_v61  ;;  %v2004_v60 = vmul.f32 %v9707_v6, %v12703_v2  ;;  %v12706_v22 = vld [vmem:[#allocation184_spill] sm:$0xff]  ;;  %v12708_v48 = vld [vmem:[#allocation75_spill] sm:$0xff] }
 0x41c   :  { %v2555_v59 = vadd.f32 %v12700_v13, %v2286_v36  ;;  %v4378_v32 = vld [vmem:[%s11237_s6] sm:$0xff]  ;;  %v9809_v46 = vadd.f32 %v9789_v14, %v3982_v45  ;;  %v3962_v58 = vadd.f32 %v3155_v38, %v2553_v18  ;;  %v9817_v50 = vadd.f32 %v9668_v7, %v2556_v29  ;;  %v9826_v18 = vpop.permute.xlu0 %4046  ;;  %v12709_v38 = vld [vmem:[#allocation89_spill] sm:$0xff]  ;;  %v12712_v40 = vld [vmem:[#allocation176_spill] sm:$0xff] }
 0x41d   :  { %v9811_v52 = vadd.f32 %v3156_v3, %v2554_v16  ;;  %v3308_v36 = vmul.f32 %v8602_v41, %v12706_v22  ;;  %v2005_v23 = vmul.f32 %v9707_v6, %v12707_v55  ;;  %v2006_v13 = vmul.f32 %v9707_v6, %v12708_v48  ;;  %4384 = vperm.xlu1 %5808, %v4378_v32   ;;  %v12711_v16 = vld [vmem:[#allocation31_spill] sm:$0xff]  ;;  %v9841_v32 = vpop.permute.xlu1 %4036  ;;  %v12714_v48 = vld [vmem:[#allocation228_spill] sm:$0xff] }
 0x41e   :  { %v9814_v12 = vadd.f32 %v9666_v5, %v2555_v59  ;;  %12705 = vst [vmem:[#allocation85_spill] sm:$0xff] %v9817_v50  ;;  %v4126_v45 = vmul.f32 0.044715, %v9809_v46  ;;  %v12710_v5 = vld [vmem:[#allocation57_spill] sm:$0xff]  ;;  %v9831_v7 = vadd.f32 %v3160_v39, %v12711_v16  ;;  %v3994_v59 = vadd.f32 %v3962_v58, %v3930_v10  ;;  %v12713_v55 = vld [vmem:[#allocation35_spill] sm:$0xff] }
 0x41f   :  { %v3161_v3 = vadd.f32 %v12710_v5, %v12709_v38  ;;  %v9835_v41 = vadd.f32 %v9826_v18, %v12712_v40  ;;  %v3545_v29 = vmul.f32 %v9016_v44, %v3469_v49  ;;  %v3814_v6 = vmul.f32 %v9035_v47, %v3738_v21  ;;  %3687 = vrot.lane.b32.xlu2 %v12688_v28, %s5909_s18  ;;  %v9853_v47 = vpop.permute.xlu2 %3227  ;;  %v12715_v49 = vld [vmem:[#allocation86_spill] sm:$0xff]  ;;  %v12716_v21 = vld [vmem:[#allocation115_spill] sm:$0xff]  ;;  %v4381_v16 = vld [vmem:[%s11237_s6 + $0x18] sm:$0xff] }
 0x420   :  { %12704 = vst [vmem:[#allocation77_spill] sm:$0xff] %v9814_v12  ;;  %v3372_v2 = vmul.f32 %v3342_v20, %v3308_v36  ;;  %v4158_v22 = vmul.f32 %v4126_v45, %v9809_v46  ;;  %v2273_v39 = vadd.f32 %v12713_v55, %v2004_v60  ;;  %v9846_v10 = vadd.f32 %v9709_v0, %v3994_v59  ;;  %v12717_v60 = vld [vmem:[#allocation178_spill] sm:$0xff]  ;;  %v5891_v59 = vld [vmem:[%s11235_s7 + $0x8] sm:$0xff] }
 0x421   :  { %v4142_v58 = vmul.f32 0.044715, %v9835_v41  ;;  %v9851_v44 = vadd.f32 %v9841_v32, %v12714_v48  ;;  %v3609_v20 = vmul.f32 %v9642_v8, %v3545_v29  ;;  %v2274_v28 = vadd.f32 %v12715_v49, %v2005_v23  ;;  %v12719_v55 = vld [vmem:[#allocation199_spill] sm:$0xff] }
 0x422   :  { %v2275_v36 = vadd.f32 %v12716_v21, %v2006_v13  ;;  %v4190_v45 = vmul.f32 %v4158_v22, %v9809_v46  ;;  %v9860_v38 = vadd.f32 %v3161_v3, %v12717_v60  ;;  %v9869_v40 = vperm.slane %v5891_v59, 7  ;;  %v4379_v49 = vld [vmem:[%s11237_s6 + $0x8] sm:$0xff] }
 0x423   :  { %v4134_v5 = vmul.f32 0.044715, %v9851_v44  ;;  %v4174_v23 = vmul.f32 %v4142_v58, %v9835_v41  ;;  %v3878_v13 = vmul.f32 %v9726_v42, %v3814_v6  ;;  %v3641_v29 = vadd.f32 %v3609_v20, %v3372_v2  ;;  %v4374_v58 = vld [vmem:[%s11238_s5] sm:$0xff]  ;;  %v12721_v20 = vld [vmem:[#allocation241_spill] sm:$0xff] }
 0x424   :  { %12718 = vst [vmem:[#allocation25_spill] sm:$0xff] %v9860_v38  ;;  %v4138_v3 = vmul.f32 0.044715, %v9846_v10  ;;  %v4222_v22 = vadd.f32 %v4190_v45, %v9809_v46  ;;  %v2542_v48 = vadd.f32 %v12719_v55, %v2273_v39  ;;  %v12720_v6 = vld [vmem:[#allocation154_spill] sm:$0xff]  ;;  %v2544_v59 = vadd.f32 %v12721_v20, %v2275_v36  ;;  %v9886_v45 = vpop.permute.xlu0 %4021  ;;  %v12727_v20 = vld [vmem:[#allocation255_spill] sm:$0xff] }
 0x425   :  { %v4206_v21 = vmul.f32 %v4174_v23, %v9835_v41  ;;  %v4166_v60 = vmul.f32 %v4134_v5, %v9851_v44  ;;  %v2543_v2 = vadd.f32 %v12720_v6, %v2274_v28  ;;  %4399 = vperm.xlu1 %5808, %v4381_v16   ;;  %12722 = vst [vmem:[#allocation147_spill] sm:$0xff] %v9886_v45  ;;  %v4404_v35 = vsel %vm4402_vm9, %v4374_v58, 0  ;;  %v12723_v38 = vld [vmem:[#allocation258_spill] sm:$0xff]  ;;  %v9897_v36 = vpop.permute.xlu1 %4031 }
 0x426   :  { %v4170_v39 = vmul.f32 %v4138_v3, %v9846_v10  ;;  %v4254_v55 = vmul.f32 0.7978846, %v4222_v22  ;;  %v4058_v23 = vadd.f32 %v9886_v45, %v9683_v57  ;;  %v3254_v28 = vsel %vm3231_vm6, %v12723_v38, %v9853_v47  ;;  %12724 = vst [vmem:[#allocation72_spill] sm:$0xff] %v9897_v36  ;;  %v12725_v6 = vld [vmem:[#allocation118_spill] sm:$0xff] }
 0x427   :  { %v4238_v5 = vadd.f32 %v4206_v21, %v9835_v41  ;;  %v4198_v1 = vmul.f32 %v4166_v60, %v9851_v44  ;;  %4389 = vperm.xlu2 %5810, %v4379_v49   ;;  %v3910_v16 = vadd.f32 %v3878_v13, %v3641_v29  ;;  %v9902_v57 = vadd.f32 %v9897_v36, %v12725_v6  ;;  %v9904_v21 = vpop.permute.xlu2 %3456 }
 0x428   :  { %v4202_v3 = vmul.f32 %v4170_v39, %v9846_v10  ;;  %5817 = vtanh.f32 %v4254_v55  ;;  %v4122_v22 = vmul.f32 0.044715, %v4058_v23  ;;  %12726 = vst [vmem:[#allocation188_spill] sm:$0xff] %v9904_v21  ;;  %v3488_v38 = vsel %vm3468_vm7, %v12727_v20, %v9904_v21 }
 0x429   :  { %v4270_v60 = vmul.f32 0.7978846, %v4238_v5  ;;  %v4230_v58 = vadd.f32 %v4198_v1, %v9851_v44  ;;  %v9911_v13 = vand.u32 4294901760, %v4404_v35  ;;  %v9914_v29 = vadd.f32 %v9674_v30, %v2542_v48 }
 0x42a   :  { %v4234_v49 = vadd.f32 %v4202_v3, %v9846_v10  ;;  %v4130_v39 = vmul.f32 0.044715, %v9902_v57  ;;  %v9918_v6 = vadd.f32 %v9677_v37, %v2543_v2  ;;  %v3337_v1 = vmul.f32 %v12680_v9, %v3254_v28 }
 0x42b   :  { %12728 = vst [vmem:[#allocation158_spill] sm:$0xff] %v9914_v29  ;;  %5819 = vtanh.f32 %v4270_v60  ;;  %v4262_v55 = vmul.f32 0.7978846, %v4230_v58  ;;  %v4154_v50 = vmul.f32 %v4122_v22, %v4058_v23  ;;  %v9922_v20 = vadd.f32 %v9686_v11, %v2544_v59 }
 0x42c   :  { %12729 = vst [vmem:[#allocation53_spill] sm:$0xff] %v9918_v6  ;;  %v4266_v5 = vmul.f32 0.7978846, %v4234_v49  ;;  %v3570_v3 = vmul.f32 %v9869_v40, %v3488_v38  ;;  %v3974_v12 = vadd.f32 %v9612_v24, %v3910_v16  ;;  %v4162_v30 = vmul.f32 %v4130_v39, %v9902_v57  ;;  %v9927_v60 = vpop.permute.xlu0 %3733  ;;  %v12733_v16 = vld [vmem:[#allocation56_spill] sm:$0xff] }
 0x42d   :  { %12730 = vst [vmem:[#allocation192_spill] sm:$0xff] %v9922_v20  ;;  %5821 = vtanh.f32 %v4262_v55  ;;  %v4094_v37 = vmul.f32 0.5, %v9809_v46  ;;  %v4186_v2 = vmul.f32 %v4154_v50, %v4058_v23  ;;  %v9931_v9 = vsub.f32 %v4404_v35, %v9911_v13  ;;  %v9939_v58 = vpop.permute.xlu1 %4016  ;;  %v12735_v35 = vld [vmem:[#allocation138_spill] sm:$0xff]  ;;  %v12739_v20 = vld [vmem:[#allocation264_spill] sm:$0xff] }
 0x42e   :  { %v5818_v48 = vpop.eup %5817  ;;  %12731 = vst [vmem:[#allocation144_spill] sm:$0xff] %v9927_v60  ;;  %5823 = vtanh.f32 %v4266_v5  ;;  %v4110_v11 = vmul.f32 0.5, %v9835_v41  ;;  %v4106_v59 = vmul.f32 0.5, %v9846_v10  ;;  %v4194_v28 = vmul.f32 %v4162_v30, %v9902_v57  ;;  %v9948_v41 = vld [vmem:[%s11235_s7 + $0x28] ss:$0 sm:$0xff] }
 0x42f   :  { %12732 = vst [vmem:[#allocation46_spill] sm:$0xff] %v9931_v9  ;;  %v4318_v24 = vadd.f32 1.0, %v5818_v48  ;;  %v9937_v22 = vmul.f32 %v12733_v16, %v3337_v1  ;;  %v4102_v38 = vmul.f32 0.5, %v9851_v44  ;;  %v9942_v49 = vmul.f32 0.5, %v4058_v23  ;;  %v9953_v55 = vpop.permute.xlu2 %3725  ;;  %v12737_v44 = vld [vmem:[#allocation9_spill] sm:$0xff] }
 0x430   :  { %12734 = vst [vmem:[#allocation30_spill] sm:$0xff] %v9939_v58  ;;  %v4218_v46 = vadd.f32 %v4186_v2, %v4058_v23  ;;  %v3634_v39 = vmul.f32 %v12735_v35, %v3570_v3  ;;  %v9951_v10 = vadd.f32 %v9939_v58, %v3974_v12  ;;  %v4226_v1 = vadd.f32 %v4194_v28, %v9902_v57 }
 0x431   :  { %v5820_v50 = vpop.eup %5819  ;;  %12736 = vst [vmem:[#allocation189_spill] sm:$0xff] %v9953_v55  ;;  %v4350_v5 = vmul.f32 %v4318_v24, %v4094_v37  ;;  %v3757_v23 = vsel %vm3737_vm8, %v12737_v44, %v9953_v55  ;;  %v9960_v3 = vand.u32 4294901760, %v9931_v9  ;;  %v3760_v12 = vsel %vm3737_vm8, %v12739_v20, %v9927_v60  ;;  %v12741_v44 = vld [vmem:[#allocation160_spill] sm:$0xff] }
 0x432   :  { %v4334_v30 = vadd.f32 1.0, %v5820_v50  ;;  %v4250_v48 = vmul.f32 0.7978846, %v4218_v46  ;;  %v4118_v6 = vmul.f32 0.044715, %v9951_v10  ;;  %v3839_v58 = vmul.f32 %v9948_v41, %v3757_v23  ;;  %v12740_v46 = vld [vmem:[#allocation62_spill] sm:$0xff] }
 0x433   :  { %12738 = vst [vmem:[#allocation116_spill] sm:$0xff] %v9960_v3  ;;  %v5822_v2 = vpop.eup %5821  ;;  %v4258_v28 = vmul.f32 0.7978846, %v4226_v1  ;;  %v9967_v21 = vand.u32 4294901760, %v4350_v5  ;;  %v3666_v50 = vadd.f32 %v3634_v39, %v12740_v46  ;;  %v4098_v23 = vmul.f32 0.5, %v9902_v57 }
 0x434   :  { %v5824_v37 = vpop.eup %5823  ;;  %v4366_v24 = vmul.f32 %v4334_v30, %v4110_v11  ;;  %v4326_v35 = vadd.f32 1.0, %v5822_v2  ;;  %5825 = vtanh.f32 %v4250_v48  ;;  %v3903_v55 = vmul.f32 %v12741_v44, %v3839_v58  ;;  %v9971_v42 = vpop.permute.xlu0 %3440  ;;  %v12744_v48 = vld [vmem:[#allocation19_spill] sm:$0xff] }
 0x435   :  { %v4330_v14 = vadd.f32 1.0, %v5824_v37  ;;  %5827 = vtanh.f32 %v4258_v28  ;;  %12742 = vst [vmem:[#allocation190_spill] sm:$0xff] %v9971_v42  ;;  %v4150_v1 = vmul.f32 %v4118_v6, %v9951_v10  ;;  %v3843_v11 = vmul.f32 %v9948_v41, %v3760_v12  ;;  %v9981_v58 = vpop.permute.xlu1 %3464 }
 0x436   :  { %v9973_v20 = vand.u32 4294901760, %v4366_v24  ;;  %v4358_v45 = vmul.f32 %v4326_v35, %v4102_v38  ;;  %v3935_v30 = vadd.f32 %v3903_v55, %v3666_v50  ;;  %v3482_v39 = vsel %vm3468_vm7, %v12744_v48, %v9971_v42 }
 0x437   :  { %v4362_v2 = vmul.f32 %v4330_v14, %v4106_v59  ;;  %v9991_v6 = vsub.f32 %v4350_v5, %v9967_v21  ;;  %v3562_v14 = vmul.f32 %v9869_v40, %v3482_v39  ;;  %v12746_v59 = vld [vmem:[#allocation73_spill] sm:$0xff]  ;;  %v10002_v28 = vpop.permute.xlu2 %3432  ;;  %v4375_v5 = vld [vmem:[%s11238_s5 + $0x8] sm:$0xff]  ;;  %v4182_v48 = vmul.f32 %v4150_v1, %v9951_v10 }
 0x438   :  { %12743 = vst [vmem:[#allocation151_spill] sm:$0xff] %v9973_v20  ;;  %4426 = vmatpush.msra.mxu0 %v9973_v20  ;;  %4609 = vmatpush.msra.mxu3 %v9973_v20  ;;  %v9986_v38 = vsub.f32 %v4366_v24, %v9973_v20  ;;  %v9988_v57 = vand.u32 4294901760, %v4358_v45  ;;  %v9996_v55 = vadd.f32 %v9831_v7, %v3935_v30  ;;  %v12749_v7 = vld [vmem:[#allocation167_spill] sm:$0xff]  ;;  %v10029_v1 = vsel %vm4402_vm9, %v4375_v5, 0 }
 0x439   :  { %v3491_v12 = vsel %vm3468_vm7, %v12746_v59, %v9981_v58  ;;  %12747 = vst [vmem:[#allocation76_spill] sm:$0xff] %v10002_v28  ;;  %v10004_v37 = vand.u32 4294901760, %v4362_v2  ;;  %v3479_v50 = vsel %vm3468_vm7, %v12749_v7, %v10002_v28  ;;  %v12750_v59 = vld [vmem:[#allocation94_spill] sm:$0xff]  ;;  %v12751_v28 = vld [vmem:[#allocation80_spill] sm:$0xff]  ;;  %v12754_v20 = vld [vmem:[#allocation227_spill] sm:$0xff] }
 0x43a   :  { %12745 = vst [vmem:[#allocation153_spill] sm:$0xff] %v9988_v57  ;;  %v5826_v24 = vpop.eup %5825  ;;  %v3574_v46 = vmul.f32 %v9869_v40, %v3491_v12  ;;  %4558 = vmatpush.msra.mxu2 %v9986_v38  ;;  %v10015_v30 = vsub.f32 %v4358_v45, %v9988_v57  ;;  %v3907_v35 = vmul.f32 %v12750_v59, %v3843_v11  ;;  %v11661_v7 = vand.u32 4294901760, %v9986_v38 }
 0x43b   :  { %12748 = vst [vmem:[#allocation221_spill] sm:$0xff] %v10004_v37  ;;  %v5828_v39 = vpop.eup %5827  ;;  %v3558_v44 = vmul.f32 %v9869_v40, %v3479_v50  ;;  %4428 = vmatpush.msra.mxu0 %v10004_v37  ;;  %4611 = vmatpush.msra.mxu3 %v10004_v37  ;;  %v10023_v12 = vsub.f32 %v4362_v2, %v10004_v37  ;;  %v4314_v50 = vadd.f32 1.0, %v5826_v24 }
 0x43c   :  { %v3638_v42 = vmul.f32 %v12751_v28, %v3574_v46  ;;  %v4322_v45 = vadd.f32 1.0, %v5828_v39  ;;  %v4489_v11 = vsub.f32 %v9986_v38, %v11661_v7  ;;  %v12752_v46 = vld [vmem:[#allocation164_spill] sm:$0xff]  ;;  %v10041_v5 = vpop.permute.xlu0 %3709  ;;  %v4214_v37 = vadd.f32 %v4182_v48, %v9951_v10  ;;  %v12755_v7 = vld [vmem:[#allocation45_spill] sm:$0xff] }
 0x43d   :  { %4430 = vmatpush.msra.mxu0 %v9988_v57  ;;  %4561 = vmatpush.msra.mxu2 %v10023_v12  ;;  %v3626_v39 = vmul.f32 %v12752_v46, %v3562_v14  ;;  %12753 = vst [vmem:[#allocation10_spill] sm:$0xff] %v10041_v5  ;;  %v3622_v60 = vmul.f32 %v12754_v20, %v3558_v44  ;;  %v12756_v14 = vand.u32 4294901760, %v10023_v12  ;;  %v10053_v46 = vpop.permute.xlu1 %3448  ;;  %v12757_v44 = vand.u32 4294901760, %v10015_v30  ;;  %v12761_v28 = vld [vmem:[#allocation172_spill] sm:$0xff] }
 0x43e   :  { %v3670_v61 = vadd.f32 %v3638_v42, %v9937_v22  ;;  %4613 = vmatpush.msra.mxu3 %v9988_v57  ;;  %v4354_v59 = vmul.f32 %v4322_v45, %v4098_v23  ;;  %v3751_v2 = vsel %vm3737_vm8, %v12755_v7, %v10041_v5  ;;  %v4490_v24 = vand.u32 4294901760, %v4489_v11  ;;  %v12760_v5 = vld [vmem:[#allocation177_spill] sm:$0xff] }
 0x43f   :  { %4564 = vmatpush.msra.mxu2 %v10015_v30  ;;  %v4495_v42 = vsub.f32 %v10023_v12, %v12756_v14  ;;  %v3831_v29 = vmul.f32 %v9948_v41, %v3751_v2  ;;  %v4501_v48 = vsub.f32 %v10015_v30, %v12757_v44  ;;  %v3485_v7 = vsel %vm3468_vm7, %v12665_v25, %v10053_v46  ;;  %v10063_v45 = vpop.permute.xlu2 %3701  ;;  %v12759_v2 = vld [vmem:[#allocation110_spill] sm:$0xff] }
 0x440   :  { %v3939_v22 = vadd.f32 %v3907_v35, %v3670_v61  ;;  %v10055_v23 = vand.u32 4294901760, %v4354_v59  ;;  %4491 = vmatpush.msra.mxu1 %v4490_v24  ;;  %12758 = vst [vmem:[#allocation145_spill] sm:$0xff] %v10063_v45  ;;  %v4346_v61 = vmul.f32 %v4314_v50, %v9942_v49  ;;  %v4246_v35 = vmul.f32 0.7978846, %v4214_v37  ;;  %v12763_v24 = vld [vmem:[#allocation34_spill] sm:$0xff] }
 0x441   :  { %v4496_v11 = vand.u32 4294901760, %v4495_v42  ;;  %v3658_v14 = vadd.f32 %v3626_v39, %v12759_v2  ;;  %v3895_v57 = vmul.f32 %v12760_v5, %v3831_v29  ;;  %v3748_v44 = vsel %vm3737_vm8, %v12761_v28, %v10063_v45 }
 0x442   :  { %v4003_v20 = vadd.f32 %v9746_v17, %v3939_v22  ;;  %4432 = vmatpush.msra.mxu0 %v10055_v23  ;;  %v3827_v25 = vmul.f32 %v9948_v41, %v3748_v44  ;;  %4615 = vmatpush.msra.mxu3 %v10055_v23  ;;  %v10076_v49 = vsub.f32 %v4354_v59, %v10055_v23  ;;  %v10078_v37 = vand.u32 4294901760, %v4346_v61  ;;  %v12762_v17 = vld [vmem:[#allocation247_spill] sm:$0xff] }
 0x443   :  { %4497 = vmatpush.msra.mxu1 %v4496_v11  ;;  %5829 = vtanh.f32 %v4246_v35  ;;  %v3654_v50 = vadd.f32 %v3622_v60, %v12762_v17  ;;  %v3927_v29 = vadd.f32 %v3895_v57, %v3658_v14  ;;  %v3566_v39 = vmul.f32 %v9869_v40, %v3485_v7  ;;  %v4376_v60 = vld [vmem:[%s11238_s5 + $0x10] sm:$0xff] }
 0x444   :  { %4434 = vmatpush.msra.mxu0 %v9967_v21  ;;  %v4502_v28 = vand.u32 4294901760, %v4501_v48  ;;  %v3891_v42 = vmul.f32 %v12763_v24, %v3827_v25  ;;  %4567 = vmatpush.msra.mxu2 %v10076_v49  ;;  %v10087_v59 = vsub.f32 %v4346_v61, %v10078_v37  ;;  %v11664_v22 = vand.u32 4294901760, %v10076_v49  ;;  %v12764_v57 = vld [vmem:[#allocation120_spill] sm:$0xff]  ;;  %v10103_v61 = vpop.permute.xlu0 %3416 }
 0x445   :  { %4617 = vmatpush.msra.mxu3 %v9967_v21  ;;  %v10091_v11 = vand.u32 4294901760, %v10029_v1  ;;  %v10097_v48 = vadd.f32 %v12764_v57, %v4003_v20  ;;  %v10100_v7 = vadd.f32 %v9689_v54, %v3927_v29  ;;  %12765 = vst [vmem:[#allocation20_spill] sm:$0xff] %v10103_v61  ;;  %v12766_v35 = vsub.f32 %v9931_v9, %v9960_v3 }
 0x446   :  { %4503 = vmatpush.msra.mxu1 %v4502_v28  ;;  %4436 = vmatpush.msra.mxu0 %v10078_v37  ;;  %v12768_v14 = vand.u32 4294901760, %v9991_v6  ;;  %v3923_v25 = vadd.f32 %v3891_v42, %v3654_v50  ;;  %v3473_v54 = vsel %vm3468_vm7, %v9270_v19, %v10103_v61  ;;  %v4507_v20 = vsub.f32 %v10076_v49, %v11664_v22 }
 0x447   :  { %v10108_v2 = vand.u32 4294901760, %v12766_v35  ;;  %4570 = vmatpush.msra.mxu2 %v9991_v6  ;;  %4619 = vmatpush.msra.mxu3 %v10078_v37  ;;  %v11667_v17 = vand.u32 4294901760, %v10087_v59  ;;  %v3630_v29 = vmul.f32 %v12681_v31, %v3566_v39  ;;  %v3550_v28 = vmul.f32 %v9869_v40, %v3473_v54  ;;  %v10124_v35 = vpop.permute.xlu1 %3717  ;;  %v10136_v39 = vpop.permute.xlu2 %3408 }
 0x448   :  { %v4513_v44 = vsub.f32 %v9991_v6, %v12768_v14  ;;  %v10128_v50 = vsub.f32 %v10029_v1, %v10091_v11  ;;  %v4410_v42 = vsel %vm4402_vm9, %v4376_v60, 0  ;;  %v3987_v19 = vadd.f32 %v9645_v26, %v3923_v25  ;;  %12770 = vst [vmem:[#allocation27_spill] sm:$0xff] %v10136_v39 }
 0x449   :  { %12767 = vst [vmem:[#allocation238_spill] sm:$0xff] %v10108_v2  ;;  %v5830_v14 = vpop.eup %5829  ;;  %4573 = vmatpush.msra.mxu2 %v10087_v59  ;;  %v3754_v22 = vsel %vm3737_vm8, %v12667_v15, %v10124_v35  ;;  %v4508_v54 = vand.u32 4294901760, %v4507_v20  ;;  %v4519_v24 = vsub.f32 %v10087_v59, %v11667_v17  ;;  %v3470_v60 = vsel %vm3468_vm7, %v12696_v33, %v10136_v39  ;;  %v12772_v17 = vld [vmem:[#allocation209_spill] sm:$0xff] }
 0x44a   :  { %12769 = vst [vmem:[#allocation15_spill] sm:$0xff] %v10128_v50  ;;  %v3835_v1 = vmul.f32 %v9948_v41, %v3754_v22  ;;  %v4086_v26 = vmul.f32 0.5, %v9951_v10  ;;  %v4310_v25 = vadd.f32 1.0, %v5830_v14  ;;  %v10148_v45 = vadd.f32 %v9826_v18, %v9996_v55 }
 0x44b   :  { %v3546_v15 = vmul.f32 %v9869_v40, %v3470_v60  ;;  %4509 = vmatpush.msra.mxu1 %v4508_v54  ;;  %v4514_v20 = vand.u32 4294901760, %v4513_v44  ;;  %v10152_v61 = vand.u32 4294901760, %v10128_v50  ;;  %v3662_v22 = vadd.f32 %v3630_v29, %v12772_v17  ;;  %v5892_v17 = vld [vmem:[%s11235_s7 + $0x10] sm:$0xff] }
 0x44c   :  { %v3899_v5 = vmul.f32 %v9485_v56, %v3835_v1  ;;  %v4342_v57 = vmul.f32 %v4310_v25, %v4086_v26  ;;  %v10156_v33 = vand.u32 4294901760, %v4410_v42  ;;  %v3614_v10 = vmul.f32 %v9626_v4, %v3550_v28  ;;  %v10163_v39 = vpop.permute.xlu0 %3685 }
 0x44d   :  { %12771 = vst [vmem:[#allocation95_spill] sm:$0xff] %v10152_v61  ;;  %v3610_v14 = vmul.f32 %v9642_v8, %v3546_v15  ;;  %4515 = vmatpush.msra.mxu1 %v4514_v20  ;;  %v4520_v55 = vand.u32 4294901760, %v4519_v24  ;;  %v4147_v60 = vmul.f32 0.044715, %v10097_v48  ;;  %v10168_v29 = vperm.slane %v5892_v17, 7 }
 0x44e   :  { %v3931_v54 = vadd.f32 %v3899_v5, %v3662_v22  ;;  %v10161_v44 = vand.u32 4294901760, %v4342_v57  ;;  %v10171_v1 = vsub.f32 %v4410_v42, %v10156_v33  ;;  %v3742_v5 = vsel %vm3737_vm8, %v9446_v51, %v10163_v39  ;;  %v5893_v51 = vld [vmem:[%s11235_s7 + $0x18] sm:$0xff]  ;;  %v12774_v22 = vld [vmem:[#allocation254_spill] sm:$0xff] }
 0x44f   :  { %v10174_v28 = vadd.f32 %v3610_v14, %v9777_v34  ;;  %4521 = vmatpush.msra.mxu1 %v4520_v55  ;;  %v4450_v24 = vsub.f32 %v10128_v50, %v10152_v61  ;;  %v4179_v26 = vmul.f32 %v4147_v60, %v10097_v48  ;;  %v3819_v34 = vmul.f32 %v9948_v41, %v3742_v5  ;;  %v10189_v15 = vpop.permute.xlu1 %3424  ;;  %v12775_v60 = vld [vmem:[#allocation133_spill] sm:$0xff] }
 0x450   :  { %12773 = vst [vmem:[#allocation101_spill] sm:$0xff] %v10171_v1  ;;  %v3995_v25 = vadd.f32 %v9811_v52, %v3931_v54  ;;  %4438 = vmatpush.msra.mxu0 %v10161_v44  ;;  %4621 = vmatpush.msra.mxu3 %v10161_v44  ;;  %v10186_v42 = vsub.f32 %v4342_v57, %v10161_v44  ;;  %v10194_v20 = vperm.slane %v5893_v51, 7  ;;  %v4143_v55 = vmul.f32 0.044715, %v10148_v45  ;;  %v3230_v5 = vpop.permute.xlu2 %3229  ;;  %v12779_v51 = vld [vmem:[#allocation130_spill] sm:$0xff] }
 0x451   :  { %v3646_v14 = vadd.f32 %v3614_v10, %v12774_v22  ;;  %4444 = vmatmul.f32.vlgmr.msra.gmra.mxu0 %v10108_v2  ;;  %v3476_v52 = vsel %vm3468_vm7, %v12647_v43, %v10189_v15  ;;  %4625 = vmatmul.f32.vlgmr.msra.gmra.mxu3 %v9960_v3  ;;  %v4211_v57 = vmul.f32 %v4179_v26, %v10097_v48  ;;  %v12776_v54 = vand.u32 4294901760, %v12775_v60 }
 0x452   :  { %4576 = vmatpush.msra.mxu2 %v10186_v42  ;;  %v3883_v17 = vmul.f32 %v9628_v62, %v3819_v34  ;;  %v3554_v10 = vmul.f32 %v9869_v40, %v3476_v52  ;;  %v10211_v43 = vand.u32 4294901760, %v10171_v1  ;;  %v10215_v26 = vadd.f32 %v9841_v32, %v10100_v7  ;;  %v4377_v52 = vld [vmem:[%s11238_s5 + $0x18] sm:$0xff] }
 0x453   :  { %4658 = vmatpush.msrb.mxu0 %v12776_v54  ;;  %v10218_v22 = vadd.f32 %v9897_v36, %v3987_v19  ;;  %4579 = vmatmul.f32.vlgmr.msra.gmra.mxu2 %v9931_v9  ;;  %v3255_v34 = vsel %vm3231_vm6, %v9853_v47, %v3230_v5  ;;  %v4243_v40 = vadd.f32 %v4211_v57, %v10097_v48  ;;  %v12778_v60 = vand.u32 4294901760, %v9986_v38 }
 0x454   :  { %12777 = vst [vmem:[#allocation47_spill] sm:$0xff] %v10211_v43  ;;  %v3915_v54 = vadd.f32 %v3883_v17, %v3646_v14  ;;  %v3618_v7 = vmul.f32 %v9426_v27, %v3554_v10  ;;  %v3303_v19 = vsel %vm3231_vm6, %v3230_v5, %v12779_v51  ;;  %v10232_v3 = vand.u32 4294901760, %v4450_v24  ;;  %v3467_v24 = vpop.permute.xlu0 %3466 }
 0x455   :  { %4662 = vmatpush.msrb.mxu0 %v12778_v60  ;;  %v3338_v9 = vmul.f32 %v8596_v53, %v3255_v34  ;;  %v12781_v47 = vand.u32 4294901760, %v10186_v42  ;;  %v4275_v2 = vmul.f32 0.7978846, %v4243_v40  ;;  %v4175_v36 = vmul.f32 %v4143_v55, %v10148_v45  ;;  %v12783_v55 = vld [vmem:[#allocation8_spill] sm:$0xff]  ;;  %v12785_v34 = vld [vmem:[#allocation87_spill] sm:$0xff] }
 0x456   :  { %12780 = vst [vmem:[#allocation194_spill] sm:$0xff] %v10232_v3  ;;  %v10240_v38 = vadd.f32 %v9709_v0, %v3995_v25  ;;  %v10243_v14 = vadd.f32 %v9752_v63, %v3915_v54  ;;  %v12782_v17 = vand.u32 4294901760, %v10023_v12  ;;  %v4458_v53 = vsub.f32 %v10171_v1, %v10211_v43 }
 0x457   :  { %v4525_v57 = vsub.f32 %v10186_v42, %v12781_v47  ;;  %v4413_v10 = vsel %vm4402_vm9, %v4377_v52, 0  ;;  %v3492_v51 = vsel %vm3468_vm7, %v9981_v58, %v3467_v24  ;;  %v3540_v25 = vsel %vm3468_vm7, %v3467_v24, %v12783_v55  ;;  %v10259_v54 = vpop.permute.xlu1 %3693  ;;  %v12786_v47 = vld [vmem:[#allocation179_spill] sm:$0xff] }
 0x458   :  { %4666 = vmatpush.msrb.mxu0 %v12782_v17  ;;  %5831 = vtanh.f32 %v4275_v2  ;;  %v12784_v63 = vand.u32 4294901760, %v10015_v30  ;;  %v3339_v12 = vmul.f32 %v12785_v34, %v3303_v19  ;;  %v3575_v40 = vmul.f32 %v10168_v29, %v3492_v51  ;;  %v12787_v30 = vld [vmem:[#allocation32_spill] sm:$0xff]  ;;  %v3736_v51 = vpop.permute.xlu2 %3735 }
 0x459   :  { %v4526_v5 = vand.u32 4294901760, %v4525_v57  ;;  %v3576_v60 = vmul.f32 %v10194_v20, %v3540_v25  ;;  %v4207_v52 = vmul.f32 %v4175_v36, %v10148_v45  ;;  %v3650_v57 = vadd.f32 %v3618_v7, %v12786_v47  ;;  %4452 = vmatmul.f32.gmra.mxu0 %v10232_v3  ;;  %v10271_v19 = vld [vmem:[%s11235_s7 + $0x30] ss:$0 sm:$0xff]  ;;  %v10276_v36 = vld [vmem:[%s11235_s7 + $0x38] ss:$0 sm:$0xff]  ;;  %v12792_v47 = vld [vmem:[#allocation127_spill] sm:$0xff]  ;;  %4631 = vmatmul.f32.gmra.mxu3 %v10152_v61 }
 0x45a   :  { %4670 = vmatpush.msrb.mxu0 %v12784_v63  ;;  %v3402_v58 = vmul.f32 %v12733_v16, %v3338_v9  ;;  %v3745_v2 = vsel %vm3737_vm8, %v12787_v30, %v10259_v54  ;;  %v12788_v9 = vand.u32 4294901760, %v10076_v49  ;;  %v12789_v7 = vld [vmem:[#allocation80_spill] sm:$0xff]  ;;  %v10284_v55 = vand.u32 4294901760, %v4413_v10  ;;  %v12790_v25 = vld [vmem:[#allocation69_spill] sm:$0xff]  ;;  %v12795_v3 = vld [vmem:[#allocation151_spill] sm:$0xff] }
 0x45b   :  { %4527 = vmatpush.msra.mxu1 %v4526_v5  ;;  %v3639_v17 = vmul.f32 %v12789_v7, %v3575_v40  ;;  %v3640_v24 = vmul.f32 %v12789_v7, %v3576_v60  ;;  %v3823_v5 = vmul.f32 %v9948_v41, %v3745_v2  ;;  %4584 = vmatmul.f32.gmra.mxu2 %v10128_v50  ;;  %v12791_v63 = vld [vmem:[#allocation144_spill] sm:$0xff]  ;;  %v12793_v60 = vand.u32 4294901760, %v9991_v6 }
 0x45c   :  { %4529 = vmatmul.f32.vlgmr.msra.gmra.mxu1 %v9911_v13  ;;  %4674 = vmatpush.msrb.mxu0 %v12788_v9  ;;  %v3761_v34 = vsel %vm3737_vm8, %v12791_v63, %v3736_v51  ;;  %v3809_v49 = vsel %vm3737_vm8, %v3736_v51, %v12792_v47  ;;  %v4239_v30 = vadd.f32 %v4207_v52, %v10148_v45  ;;  %v12794_v9 = vld [vmem:[#allocation235_spill] sm:$0xff]  ;;  %v10302_v52 = vand.u32 4294901760, %v4458_v53 }
 0x45d   :  { %4713 = vmatpush.msrb.mxu1 %v12790_v25  ;;  %v3403_v40 = vmul.f32 %v12733_v16, %v3339_v12  ;;  %v3671_v2 = vadd.f32 %v3639_v17, %v3402_v58  ;;  %v3887_v7 = vmul.f32 %v12794_v9, %v3823_v5  ;;  %v4115_v25 = vmul.f32 0.5, %v10097_v48  ;;  %v3451_v5 = vpop.permute.xlu0 %3450  ;;  %v12799_v48 = vld [vmem:[#allocation221_spill] sm:$0xff] }
 0x45e   :  { %4678 = vmatpush.msrb.mxu0 %v12793_v60  ;;  %v5832_v50 = vpop.eup %5831  ;;  %v3844_v63 = vmul.f32 %v10271_v19, %v3761_v34  ;;  %v3845_v51 = vmul.f32 %v10276_v36, %v3809_v49  ;;  %12796 = vst [vmem:[#allocation166_spill] sm:$0xff] %v10302_v52  ;;  %v4271_v16 = vmul.f32 0.7978846, %v4239_v30  ;;  %v12797_v6 = vand.u32 4294901760, %v10087_v59  ;;  %v12801_v49 = vld [vmem:[#allocation212_spill] sm:$0xff]  ;;  %v12802_v59 = vld [vmem:[#allocation158_spill] sm:$0xff] }
 0x45f   :  { %4715 = vmatpush.msrb.mxu1 %v12795_v3  ;;  %v3672_v12 = vadd.f32 %v3640_v24, %v3403_v40  ;;  %v3919_v58 = vadd.f32 %v3887_v7, %v3650_v57  ;;  %v4339_v17 = vadd.f32 1.0, %v5832_v50  ;;  %v10307_v47 = vsub.f32 %v4413_v10, %v10284_v55  ;;  %v12800_v3 = vld [vmem:[#allocation94_spill] sm:$0xff]  ;;  %v10320_v40 = vpop.permute.xlu1 %3677 }
 0x460   :  { %4682 = vmatpush.msrb.mxu0 %v12797_v6  ;;  %v3908_v60 = vmul.f32 %v12800_v3, %v3844_v63  ;;  %v3909_v34 = vmul.f32 %v12800_v3, %v3845_v51  ;;  %v3486_v53 = vsel %vm3468_vm7, %v10053_v46, %v3451_v5  ;;  %v3538_v24 = vsel %vm3468_vm7, %v3451_v5, %v12801_v49  ;;  %v12804_v63 = vld [vmem:[#allocation153_spill] sm:$0xff]  ;;  %v12805_v46 = vld [vmem:[#allocation36_spill] sm:$0xff]  ;;  %v12807_v3 = vld [vmem:[#allocation186_spill] sm:$0xff] }
 0x461   :  { %12798 = vst [vmem:[#allocation4_spill] sm:$0xff] %v10307_v47  ;;  %4717 = vmatpush.msrb.mxu1 %v12799_v48  ;;  %v3983_v30 = vadd.f32 %v12802_v59, %v3919_v58  ;;  %v12803_v50 = vand.u32 4294901760, %v10186_v42  ;;  %v4371_v57 = vmul.f32 %v4339_v17, %v4115_v25  ;;  %v3567_v10 = vmul.f32 %v10168_v29, %v3486_v53  ;;  %v12806_v25 = vld [vmem:[#allocation147_spill] sm:$0xff]  ;;  %v3443_v48 = vpop.permute.xlu2 %3442 }
 0x462   :  { %v4139_v7 = vmul.f32 0.044715, %v10240_v38  ;;  %v3940_v51 = vadd.f32 %v3908_v60, %v3671_v2  ;;  %4460 = vmatmul.f32.gmra.mxu0 %v10302_v52  ;;  %5833 = vtanh.f32 %v4271_v16  ;;  %v3739_v6 = vsel %vm3737_vm8, %v12805_v46, %v10320_v40  ;;  %4637 = vmatmul.f32.gmra.mxu3 %v10211_v43  ;;  %v12814_v43 = vld [vmem:[#allocation223_spill] sm:$0xff] }
 0x463   :  { %4686 = vmatpush.msrb.mxu0 %v12803_v50  ;;  %4719 = vmatpush.msrb.mxu1 %v12804_v63  ;;  %v4135_v42 = vmul.f32 0.044715, %v10215_v26  ;;  %v10331_v58 = vadd.f32 %v12806_v25, %v10243_v14  ;;  %v10334_v17 = vand.u32 4294901760, %v4371_v57  ;;  %v3568_v5 = vmul.f32 %v10194_v20, %v3538_v24  ;;  %v12811_v63 = vld [vmem:[#allocation248_spill] sm:$0xff] }
 0x464   :  { %4533 = vmatmul.f32.gmra.mxu1 %v10091_v11  ;;  %v4111_v2 = vmul.f32 0.5, %v10148_v45  ;;  %v3941_v16 = vadd.f32 %v3909_v34, %v3672_v12  ;;  %v4004_v60 = vadd.f32 %v12807_v3, %v3940_v51  ;;  %4589 = vmatmul.f32.gmra.mxu2 %v10171_v1  ;;  %v3815_v53 = vmul.f32 %v9948_v41, %v3739_v6  ;;  %v12809_v41 = vld [vmem:[#allocation66_spill] sm:$0xff] }
 0x465   :  { %4721 = vmatpush.msrb.mxu1 %v10055_v23  ;;  %v10343_v14 = vand.u32 4294901760, %v10307_v47  ;;  %4754 = vmatpush.msrb.mxu2 %v10334_v17  ;;  %v3631_v49 = vmul.f32 %v12681_v31, %v3567_v10  ;;  %v10348_v24 = vsub.f32 %v4371_v57, %v10334_v17  ;;  %v10352_v45 = vmul.f32 0.5, %v10240_v38  ;;  %v12810_v34 = vld [vmem:[#allocation190_spill] sm:$0xff]  ;;  %v3720_v6 = vpop.permute.xlu0 %3719 }
 0x466   :  { %v10355_v23 = vmul.f32 0.5, %v10215_v26  ;;  %v3879_v12 = vmul.f32 %v12809_v41, %v3815_v53  ;;  %v3483_v59 = vsel %vm3468_vm7, %v12810_v34, %v3443_v48  ;;  %v4171_v50 = vmul.f32 %v4139_v7, %v10240_v38  ;;  %v12812_v53 = vld [vmem:[#allocation257_spill] sm:$0xff] }
 0x467   :  { %12808 = vst [vmem:[#allocation91_spill] sm:$0xff] %v10343_v14  ;;  %4723 = vmatpush.msrb.mxu1 %v9967_v21  ;;  %v10363_v57 = vmul.f32 %v4135_v42, %v10215_v26  ;;  %v3632_v10 = vmul.f32 %v12681_v31, %v3568_v5  ;;  %4885 = vmatpush.msra.mxu0 %v10348_v24  ;;  %v11689_v46 = vand.u32 4294901760, %v10348_v24  ;;  %v12813_v7 = vld [vmem:[#allocation237_spill] sm:$0xff]  ;;  %v3459_v61 = vpop.permute.xlu1 %3458 }
 0x468   :  { %v3537_v51 = vsel %vm3468_vm7, %v3443_v48, %v12811_v63  ;;  %v4466_v21 = vsub.f32 %v10307_v47, %v10343_v14  ;;  %v5834_v3 = vpop.eup %5833  ;;  %v10373_v34 = vadd.f32 %v12812_v53, %v3983_v30  ;;  %v4005_v42 = vadd.f32 %v12813_v7, %v3941_v16  ;;  %v12816_v30 = vld [vmem:[#allocation220_spill] sm:$0xff]  ;;  %v12817_v16 = vld [vmem:[#allocation38_spill] sm:$0xff] }
 0x469   :  { %4725 = vmatpush.msrb.mxu1 %v10078_v37  ;;  %v3911_v31 = vadd.f32 %v3879_v12, %v10174_v28  ;;  %v3563_v5 = vmul.f32 %v10168_v29, %v3483_v59  ;;  %v3663_v48 = vadd.f32 %v3631_v49, %v12814_v43  ;;  %v4335_v63 = vadd.f32 1.0, %v5834_v3  ;;  %v12818_v49 = vld [vmem:[#allocation132_spill] sm:$0xff]  ;;  %v3712_v7 = vpop.permute.xlu2 %3711 }
 0x46a   :  { %v10380_v1 = vand.u32 4294901760, %v4466_v21  ;;  %v4813_v52 = vsub.f32 %v10348_v24, %v11689_v46  ;;  %v3564_v37 = vmul.f32 %v10194_v20, %v3537_v51  ;;  %v3755_v28 = vsel %vm3737_vm8, %v10124_v35, %v3720_v6  ;;  %v12820_v51 = vld [vmem:[#allocation164_spill] sm:$0xff]  ;;  %4643 = vmatmul.f32.gmra.mxu3 %v10343_v14 }
 0x46b   :  { %v10386_v25 = vadd.f32 %v12816_v30, %v3911_v31  ;;  %4727 = vmatpush.msrb.mxu1 %v10161_v44  ;;  %v3807_v43 = vsel %vm3737_vm8, %v3720_v6, %v12817_v16  ;;  %v3664_v12 = vadd.f32 %v3632_v10, %v12818_v49  ;;  %v4367_v59 = vmul.f32 %v4335_v63, %v4111_v2  ;;  %v12819_v44 = vld [vmem:[#allocation120_spill] sm:$0xff]  ;;  %v12823_v63 = vld [vmem:[#allocation214_spill] sm:$0xff] }
 0x46c   :  { %12815 = vst [vmem:[#allocation187_spill] sm:$0xff] %v10380_v1  ;;  %4468 = vmatmul.f32.gmra.mxu0 %v10380_v1  ;;  %v4814_v21 = vand.u32 4294901760, %v4813_v52  ;;  %v3836_v3 = vmul.f32 %v10271_v19, %v3755_v28  ;;  %v10399_v31 = vadd.f32 %v12819_v44, %v4004_v60  ;;  %v3627_v30 = vmul.f32 %v12820_v51, %v3563_v5  ;;  %v12822_v6 = vld [vmem:[#allocation188_spill] sm:$0xff]  ;;  %v12824_v49 = vld [vmem:[#allocation10_spill] sm:$0xff] }
 0x46d   :  { %4937 = vmatpush.msra.mxu1 %v10334_v17  ;;  %v3837_v35 = vmul.f32 %v10276_v36, %v3807_v43  ;;  %4594 = vmatmul.f32.gmra.mxu2 %v10307_v47  ;;  %v10406_v2 = vmul.f32 0.5, %v10218_v22  ;;  %v10408_v10 = vand.u32 4294901760, %v4367_v59  ;;  %v3489_v60 = vsel %vm3468_vm7, %v12822_v6, %v3459_v61 }
 0x46e   :  { %4537 = vmatmul.f32.gmra.mxu1 %v10156_v33  ;;  %4815 = vmatpush.msrb.mxu3 %v4814_v21  ;;  %v3900_v52 = vmul.f32 %v9485_v56, %v3836_v3  ;;  %v3539_v5 = vsel %vm3468_vm7, %v3459_v61, %v12823_v63  ;;  %v3628_v28 = vmul.f32 %v12820_v51, %v3564_v37  ;;  %v12825_v61 = vld [vmem:[#allocation98_spill] sm:$0xff]  ;;  %v3427_v51 = vpop.permute.xlu0 %3426 }
 0x46f   :  { %12821 = vst [vmem:[#allocation253_spill] sm:$0xff] %v10408_v10  ;;  %v3901_v16 = vmul.f32 %v9485_v56, %v3837_v35  ;;  %v3571_v43 = vmul.f32 %v10168_v29, %v3489_v60  ;;  %v3752_v46 = vsel %vm3737_vm8, %v12824_v49, %v3712_v7  ;;  %4756 = vmatpush.msrb.mxu2 %v10408_v10  ;;  %v4131_v56 = vmul.f32 0.044715, %v10218_v22  ;;  %v3728_v47 = vpop.permute.xlu1 %3727 }
 0x470   :  { %v10423_v21 = vsub.f32 %v4367_v59, %v10408_v10  ;;  %4939 = vmatpush.msra.mxu1 %v10408_v10  ;;  %v3932_v3 = vadd.f32 %v3900_v52, %v3663_v48  ;;  %v3806_v37 = vsel %vm3737_vm8, %v3712_v7, %v12825_v61  ;;  %v10430_v35 = vadd.f32 %v12819_v44, %v4005_v42  ;;  %v12826_v59 = vld [vmem:[#allocation77_spill] sm:$0xff]  ;;  %v12827_v61 = vld [vmem:[#allocation107_spill] sm:$0xff] }
 0x471   :  { %v3933_v6 = vadd.f32 %v3901_v16, %v3664_v12  ;;  %v3572_v60 = vmul.f32 %v10194_v20, %v3539_v5  ;;  %v3832_v63 = vmul.f32 %v10271_v19, %v3752_v46  ;;  %v3833_v7 = vmul.f32 %v10276_v36, %v3806_v37  ;;  %v12828_v42 = vld [vmem:[#allocation111_spill] sm:$0xff]  ;;  %v12829_v12 = vld [vmem:[#allocation85_spill] sm:$0xff] }
 0x472   :  { %4888 = vmatpush.msra.mxu0 %v10423_v21  ;;  %v10436_v49 = vadd.f32 %v12826_v59, %v3932_v3  ;;  %v11696_v48 = vand.u32 4294901760, %v10423_v21  ;;  %v4203_v52 = vmul.f32 %v4171_v50, %v10240_v38  ;;  %v3659_v14 = vadd.f32 %v3627_v30, %v12827_v61  ;;  %v12830_v5 = vld [vmem:[#allocation177_spill] sm:$0xff]  ;;  %v12831_v59 = vld [vmem:[#allocation138_spill] sm:$0xff]  ;;  %v12847_v10 = vld [vmem:[#allocation191_spill] sm:$0xff] }
 0x473   :  { %v3660_v44 = vadd.f32 %v3628_v28, %v12828_v42  ;;  %v10444_v16 = vadd.f32 %v12829_v12, %v3933_v6  ;;  %v3896_v46 = vmul.f32 %v12830_v5, %v3832_v63  ;;  %v3635_v1 = vmul.f32 %v12831_v59, %v3571_v43  ;;  %v12832_v12 = vld [vmem:[#allocation175_spill] sm:$0xff] }
 0x474   :  { %v4819_v3 = vsub.f32 %v10423_v21, %v11696_v48  ;;  %v3897_v37 = vmul.f32 %v12830_v5, %v3833_v7  ;;  %4688 = vmatmul.f32.vlgmr.msrb.gmra.mxu0 %v9911_v13  ;;  %v4235_v50 = vadd.f32 %v4203_v52, %v10240_v38  ;;  %v3636_v30 = vmul.f32 %v12831_v59, %v3572_v60  ;;  %v12833_v5 = vld [vmem:[#allocation193_spill] sm:$0xff] }
 0x475   :  { %v3928_v28 = vadd.f32 %v3896_v46, %v3659_v14  ;;  %v4199_v6 = vmul.f32 %v10363_v57, %v10215_v26  ;;  %v3477_v63 = vsel %vm3468_vm7, %v10189_v15, %v3427_v51  ;;  %v3535_v7 = vsel %vm3468_vm7, %v3427_v51, %v12832_v12  ;;  %v12834_v52 = vld [vmem:[#allocation117_spill] sm:$0xff] }
 0x476   :  { %4541 = vmatmul.f32.gmra.mxu1 %v10284_v55  ;;  %v4820_v61 = vand.u32 4294901760, %v4819_v3  ;;  %v3929_v42 = vadd.f32 %v3897_v37, %v3660_v44  ;;  %v4267_v43 = vmul.f32 0.7978846, %v4235_v50  ;;  %v3555_v14 = vmul.f32 %v10168_v29, %v3477_v63  ;;  %v12835_v46 = vld [vmem:[#allocation189_spill] sm:$0xff]  ;;  %v3419_v50 = vpop.permute.xlu2 %3418 }
 0x477   :  { %v3992_v48 = vadd.f32 %v12833_v5, %v3928_v28  ;;  %v4231_v38 = vadd.f32 %v4199_v6, %v10215_v26  ;;  %v3556_v60 = vmul.f32 %v10194_v20, %v3535_v7  ;;  %v4163_v15 = vmul.f32 %v4131_v56, %v10218_v22  ;;  %v12836_v26 = vld [vmem:[#allocation17_spill] sm:$0xff]  ;;  %v12837_v28 = vld [vmem:[#allocation99_spill] sm:$0xff] }
 0x478   :  { %4821 = vmatpush.msrb.mxu3 %v4820_v61  ;;  %v3993_v57 = vadd.f32 %v12834_v52, %v3929_v42  ;;  %5835 = vtanh.f32 %v4267_v43  ;;  %v3758_v44 = vsel %vm3737_vm8, %v12835_v46, %v3728_v47  ;;  %v10471_v3 = vmul.f32 0.044715, %v10399_v31  ;;  %v12838_v61 = vld [vmem:[#allocation18_spill] sm:$0xff]  ;;  %v3696_v43 = vpop.permute.xlu0 %3695  ;;  %v12841_v46 = vld [vmem:[#allocation55_spill] sm:$0xff] }
 0x479   :  { %v10474_v51 = vmul.f32 0.044715, %v10430_v35  ;;  %v3667_v59 = vadd.f32 %v3635_v1, %v12836_v26  ;;  %v4263_v37 = vmul.f32 0.7978846, %v4231_v38  ;;  %v3668_v6 = vadd.f32 %v3636_v30, %v12837_v28  ;;  %v12839_v38 = vld [vmem:[#allocation160_spill] sm:$0xff] }
 0x47a   :  { %v4195_v63 = vmul.f32 %v4163_v15, %v10218_v22  ;;  %v3808_v56 = vsel %vm3737_vm8, %v3728_v47, %v12838_v61  ;;  %v3840_v42 = vmul.f32 %v10271_v19, %v3758_v44  ;;  %v3619_v12 = vmul.f32 %v9426_v27, %v3555_v14  ;;  %v12840_v30 = vld [vmem:[#allocation20_spill] sm:$0xff] }
 0x47b   :  { %5837 = vtanh.f32 %v4263_v37  ;;  %v3620_v7 = vmul.f32 %v9426_v27, %v3556_v60  ;;  %v3841_v5 = vmul.f32 %v10276_v36, %v3808_v56  ;;  %v3474_v15 = vsel %vm3468_vm7, %v12840_v30, %v3419_v50  ;;  %v3435_v60 = vpop.permute.xlu1 %3434  ;;  %v12843_v56 = vld [vmem:[#allocation30_spill] sm:$0xff] }
 0x47c   :  { %v4227_v1 = vadd.f32 %v4195_v63, %v10218_v22  ;;  %v3904_v52 = vmul.f32 %v12839_v38, %v3840_v42  ;;  %v3534_v47 = vsel %vm3468_vm7, %v3419_v50, %v12841_v46  ;;  %4692 = vmatmul.f32.gmra.mxu0 %v10091_v11  ;;  %v3551_v14 = vmul.f32 %v10168_v29, %v3474_v15  ;;  %v12842_v63 = vld [vmem:[#allocation123_spill] sm:$0xff]  ;;  %v12845_v46 = vld [vmem:[#allocation25_spill] sm:$0xff] }
 0x47d   :  { %v3905_v44 = vmul.f32 %v12839_v38, %v3841_v5  ;;  %v3552_v27 = vmul.f32 %v10194_v20, %v3534_v47  ;;  %v3746_v22 = vsel %vm3737_vm8, %v10259_v54, %v3696_v43  ;;  %v3804_v50 = vsel %vm3737_vm8, %v3696_v43, %v12842_v63  ;;  %v12844_v38 = vld [vmem:[#allocation71_spill] sm:$0xff] }
 0x47e   :  { %4729 = vmatmul.f32.vlgmr.msrb.gmra.mxu1 %v9911_v13  ;;  %v5836_v26 = vpop.eup %5835  ;;  %v4259_v37 = vmul.f32 0.7978846, %v4227_v1  ;;  %v3936_v28 = vadd.f32 %v3904_v52, %v3667_v59  ;;  %v3824_v61 = vmul.f32 %v10271_v19, %v3746_v22  ;;  %v10503_v42 = vadd.f32 %v12843_v56, %v10386_v25  ;;  %v12846_v52 = vld [vmem:[#allocation42_spill] sm:$0xff] }
 0x47f   :  { %v4331_v5 = vadd.f32 1.0, %v5836_v26  ;;  %v3651_v30 = vadd.f32 %v3619_v12, %v12844_v38  ;;  %v3937_v15 = vadd.f32 %v3905_v44, %v3668_v6  ;;  %v3825_v47 = vmul.f32 %v10276_v36, %v3804_v50 }
 0x480   :  { %5839 = vtanh.f32 %v4259_v37  ;;  %v4000_v54 = vadd.f32 %v12845_v46, %v3936_v28  ;;  %v3888_v59 = vmul.f32 %v12794_v9, %v3824_v61  ;;  %v3615_v63 = vmul.f32 %v9626_v4, %v3551_v14 }
 0x481   :  { %v5838_v1 = vpop.eup %5837  ;;  %v4363_v43 = vmul.f32 %v4331_v5, %v10352_v45  ;;  %v4001_v22 = vadd.f32 %v12846_v52, %v3937_v15  ;;  %v3616_v25 = vmul.f32 %v9626_v4, %v3552_v27  ;;  %v3652_v12 = vadd.f32 %v3620_v7, %v12847_v10  ;;  %v3688_v4 = vpop.permute.xlu2 %3687  ;;  %v12848_v7 = vld [vmem:[#allocation53_spill] sm:$0xff]  ;;  %v12851_v5 = vld [vmem:[#allocation192_spill] sm:$0xff] }
 0x482   :  { %v4327_v26 = vadd.f32 1.0, %v5838_v1  ;;  %v3889_v6 = vmul.f32 %v12794_v9, %v3825_v47  ;;  %v3920_v44 = vadd.f32 %v3888_v59, %v3651_v30  ;;  %v10517_v37 = vadd.f32 %v9709_v0, %v10436_v49  ;;  %v12849_v49 = vld [vmem:[#allocation126_spill] sm:$0xff]  ;;  %v12852_v30 = vld [vmem:[#allocation76_spill] sm:$0xff] }
 0x483   :  { %v10521_v28 = vadd.f32 %v9709_v0, %v10444_v16  ;;  %v10524_v45 = vadd.f32 %v9841_v32, %v3992_v48  ;;  %v10526_v14 = vand.u32 4294901760, %v4363_v43  ;;  %v10529_v27 = vadd.f32 %v9841_v32, %v3993_v57  ;;  %v12850_v16 = vld [vmem:[#allocation82_spill] sm:$0xff] }
 0x484   :  { %v4359_v9 = vmul.f32 %v4327_v26, %v10355_v23  ;;  %v3921_v10 = vadd.f32 %v3889_v6, %v3652_v12  ;;  %v10533_v50 = vadd.f32 %v12848_v7, %v3920_v44  ;;  %4696 = vmatmul.f32.gmra.mxu0 %v10156_v33  ;;  %v3647_v48 = vadd.f32 %v3615_v63, %v12849_v49  ;;  %v3704_v63 = vpop.permute.xlu1 %3703  ;;  %v12854_v26 = vld [vmem:[#allocation90_spill] sm:$0xff] }
 0x485   :  { %4758 = vmatpush.msrb.mxu2 %v10526_v14  ;;  %4941 = vmatpush.msra.mxu1 %v10526_v14  ;;  %v10539_v0 = vsub.f32 %v4363_v43, %v10526_v14  ;;  %v3648_v32 = vadd.f32 %v3616_v25, %v12850_v16  ;;  %v4127_v57 = vmul.f32 0.044715, %v10373_v34  ;;  %v3480_v15 = vsel %vm3468_vm7, %v12852_v30, %v3435_v60  ;;  %v12853_v43 = vld [vmem:[#allocation12_spill] sm:$0xff] }
 0x486   :  { %v5840_v23 = vpop.eup %5839  ;;  %v10544_v61 = vand.u32 4294901760, %v4359_v9  ;;  %v10547_v38 = vadd.f32 %v12851_v5, %v3921_v10  ;;  %v3743_v46 = vsel %vm3737_vm8, %v10163_v39, %v3688_v4  ;;  %4733 = vmatmul.f32.gmra.mxu1 %v10091_v11  ;;  %v10556_v59 = vadd.f32 %v9826_v18, %v4000_v54 }
 0x487   :  { %4891 = vmatpush.msra.mxu0 %v10539_v0  ;;  %v4323_v47 = vadd.f32 1.0, %v5840_v23  ;;  %v4824_v1 = vand.u32 4294901760, %v10539_v0  ;;  %v3803_v52 = vsel %vm3737_vm8, %v3688_v4, %v12853_v43  ;;  %v10567_v25 = vadd.f32 %v9826_v18, %v4001_v22 }
 0x488   :  { %4760 = vmatpush.msrb.mxu2 %v10544_v61  ;;  %4943 = vmatpush.msra.mxu1 %v10544_v61  ;;  %v10564_v39 = vsub.f32 %v4359_v9, %v10544_v61  ;;  %v3536_v54 = vsel %vm3468_vm7, %v3435_v60, %v12854_v26  ;;  %v4123_v12 = vmul.f32 0.044715, %v10331_v58  ;;  %v3559_v4 = vmul.f32 %v10168_v29, %v3480_v15 }
 0x489   :  { %v4355_v6 = vmul.f32 %v4323_v47, %v10406_v2  ;;  %v4825_v44 = vsub.f32 %v10539_v0, %v4824_v1  ;;  %v3820_v10 = vmul.f32 %v10271_v19, %v3743_v46  ;;  %v3821_v22 = vmul.f32 %v10276_v36, %v3803_v52  ;;  %v12855_v47 = vld [vmem:[#allocation227_spill] sm:$0xff] }
 0x48a   :  { %4894 = vmatpush.msra.mxu0 %v10564_v39  ;;  %v4830_v18 = vand.u32 4294901760, %v10564_v39  ;;  %v4159_v60 = vmul.f32 %v4127_v57, %v10373_v34  ;;  %v4155_v9 = vmul.f32 %v4123_v12, %v10331_v58  ;;  %v3560_v49 = vmul.f32 %v10194_v20, %v3536_v54  ;;  %v3680_v57 = vpop.permute.xlu0 %3679 }
 0x48b   :  { %v10583_v7 = vand.u32 4294901760, %v4355_v6  ;;  %v4826_v2 = vand.u32 4294901760, %v4825_v44  ;;  %v3884_v16 = vmul.f32 %v9628_v62, %v3820_v10  ;;  %v3885_v5 = vmul.f32 %v9628_v62, %v3821_v22  ;;  %v12856_v22 = vld [vmem:[#allocation60_spill] sm:$0xff] }
 0x48c   :  { %v4831_v23 = vsub.f32 %v10564_v39, %v4830_v18  ;;  %v4191_v30 = vmul.f32 %v4159_v60, %v10373_v34  ;;  %v4187_v15 = vmul.f32 %v4155_v9, %v10331_v58  ;;  %4700 = vmatmul.f32.gmra.mxu0 %v10284_v55  ;;  %v3623_v43 = vmul.f32 %v12855_v47, %v3559_v4  ;;  %v12857_v60 = vld [vmem:[#allocation204_spill] sm:$0xff] }
 0x48d   :  { %4762 = vmatpush.msrb.mxu2 %v10583_v7  ;;  %4945 = vmatpush.msra.mxu1 %v10583_v7  ;;  %v10597_v46 = vsub.f32 %v4355_v6, %v10583_v7  ;;  %v3916_v52 = vadd.f32 %v3884_v16, %v3647_v48  ;;  %v4095_v26 = vmul.f32 0.5, %v10373_v34  ;;  %v3917_v54 = vadd.f32 %v3885_v5, %v3648_v32  ;;  %v12859_v5 = vld [vmem:[#allocation59_spill] sm:$0xff] }
 0x48e   :  { %4827 = vmatpush.msrb.mxu3 %v4826_v2  ;;  %v4832_v62 = vand.u32 4294901760, %v4831_v23  ;;  %v4223_v12 = vadd.f32 %v4191_v30, %v10373_v34  ;;  %v4219_v44 = vadd.f32 %v4187_v15, %v10331_v58  ;;  %4737 = vmatmul.f32.gmra.mxu1 %v10156_v33  ;;  %v3624_v6 = vmul.f32 %v12855_v47, %v3560_v49  ;;  %v12858_v2 = vld [vmem:[#allocation145_spill] sm:$0xff]  ;;  %v3411_v47 = vpop.permute.xlu1 %3410 }
 0x48f   :  { %4897 = vmatpush.msra.mxu0 %v10597_v46  ;;  %v4836_v10 = vand.u32 4294901760, %v10597_v46  ;;  %v3980_v4 = vadd.f32 %v12856_v22, %v3916_v52  ;;  %v3740_v48 = vsel %vm3737_vm8, %v10320_v40, %v3680_v57  ;;  %v10611_v32 = vadd.f32 %v12857_v60, %v3917_v54  ;;  %v12860_v15 = vld [vmem:[#allocation245_spill] sm:$0xff]  ;;  %v12862_v60 = vld [vmem:[#allocation262_spill] sm:$0xff] }
 0x490   :  { %4833 = vmatpush.msrb.mxu3 %v4832_v62  ;;  %v4255_v34 = vmul.f32 0.7978846, %v4223_v12  ;;  %v4251_v9 = vmul.f32 0.7978846, %v4219_v44  ;;  %v3749_v16 = vsel %vm3737_vm8, %v12858_v2, %v3704_v63  ;;  %v3655_v49 = vadd.f32 %v3623_v43, %v12859_v5  ;;  %v12861_v62 = vld [vmem:[#allocation41_spill] sm:$0xff]  ;;  %v12863_v2 = vld [vmem:[#allocation34_spill] sm:$0xff] }
 0x491   :  { %v4837_v23 = vsub.f32 %v10597_v46, %v4836_v10  ;;  %v4091_v30 = vmul.f32 0.5, %v10331_v58  ;;  %v3802_v40 = vsel %vm3737_vm8, %v3680_v57, %v12860_v15  ;;  %v3816_v52 = vmul.f32 %v10271_v19, %v3740_v48 }
 0x492   :  { %5841 = vtanh.f32 %v4255_v34  ;;  %v3805_v54 = vsel %vm3737_vm8, %v3704_v63, %v12861_v62  ;;  %v3828_v12 = vmul.f32 %v10271_v19, %v3749_v16  ;;  %v4119_v43 = vmul.f32 0.044715, %v10503_v42  ;;  %v12864_v34 = vld [vmem:[#allocation27_spill] sm:$0xff] }
 0x493   :  { %v4838_v44 = vand.u32 4294901760, %v4837_v23  ;;  %5843 = vtanh.f32 %v4251_v9  ;;  %v3829_v22 = vmul.f32 %v10276_v36, %v3805_v54  ;;  %v3656_v58 = vadd.f32 %v3624_v6, %v12862_v60  ;;  %v12865_v9 = vld [vmem:[#allocation182_spill] sm:$0xff] }
 0x494   :  { %v3892_v5 = vmul.f32 %v12863_v2, %v3828_v12  ;;  %v4180_v57 = vmul.f32 %v10471_v3, %v10399_v31  ;;  %v3471_v48 = vsel %vm3468_vm7, %v12864_v34, %v3411_v47  ;;  %v4151_v19 = vmul.f32 %v4119_v43, %v10503_v42  ;;  %v12869_v34 = vld [vmem:[#allocation147_spill] sm:$0xff] }
 0x495   :  { %4839 = vmatpush.msrb.mxu3 %v4838_v44  ;;  %v3893_v63 = vmul.f32 %v12863_v2, %v3829_v22  ;;  %v3533_v16 = vsel %vm3468_vm7, %v3411_v47, %v12865_v9  ;;  %v3547_v23 = vmul.f32 %v10168_v29, %v3471_v48  ;;  %v10641_v6 = vadd.f32 %v12812_v53, %v10533_v50  ;;  %v12866_v29 = vld [vmem:[#allocation113_spill] sm:$0xff]  ;;  %v12867_v2 = vld [vmem:[#allocation67_spill] sm:$0xff] }
 0x496   :  { %v3817_v15 = vmul.f32 %v10276_v36, %v3802_v40  ;;  %v3924_v3 = vadd.f32 %v3892_v5, %v3655_v49  ;;  %v4212_v62 = vmul.f32 %v4180_v57, %v10399_v31  ;;  %4741 = vmatmul.f32.gmra.mxu1 %v10284_v55  ;;  %v3880_v54 = vmul.f32 %v12809_v41, %v3816_v52 }
 0x497   :  { %v3925_v12 = vadd.f32 %v3893_v63, %v3656_v58  ;;  %v4183_v44 = vmul.f32 %v4151_v19, %v10503_v42  ;;  %v3611_v47 = vmul.f32 %v9642_v8, %v3547_v23  ;;  %v3548_v60 = vmul.f32 %v10194_v20, %v3533_v16  ;;  %v12868_v58 = vld [vmem:[#allocation244_spill] sm:$0xff] }
 0x498   :  { %v5842_v22 = vpop.eup %5841  ;;  %v3988_v43 = vadd.f32 %v12866_v29, %v3924_v3  ;;  %v4244_v50 = vadd.f32 %v4212_v62, %v10399_v31  ;;  %v4144_v36 = vmul.f32 0.044715, %v10556_v59  ;;  %v10657_v48 = vadd.f32 %v12869_v34, %v3980_v4  ;;  %v12870_v4 = vld [vmem:[#allocation72_spill] sm:$0xff] }
 0x499   :  { %v5844_v49 = vpop.eup %5843  ;;  %v4319_v40 = vadd.f32 1.0, %v5842_v22  ;;  %v3989_v5 = vadd.f32 %v12867_v2, %v3925_v12  ;;  %v4215_v52 = vadd.f32 %v4183_v44, %v10503_v42  ;;  %v3643_v57 = vadd.f32 %v3611_v47, %v12868_v58 }
 0x49a   :  { %v4315_v63 = vadd.f32 1.0, %v5844_v49  ;;  %v4087_v19 = vmul.f32 0.5, %v10503_v42  ;;  %v4276_v9 = vmul.f32 0.7978846, %v4244_v50  ;;  %v10661_v20 = vmul.f32 %v12809_v41, %v3817_v15  ;;  %v12871_v15 = vld [vmem:[#allocation185_spill] sm:$0xff] }
 0x49b   :  { %v4351_v23 = vmul.f32 %v4319_v40, %v4095_v26  ;;  %v4247_v16 = vmul.f32 0.7978846, %v4215_v52  ;;  %v3912_v3 = vadd.f32 %v3880_v54, %v3643_v57  ;;  %v3612_v12 = vmul.f32 %v9642_v8, %v3548_v60  ;;  %v12872_v60 = vld [vmem:[#allocation256_spill] sm:$0xff] }
 0x49c   :  { %v4347_v62 = vmul.f32 %v4315_v63, %v4091_v30  ;;  %5845 = vtanh.f32 %v4276_v9  ;;  %v4176_v44 = vmul.f32 %v4144_v36, %v10556_v59  ;;  %v10668_v22 = vadd.f32 %v12870_v4, %v3988_v43 }
 0x49d   :  { %v10665_v47 = vand.u32 4294901760, %v4351_v23  ;;  %5847 = vtanh.f32 %v4247_v16  ;;  %v4140_v42 = vmul.f32 0.044715, %v10517_v37  ;;  %v4116_v41 = vmul.f32 0.5, %v10399_v31 }
 0x49e   :  { %v10671_v26 = vand.u32 4294901760, %v4347_v62  ;;  %v3976_v54 = vadd.f32 %v12871_v15, %v3912_v3  ;;  %v4208_v30 = vmul.f32 %v4176_v44, %v10556_v59  ;;  %v10682_v29 = vmul.f32 0.5, %v10556_v59 }
 0x49f   :  { %4764 = vmatpush.msrb.mxu2 %v10665_v47  ;;  %4947 = vmatpush.msra.mxu1 %v10665_v47  ;;  %v10679_v8 = vsub.f32 %v4351_v23, %v10665_v47  ;;  %v4172_v43 = vmul.f32 %v4140_v42, %v10517_v37  ;;  %v4136_v50 = vmul.f32 0.044715, %v10524_v45  ;;  %v10690_v36 = vadd.f32 %v3612_v12, %v12872_v60 }
 0x4a0   :  { %v10687_v31 = vsub.f32 %v4347_v62, %v10671_v26  ;;  %v4240_v49 = vadd.f32 %v4208_v30, %v10556_v59  ;;  %v10694_v40 = vmul.f32 0.5, %v10517_v37  ;;  %v4132_v57 = vmul.f32 0.044715, %v10668_v22 }
 0x4a1   :  { %4766 = vmatpush.msrb.mxu2 %v10671_v26  ;;  %4900 = vmatpush.msra.mxu0 %v10679_v8  ;;  %v11698_v2 = vand.u32 4294901760, %v10679_v8  ;;  %v4204_v52 = vmul.f32 %v4172_v43, %v10517_v37  ;;  %v4168_v58 = vmul.f32 %v4136_v50, %v10524_v45  ;;  %v10705_v9 = vadd.f32 %v12843_v56, %v3976_v54 }
 0x4a2   :  { %v5846_v63 = vpop.eup %5845  ;;  %4949 = vmatpush.msra.mxu1 %v10671_v26  ;;  %v4848_v59 = vand.u32 4294901760, %v10687_v31  ;;  %v4272_v23 = vmul.f32 0.7978846, %v4240_v49  ;;  %v4128_v16 = vmul.f32 0.044715, %v10641_v6  ;;  %v4164_v30 = vmul.f32 %v4132_v57, %v10668_v22 }
 0x4a3   :  { %v5848_v3 = vpop.eup %5847  ;;  %4903 = vmatpush.msra.mxu0 %v10687_v31  ;;  %v4843_v62 = vsub.f32 %v10679_v8, %v11698_v2  ;;  %v4340_v12 = vadd.f32 1.0, %v5846_v63  ;;  %v4236_v44 = vadd.f32 %v4204_v52, %v10517_v37  ;;  %v4200_v42 = vmul.f32 %v4168_v58, %v10524_v45 }
 0x4a4   :  { %v4311_v15 = vadd.f32 1.0, %v5848_v3  ;;  %v4849_v54 = vsub.f32 %v10687_v31, %v4848_v59  ;;  %5849 = vtanh.f32 %v4272_v23  ;;  %v10720_v2 = vadd.f32 %v12870_v4, %v3989_v5 }
 0x4a5   :  { %v4844_v43 = vand.u32 4294901760, %v4843_v62  ;;  %v4372_v50 = vmul.f32 %v4340_v12, %v4116_v41  ;;  %v4268_v60 = vmul.f32 0.7978846, %v4236_v44  ;;  %v4232_v49 = vadd.f32 %v4200_v42, %v10524_v45 }
 0x4a6   :  { %v4343_v63 = vmul.f32 %v4311_v15, %v4087_v19  ;;  %v4196_v37 = vmul.f32 %v4164_v30, %v10668_v22  ;;  %v4160_v52 = vmul.f32 %v4128_v16, %v10641_v6  ;;  %v4850_v58 = vand.u32 4294901760, %v4849_v54  ;;  %v12873_v30 = vld [vmem:[#allocation238_spill] sm:$0xff] }
 0x4a7   :  { %4845 = vmatpush.msrb.mxu3 %v4844_v43  ;;  %v10724_v3 = vand.u32 4294901760, %v4372_v50  ;;  %5851 = vtanh.f32 %v4268_v60  ;;  %v4264_v23 = vmul.f32 0.7978846, %v4232_v49  ;;  %v4124_v5 = vmul.f32 0.044715, %v10657_v48 }
 0x4a8   :  { %v10726_v57 = vand.u32 4294901760, %v4343_v63  ;;  %v4228_v41 = vadd.f32 %v4196_v37, %v10668_v22  ;;  %v4192_v62 = vmul.f32 %v4160_v52, %v10641_v6  ;;  %v4104_v4 = vmul.f32 0.5, %v10524_v45 }
 0x4a9   :  { %4851 = vmatpush.msrb.mxu3 %v4850_v58  ;;  %v10732_v19 = vsub.f32 %v4372_v50, %v10724_v3  ;;  %5853 = vtanh.f32 %v4264_v23  ;;  %v4120_v16 = vmul.f32 0.044715, %v10705_v9  ;;  %v4156_v54 = vmul.f32 %v4124_v5, %v10657_v48  ;;  %v12874_v50 = vld [vmem:[#allocation116_spill] sm:$0xff] }
 0x4aa   :  { %v5850_v12 = vpop.eup %5849  ;;  %4768 = vmatpush.msrb.mxu2 %v10726_v57  ;;  %4951 = vmatpush.msra.mxu1 %v10726_v57  ;;  %v10739_v44 = vsub.f32 %v4343_v63, %v10726_v57  ;;  %v4260_v42 = vmul.f32 0.7978846, %v4228_v41  ;;  %v4224_v15 = vadd.f32 %v4192_v62, %v10641_v6  ;;  %v4100_v60 = vmul.f32 0.5, %v10668_v22 }
 0x4ab   :  { %4774 = vmatmul.f32.vlgmr.msrb.gmra.mxu2 %v12873_v30  ;;  %v11699_v45 = vand.u32 4294901760, %v10732_v19  ;;  %v4336_v43 = vadd.f32 1.0, %v5850_v12  ;;  %4955 = vmatmul.f32.vlgmr.msra.gmra.mxu1 %v12874_v50  ;;  %v4152_v49 = vmul.f32 %v4120_v16, %v10705_v9  ;;  %v12875_v37 = vand.u32 4294901760, %v10348_v24  ;;  %v12877_v12 = vld [vmem:[#allocation46_spill] sm:$0xff] }
 0x4ac   :  { %4906 = vmatpush.msra.mxu0 %v10739_v44  ;;  %v4854_v63 = vand.u32 4294901760, %v10739_v44  ;;  %5855 = vtanh.f32 %v4260_v42  ;;  %v4256_v52 = vmul.f32 0.7978846, %v4224_v15  ;;  %v4188_v58 = vmul.f32 %v4156_v54, %v10657_v48 }
 0x4ad   :  { %4988 = vmatpush.msra.mxu2 %v12875_v37  ;;  %v5852_v23 = vpop.eup %5851  ;;  %v5143_v41 = vsub.f32 %v10732_v19, %v11699_v45  ;;  %v4368_v22 = vmul.f32 %v4336_v43, %v10682_v29  ;;  %v4184_v24 = vmul.f32 %v4152_v49, %v10705_v9  ;;  %v4181_v62 = vmul.f32 %v10474_v51, %v10430_v35 }
 0x4ae   :  { %5084 = vmatpush.msrb.mxu0 %v10724_v3  ;;  %v12876_v5 = vand.u32 4294901760, %v10423_v21  ;;  %v4855_v16 = vsub.f32 %v10739_v44, %v4854_v63  ;;  %v4332_v42 = vadd.f32 1.0, %v5852_v23  ;;  %5857 = vtanh.f32 %v4256_v52 }
 0x4af   :  { %4909 = vmatmul.f32.vlgmr.msra.gmra.mxu0 %v12877_v12  ;;  %v4220_v15 = vadd.f32 %v4188_v58, %v10657_v48  ;;  %v5854_v54 = vpop.eup %5853  ;;  %v5144_v29 = vand.u32 4294901760, %v5143_v41  ;;  %v10768_v43 = vand.u32 4294901760, %v4368_v22  ;;  %v4216_v49 = vadd.f32 %v4184_v24, %v10705_v9 }
 0x4b0   :  { %4992 = vmatpush.msra.mxu2 %v12876_v5  ;;  %v4213_v51 = vmul.f32 %v4181_v62, %v10430_v35  ;;  %v4856_v21 = vand.u32 4294901760, %v4855_v16  ;;  %v4364_v37 = vmul.f32 %v4332_v42, %v10694_v40  ;;  %v4328_v5 = vadd.f32 1.0, %v5854_v54  ;;  %v12878_v62 = vld [vmem:[#allocation194_spill] sm:$0xff]  ;;  %v12879_v54 = vld [vmem:[#allocation95_spill] sm:$0xff] }
 0x4b1   :  { %v4252_v45 = vmul.f32 0.7978846, %v4220_v15  ;;  %5145 = vmatpush.msrb.mxu1 %v5144_v29  ;;  %5086 = vmatpush.msrb.mxu0 %v10768_v43  ;;  %v10777_v52 = vsub.f32 %v4368_v22, %v10768_v43  ;;  %v4096_v58 = vmul.f32 0.5, %v10641_v6  ;;  %v4248_v23 = vmul.f32 0.7978846, %v4216_v49  ;;  %v12881_v29 = vld [vmem:[#allocation253_spill] sm:$0xff] }
 0x4b2   :  { %4996 = vmatpush.msra.mxu2 %v4824_v1  ;;  %v4245_v41 = vadd.f32 %v4213_v51, %v10430_v35  ;;  %v5856_v24 = vpop.eup %5855  ;;  %4857 = vmatpush.msrb.mxu3 %v4856_v21  ;;  %v10783_v0 = vand.u32 4294901760, %v4364_v37  ;;  %v4360_v1 = vmul.f32 %v4328_v5, %v4104_v4  ;;  %v4145_v40 = vmul.f32 0.044715, %v10567_v25 }
 0x4b3   :  { %5859 = vtanh.f32 %v4252_v45  ;;  %4782 = vmatmul.f32.gmra.mxu2 %v12878_v62  ;;  %4859 = vmatmul.f32.vlgmr.msrb.gmra.mxu3 %v9911_v13  ;;  %v5148_v6 = vand.u32 4294901760, %v10777_v52  ;;  %v4324_v22 = vadd.f32 1.0, %v5856_v24  ;;  %v4092_v4 = vmul.f32 0.5, %v10657_v48 }
 0x4b4   :  { %5000 = vmatpush.msra.mxu2 %v4830_v18  ;;  %5861 = vtanh.f32 %v4248_v23  ;;  %v4277_v16 = vmul.f32 0.7978846, %v4245_v41  ;;  %v5858_v42 = vpop.eup %5857  ;;  %5043 = vmatpush.msra.mxu3 %v10334_v17  ;;  %v10792_v39 = vand.u32 4294901760, %v4360_v1  ;;  %v10795_v18 = vsub.f32 %v4364_v37, %v10783_v0  ;;  %v12882_v37 = vld [vmem:[#allocation15_spill] sm:$0xff] }
 0x4b5   :  { %v4177_v45 = vmul.f32 %v4145_v40, %v10567_v25  ;;  %5088 = vmatpush.msrb.mxu0 %v10783_v0  ;;  %v5149_v15 = vsub.f32 %v10777_v52, %v5148_v6  ;;  %4961 = vmatmul.f32.gmra.mxu1 %v12879_v54  ;;  %v4356_v46 = vmul.f32 %v4324_v22, %v4100_v60  ;;  %v12880_v17 = vand.u32 4294901760, %v10679_v8 }
 0x4b6   :  { %5004 = vmatpush.msra.mxu2 %v4836_v10  ;;  %v4320_v10 = vadd.f32 1.0, %v5858_v42  ;;  %5863 = vtanh.f32 %v4277_v16  ;;  %5045 = vmatpush.msra.mxu3 %v12881_v29  ;;  %v10808_v48 = vsub.f32 %v4360_v1, %v10792_v39  ;;  %v5154_v49 = vand.u32 4294901760, %v10795_v18  ;;  %v12883_v29 = vld [vmem:[#allocation166_spill] sm:$0xff] }
 0x4b7   :  { %v4209_v51 = vmul.f32 %v4177_v45, %v10567_v25  ;;  %v4141_v21 = vmul.f32 0.044715, %v10521_v28  ;;  %4914 = vmatmul.f32.gmra.mxu0 %v12882_v37  ;;  %v5150_v5 = vand.u32 4294901760, %v5149_v15  ;;  %v10814_v60 = vand.u32 4294901760, %v4356_v46 }
 0x4b8   :  { %5008 = vmatpush.msra.mxu2 %v12880_v17  ;;  %v4352_v23 = vmul.f32 %v4320_v10, %v4096_v58  ;;  %v4088_v8 = vmul.f32 0.5, %v10705_v9  ;;  %5047 = vmatpush.msra.mxu3 %v10526_v14  ;;  %v5155_v24 = vsub.f32 %v10795_v18, %v5154_v49  ;;  %v5160_v1 = vand.u32 4294901760, %v10808_v48 }
 0x4b9   :  { %v5860_v41 = vpop.eup %5859  ;;  %v4241_v40 = vadd.f32 %v4209_v51, %v10567_v25  ;;  %v4173_v22 = vmul.f32 %v4141_v21, %v10521_v28  ;;  %5090 = vmatpush.msrb.mxu0 %v10792_v39  ;;  %5151 = vmatpush.msrb.mxu1 %v5150_v5  ;;  %v10830_v31 = vsub.f32 %v4356_v46, %v10814_v60 }
 0x4ba   :  { %5012 = vmatpush.msra.mxu2 %v4848_v59  ;;  %v5862_v16 = vpop.eup %5861  ;;  %v10827_v9 = vand.u32 4294901760, %v4352_v23  ;;  %v4316_v14 = vadd.f32 1.0, %v5860_v41  ;;  %v4137_v59 = vmul.f32 0.044715, %v10529_v27  ;;  %5049 = vmatpush.msra.mxu3 %v10544_v61  ;;  %v5156_v58 = vand.u32 4294901760, %v5155_v24 }
 0x4bb   :  { %v5161_v42 = vsub.f32 %v10808_v48, %v5160_v1  ;;  %v4312_v45 = vadd.f32 1.0, %v5862_v16  ;;  %v4273_v15 = vmul.f32 0.7978846, %v4241_v40  ;;  %4863 = vmatmul.f32.gmra.mxu3 %v10091_v11  ;;  %v5166_v44 = vand.u32 4294901760, %v10830_v31  ;;  %4790 = vmatmul.f32.gmra.mxu2 %v12883_v29  ;;  %v12885_v16 = vld [vmem:[#allocation112_spill] sm:$0xff] }
 0x4bc   :  { %5016 = vmatpush.msra.mxu2 %v4854_v63  ;;  %v5864_v10 = vpop.eup %5863  ;;  %v4348_v46 = vmul.f32 %v4316_v14, %v4092_v4  ;;  %v10842_v17 = vsub.f32 %v4352_v23, %v10827_v9  ;;  %v4205_v61 = vmul.f32 %v4173_v22, %v10521_v28  ;;  %v3913_v63 = vadd.f32 %v10661_v20, %v10690_v36 }
 0x4bd   :  { %5051 = vmatpush.msra.mxu3 %v10583_v7  ;;  %v4344_v51 = vmul.f32 %v4312_v45, %v4088_v8  ;;  %v4341_v21 = vadd.f32 1.0, %v5864_v10  ;;  %5865 = vtanh.f32 %v4273_v15  ;;  %5157 = vmatpush.msrb.mxu1 %v5156_v58  ;;  %v5162_v4 = vand.u32 4294901760, %v5161_v42  ;;  %v12886_v45 = vld [vmem:[#allocation47_spill] sm:$0xff] }
 0x4be   :  { %5215 = vmatpush.msrb.mxu2 %v10732_v19  ;;  %v10851_v5 = vand.u32 4294901760, %v4348_v46  ;;  %v4117_v23 = vmul.f32 0.5, %v10430_v35  ;;  %v4237_v41 = vadd.f32 %v4205_v61, %v10521_v28  ;;  %5092 = vmatpush.msrb.mxu0 %v10814_v60  ;;  %v5167_v7 = vsub.f32 %v10830_v31, %v5166_v44  ;;  %v12884_v35 = vld [vmem:[#allocation101_spill] sm:$0xff] }
 0x4bf   :  { %5053 = vmatpush.msra.mxu3 %v10665_v47  ;;  %v10860_v20 = vand.u32 4294901760, %v4344_v51  ;;  %v5172_v36 = vand.u32 4294901760, %v10842_v17  ;;  %v4169_v8 = vmul.f32 %v4137_v59, %v10529_v27  ;;  %v10866_v24 = vadd.f32 %v12812_v53, %v10547_v38  ;;  %4919 = vmatmul.f32.gmra.mxu0 %v12884_v35 }
 0x4c0   :  { %5218 = vmatpush.msrb.mxu2 %v10777_v52  ;;  %v10871_v47 = vsub.f32 %v4348_v46, %v10851_v5  ;;  %v4373_v40 = vmul.f32 %v4341_v21, %v4117_v23  ;;  %v4269_v22 = vmul.f32 0.7978846, %v4237_v41  ;;  %v3977_v14 = vadd.f32 %v12885_v16, %v3913_v63  ;;  %5163 = vmatpush.msrb.mxu1 %v5162_v4  ;;  %v12887_v21 = vld [vmem:[#allocation187_spill] sm:$0xff] }
 0x4c1   :  { %5055 = vmatpush.msra.mxu3 %v10671_v26  ;;  %v10876_v59 = vsub.f32 %v4344_v51, %v10860_v20  ;;  %v4201_v53 = vmul.f32 %v4169_v8, %v10529_v27  ;;  %v4133_v38 = vmul.f32 0.044715, %v10720_v2  ;;  %v10882_v58 = vadd.f32 %v12869_v34, %v10611_v32  ;;  %5094 = vmatpush.msrb.mxu0 %v10827_v9 }
 0x4c2   :  { %5221 = vmatpush.msrb.mxu2 %v10795_v18  ;;  %v5178_v42 = vand.u32 4294901760, %v10871_v47  ;;  %5867 = vtanh.f32 %v4269_v22  ;;  %4967 = vmatmul.f32.gmra.mxu1 %v12886_v45  ;;  %v5168_v15 = vand.u32 4294901760, %v5167_v7  ;;  %v5173_v10 = vsub.f32 %v10842_v17, %v5172_v36 }
 0x4c3   :  { %v5866_v26 = vpop.eup %5865  ;;  %5057 = vmatpush.msra.mxu3 %v10726_v57  ;;  %v4233_v32 = vadd.f32 %v4201_v53, %v10529_v27  ;;  %v4165_v34 = vmul.f32 %v4133_v38, %v10720_v2  ;;  %v10896_v46 = vand.u32 4294901760, %v4373_v40  ;;  %v4113_v61 = vmul.f32 0.5, %v10567_v25  ;;  %4798 = vmatmul.f32.gmra.mxu2 %v12887_v21  ;;  %v12888_v38 = vld [vmem:[#allocation4_spill] sm:$0xff] }
 0x4c4   :  { %5224 = vmatpush.msrb.mxu2 %v10808_v48  ;;  %v4337_v57 = vadd.f32 1.0, %v5866_v26  ;;  %v4129_v63 = vmul.f32 0.044715, %v10866_v24  ;;  %v10901_v51 = vadd.f32 %v12843_v56, %v3977_v14  ;;  %4867 = vmatmul.f32.gmra.mxu3 %v10156_v33  ;;  %v5184_v23 = vand.u32 4294901760, %v10876_v59 }
 0x4c5   :  { %5267 = vmatpush.msrb.mxu3 %v10724_v3  ;;  %v4265_v4 = vmul.f32 0.7978846, %v4233_v32  ;;  %v4197_v41 = vmul.f32 %v4165_v34, %v10720_v2  ;;  %5096 = vmatpush.msrb.mxu0 %v10851_v5  ;;  %v5179_v25 = vsub.f32 %v10871_v47, %v5178_v42  ;;  %v4125_v8 = vmul.f32 0.044715, %v10882_v58 }
 0x4c6   :  { %5227 = vmatpush.msrb.mxu2 %v10830_v31  ;;  %v4369_v7 = vmul.f32 %v4337_v57, %v4113_v61  ;;  %v4161_v56 = vmul.f32 %v4129_v63, %v10866_v24  ;;  %5169 = vmatpush.msrb.mxu1 %v5168_v15  ;;  %v5174_v22 = vand.u32 4294901760, %v5173_v10  ;;  %v4109_v16 = vmul.f32 0.5, %v10521_v28 }
 0x4c7   :  { %5269 = vmatpush.msrb.mxu3 %v10768_v43  ;;  %5869 = vtanh.f32 %v4265_v4  ;;  %v4229_v14 = vadd.f32 %v4197_v41, %v10720_v2  ;;  %4924 = vmatmul.f32.gmra.mxu0 %v12888_v38  ;;  %v10920_v26 = vsub.f32 %v4373_v40, %v10896_v46  ;;  %v4157_v15 = vmul.f32 %v4125_v8, %v10882_v58 }
 0x4c8   :  { %5230 = vmatpush.msrb.mxu2 %v10842_v17  ;;  %v5868_v53 = vpop.eup %5867  ;;  %v10922_v32 = vand.u32 4294901760, %v4369_v7  ;;  %v4193_v34 = vmul.f32 %v4161_v56, %v10866_v24  ;;  %5098 = vmatpush.msrb.mxu0 %v10860_v20  ;;  %v5185_v10 = vsub.f32 %v10876_v59, %v5184_v23  ;;  %v4121_v57 = vmul.f32 0.044715, %v10901_v51  ;;  %v12889_v56 = vld [vmem:[#allocation91_spill] sm:$0xff] }
 0x4c9   :  { %5271 = vmatpush.msrb.mxu3 %v10783_v0  ;;  %v4333_v28 = vadd.f32 1.0, %v5868_v53  ;;  %v4261_v61 = vmul.f32 0.7978846, %v4229_v14  ;;  %5175 = vmatpush.msrb.mxu1 %v5174_v22  ;;  %v5180_v40 = vand.u32 4294901760, %v5179_v25  ;;  %v4189_v41 = vmul.f32 %v4157_v15, %v10882_v58 }
 0x4ca   :  { %5233 = vmatpush.msrb.mxu2 %v10871_v47  ;;  %v10934_v63 = vsub.f32 %v4369_v7, %v10922_v32  ;;  %v4225_v4 = vadd.f32 %v4193_v34, %v10866_v24  ;;  %4973 = vmatmul.f32.gmra.mxu1 %v12889_v56  ;;  %v12890_v8 = vand.u32 4294901760, %v10732_v19  ;;  %v4153_v14 = vmul.f32 %v4121_v57, %v10901_v51 }
 0x4cb   :  { %5273 = vmatpush.msrb.mxu3 %v10792_v39  ;;  %v4365_v53 = vmul.f32 %v4333_v28, %v4109_v16  ;;  %5871 = vtanh.f32 %v4261_v61  ;;  %v5472_v25 = vand.u32 4294901760, %v10920_v26  ;;  %5181 = vmatpush.msrb.mxu1 %v5180_v40  ;;  %v4221_v22 = vadd.f32 %v4189_v41, %v10882_v58 }
 0x4cc   :  { %5318 = vmatpush.msra.mxu0 %v12890_v8  ;;  %v4257_v7 = vmul.f32 0.7978846, %v4225_v4  ;;  %4871 = vmatmul.f32.gmra.mxu3 %v10284_v55  ;;  %v4105_v19 = vmul.f32 0.5, %v10529_v27  ;;  %v5186_v16 = vand.u32 4294901760, %v5185_v10  ;;  %v4185_v28 = vmul.f32 %v4153_v14, %v10901_v51 }
 0x4cd   :  { %5275 = vmatpush.msrb.mxu3 %v10814_v60  ;;  %v5870_v34 = vpop.eup %5869  ;;  %5018 = vmatmul.f32.vlgmr.msra.gmra.mxu2 %v9911_v13  ;;  %v10947_v15 = vand.u32 4294901760, %v4365_v53  ;;  %v5478_v61 = vand.u32 4294901760, %v10934_v63  ;;  %v4253_v40 = vmul.f32 0.7978846, %v4221_v22  ;;  %v5473_v10 = vsub.f32 %v10920_v26, %v5472_v25 }
 0x4ce   :  { %5236 = vmatpush.msrb.mxu2 %v10876_v59  ;;  %v4329_v57 = vadd.f32 1.0, %v5870_v34  ;;  %5873 = vtanh.f32 %v4257_v7  ;;  %5322 = vmatpush.msra.mxu0 %v5148_v6  ;;  %v4217_v27 = vadd.f32 %v4185_v28, %v10901_v51  ;;  %v4101_v22 = vmul.f32 0.5, %v10720_v2 }
 0x4cf   :  { %5277 = vmatpush.msrb.mxu3 %v10827_v9  ;;  %v10958_v4 = vsub.f32 %v4365_v53, %v10947_v15  ;;  %5104 = vmatmul.f32.vlgmr.msrb.gmra.mxu0 %v12873_v30  ;;  %5875 = vtanh.f32 %v4253_v40  ;;  %v10970_v53 = vpop.f32.mrf.mxu0  ;;  %v5479_v14 = vsub.f32 %v10934_v63, %v5478_v61  ;;  %v5474_v34 = vand.u32 4294901760, %v5473_v10 }
 0x4d0   :  { %5414 = vmatpush.msra.mxu2 %v10896_v46  ;;  %v4361_v41 = vmul.f32 %v4329_v57, %v4105_v19  ;;  %5326 = vmatpush.msra.mxu0 %v5154_v49  ;;  %v4249_v6 = vmul.f32 0.7978846, %v4217_v27  ;;  %v4097_v2 = vmul.f32 0.5, %v10866_v24 }
 0x4d1   :  { %5279 = vmatpush.msrb.mxu3 %v10851_v5  ;;  %v5872_v8 = vpop.eup %5871  ;;  %v5484_v52 = vand.u32 4294901760, %v10958_v4  ;;  %5187 = vmatpush.msrb.mxu1 %v5186_v16  ;;  %v5480_v57 = vand.u32 4294901760, %v5479_v14 }
 0x4d2   :  { %5416 = vmatpush.msra.mxu2 %v10922_v32  ;;  %v10976_v7 = vand.u32 4294901760, %v4361_v41  ;;  %v4325_v18 = vadd.f32 1.0, %v5872_v8  ;;  %5330 = vmatpush.msra.mxu0 %v5160_v1  ;;  %5877 = vtanh.f32 %v4249_v6 }
 0x4d3   :  { %5281 = vmatpush.msrb.mxu3 %v10860_v20  ;;  %v5485_v19 = vsub.f32 %v10958_v4, %v5484_v52  ;;  %5189 = vmatmul.f32.vlgmr.msrb.gmra.mxu1 %v9911_v13 }
 0x4d4   :  { %5418 = vmatpush.msra.mxu2 %v10947_v15  ;;  %v5874_v49 = vpop.eup %5873  ;;  %v10986_v28 = vsub.f32 %v4361_v41, %v10976_v7  ;;  %v4357_v16 = vmul.f32 %v4325_v18, %v4101_v22  ;;  %5059 = vmatmul.f32.vlgmr.msra.gmra.mxu3 %v9911_v13  ;;  %v4093_v41 = vmul.f32 0.5, %v10882_v58 }
 0x4d5   :  { %5022 = vmatmul.f32.gmra.mxu2 %v10091_v11  ;;  %v4321_v48 = vadd.f32 1.0, %v5874_v49  ;;  %v5876_v1 = vpop.eup %5875  ;;  %5475 = vmatpush.msra.mxu3 %v5474_v34  ;;  %v5486_v24 = vand.u32 4294901760, %v5485_v19  ;;  %v4089_v49 = vmul.f32 0.5, %v10901_v51 }
 0x4d6   :  { %v5490_v40 = vand.u32 4294901760, %v10986_v28  ;;  %5334 = vmatpush.msra.mxu0 %v5166_v44  ;;  %v10995_v27 = vand.u32 4294901760, %v4357_v16  ;;  %5373 = vmatpush.msra.mxu1 %v10724_v3  ;;  %v4317_v8 = vadd.f32 1.0, %v5876_v1 }
 0x4d7   :  { %5420 = vmatpush.msra.mxu2 %v10976_v7  ;;  %v4353_v10 = vmul.f32 %v4321_v48, %v4097_v2  ;;  %5481 = vmatpush.msra.mxu3 %v5480_v57  ;;  %v11012_v14 = vpop.f32.mrf.mxu0 }
 0x4d8   :  { %v5491_v6 = vsub.f32 %v10986_v28, %v5490_v40  ;;  %5112 = vmatmul.f32.gmra.mxu0 %v12878_v62  ;;  %v11005_v31 = vsub.f32 %v4357_v16, %v10995_v27  ;;  %v5878_v44 = vpop.eup %5877  ;;  %5375 = vmatpush.msra.mxu1 %v10768_v43  ;;  %v4349_v58 = vmul.f32 %v4317_v8, %v4093_v41 }
 0x4d9   :  { %5338 = vmatpush.msra.mxu0 %v5172_v36  ;;  %v11010_v3 = vand.u32 4294901760, %v4353_v10  ;;  %5487 = vmatpush.msra.mxu3 %v5486_v24  ;;  %v4313_v34 = vadd.f32 1.0, %v5878_v44  ;;  %v11017_v19 = vpop.f32.mrf.mxu1 }
 0x4da   :  { %v5492_v22 = vand.u32 4294901760, %v5491_v6  ;;  %v5496_v18 = vand.u32 4294901760, %v11005_v31  ;;  %5422 = vmatpush.msra.mxu2 %v10995_v27  ;;  %5377 = vmatpush.msra.mxu1 %v10783_v0  ;;  %v11025_v43 = vand.u32 4294901760, %v4349_v58  ;;  %v11080_v6 = vpop.permute.xlu1 %4384 }
 0x4db   :  { %v11020_v17 = vsub.f32 %v4353_v10, %v11010_v3  ;;  %5342 = vmatpush.msra.mxu0 %v5178_v42  ;;  %v4345_v51 = vmul.f32 %v4313_v34, %v4089_v49  ;;  %5193 = vmatmul.f32.gmra.mxu1 %v10091_v11 }
 0x4dc   :  { %5493 = vmatpush.msra.mxu3 %v5492_v22  ;;  %v5497_v36 = vsub.f32 %v11005_v31, %v5496_v18  ;;  %5424 = vmatpush.msra.mxu2 %v11010_v3  ;;  %v11035_v47 = vsub.f32 %v4349_v58, %v11025_v43  ;;  %v4626_v58 = vpop.f32.mrf.mxu3 }
 0x4dd   :  { %5026 = vmatmul.f32.gmra.mxu2 %v10156_v33  ;;  %5063 = vmatmul.f32.gmra.mxu3 %v10091_v11  ;;  %v5502_v16 = vand.u32 4294901760, %v11020_v17  ;;  %v11040_v42 = vand.u32 4294901760, %v4345_v51 }
 0x4de   :  { %v5498_v0 = vand.u32 4294901760, %v5497_v36  ;;  %5346 = vmatpush.msra.mxu0 %v5184_v23  ;;  %5379 = vmatpush.msra.mxu1 %v10792_v39  ;;  %v5508_v48 = vand.u32 4294901760, %v11035_v47 }
 0x4df   :  { %v5503_v2 = vsub.f32 %v11020_v17, %v5502_v16  ;;  %5426 = vmatpush.msra.mxu2 %v11025_v43  ;;  %v11049_v1 = vsub.f32 %v4345_v51, %v11040_v42  ;;  %v11057_v23 = vpop.f32.mrf.mxu0 }
 0x4e0   :  { %5545 = vmatpush.msrb.mxu0 %v10920_v26  ;;  %5499 = vmatpush.msra.mxu3 %v5498_v0  ;;  %v5509_v39 = vsub.f32 %v11035_v47, %v5508_v48 }
 0x4e1   :  { %5120 = vmatmul.f32.gmra.mxu0 %v12883_v29  ;;  %v5504_v59 = vand.u32 4294901760, %v5503_v2  ;;  %5428 = vmatpush.msra.mxu2 %v11040_v42  ;;  %v5514_v57 = vand.u32 4294901760, %v11049_v1  ;;  %v4534_v10 = vpop.f32.mrf.mxu1 }
 0x4e2   :  { %5381 = vmatpush.msra.mxu1 %v10814_v60  ;;  %5548 = vmatpush.msrb.mxu0 %v10934_v63  ;;  %v5510_v41 = vand.u32 4294901760, %v5509_v39 }
 0x4e3   :  { %5505 = vmatpush.msra.mxu3 %v5504_v59  ;;  %v5515_v8 = vsub.f32 %v11049_v1, %v5514_v57  ;;  %5197 = vmatmul.f32.gmra.mxu1 %v10156_v33 }
 0x4e4   :  { %5383 = vmatpush.msra.mxu1 %v10827_v9  ;;  %5551 = vmatpush.msrb.mxu0 %v10958_v4 }
 0x4e5   :  { %5511 = vmatpush.msra.mxu3 %v5510_v41  ;;  %5030 = vmatmul.f32.gmra.mxu2 %v10284_v55  ;;  %v5516_v24 = vand.u32 4294901760, %v5515_v8 }
 0x4e6   :  { %5067 = vmatmul.f32.gmra.mxu3 %v10156_v33  ;;  %5385 = vmatpush.msra.mxu1 %v10851_v5  ;;  %v4580_v5 = vpop.f32.mrf.mxu2 }
 0x4e7   :  { %5554 = vmatpush.msrb.mxu0 %v10986_v28  ;;  %5517 = vmatpush.msra.mxu3 %v5516_v24 }
 0x4e8   :  { %5387 = vmatpush.msra.mxu1 %v10860_v20  ;;  %v4446_v20 = vadd.f32 %v10970_v53, %v11080_v6 }
 0x4e9   :  { %5557 = vmatpush.msrb.mxu0 %v11005_v31  ;;  %v11076_v60 = vpop.f32.mrf.mxu0 }
 0x4ea   :  { %5597 = vmatpush.msrb.mxu1 %v10896_v46  ;;  %5128 = vmatmul.f32.gmra.mxu0 %v12887_v21  ;;  %v4531_v44 = vadd.f32 %v11017_v19, %v4446_v20 }
 0x4eb   :  { %5560 = vmatpush.msrb.mxu0 %v11020_v17  ;;  %v4538_v9 = vpop.f32.mrf.mxu1  ;;  %5201 = vmatmul.f32.gmra.mxu1 %v10284_v55 }
 0x4ec   :  { %5599 = vmatpush.msrb.mxu1 %v10922_v32  ;;  %v4581_v63 = vadd.f32 %v4580_v5, %v4531_v44 }
 0x4ed   :  { %5239 = vmatmul.f32.vlgmr.msrb.gmra.mxu2 %v12877_v12  ;;  %5563 = vmatpush.msrb.mxu0 %v11035_v47 }
 0x4ee   :  { %5071 = vmatmul.f32.gmra.mxu3 %v10284_v55  ;;  %5648 = vmatpush.msrb.mxu2 %v5472_v25  ;;  %v4585_v4 = vpop.f32.mrf.mxu2  ;;  %v4627_v53 = vadd.f32 %v4626_v58, %v4581_v63 }
 0x4ef   :  { %5601 = vmatpush.msrb.mxu1 %v10947_v15  ;;  %5566 = vmatpush.msrb.mxu0 %v11049_v1 }
 0x4f0   :  { %5652 = vmatpush.msrb.mxu2 %v5478_v61  ;;  %v11104_v61 = vpop.permute.xlu2 %4389 }
 0x4f1   :  { %5603 = vmatpush.msrb.mxu1 %v10976_v7  ;;  %v4689_v26 = vpop.f32.mrf.mxu0 }
 0x4f2   :  { %5656 = vmatpush.msrb.mxu2 %v5484_v52  ;;  %5348 = vmatmul.f32.vlgmr.msra.gmra.mxu0 %v9911_v13  ;;  %v4454_v52 = vadd.f32 %v11012_v14, %v11104_v61 }
 0x4f3   :  { %5605 = vmatpush.msrb.mxu1 %v10995_v27  ;;  %v4542_v25 = vpop.f32.mrf.mxu1 }
 0x4f4   :  { %5660 = vmatpush.msrb.mxu2 %v5490_v40  ;;  %v4535_v28 = vadd.f32 %v4534_v10, %v4454_v52  ;;  %5389 = vmatmul.f32.vlgmr.msra.gmra.mxu1 %v9911_v13  ;;  %v4690_v40 = vadd.f32 %v4689_v26, %v4627_v53 }
 0x4f5   :  { %5244 = vmatmul.f32.gmra.mxu2 %v12882_v37  ;;  %5607 = vmatpush.msrb.mxu1 %v11010_v3 }
 0x4f6   :  { %5285 = vmatmul.f32.vlgmr.msrb.gmra.mxu3 %v12874_v50  ;;  %5664 = vmatpush.msrb.mxu2 %v5496_v18  ;;  %v4586_v22 = vadd.f32 %v4585_v4, %v4535_v28  ;;  %v11126_v18 = vpop.permute.xlu0 %4394  ;;  %v4590_v49 = vpop.f32.mrf.mxu2 }
 0x4f7   :  { %5703 = vmatpush.msrb.mxu3 %v10896_v46  ;;  %5609 = vmatpush.msrb.mxu1 %v11025_v43  ;;  %v4632_v46 = vpop.f32.mrf.mxu3 }
 0x4f8   :  { %5668 = vmatpush.msrb.mxu2 %v5502_v16  ;;  %v11141_v16 = vpop.permute.xlu1 %4399 }
 0x4f9   :  { %5705 = vmatpush.msrb.mxu3 %v10922_v32  ;;  %5611 = vmatpush.msrb.mxu1 %v11040_v42  ;;  %v4693_v14 = vpop.f32.mrf.mxu0  ;;  %v4470_v47 = vadd.f32 %v11076_v60, %v11141_v16 }
 0x4fa   :  { %5672 = vmatpush.msrb.mxu2 %v5508_v48  ;;  %5352 = vmatmul.f32.gmra.mxu0 %v10091_v11 }
 0x4fb   :  { %5707 = vmatpush.msrb.mxu3 %v10947_v15  ;;  %v4730_v31 = vpop.f32.mrf.mxu1  ;;  %v4462_v15 = vadd.f32 %v11057_v23, %v11126_v18  ;;  %v4543_v0 = vadd.f32 %v4542_v25, %v4470_v47 }
 0x4fc   :  { %5676 = vmatpush.msrb.mxu2 %v5514_v57  ;;  %v4731_v32 = vadd.f32 %v4730_v31, %v4690_v40  ;;  %5393 = vmatmul.f32.gmra.mxu1 %v10091_v11 }
 0x4fd   :  { %5709 = vmatpush.msrb.mxu3 %v10976_v7  ;;  %5249 = vmatmul.f32.gmra.mxu2 %v12884_v35  ;;  %v4633_v7 = vadd.f32 %v4632_v46, %v4586_v22  ;;  %v4539_v34 = vadd.f32 %v4538_v9, %v4462_v15 }
 0x4fe   :  { %5291 = vmatmul.f32.gmra.mxu3 %v12879_v54  ;;  %5735 = vst [vmem:[%s11239_s8] sm:$0xff] %v4731_v32 }
 0x4ff   :  { %5711 = vmatpush.msrb.mxu3 %v10995_v27  ;;  %v4694_v19 = vadd.f32 %v4693_v14, %v4633_v7  ;;  %v4638_v17 = vpop.f32.mrf.mxu3  ;;  %v4591_v27 = vadd.f32 %v4590_v49, %v4539_v34 }
 0x501   :  { %5713 = vmatpush.msrb.mxu3 %v11010_v3  ;;  %v4697_v3 = vpop.f32.mrf.mxu0 }
 0x502   :  { %5356 = vmatmul.f32.gmra.mxu0 %v10156_v33 }
 0x503   :  { %5715 = vmatpush.msrb.mxu3 %v11025_v43  ;;  %v4734_v36 = vpop.f32.mrf.mxu1  ;;  %v4639_v43 = vadd.f32 %v4638_v17, %v4591_v27 }
 0x504   :  { %v4735_v51 = vadd.f32 %v4734_v36, %v4694_v19  ;;  %5397 = vmatmul.f32.gmra.mxu1 %v10156_v33 }
 0x505   :  { %5717 = vmatpush.msrb.mxu3 %v11040_v42  ;;  %5254 = vmatmul.f32.gmra.mxu2 %v12888_v38  ;;  %v4595_v42 = vpop.f32.mrf.mxu2  ;;  %v4698_v2 = vadd.f32 %v4697_v3, %v4639_v43 }
 0x506   :  { %5297 = vmatmul.f32.gmra.mxu3 %v12886_v45  ;;  %5739 = vst [vmem:[%s11239_s8 + $0x20] sm:$0xff] %v4735_v51  ;;  %v4596_v1 = vadd.f32 %v4595_v42, %v4543_v0 }
 0x507   :  { %v4644_v39 = vpop.f32.mrf.mxu3 }
 0x508   :  { %v4645_v57 = vadd.f32 %v4644_v39, %v4596_v1 }
 0x509   :  { %v4701_v23 = vpop.f32.mrf.mxu0 }
 0x50a   :  { %5360 = vmatmul.f32.gmra.mxu0 %v10284_v55  ;;  %v4702_v10 = vadd.f32 %v4701_v23, %v4645_v57 }
 0x50b   :  { %v4738_v48 = vpop.f32.mrf.mxu1 }
 0x50c   :  { %v4739_v59 = vadd.f32 %v4738_v48, %v4698_v2  ;;  %5401 = vmatmul.f32.gmra.mxu1 %v10284_v55 }
 0x50d   :  { %5434 = vmatmul.f32.vlgmr.msra.gmra.mxu2 %v12873_v30 }
 0x50e   :  { %5303 = vmatmul.f32.gmra.mxu3 %v12889_v56  ;;  %5743 = vst [vmem:[%s11239_s8 + $0x40] sm:$0xff] %v4739_v59 }
 0x512   :  { %5569 = vmatmul.f32.vlgmr.msrb.gmra.mxu0 %v12877_v12 }
 0x513   :  { %v4742_v41 = vpop.f32.mrf.mxu1 }
 0x514   :  { %v4743_v30 = vadd.f32 %v4742_v41, %v4702_v10  ;;  %5615 = vmatmul.f32.vlgmr.msrb.gmra.mxu1 %v12874_v50 }
 0x515   :  { %5442 = vmatmul.f32.gmra.mxu2 %v12878_v62 }
 0x516   :  { %5519 = vmatmul.f32.vlgmr.msra.gmra.mxu3 %v9911_v13  ;;  %5747 = vst [vmem:[%s11239_s8 + $0x60] sm:$0xff] %v4743_v30 }
 0x51a   :  { %5574 = vmatmul.f32.gmra.mxu0 %v12882_v37 }
 0x51c   :  { %5621 = vmatmul.f32.gmra.mxu1 %v12879_v54 }
 0x51d   :  { %5450 = vmatmul.f32.gmra.mxu2 %v12883_v29 }
 0x51e   :  { %5523 = vmatmul.f32.gmra.mxu3 %v10091_v11 }
 0x522   :  { %5579 = vmatmul.f32.gmra.mxu0 %v12884_v35 }
 0x524   :  { %5627 = vmatmul.f32.gmra.mxu1 %v12886_v45 }
 0x525   :  { %5458 = vmatmul.f32.gmra.mxu2 %v12887_v21 }
 0x526   :  { %5527 = vmatmul.f32.gmra.mxu3 %v10156_v33 }
 0x528   :  { %v4956_v50 = vpop.f32.mrf.mxu1 }
 0x52a   :  { %5584 = vmatmul.f32.gmra.mxu0 %v12888_v38 }
 0x52c   :  { %v4910_v12 = vpop.f32.mrf.mxu0  ;;  %5633 = vmatmul.f32.gmra.mxu1 %v12889_v56 }
 0x52d   :  { %5678 = vmatmul.f32.vlgmr.msrb.gmra.mxu2 %v9911_v13 }
 0x52e   :  { %5531 = vmatmul.f32.gmra.mxu3 %v10284_v55  ;;  %v4775_v62 = vpop.f32.mrf.mxu2 }
 0x532   :  { %v4962_v37 = vpop.f32.mrf.mxu1 }
 0x534   :  { %v4915_v54 = vpop.f32.mrf.mxu0 }
 0x535   :  { %5682 = vmatmul.f32.gmra.mxu2 %v10091_v11 }
 0x536   :  { %5719 = vmatmul.f32.vlgmr.msrb.gmra.mxu3 %v9911_v13  ;;  %v4783_v29 = vpop.f32.mrf.mxu2  ;;  %v4860_v35 = vpop.f32.mrf.mxu3  ;;  %v4776_v13 = vadd.f32 %v4775_v62, %v11080_v6 }
 0x537   :  { %v4784_v26 = vadd.f32 %v4783_v29, %v11104_v61 }
 0x538   :  { %v4861_v5 = vadd.f32 %v4860_v35, %v4776_v13 }
 0x53c   :  { %v4920_v45 = vpop.f32.mrf.mxu0 }
 0x53d   :  { %5686 = vmatmul.f32.gmra.mxu2 %v10156_v33 }
 0x53e   :  { %5723 = vmatmul.f32.gmra.mxu3 %v10091_v11  ;;  %v4864_v21 = vpop.f32.mrf.mxu3  ;;  %v4791_v38 = vpop.f32.mrf.mxu2  ;;  %v4911_v11 = vadd.f32 %v4910_v12, %v4861_v5 }
 0x53f   :  { %v4968_v8 = vpop.f32.mrf.mxu1  ;;  %v4865_v4 = vadd.f32 %v4864_v21, %v4784_v26 }
 0x540   :  { %v4957_v63 = vadd.f32 %v4956_v50, %v4911_v11 }
 0x541   :  { %v4916_v46 = vadd.f32 %v4915_v54, %v4865_v4 }
 0x543   :  { %v4963_v31 = vadd.f32 %v4962_v37, %v4916_v46 }
 0x544   :  { %v4925_v24 = vpop.f32.mrf.mxu0 }
 0x545   :  { %5690 = vmatmul.f32.gmra.mxu2 %v10284_v55 }
 0x546   :  { %5727 = vmatmul.f32.gmra.mxu3 %v10156_v33  ;;  %v4799_v56 = vpop.f32.mrf.mxu2 }
 0x547   :  { %v4868_v60 = vpop.f32.mrf.mxu3  ;;  %v4974_v9 = vpop.f32.mrf.mxu1  ;;  %v4800_v17 = vadd.f32 %v4799_v56, %v11141_v16 }
 0x54c   :  { %v5105_v20 = vpop.f32.mrf.mxu0 }
 0x54d   :  { %v5106_v41 = vadd.f32 %v5105_v20, %v11080_v6 }
 0x54e   :  { %5731 = vmatmul.f32.gmra.mxu3 %v10284_v55  ;;  %v4792_v55 = vadd.f32 %v4791_v38, %v11126_v18 }
 0x54f   :  { %v4872_v44 = vpop.f32.mrf.mxu3 }
 0x550   :  { %v5019_v58 = vpop.f32.mrf.mxu2  ;;  %v5190_v25 = vpop.f32.mrf.mxu1  ;;  %v4869_v14 = vadd.f32 %v4868_v60, %v4792_v55  ;;  %v4873_v27 = vadd.f32 %v4872_v44, %v4800_v17 }
 0x551   :  { %v5020_v52 = vadd.f32 %v5019_v58, %v4957_v63  ;;  %v5191_v30 = vadd.f32 %v5190_v25, %v5106_v41 }
 0x552   :  { %v4921_v19 = vadd.f32 %v4920_v45, %v4869_v14  ;;  %v4926_v0 = vadd.f32 %v4925_v24, %v4873_v27 }
 0x554   :  { %v4969_v36 = vadd.f32 %v4968_v8, %v4921_v19  ;;  %v4975_v48 = vadd.f32 %v4974_v9, %v4926_v0 }
 0x555   :  { %v5113_v53 = vpop.f32.mrf.mxu0 }
 0x556   :  { %v5114_v29 = vadd.f32 %v5113_v53, %v11104_v61 }
 0x557   :  { %v5060_v28 = vpop.f32.mrf.mxu3 }
 0x558   :  { %v5023_v33 = vpop.f32.mrf.mxu2  ;;  %v5061_v40 = vadd.f32 %v5060_v28, %v5020_v52  ;;  %v5194_v32 = vpop.f32.mrf.mxu1 }
 0x559   :  { %v5024_v22 = vadd.f32 %v5023_v33, %v4963_v31  ;;  %v5195_v21 = vadd.f32 %v5194_v32, %v5114_v29 }
 0x55a   :  { %5736 = vst [vmem:[%s11239_s8 + $0x8] sm:$0xff] %v5061_v40 }
 0x55e   :  { %v5121_v34 = vpop.f32.mrf.mxu0 }
 0x55f   :  { %v5122_v13 = vadd.f32 %v5121_v34, %v11126_v18 }
 0x560   :  { %v5027_v15 = vpop.f32.mrf.mxu2  ;;  %v5064_v49 = vpop.f32.mrf.mxu3 }
 0x561   :  { %v5065_v7 = vadd.f32 %v5064_v49, %v5024_v22  ;;  %v5198_v51 = vpop.f32.mrf.mxu1  ;;  %v5028_v3 = vadd.f32 %v5027_v15, %v4969_v36 }
 0x562   :  { %v5199_v20 = vadd.f32 %v5198_v51, %v5122_v13 }
 0x563   :  { %5740 = vst [vmem:[%s11239_s8 + $0x28] sm:$0xff] %v5065_v7 }
 0x567   :  { %v5129_v2 = vpop.f32.mrf.mxu0 }
 0x568   :  { %v5031_v47 = vpop.f32.mrf.mxu2  ;;  %v5130_v52 = vadd.f32 %v5129_v2, %v11141_v16 }
 0x569   :  { %v5068_v43 = vpop.f32.mrf.mxu3  ;;  %v5202_v1 = vpop.f32.mrf.mxu1  ;;  %v5032_v59 = vadd.f32 %v5031_v47, %v4975_v48 }
 0x56a   :  { %v5069_v42 = vadd.f32 %v5068_v43, %v5028_v3  ;;  %v5203_v33 = vadd.f32 %v5202_v1, %v5130_v52 }
 0x56c   :  { %5744 = vst [vmem:[%s11239_s8 + $0x48] sm:$0xff] %v5069_v42 }
 0x56f   :  { %v5349_v10 = vpop.f32.mrf.mxu0 }
 0x570   :  { %v5240_v39 = vpop.f32.mrf.mxu2 }
 0x571   :  { %v5072_v23 = vpop.f32.mrf.mxu3  ;;  %v5390_v12 = vpop.f32.mrf.mxu1  ;;  %v5241_v50 = vadd.f32 %v5240_v39, %v5191_v30 }
 0x572   :  { %v5073_v57 = vadd.f32 %v5072_v23, %v5032_v59 }
 0x574   :  { %5748 = vst [vmem:[%s11239_s8 + $0x68] sm:$0xff] %v5073_v57 }
 0x577   :  { %v5353_v45 = vpop.f32.mrf.mxu0 }
 0x578   :  { %v5245_v62 = vpop.f32.mrf.mxu2 }
 0x579   :  { %v5286_v54 = vpop.f32.mrf.mxu3  ;;  %v5394_v8 = vpop.f32.mrf.mxu1  ;;  %v5246_v24 = vadd.f32 %v5245_v62, %v5195_v21 }
 0x57a   :  { %v5287_v37 = vadd.f32 %v5286_v54, %v5241_v50 }
 0x57c   :  { %v5350_v35 = vadd.f32 %v5349_v10, %v5287_v37 }
 0x57e   :  { %v5391_v38 = vadd.f32 %v5390_v12, %v5350_v35 }
 0x57f   :  { %v5357_v58 = vpop.f32.mrf.mxu0 }
 0x580   :  { %5737 = vst [vmem:[%s11239_s8 + $0x10] sm:$0xff] %v5391_v38  ;;  %v5250_v56 = vpop.f32.mrf.mxu2 }
 0x581   :  { %v5292_v60 = vpop.f32.mrf.mxu3  ;;  %v5251_v11 = vadd.f32 %v5250_v56, %v5199_v20  ;;  %v5398_v63 = vpop.f32.mrf.mxu1 }
 0x582   :  { %v5293_v9 = vadd.f32 %v5292_v60, %v5246_v24 }
 0x584   :  { %v5354_v5 = vadd.f32 %v5353_v45, %v5293_v9 }
 0x586   :  { %v5395_v44 = vadd.f32 %v5394_v8, %v5354_v5 }
 0x587   :  { %v5361_v31 = vpop.f32.mrf.mxu0 }
 0x588   :  { %5741 = vst [vmem:[%s11239_s8 + $0x30] sm:$0xff] %v5395_v44  ;;  %v5255_v26 = vpop.f32.mrf.mxu2 }
 0x589   :  { %v5298_v25 = vpop.f32.mrf.mxu3  ;;  %v5256_v46 = vadd.f32 %v5255_v26, %v5203_v33  ;;  %v5402_v32 = vpop.f32.mrf.mxu1 }
 0x58a   :  { %v5299_v4 = vadd.f32 %v5298_v25, %v5251_v11 }
 0x58c   :  { %v5358_v53 = vadd.f32 %v5357_v58, %v5299_v4 }
 0x58e   :  { %v5399_v28 = vadd.f32 %v5398_v63, %v5358_v53 }
 0x58f   :  { %v5570_v36 = vpop.f32.mrf.mxu0 }
 0x590   :  { %5745 = vst [vmem:[%s11239_s8 + $0x50] sm:$0xff] %v5399_v28  ;;  %v5435_v40 = vpop.f32.mrf.mxu2 }
 0x591   :  { %v5304_v55 = vpop.f32.mrf.mxu3  ;;  %v5436_v51 = vadd.f32 %v5435_v40, %v11080_v6  ;;  %v5616_v3 = vpop.f32.mrf.mxu1 }
 0x592   :  { %v5305_v14 = vadd.f32 %v5304_v55, %v5256_v46 }
 0x594   :  { %v5362_v22 = vadd.f32 %v5361_v31, %v5305_v14 }
 0x596   :  { %v5403_v15 = vadd.f32 %v5402_v32, %v5362_v22 }
 0x597   :  { %v5575_v2 = vpop.f32.mrf.mxu0 }
 0x598   :  { %5749 = vst [vmem:[%s11239_s8 + $0x70] sm:$0xff] %v5403_v15  ;;  %v5443_v49 = vpop.f32.mrf.mxu2 }
 0x599   :  { %v5520_v7 = vpop.f32.mrf.mxu3  ;;  %v5444_v48 = vadd.f32 %v5443_v49, %v11104_v61  ;;  %v5622_v39 = vpop.f32.mrf.mxu1 }
 0x59a   :  { %v5521_v47 = vadd.f32 %v5520_v7, %v5436_v51 }
 0x59c   :  { %v5571_v42 = vadd.f32 %v5570_v36, %v5521_v47 }
 0x59e   :  { %v5617_v1 = vadd.f32 %v5616_v3, %v5571_v42 }
 0x59f   :  { %v5580_v6 = vpop.f32.mrf.mxu0 }
 0x5a0   :  { %v5451_v34 = vpop.f32.mrf.mxu2 }
 0x5a1   :  { %v5524_v19 = vpop.f32.mrf.mxu3  ;;  %v5452_v12 = vadd.f32 %v5451_v34, %v11126_v18  ;;  %v5628_v37 = vpop.f32.mrf.mxu1 }
 0x5a2   :  { %v5525_v59 = vadd.f32 %v5524_v19, %v5444_v48 }
 0x5a4   :  { %v5576_v41 = vadd.f32 %v5575_v2, %v5525_v59 }
 0x5a6   :  { %v5623_v50 = vadd.f32 %v5622_v39, %v5576_v41 }
 0x5a7   :  { %v5585_v8 = vpop.f32.mrf.mxu0 }
 0x5a8   :  { %v5459_v17 = vpop.f32.mrf.mxu2 }
 0x5a9   :  { %v5528_v27 = vpop.f32.mrf.mxu3  ;;  %v5460_v21 = vadd.f32 %v5459_v17, %v11141_v16  ;;  %v5634_v13 = vpop.f32.mrf.mxu1 }
 0x5aa   :  { %v5529_v62 = vadd.f32 %v5528_v27, %v5452_v12 }
 0x5ac   :  { %v5581_v29 = vadd.f32 %v5580_v6, %v5529_v62 }
 0x5ae   :  { %v5629_v18 = vadd.f32 %v5628_v37, %v5581_v29 }
 0x5b0   :  { %v5679_v43 = vpop.f32.mrf.mxu2 }
 0x5b1   :  { %v5532_v0 = vpop.f32.mrf.mxu3  ;;  %v5680_v23 = vadd.f32 %v5679_v43, %v5617_v1 }
 0x5b2   :  { %v5533_v38 = vadd.f32 %v5532_v0, %v5460_v21 }
 0x5b4   :  { %v5586_v60 = vadd.f32 %v5585_v8, %v5533_v38 }
 0x5b6   :  { %v5635_v20 = vadd.f32 %v5634_v13, %v5586_v60 }
 0x5b8   :  { %v5683_v57 = vpop.f32.mrf.mxu2 }
 0x5b9   :  { %v5720_v10 = vpop.f32.mrf.mxu3  ;;  %v5684_v54 = vadd.f32 %v5683_v57, %v5623_v50 }
 0x5ba   :  { %v5721_v30 = vadd.f32 %v5720_v10, %v5680_v23 }
 0x5bc   :  { %5738 = vst [vmem:[%s11239_s8 + $0x18] sm:$0xff] %v5721_v30 }
 0x5c0   :  { %v5687_v45 = vpop.f32.mrf.mxu2 }
 0x5c1   :  { %v5724_v61 = vpop.f32.mrf.mxu3  ;;  %v5688_v24 = vadd.f32 %v5687_v45, %v5629_v18 }
 0x5c2   :  { %v5725_v35 = vadd.f32 %v5724_v61, %v5684_v54 }
 0x5c4   :  { %5742 = vst [vmem:[%s11239_s8 + $0x38] sm:$0xff] %v5725_v35 }
 0x5c8   :  { %v5691_v5 = vpop.f32.mrf.mxu2 }
 0x5c9   :  { %v5728_v56 = vpop.f32.mrf.mxu3  ;;  %v5692_v44 = vadd.f32 %v5691_v5, %v5635_v20 }
 0x5ca   :  { %v5729_v9 = vadd.f32 %v5728_v56, %v5688_v24 }
 0x5cc   :  { %5746 = vst [vmem:[%s11239_s8 + $0x58] sm:$0xff] %v5729_v9 }
 0x5d1   :  { %v5732_v16 = vpop.f32.mrf.mxu3 }
 0x5d2   :  { %v5733_v58 = vadd.f32 %v5732_v16, %v5692_v44 }
 0x5d4   :  { %5750 = vst [vmem:[%s11239_s8 + $0x78] sm:$0xff] %v5733_v58 }

</bundles_post_ra>
